<compile_context>
chip_gen: v6e
topology: v6e:2x2x1
jax: 0.10.0
libtpu: 0.0.40
codegen_flags: <defaults>
</compile_context>

<pallas_src>
import functools

import numpy as np
import jax
import jax.numpy as jnp
from jax.experimental import pallas as pl
from jax.experimental.pallas import tpu as pltpu


CPAD = 128  # lane-dense channel padding


# ----------------------------------------------------------------------------
# cfg parsing (same semantics as parse_cfg, but from an in-script string)
# ----------------------------------------------------------------------------
CFG_TEXT = """
[net]
height=16
width=16
channels=3

[convolutional]
batch_normalize=1
filters=8
size=3
stride=1
pad=1
activation=leaky

[convolutional]
batch_normalize=1
filters=16
size=3
stride=2
pad=1
activation=leaky

[convolutional]
batch_normalize=1
filters=16
size=3
stride=1
pad=1
activation=leaky

[shortcut]
from=-2
activation=linear

[convolutional]
size=1
stride=1
pad=1
filters=27
activation=linear

[yolo]
mask = 0,1,2
anchors = 10,13, 16,30, 33,23, 30,61, 62,45, 59,119
classes=4
num=6

[route]
layers = -4

[convolutional]
batch_normalize=1
filters=8
size=1
stride=1
pad=1
activation=leaky

[upsample]
stride=2

[route]
layers = -1, -9

[convolutional]
batch_normalize=1
filters=16
size=3
stride=1
pad=1
activation=leaky

[convolutional]
size=1
stride=1
pad=1
filters=27
activation=linear

[yolo]
mask = 3,4,5
anchors = 10,13, 16,30, 33,23, 30,61, 62,45, 59,119
classes=4
num=6
"""


def parse_cfg_string(cfg_text):
    lines = [l.strip() for l in cfg_text.split("\n")]
    lines = [l for l in lines if len(l) > 0 and not l.startswith("#")]
    blocks, block = [], {}
    for line in lines:
        if line.startswith("["):
            if block:
                blocks.append(block)
                block = {}
            block["type"] = line[1:-1].rstrip()
        else:
            k, v = line.split("=")
            block[k.rstrip()] = v.lstrip()
    blocks.append(block)
    return blocks


def _round_up(v, m):
    return ((v + m - 1) // m) * m


# ----------------------------------------------------------------------------
# Conv: in-kernel shifted-matmul accumulation (stride handled by host s2d)
# ----------------------------------------------------------------------------
def _conv_kernel(x_ref, w_ref, b_ref, o_ref, *, d, Ho, Wo, leaky):
    # x_ref: (1, H2, W2, Kc) bf16   -- one (space-to-depth'd, padded) image
    # w_ref: (d*d, Kc, CPAD) bf16   -- per-shift weight slabs (scale folded in)
    # b_ref: (1, CPAD) f32          -- folded BN shift / conv bias
    # o_ref: (1, Ho, Wo, CPAD) f32
    acc = None
    for di in range(d):
        for dj in range(d):
            xs = x_ref[0, di:di + Ho, dj:dj + Wo, :]        # (Ho, Wo, Kc)
            xs = xs.reshape(Ho * Wo, xs.shape[-1])
            t = jnp.dot(xs, w_ref[di * d + dj],
                        preferred_element_type=jnp.float32)  # (Ho*Wo, CPAD)
            acc = t if acc is None else acc + t
    y = acc + b_ref[...]
    if leaky:
        y = jnp.where(y > 0.0, y, 0.1 * y)
    o_ref[0] = y.reshape(Ho, Wo, o_ref.shape[-1])


def conv2d_fused(x_p, c_in, params):
    """x_p: (N, H, W, 128) f32 (real channels = c_in).  Returns ((N,Ho,Wo,128), c_out)."""
    w2, shift, k, s, pad, leaky, c_out = params
    N, H, W, _ = x_p.shape
    Hp, Wp = H + 2 * pad, W + 2 * pad
    Ho, Wo = (Hp - k) // s + 1, (Wp - k) // s + 1
    d = -(-k // s)

    if s == 1:
        # activation already lane-padded to 128; weights are zero on pad lanes.
        x2 = jnp.pad(x_p, ((0, 0), (pad, pad), (pad, pad), (0, 0))) if pad else x_p
        H2, W2 = Hp, Wp
    else:
        # space-to-depth by s: stride-s conv becomes a stride-1 conv with
        # d = ceil(k/s) taps over s*s*c_in channels (pure relayout, no blow-up).
        H2 = max(-(-Hp // s), Ho + d - 1)
        W2 = max(-(-Wp // s), Wo + d - 1)
        xr = x_p[..., :c_in]
        xr = jnp.pad(xr, ((0, 0),
                          (pad, H2 * s - H - pad),
                          (pad, W2 * s - W - pad),
                          (0, 0)))
        xr = xr.reshape(N, H2, s, W2, s, c_in)
        xr = xr.transpose(0, 1, 3, 2, 4, 5).reshape(N, H2, W2, s * s * c_in)
        kc = _round_up(s * s * c_in, CPAD)
        x2 = jnp.pad(xr, ((0, 0), (0, 0), (0, 0), (0, kc - s * s * c_in)))

    x2 = x2.astype(jnp.bfloat16)              # bf16 operands, f32 accumulate
    Kc = x2.shape[-1]

    out = pl.pallas_call(
        functools.partial(_conv_kernel, d=d, Ho=Ho, Wo=Wo, leaky=leaky),
        out_shape=jax.ShapeDtypeStruct((N, Ho, Wo, CPAD), jnp.float32),
        grid=(N,),
        in_specs=[
            pl.BlockSpec((1, H2, W2, Kc), lambda n: (n, 0, 0, 0)),
            pl.BlockSpec((d * d, Kc, CPAD), lambda n: (0, 0, 0)),
            pl.BlockSpec((1, CPAD), lambda n: (0, 0)),
        ],
        out_specs=pl.BlockSpec((1, Ho, Wo, CPAD), lambda n: (n, 0, 0, 0)),
        compiler_params=pltpu.CompilerParams(dimension_semantics=("parallel",)),
    )(x2, w2, shift)
    return out, c_out


# ----------------------------------------------------------------------------
# Shortcut add (lane-dense (M, 128) view)
# ----------------------------------------------------------------------------
def _add_kernel(a_ref, b_ref, o_ref):
    o_ref[...] = a_ref[...] + b_ref[...]


def shortcut_add(a, b):
    N, H, W, C = a.shape
    M = N * H * W
    a2 = a.reshape(M, C)
    b2 = b.reshape(M, C)
    tm = M
    for cand in (512, 256, 128, 64, 32, 16, 8):
        if M % cand == 0 and M // cand >= 2:
            tm = cand
            break
    out = pl.pallas_call(
        _add_kernel,
        out_shape=jax.ShapeDtypeStruct((M, C), a.dtype),
        grid=(M // tm,),
        in_specs=[pl.BlockSpec((tm, C), lambda i: (i, 0)),
                  pl.BlockSpec((tm, C), lambda i: (i, 0))],
        out_specs=pl.BlockSpec((tm, C), lambda i: (i, 0)),
        compiler_params=pltpu.CompilerParams(dimension_semantics=("parallel",)),
    )(a2, b2)
    return out.reshape(N, H, W, C)


# ----------------------------------------------------------------------------
# 2x bilinear upsample (align_corners=True), NHWC, one matmul per image
# ----------------------------------------------------------------------------
def _bilinear_matrix(n_in, n_out):
    A = np.zeros((n_out, n_in), dtype=np.float32)
    if n_out == 1 or n_in == 1:
        A[:, 0] = 1.0
        return A
    for i in range(n_out):
        src = i * (n_in - 1) / (n_out - 1)
        i0 = int(np.floor(src))
        i1 = min(i0 + 1, n_in - 1)
        w1 = src - i0
        A[i, i0] += 1.0 - w1
        A[i, i1] += w1
    return A


def _upsample_kernel(m_ref, x_ref, o_ref):
    o_ref[0] = jnp.dot(m_ref[...], x_ref[0], preferred_element_type=jnp.float32)


def upsample2x_bilinear(x):
    """nn.Upsample(scale_factor=2, mode='bilinear', align_corners=True), NHWC padded."""
    N, H, W, C = x.shape
    Ho, Wo = 2 * H, 2 * W
    A = _bilinear_matrix(H, Ho)                  # (Ho, H)
    B = _bilinear_matrix(W, Wo)                  # (Wo, W)
    M2 = jnp.asarray(np.einsum("ih,jw->ijhw", A, B).reshape(Ho * Wo, H * W))
    x2 = x.reshape(N, H * W, C)
    out = pl.pallas_call(
        _upsample_kernel,
        out_shape=jax.ShapeDtypeStruct((N, Ho * Wo, C), jnp.float32),
        grid=(N,),
        in_specs=[
            pl.BlockSpec((Ho * Wo, H * W), lambda n: (0, 0)),
            pl.BlockSpec((1, H * W, C), lambda n: (n, 0, 0)),
        ],
        out_specs=pl.BlockSpec((1, Ho * Wo, C), lambda n: (n, 0, 0)),
        compiler_params=pltpu.CompilerParams(dimension_semantics=("parallel",)),
    )(M2, x2)
    return out.reshape(N, Ho, Wo, C)


# ----------------------------------------------------------------------------
# YOLO predict_transform: out = s_mul*sigmoid(p) + e_mul*exp(p) + add_map
# ----------------------------------------------------------------------------
def _yolo_kernel(x_ref, s_ref, e_ref, a_ref, o_ref):
    p = x_ref[0]                                                 # (GG, 128)
    o_ref[0] = (s_ref[...] * jax.nn.sigmoid(p)
                + e_ref[...] * jnp.exp(p)
                + a_ref[...])


def predict_transform(x_p, inp_dim, anchors, num_classes):
    """x_p: (N, G, G, 128) NHWC conv output (real channels = A*(5+nc)).
    Returns (N, G*G*A, 5+nc) matching the torch predict_transform ordering."""
    N, G, _, C = x_p.shape
    A = len(anchors)
    attrs = 5 + num_classes
    GG = G * G
    stride = inp_dim // G

    s_mul = np.zeros((1, C), np.float32)
    e_mul = np.zeros((1, C), np.float32)
    add = np.zeros((GG, C), np.float32)
    gx = np.tile(np.arange(G, dtype=np.float32), G)      # gg % G
    gy = np.repeat(np.arange(G, dtype=np.float32), G)    # gg // G
    for a in range(A):
        base = a * attrs
        s_mul[0, base + 0] = stride
        s_mul[0, base + 1] = stride
        s_mul[0, base + 4:base + attrs] = 1.0
        e_mul[0, base + 2] = anchors[a][0]   # (anchor/stride)*stride == anchor
        e_mul[0, base + 3] = anchors[a][1]
        add[:, base + 0] = stride * gx
        add[:, base + 1] = stride * gy

    x2 = x_p.reshape(N, GG, C)
    out = pl.pallas_call(
        _yolo_kernel,
        out_shape=jax.ShapeDtypeStruct((N, GG, C), jnp.float32),
        grid=(N,),
        in_specs=[
            pl.BlockSpec((1, GG, C), lambda n: (n, 0, 0)),
            pl.BlockSpec((1, C), lambda n: (0, 0)),
            pl.BlockSpec((1, C), lambda n: (0, 0)),
            pl.BlockSpec((GG, C), lambda n: (0, 0)),
        ],
        out_specs=pl.BlockSpec((1, GG, C), lambda n: (n, 0, 0)),
        compiler_params=pltpu.CompilerParams(dimension_semantics=("parallel",)),
    )(x2, jnp.asarray(s_mul), jnp.asarray(e_mul), jnp.asarray(add))

    det = out[:, :, :A * attrs].reshape(N, GG, A, attrs).reshape(N, GG * A, attrs)
    return det


# ----------------------------------------------------------------------------
# Host-side weight preparation (BN fold + shifted-matmul / s2d reorg + padding)
# ----------------------------------------------------------------------------
def _prepare_conv_weight(weight, scale, shift, k, s, c_in, c_out):
    # NOTE: assumes c_in (and s*s*c_in) <= 128 for this toy config.
    # TODO(synk): add a K-reduction grid axis (accumulator + pl.when) for real
    # Darknet layer sizes (K up to 4608) / the 64 MiB VMEM budget on v7x.
    w = np.asarray(weight, np.float32) * np.asarray(scale, np.float32)[:, None, None, None]
    d = -(-k // s)
    if s == 1:
        kc = CPAD
        w2 = np.zeros((d * d, kc, CPAD), np.float32)
        for ki in range(k):
            for kj in range(k):
                w2[ki * k + kj, :c_in, :c_out] = w[:, :, ki, kj].T
    else:
        kc = _round_up(s * s * c_in, CPAD)
        w2 = np.zeros((d * d, kc, CPAD), np.float32)
        for ki in range(k):
            for kj in range(k):
                di, pi = divmod(ki, s)
                dj, pj = divmod(kj, s)
                base = (pi * s + pj) * c_in
                w2[di * d + dj, base:base + c_in, :c_out] = w[:, :, ki, kj].T
    sh = np.zeros((1, CPAD), np.float32)
    sh[0, :c_out] = np.asarray(shift, np.float32)
    return jnp.asarray(w2, jnp.bfloat16), jnp.asarray(sh)


# ----------------------------------------------------------------------------
# Darknet in JAX
# ----------------------------------------------------------------------------
class DarknetJAX:
    def __init__(self, cfg_text, key):
        self.blocks = parse_cfg_string(cfg_text)
        self.net_info = self.blocks[0]
        self.params = {}
        self._init_params(key)

    def _init_params(self, key):
        prev_filters = int(self.net_info.get("channels", 3))
        output_filters = []
        eps = 1e-5
        for index, blk in enumerate(self.blocks[1:]):
            t = blk["type"]
            if t == "convolutional":
                bn = "batch_normalize" in blk and int(blk["batch_normalize"]) != 0
                filters = int(blk["filters"])
                k = int(blk["size"])
                stride = int(blk["stride"])
                pad = (k - 1) // 2 if int(blk["pad"]) else 0
                leaky = blk["activation"] == "leaky"

                key, kw, kb, kg, kbe, km, kv = jax.random.split(key, 7)
                weight = 0.1 * jax.random.normal(kw, (filters, prev_filters, k, k),
                                                 dtype=jnp.float32)
                if bn:
                    gamma = 1.0 + 0.1 * jax.random.normal(kg, (filters,), dtype=jnp.float32)
                    beta = 0.1 * jax.random.normal(kbe, (filters,), dtype=jnp.float32)
                    mean = 0.1 * jax.random.normal(km, (filters,), dtype=jnp.float32)
                    var = 0.5 + jnp.abs(0.1 * jax.random.normal(kv, (filters,),
                                                                dtype=jnp.float32))
                    scale = gamma / jnp.sqrt(var + eps)
                    shift = beta - mean * scale
                else:
                    bias = 0.1 * jax.random.normal(kb, (filters,), dtype=jnp.float32)
                    scale = jnp.ones((filters,), dtype=jnp.float32)
                    shift = bias
                w2, sh = _prepare_conv_weight(weight, scale, shift, k, stride,
                                              prev_filters, filters)
                self.params[index] = (w2, sh, k, stride, pad, leaky, filters)
            elif t == "route":
                layers = [int(a) for a in blk["layers"].split(",")]
                start = layers[0]
                end = layers[1] if len(layers) > 1 else 0
                if start > 0:
                    start -= index
                if end > 0:
                    end -= index
                if end < 0:
                    filters = output_filters[index + start] + output_filters[index + end]
                else:
                    filters = output_filters[index + start]
            else:  # upsample / shortcut / yolo keep previous filter count
                filters = prev_filters
            prev_filters = filters
            output_filters.append(filters)

    def forward(self, x_nchw):
        # NCHW (torch) -> NHWC, channels padded to 128 lanes.
        x = jnp.transpose(x_nchw, (0, 2, 3, 1)).astype(jnp.float32)
        c = x.shape[-1]
        x = jnp.pad(x, ((0, 0), (0, 0), (0, 0), (0, CPAD - c)))
        cur = (x, c)

        outputs = {}
        detections = None
        for i, blk in enumerate(self.blocks[1:]):
            t = blk["type"]
            if t == "convolutional":
                arr, c_out = conv2d_fused(cur[0], cur[1], self.params[i])
                cur = (arr, c_out)
            elif t == "upsample":
                cur = (upsample2x_bilinear(cur[0]), cur[1])
            elif t == "route":
                layers = [int(a) for a in blk["layers"].split(",")]
                if layers[0] > 0:
                    layers[0] -= i
                if len(layers) == 1:
                    cur = outputs[i + layers[0]]
                else:
                    if layers[1] > 0:
                        layers[1] -= i
                    a1, c1 = outputs[i + layers[0]]
                    a2, c2 = outputs[i + layers[1]]
                    cat = jnp.concatenate([a1[..., :c1], a2[..., :c2]], axis=-1)
                    cc = c1 + c2
                    cat = jnp.pad(cat, ((0, 0), (0, 0), (0, 0), (0, CPAD - cc)))
                    cur = (cat, cc)
            elif t == "shortcut":
                frm = int(blk["from"])
                a1, c1 = outputs[i - 1]
                a2, _ = outputs[i + frm]
                cur = (shortcut_add(a1, a2), c1)
            elif t == "yolo":
                mask = [int(a) for a in blk["mask"].split(",")]
                anchors_all = [int(a) for a in blk["anchors"].split(",")]
                pairs = [(anchors_all[2 * j], anchors_all[2 * j + 1])
                         for j in range(len(anchors_all) // 2)]
                anchors = [pairs[m] for m in mask]
                inp_dim = int(self.net_info["height"])
                num_classes = int(blk["classes"])
                det = predict_transform(cur[0], inp_dim, anchors, num_classes)
                if detections is None:
                    detections = det
                else:
                    detections = jnp.concatenate([detections, det], axis=1)
                cur = (det, cur[1])
            outputs[i] = cur
        return detections


# TODO(synk): Darknet.load_weights (.weights file deserialization) is intentionally
# not translated; parameters are deterministically synthesized in-script.

if __name__ == "__main__":
    key = jax.random.PRNGKey(0)
    net = DarknetJAX(CFG_TEXT, key)

    x_key = jax.random.fold_in(key, 999)
    x = jax.random.normal(x_key, (2, 3, 16, 16), dtype=jnp.float32)  # NCHW, like torch

    fwd = jax.jit(net.forward)
    det = jax.block_until_ready(fwd(x))

    # two YOLO heads: 8*8*3 + 16*16*3 boxes, 5 + 4 class attributes each
    assert det.shape == (2, 8 * 8 * 3 + 16 * 16 * 3, 9), det.shape
    assert bool(jnp.all(jnp.isfinite(det)))
    print("KERNEL_OK")
</pallas_src>

<mosaic_0001>
module attributes {stable_mosaic.version = 11 : i64} {
  func.func @_conv_kernel(%arg0: i32, %arg1: memref<1x18x18x128xbf16, #tpu.memory_space<vmem>>, %arg2: memref<9x128x128xbf16, #tpu.memory_space<vmem>>, %arg3: memref<1x128xf32, #tpu.memory_space<vmem>>, %arg4: memref<1x16x16x128xf32, #tpu.memory_space<vmem>>) attributes {dimension_semantics = [#tpu.dimension_semantics<parallel>], iteration_bounds = array<i64: 2>, scalar_prefetch = 0 : i64, scratch_operands = 0 : i64, tpu.core_type = #tpu.core_type<tc>, window_params = [{transform_indices = @transform_0, window_bounds = array<i64: 1, 18, 18, 128>}, {pipeline_mode = #tpu.pipeline_mode<synchronous>, transform_indices = @transform_1, window_bounds = array<i64: 9, 128, 128>}, {pipeline_mode = #tpu.pipeline_mode<synchronous>, transform_indices = @transform_2, window_bounds = array<i64: 1, 128>}, {transform_indices = @transform_3, window_bounds = array<i64: 1, 16, 16, 128>}]} {
    %c0 = arith.constant 0 : index
    %c0_0 = arith.constant 0 : index
    %c0_1 = arith.constant 0 : index
    %c0_2 = arith.constant 0 : index
    %0 = vector.load %arg1[%c0, %c0_0, %c0_1, %c0_2] : memref<1x18x18x128xbf16, #tpu.memory_space<vmem>>, vector<1x16x16x128xbf16>
    %1 = vector.shape_cast %0 : vector<1x16x16x128xbf16> to vector<16x16x128xbf16>
    %2 = vector.shape_cast %1 : vector<16x16x128xbf16> to vector<256x128xbf16>
    %c0_3 = arith.constant 0 : index
    %c0_4 = arith.constant 0 : index
    %c0_5 = arith.constant 0 : index
    %3 = vector.load %arg2[%c0_3, %c0_4, %c0_5] : memref<9x128x128xbf16, #tpu.memory_space<vmem>>, vector<1x128x128xbf16>
    %4 = vector.shape_cast %3 : vector<1x128x128xbf16> to vector<128x128xbf16>
    %cst = arith.constant dense<0.000000e+00> : vector<256x128xf32>
    %5 = tpu.matmul %2, %4, %cst {dimension_numbers = #tpu.dot_dimension_numbers<[1], [0], [0], [1], [0, 0, 1, 1], [], []>} : vector<256x128xbf16>, vector<128x128xbf16>, vector<256x128xf32> -> vector<256x128xf32>
    %c0_6 = arith.constant 0 : index
    %c0_7 = arith.constant 0 : index
    %c1 = arith.constant 1 : index
    %c0_8 = arith.constant 0 : index
    %6 = vector.load %arg1[%c0_6, %c0_7, %c1, %c0_8] : memref<1x18x18x128xbf16, #tpu.memory_space<vmem>>, vector<1x16x16x128xbf16>
    %7 = vector.shape_cast %6 : vector<1x16x16x128xbf16> to vector<16x16x128xbf16>
    %8 = vector.shape_cast %7 : vector<16x16x128xbf16> to vector<256x128xbf16>
    %c1_9 = arith.constant 1 : index
    %c0_10 = arith.constant 0 : index
    %c0_11 = arith.constant 0 : index
    %9 = vector.load %arg2[%c1_9, %c0_10, %c0_11] : memref<9x128x128xbf16, #tpu.memory_space<vmem>>, vector<1x128x128xbf16>
    %10 = vector.shape_cast %9 : vector<1x128x128xbf16> to vector<128x128xbf16>
    %cst_12 = arith.constant dense<0.000000e+00> : vector<256x128xf32>
    %11 = tpu.matmul %8, %10, %cst_12 {dimension_numbers = #tpu.dot_dimension_numbers<[1], [0], [0], [1], [0, 0, 1, 1], [], []>} : vector<256x128xbf16>, vector<128x128xbf16>, vector<256x128xf32> -> vector<256x128xf32>
    %12 = arith.addf %5, %11 : vector<256x128xf32>
    %c0_13 = arith.constant 0 : index
    %c0_14 = arith.constant 0 : index
    %c2 = arith.constant 2 : index
    %c0_15 = arith.constant 0 : index
    %13 = vector.load %arg1[%c0_13, %c0_14, %c2, %c0_15] : memref<1x18x18x128xbf16, #tpu.memory_space<vmem>>, vector<1x16x16x128xbf16>
    %14 = vector.shape_cast %13 : vector<1x16x16x128xbf16> to vector<16x16x128xbf16>
    %15 = vector.shape_cast %14 : vector<16x16x128xbf16> to vector<256x128xbf16>
    %c2_16 = arith.constant 2 : index
    %c0_17 = arith.constant 0 : index
    %c0_18 = arith.constant 0 : index
    %16 = vector.load %arg2[%c2_16, %c0_17, %c0_18] : memref<9x128x128xbf16, #tpu.memory_space<vmem>>, vector<1x128x128xbf16>
    %17 = vector.shape_cast %16 : vector<1x128x128xbf16> to vector<128x128xbf16>
    %cst_19 = arith.constant dense<0.000000e+00> : vector<256x128xf32>
    %18 = tpu.matmul %15, %17, %cst_19 {dimension_numbers = #tpu.dot_dimension_numbers<[1], [0], [0], [1], [0, 0, 1, 1], [], []>} : vector<256x128xbf16>, vector<128x128xbf16>, vector<256x128xf32> -> vector<256x128xf32>
    %19 = arith.addf %12, %18 : vector<256x128xf32>
    %c0_20 = arith.constant 0 : index
    %c1_21 = arith.constant 1 : index
    %c0_22 = arith.constant 0 : index
    %c0_23 = arith.constant 0 : index
    %20 = vector.load %arg1[%c0_20, %c1_21, %c0_22, %c0_23] : memref<1x18x18x128xbf16, #tpu.memory_space<vmem>>, vector<1x16x16x128xbf16>
    %21 = vector.shape_cast %20 : vector<1x16x16x128xbf16> to vector<16x16x128xbf16>
    %22 = vector.shape_cast %21 : vector<16x16x128xbf16> to vector<256x128xbf16>
    %c3 = arith.constant 3 : index
    %c0_24 = arith.constant 0 : index
    %c0_25 = arith.constant 0 : index
    %23 = vector.load %arg2[%c3, %c0_24, %c0_25] : memref<9x128x128xbf16, #tpu.memory_space<vmem>>, vector<1x128x128xbf16>
    %24 = vector.shape_cast %23 : vector<1x128x128xbf16> to vector<128x128xbf16>
    %cst_26 = arith.constant dense<0.000000e+00> : vector<256x128xf32>
    %25 = tpu.matmul %22, %24, %cst_26 {dimension_numbers = #tpu.dot_dimension_numbers<[1], [0], [0], [1], [0, 0, 1, 1], [], []>} : vector<256x128xbf16>, vector<128x128xbf16>, vector<256x128xf32> -> vector<256x128xf32>
    %26 = arith.addf %19, %25 : vector<256x128xf32>
    %c0_27 = arith.constant 0 : index
    %c1_28 = arith.constant 1 : index
    %c1_29 = arith.constant 1 : index
    %c0_30 = arith.constant 0 : index
    %27 = vector.load %arg1[%c0_27, %c1_28, %c1_29, %c0_30] : memref<1x18x18x128xbf16, #tpu.memory_space<vmem>>, vector<1x16x16x128xbf16>
    %28 = vector.shape_cast %27 : vector<1x16x16x128xbf16> to vector<16x16x128xbf16>
    %29 = vector.shape_cast %28 : vector<16x16x128xbf16> to vector<256x128xbf16>
    %c4 = arith.constant 4 : index
    %c0_31 = arith.constant 0 : index
    %c0_32 = arith.constant 0 : index
    %30 = vector.load %arg2[%c4, %c0_31, %c0_32] : memref<9x128x128xbf16, #tpu.memory_space<vmem>>, vector<1x128x128xbf16>
    %31 = vector.shape_cast %30 : vector<1x128x128xbf16> to vector<128x128xbf16>
    %cst_33 = arith.constant dense<0.000000e+00> : vector<256x128xf32>
    %32 = tpu.matmul %29, %31, %cst_33 {dimension_numbers = #tpu.dot_dimension_numbers<[1], [0], [0], [1], [0, 0, 1, 1], [], []>} : vector<256x128xbf16>, vector<128x128xbf16>, vector<256x128xf32> -> vector<256x128xf32>
    %33 = arith.addf %26, %32 : vector<256x128xf32>
    %c0_34 = arith.constant 0 : index
    %c1_35 = arith.constant 1 : index
    %c2_36 = arith.constant 2 : index
    %c0_37 = arith.constant 0 : index
    %34 = vector.load %arg1[%c0_34, %c1_35, %c2_36, %c0_37] : memref<1x18x18x128xbf16, #tpu.memory_space<vmem>>, vector<1x16x16x128xbf16>
    %35 = vector.shape_cast %34 : vector<1x16x16x128xbf16> to vector<16x16x128xbf16>
    %36 = vector.shape_cast %35 : vector<16x16x128xbf16> to vector<256x128xbf16>
    %c5 = arith.constant 5 : index
    %c0_38 = arith.constant 0 : index
    %c0_39 = arith.constant 0 : index
    %37 = vector.load %arg2[%c5, %c0_38, %c0_39] : memref<9x128x128xbf16, #tpu.memory_space<vmem>>, vector<1x128x128xbf16>
    %38 = vector.shape_cast %37 : vector<1x128x128xbf16> to vector<128x128xbf16>
    %cst_40 = arith.constant dense<0.000000e+00> : vector<256x128xf32>
    %39 = tpu.matmul %36, %38, %cst_40 {dimension_numbers = #tpu.dot_dimension_numbers<[1], [0], [0], [1], [0, 0, 1, 1], [], []>} : vector<256x128xbf16>, vector<128x128xbf16>, vector<256x128xf32> -> vector<256x128xf32>
    %40 = arith.addf %33, %39 : vector<256x128xf32>
    %c0_41 = arith.constant 0 : index
    %c2_42 = arith.constant 2 : index
    %c0_43 = arith.constant 0 : index
    %c0_44 = arith.constant 0 : index
    %41 = vector.load %arg1[%c0_41, %c2_42, %c0_43, %c0_44] : memref<1x18x18x128xbf16, #tpu.memory_space<vmem>>, vector<1x16x16x128xbf16>
    %42 = vector.shape_cast %41 : vector<1x16x16x128xbf16> to vector<16x16x128xbf16>
    %43 = vector.shape_cast %42 : vector<16x16x128xbf16> to vector<256x128xbf16>
    %c6 = arith.constant 6 : index
    %c0_45 = arith.constant 0 : index
    %c0_46 = arith.constant 0 : index
    %44 = vector.load %arg2[%c6, %c0_45, %c0_46] : memref<9x128x128xbf16, #tpu.memory_space<vmem>>, vector<1x128x128xbf16>
    %45 = vector.shape_cast %44 : vector<1x128x128xbf16> to vector<128x128xbf16>
    %cst_47 = arith.constant dense<0.000000e+00> : vector<256x128xf32>
    %46 = tpu.matmul %43, %45, %cst_47 {dimension_numbers = #tpu.dot_dimension_numbers<[1], [0], [0], [1], [0, 0, 1, 1], [], []>} : vector<256x128xbf16>, vector<128x128xbf16>, vector<256x128xf32> -> vector<256x128xf32>
    %47 = arith.addf %40, %46 : vector<256x128xf32>
    %c0_48 = arith.constant 0 : index
    %c2_49 = arith.constant 2 : index
    %c1_50 = arith.constant 1 : index
    %c0_51 = arith.constant 0 : index
    %48 = vector.load %arg1[%c0_48, %c2_49, %c1_50, %c0_51] : memref<1x18x18x128xbf16, #tpu.memory_space<vmem>>, vector<1x16x16x128xbf16>
    %49 = vector.shape_cast %48 : vector<1x16x16x128xbf16> to vector<16x16x128xbf16>
    %50 = vector.shape_cast %49 : vector<16x16x128xbf16> to vector<256x128xbf16>
    %c7 = arith.constant 7 : index
    %c0_52 = arith.constant 0 : index
    %c0_53 = arith.constant 0 : index
    %51 = vector.load %arg2[%c7, %c0_52, %c0_53] : memref<9x128x128xbf16, #tpu.memory_space<vmem>>, vector<1x128x128xbf16>
    %52 = vector.shape_cast %51 : vector<1x128x128xbf16> to vector<128x128xbf16>
    %cst_54 = arith.constant dense<0.000000e+00> : vector<256x128xf32>
    %53 = tpu.matmul %50, %52, %cst_54 {dimension_numbers = #tpu.dot_dimension_numbers<[1], [0], [0], [1], [0, 0, 1, 1], [], []>} : vector<256x128xbf16>, vector<128x128xbf16>, vector<256x128xf32> -> vector<256x128xf32>
    %54 = arith.addf %47, %53 : vector<256x128xf32>
    %c0_55 = arith.constant 0 : index
    %c2_56 = arith.constant 2 : index
    %c2_57 = arith.constant 2 : index
    %c0_58 = arith.constant 0 : index
    %55 = vector.load %arg1[%c0_55, %c2_56, %c2_57, %c0_58] : memref<1x18x18x128xbf16, #tpu.memory_space<vmem>>, vector<1x16x16x128xbf16>
    %56 = vector.shape_cast %55 : vector<1x16x16x128xbf16> to vector<16x16x128xbf16>
    %57 = vector.shape_cast %56 : vector<16x16x128xbf16> to vector<256x128xbf16>
    %c8 = arith.constant 8 : index
    %c0_59 = arith.constant 0 : index
    %c0_60 = arith.constant 0 : index
    %58 = vector.load %arg2[%c8, %c0_59, %c0_60] : memref<9x128x128xbf16, #tpu.memory_space<vmem>>, vector<1x128x128xbf16>
    %59 = vector.shape_cast %58 : vector<1x128x128xbf16> to vector<128x128xbf16>
    %cst_61 = arith.constant dense<0.000000e+00> : vector<256x128xf32>
    %60 = tpu.matmul %57, %59, %cst_61 {dimension_numbers = #tpu.dot_dimension_numbers<[1], [0], [0], [1], [0, 0, 1, 1], [], []>} : vector<256x128xbf16>, vector<128x128xbf16>, vector<256x128xf32> -> vector<256x128xf32>
    %61 = arith.addf %54, %60 : vector<256x128xf32>
    %c0_62 = arith.constant 0 : index
    %c0_63 = arith.constant 0 : index
    %62 = vector.load %arg3[%c0_62, %c0_63] : memref<1x128xf32, #tpu.memory_space<vmem>>, vector<1x128xf32>
    %63 = vector.broadcast %62 : vector<1x128xf32> to vector<256x128xf32>
    %64 = arith.addf %61, %63 : vector<256x128xf32>
    %cst_64 = arith.constant 0.000000e+00 : f32
    %65 = vector.broadcast %cst_64 : f32 to vector<256x128xf32>
    %66 = arith.cmpf ogt, %64, %65 : vector<256x128xf32>
    %cst_65 = arith.constant 1.000000e-01 : f32
    %67 = vector.broadcast %cst_65 : f32 to vector<256x128xf32>
    %68 = arith.mulf %67, %64 : vector<256x128xf32>
    %69 = arith.select %66, %64, %68 : vector<256x128xi1>, vector<256x128xf32>
    %70 = vector.shape_cast %69 : vector<256x128xf32> to vector<16x16x128xf32>
    %c0_66 = arith.constant 0 : index
    %c0_67 = arith.constant 0 : index
    %c0_68 = arith.constant 0 : index
    %c0_69 = arith.constant 0 : index
    %71 = vector.load %arg4[%c0_66, %c0_67, %c0_68, %c0_69] : memref<1x16x16x128xf32, #tpu.memory_space<vmem>>, vector<1x16x16x128xf32>
    %72 = vector.shape_cast %71 : vector<1x16x16x128xf32> to vector<16x16x128xf32>
    %73 = vector.shape_cast %70 : vector<16x16x128xf32> to vector<1x16x16x128xf32>
    tpu.vector_store %arg4[%c0_66, %c0_67, %c0_68, %c0_69], %73 {strides = array<i32>} : memref<1x16x16x128xf32, #tpu.memory_space<vmem>>, vector<1x16x16x128xf32>,
    return
  }
  func.func @transform_0(%arg0: i32) -> (i32, i32, i32, i32) {
    %c0_i32 = arith.constant 0 : i32
    %c0_i32_0 = arith.constant 0 : i32
    %c0_i32_1 = arith.constant 0 : i32
    %c0_i32_2 = arith.constant 0 : i32
    return %arg0, %c0_i32, %c0_i32_0, %c0_i32_1 : i32, i32, i32, i32
  }
  func.func @transform_1(%arg0: i32) -> (i32, i32, i32) {
    %c0_i32 = arith.constant 0 : i32
    %c0_i32_0 = arith.constant 0 : i32
    %c0_i32_1 = arith.constant 0 : i32
    %c0_i32_2 = arith.constant 0 : i32
    return %c0_i32, %c0_i32_0, %c0_i32_1 : i32, i32, i32
  }
  func.func @transform_2(%arg0: i32) -> (i32, i32) {
    %c0_i32 = arith.constant 0 : i32
    %c0_i32_0 = arith.constant 0 : i32
    %c0_i32_1 = arith.constant 0 : i32
    return %c0_i32, %c0_i32_0 : i32, i32
  }
  func.func @transform_3(%arg0: i32) -> (i32, i32, i32, i32) {
    %c0_i32 = arith.constant 0 : i32
    %c0_i32_0 = arith.constant 0 : i32
    %c0_i32_1 = arith.constant 0 : i32
    %c0_i32_2 = arith.constant 0 : i32
    return %arg0, %c0_i32, %c0_i32_0, %c0_i32_1 : i32, i32, i32, i32
  }
}

module attributes {stable_mosaic.version = 11 : i64} {
  func.func @_conv_kernel(%arg0: i32, %arg1: memref<1x9x9x128xbf16, #tpu.memory_space<vmem>>, %arg2: memref<4x128x128xbf16, #tpu.memory_space<vmem>>, %arg3: memref<1x128xf32, #tpu.memory_space<vmem>>, %arg4: memref<1x8x8x128xf32, #tpu.memory_space<vmem>>) attributes {dimension_semantics = [#tpu.dimension_semantics<parallel>], iteration_bounds = array<i64: 2>, scalar_prefetch = 0 : i64, scratch_operands = 0 : i64, tpu.core_type = #tpu.core_type<tc>, window_params = [{transform_indices = @transform_0, window_bounds = array<i64: 1, 9, 9, 128>}, {pipeline_mode = #tpu.pipeline_mode<synchronous>, transform_indices = @transform_1, window_bounds = array<i64: 4, 128, 128>}, {pipeline_mode = #tpu.pipeline_mode<synchronous>, transform_indices = @transform_2, window_bounds = array<i64: 1, 128>}, {transform_indices = @transform_3, window_bounds = array<i64: 1, 8, 8, 128>}]} {
    %c0 = arith.constant 0 : index
    %c0_0 = arith.constant 0 : index
    %c0_1 = arith.constant 0 : index
    %c0_2 = arith.constant 0 : index
    %0 = vector.load %arg1[%c0, %c0_0, %c0_1, %c0_2] : memref<1x9x9x128xbf16, #tpu.memory_space<vmem>>, vector<1x8x8x128xbf16>
    %1 = vector.shape_cast %0 : vector<1x8x8x128xbf16> to vector<8x8x128xbf16>
    %2 = vector.shape_cast %1 : vector<8x8x128xbf16> to vector<64x128xbf16>
    %c0_3 = arith.constant 0 : index
    %c0_4 = arith.constant 0 : index
    %c0_5 = arith.constant 0 : index
    %3 = vector.load %arg2[%c0_3, %c0_4, %c0_5] : memref<4x128x128xbf16, #tpu.memory_space<vmem>>, vector<1x128x128xbf16>
    %4 = vector.shape_cast %3 : vector<1x128x128xbf16> to vector<128x128xbf16>
    %cst = arith.constant dense<0.000000e+00> : vector<64x128xf32>
    %5 = tpu.matmul %2, %4, %cst {dimension_numbers = #tpu.dot_dimension_numbers<[1], [0], [0], [1], [0, 0, 1, 1], [], []>} : vector<64x128xbf16>, vector<128x128xbf16>, vector<64x128xf32> -> vector<64x128xf32>
    %c0_6 = arith.constant 0 : index
    %c0_7 = arith.constant 0 : index
    %c1 = arith.constant 1 : index
    %c0_8 = arith.constant 0 : index
    %6 = vector.load %arg1[%c0_6, %c0_7, %c1, %c0_8] : memref<1x9x9x128xbf16, #tpu.memory_space<vmem>>, vector<1x8x8x128xbf16>
    %7 = vector.shape_cast %6 : vector<1x8x8x128xbf16> to vector<8x8x128xbf16>
    %8 = vector.shape_cast %7 : vector<8x8x128xbf16> to vector<64x128xbf16>
    %c1_9 = arith.constant 1 : index
    %c0_10 = arith.constant 0 : index
    %c0_11 = arith.constant 0 : index
    %9 = vector.load %arg2[%c1_9, %c0_10, %c0_11] : memref<4x128x128xbf16, #tpu.memory_space<vmem>>, vector<1x128x128xbf16>
    %10 = vector.shape_cast %9 : vector<1x128x128xbf16> to vector<128x128xbf16>
    %cst_12 = arith.constant dense<0.000000e+00> : vector<64x128xf32>
    %11 = tpu.matmul %8, %10, %cst_12 {dimension_numbers = #tpu.dot_dimension_numbers<[1], [0], [0], [1], [0, 0, 1, 1], [], []>} : vector<64x128xbf16>, vector<128x128xbf16>, vector<64x128xf32> -> vector<64x128xf32>
    %12 = arith.addf %5, %11 : vector<64x128xf32>
    %c0_13 = arith.constant 0 : index
    %c1_14 = arith.constant 1 : index
    %c0_15 = arith.constant 0 : index
    %c0_16 = arith.constant 0 : index
    %13 = vector.load %arg1[%c0_13, %c1_14, %c0_15, %c0_16] : memref<1x9x9x128xbf16, #tpu.memory_space<vmem>>, vector<1x8x8x128xbf16>
    %14 = vector.shape_cast %13 : vector<1x8x8x128xbf16> to vector<8x8x128xbf16>
    %15 = vector.shape_cast %14 : vector<8x8x128xbf16> to vector<64x128xbf16>
    %c2 = arith.constant 2 : index
    %c0_17 = arith.constant 0 : index
    %c0_18 = arith.constant 0 : index
    %16 = vector.load %arg2[%c2, %c0_17, %c0_18] : memref<4x128x128xbf16, #tpu.memory_space<vmem>>, vector<1x128x128xbf16>
    %17 = vector.shape_cast %16 : vector<1x128x128xbf16> to vector<128x128xbf16>
    %cst_19 = arith.constant dense<0.000000e+00> : vector<64x128xf32>
    %18 = tpu.matmul %15, %17, %cst_19 {dimension_numbers = #tpu.dot_dimension_numbers<[1], [0], [0], [1], [0, 0, 1, 1], [], []>} : vector<64x128xbf16>, vector<128x128xbf16>, vector<64x128xf32> -> vector<64x128xf32>
    %19 = arith.addf %12, %18 : vector<64x128xf32>
    %c0_20 = arith.constant 0 : index
    %c1_21 = arith.constant 1 : index
    %c1_22 = arith.constant 1 : index
    %c0_23 = arith.constant 0 : index
    %20 = vector.load %arg1[%c0_20, %c1_21, %c1_22, %c0_23] : memref<1x9x9x128xbf16, #tpu.memory_space<vmem>>, vector<1x8x8x128xbf16>
    %21 = vector.shape_cast %20 : vector<1x8x8x128xbf16> to vector<8x8x128xbf16>
    %22 = vector.shape_cast %21 : vector<8x8x128xbf16> to vector<64x128xbf16>
    %c3 = arith.constant 3 : index
    %c0_24 = arith.constant 0 : index
    %c0_25 = arith.constant 0 : index
    %23 = vector.load %arg2[%c3, %c0_24, %c0_25] : memref<4x128x128xbf16, #tpu.memory_space<vmem>>, vector<1x128x128xbf16>
    %24 = vector.shape_cast %23 : vector<1x128x128xbf16> to vector<128x128xbf16>
    %cst_26 = arith.constant dense<0.000000e+00> : vector<64x128xf32>
    %25 = tpu.matmul %22, %24, %cst_26 {dimension_numbers = #tpu.dot_dimension_numbers<[1], [0], [0], [1], [0, 0, 1, 1], [], []>} : vector<64x128xbf16>, vector<128x128xbf16>, vector<64x128xf32> -> vector<64x128xf32>
    %26 = arith.addf %19, %25 : vector<64x128xf32>
    %c0_27 = arith.constant 0 : index
    %c0_28 = arith.constant 0 : index
    %27 = vector.load %arg3[%c0_27, %c0_28] : memref<1x128xf32, #tpu.memory_space<vmem>>, vector<1x128xf32>
    %28 = vector.broadcast %27 : vector<1x128xf32> to vector<64x128xf32>
    %29 = arith.addf %26, %28 : vector<64x128xf32>
    %cst_29 = arith.constant 0.000000e+00 : f32
    %30 = vector.broadcast %cst_29 : f32 to vector<64x128xf32>
    %31 = arith.cmpf ogt, %29, %30 : vector<64x128xf32>
    %cst_30 = arith.constant 1.000000e-01 : f32
    %32 = vector.broadcast %cst_30 : f32 to vector<64x128xf32>
    %33 = arith.mulf %32, %29 : vector<64x128xf32>
    %34 = arith.select %31, %29, %33 : vector<64x128xi1>, vector<64x128xf32>
    %35 = vector.shape_cast %34 : vector<64x128xf32> to vector<8x8x128xf32>
    %c0_31 = arith.constant 0 : index
    %c0_32 = arith.constant 0 : index
    %c0_33 = arith.constant 0 : index
    %c0_34 = arith.constant 0 : index
    %36 = vector.load %arg4[%c0_31, %c0_32, %c0_33, %c0_34] : memref<1x8x8x128xf32, #tpu.memory_space<vmem>>, vector<1x8x8x128xf32>
    %37 = vector.shape_cast %36 : vector<1x8x8x128xf32> to vector<8x8x128xf32>
    %38 = vector.shape_cast %35 : vector<8x8x128xf32> to vector<1x8x8x128xf32>
    tpu.vector_store %arg4[%c0_31, %c0_32, %c0_33, %c0_34], %38 {strides = array<i32>} : memref<1x8x8x128xf32, #tpu.memory_space<vmem>>, vector<1x8x8x128xf32>,
    return
  }
  func.func @transform_0(%arg0: i32) -> (i32, i32, i32, i32) {
    %c0_i32 = arith.constant 0 : i32
    %c0_i32_0 = arith.constant 0 : i32
    %c0_i32_1 = arith.constant 0 : i32
    %c0_i32_2 = arith.constant 0 : i32
    return %arg0, %c0_i32, %c0_i32_0, %c0_i32_1 : i32, i32, i32, i32
  }
  func.func @transform_1(%arg0: i32) -> (i32, i32, i32) {
    %c0_i32 = arith.constant 0 : i32
    %c0_i32_0 = arith.constant 0 : i32
    %c0_i32_1 = arith.constant 0 : i32
    %c0_i32_2 = arith.constant 0 : i32
    return %c0_i32, %c0_i32_0, %c0_i32_1 : i32, i32, i32
  }
  func.func @transform_2(%arg0: i32) -> (i32, i32) {
    %c0_i32 = arith.constant 0 : i32
    %c0_i32_0 = arith.constant 0 : i32
    %c0_i32_1 = arith.constant 0 : i32
    return %c0_i32, %c0_i32_0 : i32, i32
  }
  func.func @transform_3(%arg0: i32) -> (i32, i32, i32, i32) {
    %c0_i32 = arith.constant 0 : i32
    %c0_i32_0 = arith.constant 0 : i32
    %c0_i32_1 = arith.constant 0 : i32
    %c0_i32_2 = arith.constant 0 : i32
    return %arg0, %c0_i32, %c0_i32_0, %c0_i32_1 : i32, i32, i32, i32
  }
}

module attributes {stable_mosaic.version = 11 : i64} {
  func.func @_conv_kernel(%arg0: i32, %arg1: memref<1x10x10x128xbf16, #tpu.memory_space<vmem>>, %arg2: memref<9x128x128xbf16, #tpu.memory_space<vmem>>, %arg3: memref<1x128xf32, #tpu.memory_space<vmem>>, %arg4: memref<1x8x8x128xf32, #tpu.memory_space<vmem>>) attributes {dimension_semantics = [#tpu.dimension_semantics<parallel>], iteration_bounds = array<i64: 2>, scalar_prefetch = 0 : i64, scratch_operands = 0 : i64, tpu.core_type = #tpu.core_type<tc>, window_params = [{transform_indices = @transform_0, window_bounds = array<i64: 1, 10, 10, 128>}, {pipeline_mode = #tpu.pipeline_mode<synchronous>, transform_indices = @transform_1, window_bounds = array<i64: 9, 128, 128>}, {pipeline_mode = #tpu.pipeline_mode<synchronous>, transform_indices = @transform_2, window_bounds = array<i64: 1, 128>}, {transform_indices = @transform_3, window_bounds = array<i64: 1, 8, 8, 128>}]} {
    %c0 = arith.constant 0 : index
    %c0_0 = arith.constant 0 : index
    %c0_1 = arith.constant 0 : index
    %c0_2 = arith.constant 0 : index
    %0 = vector.load %arg1[%c0, %c0_0, %c0_1, %c0_2] : memref<1x10x10x128xbf16, #tpu.memory_space<vmem>>, vector<1x8x8x128xbf16>
    %1 = vector.shape_cast %0 : vector<1x8x8x128xbf16> to vector<8x8x128xbf16>
    %2 = vector.shape_cast %1 : vector<8x8x128xbf16> to vector<64x128xbf16>
    %c0_3 = arith.constant 0 : index
    %c0_4 = arith.constant 0 : index
    %c0_5 = arith.constant 0 : index
    %3 = vector.load %arg2[%c0_3, %c0_4, %c0_5] : memref<9x128x128xbf16, #tpu.memory_space<vmem>>, vector<1x128x128xbf16>
    %4 = vector.shape_cast %3 : vector<1x128x128xbf16> to vector<128x128xbf16>
    %cst = arith.constant dense<0.000000e+00> : vector<64x128xf32>
    %5 = tpu.matmul %2, %4, %cst {dimension_numbers = #tpu.dot_dimension_numbers<[1], [0], [0], [1], [0, 0, 1, 1], [], []>} : vector<64x128xbf16>, vector<128x128xbf16>, vector<64x128xf32> -> vector<64x128xf32>
    %c0_6 = arith.constant 0 : index
    %c0_7 = arith.constant 0 : index
    %c1 = arith.constant 1 : index
    %c0_8 = arith.constant 0 : index
    %6 = vector.load %arg1[%c0_6, %c0_7, %c1, %c0_8] : memref<1x10x10x128xbf16, #tpu.memory_space<vmem>>, vector<1x8x8x128xbf16>
    %7 = vector.shape_cast %6 : vector<1x8x8x128xbf16> to vector<8x8x128xbf16>
    %8 = vector.shape_cast %7 : vector<8x8x128xbf16> to vector<64x128xbf16>
    %c1_9 = arith.constant 1 : index
    %c0_10 = arith.constant 0 : index
    %c0_11 = arith.constant 0 : index
    %9 = vector.load %arg2[%c1_9, %c0_10, %c0_11] : memref<9x128x128xbf16, #tpu.memory_space<vmem>>, vector<1x128x128xbf16>
    %10 = vector.shape_cast %9 : vector<1x128x128xbf16> to vector<128x128xbf16>
    %cst_12 = arith.constant dense<0.000000e+00> : vector<64x128xf32>
    %11 = tpu.matmul %8, %10, %cst_12 {dimension_numbers = #tpu.dot_dimension_numbers<[1], [0], [0], [1], [0, 0, 1, 1], [], []>} : vector<64x128xbf16>, vector<128x128xbf16>, vector<64x128xf32> -> vector<64x128xf32>
    %12 = arith.addf %5, %11 : vector<64x128xf32>
    %c0_13 = arith.constant 0 : index
    %c0_14 = arith.constant 0 : index
    %c2 = arith.constant 2 : index
    %c0_15 = arith.constant 0 : index
    %13 = vector.load %arg1[%c0_13, %c0_14, %c2, %c0_15] : memref<1x10x10x128xbf16, #tpu.memory_space<vmem>>, vector<1x8x8x128xbf16>
    %14 = vector.shape_cast %13 : vector<1x8x8x128xbf16> to vector<8x8x128xbf16>
    %15 = vector.shape_cast %14 : vector<8x8x128xbf16> to vector<64x128xbf16>
    %c2_16 = arith.constant 2 : index
    %c0_17 = arith.constant 0 : index
    %c0_18 = arith.constant 0 : index
    %16 = vector.load %arg2[%c2_16, %c0_17, %c0_18] : memref<9x128x128xbf16, #tpu.memory_space<vmem>>, vector<1x128x128xbf16>
    %17 = vector.shape_cast %16 : vector<1x128x128xbf16> to vector<128x128xbf16>
    %cst_19 = arith.constant dense<0.000000e+00> : vector<64x128xf32>
    %18 = tpu.matmul %15, %17, %cst_19 {dimension_numbers = #tpu.dot_dimension_numbers<[1], [0], [0], [1], [0, 0, 1, 1], [], []>} : vector<64x128xbf16>, vector<128x128xbf16>, vector<64x128xf32> -> vector<64x128xf32>
    %19 = arith.addf %12, %18 : vector<64x128xf32>
    %c0_20 = arith.constant 0 : index
    %c1_21 = arith.constant 1 : index
    %c0_22 = arith.constant 0 : index
    %c0_23 = arith.constant 0 : index
    %20 = vector.load %arg1[%c0_20, %c1_21, %c0_22, %c0_23] : memref<1x10x10x128xbf16, #tpu.memory_space<vmem>>, vector<1x8x8x128xbf16>
    %21 = vector.shape_cast %20 : vector<1x8x8x128xbf16> to vector<8x8x128xbf16>
    %22 = vector.shape_cast %21 : vector<8x8x128xbf16> to vector<64x128xbf16>
    %c3 = arith.constant 3 : index
    %c0_24 = arith.constant 0 : index
    %c0_25 = arith.constant 0 : index
    %23 = vector.load %arg2[%c3, %c0_24, %c0_25] : memref<9x128x128xbf16, #tpu.memory_space<vmem>>, vector<1x128x128xbf16>
    %24 = vector.shape_cast %23 : vector<1x128x128xbf16> to vector<128x128xbf16>
    %cst_26 = arith.constant dense<0.000000e+00> : vector<64x128xf32>
    %25 = tpu.matmul %22, %24, %cst_26 {dimension_numbers = #tpu.dot_dimension_numbers<[1], [0], [0], [1], [0, 0, 1, 1], [], []>} : vector<64x128xbf16>, vector<128x128xbf16>, vector<64x128xf32> -> vector<64x128xf32>
    %26 = arith.addf %19, %25 : vector<64x128xf32>
    %c0_27 = arith.constant 0 : index
    %c1_28 = arith.constant 1 : index
    %c1_29 = arith.constant 1 : index
    %c0_30 = arith.constant 0 : index
    %27 = vector.load %arg1[%c0_27, %c1_28, %c1_29, %c0_30] : memref<1x10x10x128xbf16, #tpu.memory_space<vmem>>, vector<1x8x8x128xbf16>
    %28 = vector.shape_cast %27 : vector<1x8x8x128xbf16> to vector<8x8x128xbf16>
    %29 = vector.shape_cast %28 : vector<8x8x128xbf16> to vector<64x128xbf16>
    %c4 = arith.constant 4 : index
    %c0_31 = arith.constant 0 : index
    %c0_32 = arith.constant 0 : index
    %30 = vector.load %arg2[%c4, %c0_31, %c0_32] : memref<9x128x128xbf16, #tpu.memory_space<vmem>>, vector<1x128x128xbf16>
    %31 = vector.shape_cast %30 : vector<1x128x128xbf16> to vector<128x128xbf16>
    %cst_33 = arith.constant dense<0.000000e+00> : vector<64x128xf32>
    %32 = tpu.matmul %29, %31, %cst_33 {dimension_numbers = #tpu.dot_dimension_numbers<[1], [0], [0], [1], [0, 0, 1, 1], [], []>} : vector<64x128xbf16>, vector<128x128xbf16>, vector<64x128xf32> -> vector<64x128xf32>
    %33 = arith.addf %26, %32 : vector<64x128xf32>
    %c0_34 = arith.constant 0 : index
    %c1_35 = arith.constant 1 : index
    %c2_36 = arith.constant 2 : index
    %c0_37 = arith.constant 0 : index
    %34 = vector.load %arg1[%c0_34, %c1_35, %c2_36, %c0_37] : memref<1x10x10x128xbf16, #tpu.memory_space<vmem>>, vector<1x8x8x128xbf16>
    %35 = vector.shape_cast %34 : vector<1x8x8x128xbf16> to vector<8x8x128xbf16>
    %36 = vector.shape_cast %35 : vector<8x8x128xbf16> to vector<64x128xbf16>
    %c5 = arith.constant 5 : index
    %c0_38 = arith.constant 0 : index
    %c0_39 = arith.constant 0 : index
    %37 = vector.load %arg2[%c5, %c0_38, %c0_39] : memref<9x128x128xbf16, #tpu.memory_space<vmem>>, vector<1x128x128xbf16>
    %38 = vector.shape_cast %37 : vector<1x128x128xbf16> to vector<128x128xbf16>
    %cst_40 = arith.constant dense<0.000000e+00> : vector<64x128xf32>
    %39 = tpu.matmul %36, %38, %cst_40 {dimension_numbers = #tpu.dot_dimension_numbers<[1], [0], [0], [1], [0, 0, 1, 1], [], []>} : vector<64x128xbf16>, vector<128x128xbf16>, vector<64x128xf32> -> vector<64x128xf32>
    %40 = arith.addf %33, %39 : vector<64x128xf32>
    %c0_41 = arith.constant 0 : index
    %c2_42 = arith.constant 2 : index
    %c0_43 = arith.constant 0 : index
    %c0_44 = arith.constant 0 : index
    %41 = vector.load %arg1[%c0_41, %c2_42, %c0_43, %c0_44] : memref<1x10x10x128xbf16, #tpu.memory_space<vmem>>, vector<1x8x8x128xbf16>
    %42 = vector.shape_cast %41 : vector<1x8x8x128xbf16> to vector<8x8x128xbf16>
    %43 = vector.shape_cast %42 : vector<8x8x128xbf16> to vector<64x128xbf16>
    %c6 = arith.constant 6 : index
    %c0_45 = arith.constant 0 : index
    %c0_46 = arith.constant 0 : index
    %44 = vector.load %arg2[%c6, %c0_45, %c0_46] : memref<9x128x128xbf16, #tpu.memory_space<vmem>>, vector<1x128x128xbf16>
    %45 = vector.shape_cast %44 : vector<1x128x128xbf16> to vector<128x128xbf16>
    %cst_47 = arith.constant dense<0.000000e+00> : vector<64x128xf32>
    %46 = tpu.matmul %43, %45, %cst_47 {dimension_numbers = #tpu.dot_dimension_numbers<[1], [0], [0], [1], [0, 0, 1, 1], [], []>} : vector<64x128xbf16>, vector<128x128xbf16>, vector<64x128xf32> -> vector<64x128xf32>
    %47 = arith.addf %40, %46 : vector<64x128xf32>
    %c0_48 = arith.constant 0 : index
    %c2_49 = arith.constant 2 : index
    %c1_50 = arith.constant 1 : index
    %c0_51 = arith.constant 0 : index
    %48 = vector.load %arg1[%c0_48, %c2_49, %c1_50, %c0_51] : memref<1x10x10x128xbf16, #tpu.memory_space<vmem>>, vector<1x8x8x128xbf16>
    %49 = vector.shape_cast %48 : vector<1x8x8x128xbf16> to vector<8x8x128xbf16>
    %50 = vector.shape_cast %49 : vector<8x8x128xbf16> to vector<64x128xbf16>
    %c7 = arith.constant 7 : index
    %c0_52 = arith.constant 0 : index
    %c0_53 = arith.constant 0 : index
    %51 = vector.load %arg2[%c7, %c0_52, %c0_53] : memref<9x128x128xbf16, #tpu.memory_space<vmem>>, vector<1x128x128xbf16>
    %52 = vector.shape_cast %51 : vector<1x128x128xbf16> to vector<128x128xbf16>
    %cst_54 = arith.constant dense<0.000000e+00> : vector<64x128xf32>
    %53 = tpu.matmul %50, %52, %cst_54 {dimension_numbers = #tpu.dot_dimension_numbers<[1], [0], [0], [1], [0, 0, 1, 1], [], []>} : vector<64x128xbf16>, vector<128x128xbf16>, vector<64x128xf32> -> vector<64x128xf32>
    %54 = arith.addf %47, %53 : vector<64x128xf32>
    %c0_55 = arith.constant 0 : index
    %c2_56 = arith.constant 2 : index
    %c2_57 = arith.constant 2 : index
    %c0_58 = arith.constant 0 : index
    %55 = vector.load %arg1[%c0_55, %c2_56, %c2_57, %c0_58] : memref<1x10x10x128xbf16, #tpu.memory_space<vmem>>, vector<1x8x8x128xbf16>
    %56 = vector.shape_cast %55 : vector<1x8x8x128xbf16> to vector<8x8x128xbf16>
    %57 = vector.shape_cast %56 : vector<8x8x128xbf16> to vector<64x128xbf16>
    %c8 = arith.constant 8 : index
    %c0_59 = arith.constant 0 : index
    %c0_60 = arith.constant 0 : index
    %58 = vector.load %arg2[%c8, %c0_59, %c0_60] : memref<9x128x128xbf16, #tpu.memory_space<vmem>>, vector<1x128x128xbf16>
    %59 = vector.shape_cast %58 : vector<1x128x128xbf16> to vector<128x128xbf16>
    %cst_61 = arith.constant dense<0.000000e+00> : vector<64x128xf32>
    %60 = tpu.matmul %57, %59, %cst_61 {dimension_numbers = #tpu.dot_dimension_numbers<[1], [0], [0], [1], [0, 0, 1, 1], [], []>} : vector<64x128xbf16>, vector<128x128xbf16>, vector<64x128xf32> -> vector<64x128xf32>
    %61 = arith.addf %54, %60 : vector<64x128xf32>
    %c0_62 = arith.constant 0 : index
    %c0_63 = arith.constant 0 : index
    %62 = vector.load %arg3[%c0_62, %c0_63] : memref<1x128xf32, #tpu.memory_space<vmem>>, vector<1x128xf32>
    %63 = vector.broadcast %62 : vector<1x128xf32> to vector<64x128xf32>
    %64 = arith.addf %61, %63 : vector<64x128xf32>
    %cst_64 = arith.constant 0.000000e+00 : f32
    %65 = vector.broadcast %cst_64 : f32 to vector<64x128xf32>
    %66 = arith.cmpf ogt, %64, %65 : vector<64x128xf32>
    %cst_65 = arith.constant 1.000000e-01 : f32
    %67 = vector.broadcast %cst_65 : f32 to vector<64x128xf32>
    %68 = arith.mulf %67, %64 : vector<64x128xf32>
    %69 = arith.select %66, %64, %68 : vector<64x128xi1>, vector<64x128xf32>
    %70 = vector.shape_cast %69 : vector<64x128xf32> to vector<8x8x128xf32>
    %c0_66 = arith.constant 0 : index
    %c0_67 = arith.constant 0 : index
    %c0_68 = arith.constant 0 : index
    %c0_69 = arith.constant 0 : index
    %71 = vector.load %arg4[%c0_66, %c0_67, %c0_68, %c0_69] : memref<1x8x8x128xf32, #tpu.memory_space<vmem>>, vector<1x8x8x128xf32>
    %72 = vector.shape_cast %71 : vector<1x8x8x128xf32> to vector<8x8x128xf32>
    %73 = vector.shape_cast %70 : vector<8x8x128xf32> to vector<1x8x8x128xf32>
    tpu.vector_store %arg4[%c0_66, %c0_67, %c0_68, %c0_69], %73 {strides = array<i32>} : memref<1x8x8x128xf32, #tpu.memory_space<vmem>>, vector<1x8x8x128xf32>,
    return
  }
  func.func @transform_0(%arg0: i32) -> (i32, i32, i32, i32) {
    %c0_i32 = arith.constant 0 : i32
    %c0_i32_0 = arith.constant 0 : i32
    %c0_i32_1 = arith.constant 0 : i32
    %c0_i32_2 = arith.constant 0 : i32
    return %arg0, %c0_i32, %c0_i32_0, %c0_i32_1 : i32, i32, i32, i32
  }
  func.func @transform_1(%arg0: i32) -> (i32, i32, i32) {
    %c0_i32 = arith.constant 0 : i32
    %c0_i32_0 = arith.constant 0 : i32
    %c0_i32_1 = arith.constant 0 : i32
    %c0_i32_2 = arith.constant 0 : i32
    return %c0_i32, %c0_i32_0, %c0_i32_1 : i32, i32, i32
  }
  func.func @transform_2(%arg0: i32) -> (i32, i32) {
    %c0_i32 = arith.constant 0 : i32
    %c0_i32_0 = arith.constant 0 : i32
    %c0_i32_1 = arith.constant 0 : i32
    return %c0_i32, %c0_i32_0 : i32, i32
  }
  func.func @transform_3(%arg0: i32) -> (i32, i32, i32, i32) {
    %c0_i32 = arith.constant 0 : i32
    %c0_i32_0 = arith.constant 0 : i32
    %c0_i32_1 = arith.constant 0 : i32
    %c0_i32_2 = arith.constant 0 : i32
    return %arg0, %c0_i32, %c0_i32_0, %c0_i32_1 : i32, i32, i32, i32
  }
}

module attributes {stable_mosaic.version = 11 : i64} {
  func.func @_conv_kernel(%arg0: i32, %arg1: memref<1x8x8x128xbf16, #tpu.memory_space<vmem>>, %arg2: memref<1x128x128xbf16, #tpu.memory_space<vmem>>, %arg3: memref<1x128xf32, #tpu.memory_space<vmem>>, %arg4: memref<1x8x8x128xf32, #tpu.memory_space<vmem>>) attributes {dimension_semantics = [#tpu.dimension_semantics<parallel>], iteration_bounds = array<i64: 2>, scalar_prefetch = 0 : i64, scratch_operands = 0 : i64, tpu.core_type = #tpu.core_type<tc>, window_params = [{transform_indices = @transform_0, window_bounds = array<i64: 1, 8, 8, 128>}, {pipeline_mode = #tpu.pipeline_mode<synchronous>, transform_indices = @transform_1, window_bounds = array<i64: 1, 128, 128>}, {pipeline_mode = #tpu.pipeline_mode<synchronous>, transform_indices = @transform_2, window_bounds = array<i64: 1, 128>}, {transform_indices = @transform_3, window_bounds = array<i64: 1, 8, 8, 128>}]} {
    %c0 = arith.constant 0 : index
    %c0_0 = arith.constant 0 : index
    %c0_1 = arith.constant 0 : index
    %c0_2 = arith.constant 0 : index
    %0 = vector.load %arg1[%c0, %c0_0, %c0_1, %c0_2] : memref<1x8x8x128xbf16, #tpu.memory_space<vmem>>, vector<1x8x8x128xbf16>
    %1 = vector.shape_cast %0 : vector<1x8x8x128xbf16> to vector<8x8x128xbf16>
    %2 = vector.shape_cast %1 : vector<8x8x128xbf16> to vector<64x128xbf16>
    %c0_3 = arith.constant 0 : index
    %c0_4 = arith.constant 0 : index
    %c0_5 = arith.constant 0 : index
    %3 = vector.load %arg2[%c0_3, %c0_4, %c0_5] : memref<1x128x128xbf16, #tpu.memory_space<vmem>>, vector<1x128x128xbf16>
    %4 = vector.shape_cast %3 : vector<1x128x128xbf16> to vector<128x128xbf16>
    %cst = arith.constant dense<0.000000e+00> : vector<64x128xf32>
    %5 = tpu.matmul %2, %4, %cst {dimension_numbers = #tpu.dot_dimension_numbers<[1], [0], [0], [1], [0, 0, 1, 1], [], []>} : vector<64x128xbf16>, vector<128x128xbf16>, vector<64x128xf32> -> vector<64x128xf32>
    %c0_6 = arith.constant 0 : index
    %c0_7 = arith.constant 0 : index
    %6 = vector.load %arg3[%c0_6, %c0_7] : memref<1x128xf32, #tpu.memory_space<vmem>>, vector<1x128xf32>
    %7 = vector.broadcast %6 : vector<1x128xf32> to vector<64x128xf32>
    %8 = arith.addf %5, %7 : vector<64x128xf32>
    %9 = vector.shape_cast %8 : vector<64x128xf32> to vector<8x8x128xf32>
    %c0_8 = arith.constant 0 : index
    %c0_9 = arith.constant 0 : index
    %c0_10 = arith.constant 0 : index
    %c0_11 = arith.constant 0 : index
    %10 = vector.load %arg4[%c0_8, %c0_9, %c0_10, %c0_11] : memref<1x8x8x128xf32, #tpu.memory_space<vmem>>, vector<1x8x8x128xf32>
    %11 = vector.shape_cast %10 : vector<1x8x8x128xf32> to vector<8x8x128xf32>
    %12 = vector.shape_cast %9 : vector<8x8x128xf32> to vector<1x8x8x128xf32>
    tpu.vector_store %arg4[%c0_8, %c0_9, %c0_10, %c0_11], %12 {strides = array<i32>} : memref<1x8x8x128xf32, #tpu.memory_space<vmem>>, vector<1x8x8x128xf32>,
    return
  }
  func.func @transform_0(%arg0: i32) -> (i32, i32, i32, i32) {
    %c0_i32 = arith.constant 0 : i32
    %c0_i32_0 = arith.constant 0 : i32
    %c0_i32_1 = arith.constant 0 : i32
    %c0_i32_2 = arith.constant 0 : i32
    return %arg0, %c0_i32, %c0_i32_0, %c0_i32_1 : i32, i32, i32, i32
  }
  func.func @transform_1(%arg0: i32) -> (i32, i32, i32) {
    %c0_i32 = arith.constant 0 : i32
    %c0_i32_0 = arith.constant 0 : i32
    %c0_i32_1 = arith.constant 0 : i32
    %c0_i32_2 = arith.constant 0 : i32
    return %c0_i32, %c0_i32_0, %c0_i32_1 : i32, i32, i32
  }
  func.func @transform_2(%arg0: i32) -> (i32, i32) {
    %c0_i32 = arith.constant 0 : i32
    %c0_i32_0 = arith.constant 0 : i32
    %c0_i32_1 = arith.constant 0 : i32
    return %c0_i32, %c0_i32_0 : i32, i32
  }
  func.func @transform_3(%arg0: i32) -> (i32, i32, i32, i32) {
    %c0_i32 = arith.constant 0 : i32
    %c0_i32_0 = arith.constant 0 : i32
    %c0_i32_1 = arith.constant 0 : i32
    %c0_i32_2 = arith.constant 0 : i32
    return %arg0, %c0_i32, %c0_i32_0, %c0_i32_1 : i32, i32, i32, i32
  }
}

module attributes {stable_mosaic.version = 11 : i64} {
  func.func @_add_kernel(%arg0: i32, %arg1: memref<64x128xf32, #tpu.memory_space<vmem>>, %arg2: memref<64x128xf32, #tpu.memory_space<vmem>>, %arg3: memref<64x128xf32, #tpu.memory_space<vmem>>) attributes {dimension_semantics = [#tpu.dimension_semantics<parallel>], iteration_bounds = array<i64: 2>, scalar_prefetch = 0 : i64, scratch_operands = 0 : i64, tpu.core_type = #tpu.core_type<tc>, window_params = [{transform_indices = @transform_0, window_bounds = array<i64: 64, 128>}, {transform_indices = @transform_1, window_bounds = array<i64: 64, 128>}, {transform_indices = @transform_2, window_bounds = array<i64: 64, 128>}]} {
    %c0 = arith.constant 0 : index
    %c0_0 = arith.constant 0 : index
    %0 = vector.load %arg1[%c0, %c0_0] : memref<64x128xf32, #tpu.memory_space<vmem>>, vector<64x128xf32>
    %c0_1 = arith.constant 0 : index
    %c0_2 = arith.constant 0 : index
    %1 = vector.load %arg2[%c0_1, %c0_2] : memref<64x128xf32, #tpu.memory_space<vmem>>, vector<64x128xf32>
    %2 = arith.addf %0, %1 : vector<64x128xf32>
    %c0_3 = arith.constant 0 : index
    %c0_4 = arith.constant 0 : index
    %3 = vector.load %arg3[%c0_3, %c0_4] : memref<64x128xf32, #tpu.memory_space<vmem>>, vector<64x128xf32>
    tpu.vector_store %arg3[%c0_3, %c0_4], %2 {strides = array<i32>} : memref<64x128xf32, #tpu.memory_space<vmem>>, vector<64x128xf32>,
    return
  }
  func.func @transform_0(%arg0: i32) -> (i32, i32) {
    %c0_i32 = arith.constant 0 : i32
    %c0_i32_0 = arith.constant 0 : i32
    return %arg0, %c0_i32 : i32, i32
  }
  func.func @transform_1(%arg0: i32) -> (i32, i32) {
    %c0_i32 = arith.constant 0 : i32
    %c0_i32_0 = arith.constant 0 : i32
    return %arg0, %c0_i32 : i32, i32
  }
  func.func @transform_2(%arg0: i32) -> (i32, i32) {
    %c0_i32 = arith.constant 0 : i32
    %c0_i32_0 = arith.constant 0 : i32
    return %arg0, %c0_i32 : i32, i32
  }
}

module attributes {stable_mosaic.version = 11 : i64} {
  func.func @_conv_kernel(%arg0: i32, %arg1: memref<1x8x8x128xbf16, #tpu.memory_space<vmem>>, %arg2: memref<1x128x128xbf16, #tpu.memory_space<vmem>>, %arg3: memref<1x128xf32, #tpu.memory_space<vmem>>, %arg4: memref<1x8x8x128xf32, #tpu.memory_space<vmem>>) attributes {dimension_semantics = [#tpu.dimension_semantics<parallel>], iteration_bounds = array<i64: 2>, scalar_prefetch = 0 : i64, scratch_operands = 0 : i64, tpu.core_type = #tpu.core_type<tc>, window_params = [{transform_indices = @transform_0, window_bounds = array<i64: 1, 8, 8, 128>}, {pipeline_mode = #tpu.pipeline_mode<synchronous>, transform_indices = @transform_1, window_bounds = array<i64: 1, 128, 128>}, {pipeline_mode = #tpu.pipeline_mode<synchronous>, transform_indices = @transform_2, window_bounds = array<i64: 1, 128>}, {transform_indices = @transform_3, window_bounds = array<i64: 1, 8, 8, 128>}]} {
    %c0 = arith.constant 0 : index
    %c0_0 = arith.constant 0 : index
    %c0_1 = arith.constant 0 : index
    %c0_2 = arith.constant 0 : index
    %0 = vector.load %arg1[%c0, %c0_0, %c0_1, %c0_2] : memref<1x8x8x128xbf16, #tpu.memory_space<vmem>>, vector<1x8x8x128xbf16>
    %1 = vector.shape_cast %0 : vector<1x8x8x128xbf16> to vector<8x8x128xbf16>
    %2 = vector.shape_cast %1 : vector<8x8x128xbf16> to vector<64x128xbf16>
    %c0_3 = arith.constant 0 : index
    %c0_4 = arith.constant 0 : index
    %c0_5 = arith.constant 0 : index
    %3 = vector.load %arg2[%c0_3, %c0_4, %c0_5] : memref<1x128x128xbf16, #tpu.memory_space<vmem>>, vector<1x128x128xbf16>
    %4 = vector.shape_cast %3 : vector<1x128x128xbf16> to vector<128x128xbf16>
    %cst = arith.constant dense<0.000000e+00> : vector<64x128xf32>
    %5 = tpu.matmul %2, %4, %cst {dimension_numbers = #tpu.dot_dimension_numbers<[1], [0], [0], [1], [0, 0, 1, 1], [], []>} : vector<64x128xbf16>, vector<128x128xbf16>, vector<64x128xf32> -> vector<64x128xf32>
    %c0_6 = arith.constant 0 : index
    %c0_7 = arith.constant 0 : index
    %6 = vector.load %arg3[%c0_6, %c0_7] : memref<1x128xf32, #tpu.memory_space<vmem>>, vector<1x128xf32>
    %7 = vector.broadcast %6 : vector<1x128xf32> to vector<64x128xf32>
    %8 = arith.addf %5, %7 : vector<64x128xf32>
    %cst_8 = arith.constant 0.000000e+00 : f32
    %9 = vector.broadcast %cst_8 : f32 to vector<64x128xf32>
    %10 = arith.cmpf ogt, %8, %9 : vector<64x128xf32>
    %cst_9 = arith.constant 1.000000e-01 : f32
    %11 = vector.broadcast %cst_9 : f32 to vector<64x128xf32>
    %12 = arith.mulf %11, %8 : vector<64x128xf32>
    %13 = arith.select %10, %8, %12 : vector<64x128xi1>, vector<64x128xf32>
    %14 = vector.shape_cast %13 : vector<64x128xf32> to vector<8x8x128xf32>
    %c0_10 = arith.constant 0 : index
    %c0_11 = arith.constant 0 : index
    %c0_12 = arith.constant 0 : index
    %c0_13 = arith.constant 0 : index
    %15 = vector.load %arg4[%c0_10, %c0_11, %c0_12, %c0_13] : memref<1x8x8x128xf32, #tpu.memory_space<vmem>>, vector<1x8x8x128xf32>
    %16 = vector.shape_cast %15 : vector<1x8x8x128xf32> to vector<8x8x128xf32>
    %17 = vector.shape_cast %14 : vector<8x8x128xf32> to vector<1x8x8x128xf32>
    tpu.vector_store %arg4[%c0_10, %c0_11, %c0_12, %c0_13], %17 {strides = array<i32>} : memref<1x8x8x128xf32, #tpu.memory_space<vmem>>, vector<1x8x8x128xf32>,
    return
  }
  func.func @transform_0(%arg0: i32) -> (i32, i32, i32, i32) {
    %c0_i32 = arith.constant 0 : i32
    %c0_i32_0 = arith.constant 0 : i32
    %c0_i32_1 = arith.constant 0 : i32
    %c0_i32_2 = arith.constant 0 : i32
    return %arg0, %c0_i32, %c0_i32_0, %c0_i32_1 : i32, i32, i32, i32
  }
  func.func @transform_1(%arg0: i32) -> (i32, i32, i32) {
    %c0_i32 = arith.constant 0 : i32
    %c0_i32_0 = arith.constant 0 : i32
    %c0_i32_1 = arith.constant 0 : i32
    %c0_i32_2 = arith.constant 0 : i32
    return %c0_i32, %c0_i32_0, %c0_i32_1 : i32, i32, i32
  }
  func.func @transform_2(%arg0: i32) -> (i32, i32) {
    %c0_i32 = arith.constant 0 : i32
    %c0_i32_0 = arith.constant 0 : i32
    %c0_i32_1 = arith.constant 0 : i32
    return %c0_i32, %c0_i32_0 : i32, i32
  }
  func.func @transform_3(%arg0: i32) -> (i32, i32, i32, i32) {
    %c0_i32 = arith.constant 0 : i32
    %c0_i32_0 = arith.constant 0 : i32
    %c0_i32_1 = arith.constant 0 : i32
    %c0_i32_2 = arith.constant 0 : i32
    return %arg0, %c0_i32, %c0_i32_0, %c0_i32_1 : i32, i32, i32, i32
  }
}

module attributes {stable_mosaic.version = 11 : i64} {
  func.func @_yolo_kernel(%arg0: i32, %arg1: memref<1x64x128xf32, #tpu.memory_space<vmem>>, %arg2: memref<1x128xf32, #tpu.memory_space<vmem>>, %arg3: memref<1x128xf32, #tpu.memory_space<vmem>>, %arg4: memref<64x128xf32, #tpu.memory_space<vmem>>, %arg5: memref<1x64x128xf32, #tpu.memory_space<vmem>>) attributes {dimension_semantics = [#tpu.dimension_semantics<parallel>], iteration_bounds = array<i64: 2>, scalar_prefetch = 0 : i64, scratch_operands = 0 : i64, tpu.core_type = #tpu.core_type<tc>, window_params = [{transform_indices = @transform_0, window_bounds = array<i64: 1, 64, 128>}, {pipeline_mode = #tpu.pipeline_mode<synchronous>, transform_indices = @transform_1, window_bounds = array<i64: 1, 128>}, {pipeline_mode = #tpu.pipeline_mode<synchronous>, transform_indices = @transform_2, window_bounds = array<i64: 1, 128>}, {pipeline_mode = #tpu.pipeline_mode<synchronous>, transform_indices = @transform_3, window_bounds = array<i64: 64, 128>}, {transform_indices = @transform_4, window_bounds = array<i64: 1, 64, 128>}]} {
    %c0 = arith.constant 0 : index
    %c0_0 = arith.constant 0 : index
    %c0_1 = arith.constant 0 : index
    %0 = vector.load %arg1[%c0, %c0_0, %c0_1] : memref<1x64x128xf32, #tpu.memory_space<vmem>>, vector<1x64x128xf32>
    %1 = vector.shape_cast %0 : vector<1x64x128xf32> to vector<64x128xf32>
    %c0_2 = arith.constant 0 : index
    %c0_3 = arith.constant 0 : index
    %2 = vector.load %arg2[%c0_2, %c0_3] : memref<1x128xf32, #tpu.memory_space<vmem>>, vector<1x128xf32>
    %3 = arith.negf %1 : vector<64x128xf32>
    %4 = math.exp %3 : vector<64x128xf32>
    %cst = arith.constant 1.000000e+00 : f32
    %5 = vector.broadcast %cst : f32 to vector<64x128xf32>
    %6 = arith.addf %5, %4 : vector<64x128xf32>
    %7 = arith.divf %5, %6 : vector<64x128xf32>
    %8 = vector.broadcast %2 : vector<1x128xf32> to vector<64x128xf32>
    %9 = arith.mulf %8, %7 : vector<64x128xf32>
    %c0_4 = arith.constant 0 : index
    %c0_5 = arith.constant 0 : index
    %10 = vector.load %arg3[%c0_4, %c0_5] : memref<1x128xf32, #tpu.memory_space<vmem>>, vector<1x128xf32>
    %11 = math.exp %1 : vector<64x128xf32>
    %12 = vector.broadcast %10 : vector<1x128xf32> to vector<64x128xf32>
    %13 = arith.mulf %12, %11 : vector<64x128xf32>
    %14 = arith.addf %9, %13 : vector<64x128xf32>
    %c0_6 = arith.constant 0 : index
    %c0_7 = arith.constant 0 : index
    %15 = vector.load %arg4[%c0_6, %c0_7] : memref<64x128xf32, #tpu.memory_space<vmem>>, vector<64x128xf32>
    %16 = arith.addf %14, %15 : vector<64x128xf32>
    %c0_8 = arith.constant 0 : index
    %c0_9 = arith.constant 0 : index
    %c0_10 = arith.constant 0 : index
    %17 = vector.load %arg5[%c0_8, %c0_9, %c0_10] : memref<1x64x128xf32, #tpu.memory_space<vmem>>, vector<1x64x128xf32>
    %18 = vector.shape_cast %17 : vector<1x64x128xf32> to vector<64x128xf32>
    %19 = vector.shape_cast %16 : vector<64x128xf32> to vector<1x64x128xf32>
    tpu.vector_store %arg5[%c0_8, %c0_9, %c0_10], %19 {strides = array<i32>} : memref<1x64x128xf32, #tpu.memory_space<vmem>>, vector<1x64x128xf32>,
    return
  }
  func.func @transform_0(%arg0: i32) -> (i32, i32, i32) {
    %c0_i32 = arith.constant 0 : i32
    %c0_i32_0 = arith.constant 0 : i32
    %c0_i32_1 = arith.constant 0 : i32
    return %arg0, %c0_i32, %c0_i32_0 : i32, i32, i32
  }
  func.func @transform_1(%arg0: i32) -> (i32, i32) {
    %c0_i32 = arith.constant 0 : i32
    %c0_i32_0 = arith.constant 0 : i32
    %c0_i32_1 = arith.constant 0 : i32
    return %c0_i32, %c0_i32_0 : i32, i32
  }
  func.func @transform_2(%arg0: i32) -> (i32, i32) {
    %c0_i32 = arith.constant 0 : i32
    %c0_i32_0 = arith.constant 0 : i32
    %c0_i32_1 = arith.constant 0 : i32
    return %c0_i32, %c0_i32_0 : i32, i32
  }
  func.func @transform_3(%arg0: i32) -> (i32, i32) {
    %c0_i32 = arith.constant 0 : i32
    %c0_i32_0 = arith.constant 0 : i32
    %c0_i32_1 = arith.constant 0 : i32
    return %c0_i32, %c0_i32_0 : i32, i32
  }
  func.func @transform_4(%arg0: i32) -> (i32, i32, i32) {
    %c0_i32 = arith.constant 0 : i32
    %c0_i32_0 = arith.constant 0 : i32
    %c0_i32_1 = arith.constant 0 : i32
    return %arg0, %c0_i32, %c0_i32_0 : i32, i32, i32
  }
}

module attributes {stable_mosaic.version = 11 : i64} {
  func.func @_upsample_kernel(%arg0: i32, %arg1: memref<256x64xf32, #tpu.memory_space<vmem>>, %arg2: memref<1x64x128xf32, #tpu.memory_space<vmem>>, %arg3: memref<1x256x128xf32, #tpu.memory_space<vmem>>) attributes {dimension_semantics = [#tpu.dimension_semantics<parallel>], iteration_bounds = array<i64: 2>, scalar_prefetch = 0 : i64, scratch_operands = 0 : i64, tpu.core_type = #tpu.core_type<tc>, window_params = [{pipeline_mode = #tpu.pipeline_mode<synchronous>, transform_indices = @transform_0, window_bounds = array<i64: 256, 64>}, {transform_indices = @transform_1, window_bounds = array<i64: 1, 64, 128>}, {transform_indices = @transform_2, window_bounds = array<i64: 1, 256, 128>}]} {
    %c0 = arith.constant 0 : index
    %c0_0 = arith.constant 0 : index
    %0 = vector.load %arg1[%c0, %c0_0] : memref<256x64xf32, #tpu.memory_space<vmem>>, vector<256x64xf32>
    %c0_1 = arith.constant 0 : index
    %c0_2 = arith.constant 0 : index
    %c0_3 = arith.constant 0 : index
    %1 = vector.load %arg2[%c0_1, %c0_2, %c0_3] : memref<1x64x128xf32, #tpu.memory_space<vmem>>, vector<1x64x128xf32>
    %2 = vector.shape_cast %1 : vector<1x64x128xf32> to vector<64x128xf32>
    %cst = arith.constant dense<0.000000e+00> : vector<256x128xf32>
    %3 = tpu.matmul %0, %2, %cst {dimension_numbers = #tpu.dot_dimension_numbers<[1], [0], [0], [1], [0, 0, 1, 1], [], []>} : vector<256x64xf32>, vector<64x128xf32>, vector<256x128xf32> -> vector<256x128xf32>
    %c0_4 = arith.constant 0 : index
    %c0_5 = arith.constant 0 : index
    %c0_6 = arith.constant 0 : index
    %4 = vector.load %arg3[%c0_4, %c0_5, %c0_6] : memref<1x256x128xf32, #tpu.memory_space<vmem>>, vector<1x256x128xf32>
    %5 = vector.shape_cast %4 : vector<1x256x128xf32> to vector<256x128xf32>
    %6 = vector.shape_cast %3 : vector<256x128xf32> to vector<1x256x128xf32>
    tpu.vector_store %arg3[%c0_4, %c0_5, %c0_6], %6 {strides = array<i32>} : memref<1x256x128xf32, #tpu.memory_space<vmem>>, vector<1x256x128xf32>,
    return
  }
  func.func @transform_0(%arg0: i32) -> (i32, i32) {
    %c0_i32 = arith.constant 0 : i32
    %c0_i32_0 = arith.constant 0 : i32
    %c0_i32_1 = arith.constant 0 : i32
    return %c0_i32, %c0_i32_0 : i32, i32
  }
  func.func @transform_1(%arg0: i32) -> (i32, i32, i32) {
    %c0_i32 = arith.constant 0 : i32
    %c0_i32_0 = arith.constant 0 : i32
    %c0_i32_1 = arith.constant 0 : i32
    return %arg0, %c0_i32, %c0_i32_0 : i32, i32, i32
  }
  func.func @transform_2(%arg0: i32) -> (i32, i32, i32) {
    %c0_i32 = arith.constant 0 : i32
    %c0_i32_0 = arith.constant 0 : i32
    %c0_i32_1 = arith.constant 0 : i32
    return %arg0, %c0_i32, %c0_i32_0 : i32, i32, i32
  }
}

module attributes {stable_mosaic.version = 11 : i64} {
  func.func @_conv_kernel(%arg0: i32, %arg1: memref<1x16x16x128xbf16, #tpu.memory_space<vmem>>, %arg2: memref<1x128x128xbf16, #tpu.memory_space<vmem>>, %arg3: memref<1x128xf32, #tpu.memory_space<vmem>>, %arg4: memref<1x16x16x128xf32, #tpu.memory_space<vmem>>) attributes {dimension_semantics = [#tpu.dimension_semantics<parallel>], iteration_bounds = array<i64: 2>, scalar_prefetch = 0 : i64, scratch_operands = 0 : i64, tpu.core_type = #tpu.core_type<tc>, window_params = [{transform_indices = @transform_0, window_bounds = array<i64: 1, 16, 16, 128>}, {pipeline_mode = #tpu.pipeline_mode<synchronous>, transform_indices = @transform_1, window_bounds = array<i64: 1, 128, 128>}, {pipeline_mode = #tpu.pipeline_mode<synchronous>, transform_indices = @transform_2, window_bounds = array<i64: 1, 128>}, {transform_indices = @transform_3, window_bounds = array<i64: 1, 16, 16, 128>}]} {
    %c0 = arith.constant 0 : index
    %c0_0 = arith.constant 0 : index
    %c0_1 = arith.constant 0 : index
    %c0_2 = arith.constant 0 : index
    %0 = vector.load %arg1[%c0, %c0_0, %c0_1, %c0_2] : memref<1x16x16x128xbf16, #tpu.memory_space<vmem>>, vector<1x16x16x128xbf16>
    %1 = vector.shape_cast %0 : vector<1x16x16x128xbf16> to vector<16x16x128xbf16>
    %2 = vector.shape_cast %1 : vector<16x16x128xbf16> to vector<256x128xbf16>
    %c0_3 = arith.constant 0 : index
    %c0_4 = arith.constant 0 : index
    %c0_5 = arith.constant 0 : index
    %3 = vector.load %arg2[%c0_3, %c0_4, %c0_5] : memref<1x128x128xbf16, #tpu.memory_space<vmem>>, vector<1x128x128xbf16>
    %4 = vector.shape_cast %3 : vector<1x128x128xbf16> to vector<128x128xbf16>
    %cst = arith.constant dense<0.000000e+00> : vector<256x128xf32>
    %5 = tpu.matmul %2, %4, %cst {dimension_numbers = #tpu.dot_dimension_numbers<[1], [0], [0], [1], [0, 0, 1, 1], [], []>} : vector<256x128xbf16>, vector<128x128xbf16>, vector<256x128xf32> -> vector<256x128xf32>
    %c0_6 = arith.constant 0 : index
    %c0_7 = arith.constant 0 : index
    %6 = vector.load %arg3[%c0_6, %c0_7] : memref<1x128xf32, #tpu.memory_space<vmem>>, vector<1x128xf32>
    %7 = vector.broadcast %6 : vector<1x128xf32> to vector<256x128xf32>
    %8 = arith.addf %5, %7 : vector<256x128xf32>
    %9 = vector.shape_cast %8 : vector<256x128xf32> to vector<16x16x128xf32>
    %c0_8 = arith.constant 0 : index
    %c0_9 = arith.constant 0 : index
    %c0_10 = arith.constant 0 : index
    %c0_11 = arith.constant 0 : index
    %10 = vector.load %arg4[%c0_8, %c0_9, %c0_10, %c0_11] : memref<1x16x16x128xf32, #tpu.memory_space<vmem>>, vector<1x16x16x128xf32>
    %11 = vector.shape_cast %10 : vector<1x16x16x128xf32> to vector<16x16x128xf32>
    %12 = vector.shape_cast %9 : vector<16x16x128xf32> to vector<1x16x16x128xf32>
    tpu.vector_store %arg4[%c0_8, %c0_9, %c0_10, %c0_11], %12 {strides = array<i32>} : memref<1x16x16x128xf32, #tpu.memory_space<vmem>>, vector<1x16x16x128xf32>,
    return
  }
  func.func @transform_0(%arg0: i32) -> (i32, i32, i32, i32) {
    %c0_i32 = arith.constant 0 : i32
    %c0_i32_0 = arith.constant 0 : i32
    %c0_i32_1 = arith.constant 0 : i32
    %c0_i32_2 = arith.constant 0 : i32
    return %arg0, %c0_i32, %c0_i32_0, %c0_i32_1 : i32, i32, i32, i32
  }
  func.func @transform_1(%arg0: i32) -> (i32, i32, i32) {
    %c0_i32 = arith.constant 0 : i32
    %c0_i32_0 = arith.constant 0 : i32
    %c0_i32_1 = arith.constant 0 : i32
    %c0_i32_2 = arith.constant 0 : i32
    return %c0_i32, %c0_i32_0, %c0_i32_1 : i32, i32, i32
  }
  func.func @transform_2(%arg0: i32) -> (i32, i32) {
    %c0_i32 = arith.constant 0 : i32
    %c0_i32_0 = arith.constant 0 : i32
    %c0_i32_1 = arith.constant 0 : i32
    return %c0_i32, %c0_i32_0 : i32, i32
  }
  func.func @transform_3(%arg0: i32) -> (i32, i32, i32, i32) {
    %c0_i32 = arith.constant 0 : i32
    %c0_i32_0 = arith.constant 0 : i32
    %c0_i32_1 = arith.constant 0 : i32
    %c0_i32_2 = arith.constant 0 : i32
    return %arg0, %c0_i32, %c0_i32_0, %c0_i32_1 : i32, i32, i32, i32
  }
}

module attributes {stable_mosaic.version = 11 : i64} {
  func.func @_yolo_kernel(%arg0: i32, %arg1: memref<1x256x128xf32, #tpu.memory_space<vmem>>, %arg2: memref<1x128xf32, #tpu.memory_space<vmem>>, %arg3: memref<1x128xf32, #tpu.memory_space<vmem>>, %arg4: memref<256x128xf32, #tpu.memory_space<vmem>>, %arg5: memref<1x256x128xf32, #tpu.memory_space<vmem>>) attributes {dimension_semantics = [#tpu.dimension_semantics<parallel>], iteration_bounds = array<i64: 2>, scalar_prefetch = 0 : i64, scratch_operands = 0 : i64, tpu.core_type = #tpu.core_type<tc>, window_params = [{transform_indices = @transform_0, window_bounds = array<i64: 1, 256, 128>}, {pipeline_mode = #tpu.pipeline_mode<synchronous>, transform_indices = @transform_1, window_bounds = array<i64: 1, 128>}, {pipeline_mode = #tpu.pipeline_mode<synchronous>, transform_indices = @transform_2, window_bounds = array<i64: 1, 128>}, {pipeline_mode = #tpu.pipeline_mode<synchronous>, transform_indices = @transform_3, window_bounds = array<i64: 256, 128>}, {transform_indices = @transform_4, window_bounds = array<i64: 1, 256, 128>}]} {
    %c0 = arith.constant 0 : index
    %c0_0 = arith.constant 0 : index
    %c0_1 = arith.constant 0 : index
    %0 = vector.load %arg1[%c0, %c0_0, %c0_1] : memref<1x256x128xf32, #tpu.memory_space<vmem>>, vector<1x256x128xf32>
    %1 = vector.shape_cast %0 : vector<1x256x128xf32> to vector<256x128xf32>
    %c0_2 = arith.constant 0 : index
    %c0_3 = arith.constant 0 : index
    %2 = vector.load %arg2[%c0_2, %c0_3] : memref<1x128xf32, #tpu.memory_space<vmem>>, vector<1x128xf32>
    %3 = arith.negf %1 : vector<256x128xf32>
    %4 = math.exp %3 : vector<256x128xf32>
    %cst = arith.constant 1.000000e+00 : f32
    %5 = vector.broadcast %cst : f32 to vector<256x128xf32>
    %6 = arith.addf %5, %4 : vector<256x128xf32>
    %7 = arith.divf %5, %6 : vector<256x128xf32>
    %8 = vector.broadcast %2 : vector<1x128xf32> to vector<256x128xf32>
    %9 = arith.mulf %8, %7 : vector<256x128xf32>
    %c0_4 = arith.constant 0 : index
    %c0_5 = arith.constant 0 : index
    %10 = vector.load %arg3[%c0_4, %c0_5] : memref<1x128xf32, #tpu.memory_space<vmem>>, vector<1x128xf32>
    %11 = math.exp %1 : vector<256x128xf32>
    %12 = vector.broadcast %10 : vector<1x128xf32> to vector<256x128xf32>
    %13 = arith.mulf %12, %11 : vector<256x128xf32>
    %14 = arith.addf %9, %13 : vector<256x128xf32>
    %c0_6 = arith.constant 0 : index
    %c0_7 = arith.constant 0 : index
    %15 = vector.load %arg4[%c0_6, %c0_7] : memref<256x128xf32, #tpu.memory_space<vmem>>, vector<256x128xf32>
    %16 = arith.addf %14, %15 : vector<256x128xf32>
    %c0_8 = arith.constant 0 : index
    %c0_9 = arith.constant 0 : index
    %c0_10 = arith.constant 0 : index
    %17 = vector.load %arg5[%c0_8, %c0_9, %c0_10] : memref<1x256x128xf32, #tpu.memory_space<vmem>>, vector<1x256x128xf32>
    %18 = vector.shape_cast %17 : vector<1x256x128xf32> to vector<256x128xf32>
    %19 = vector.shape_cast %16 : vector<256x128xf32> to vector<1x256x128xf32>
    tpu.vector_store %arg5[%c0_8, %c0_9, %c0_10], %19 {strides = array<i32>} : memref<1x256x128xf32, #tpu.memory_space<vmem>>, vector<1x256x128xf32>,
    return
  }
  func.func @transform_0(%arg0: i32) -> (i32, i32, i32) {
    %c0_i32 = arith.constant 0 : i32
    %c0_i32_0 = arith.constant 0 : i32
    %c0_i32_1 = arith.constant 0 : i32
    return %arg0, %c0_i32, %c0_i32_0 : i32, i32, i32
  }
  func.func @transform_1(%arg0: i32) -> (i32, i32) {
    %c0_i32 = arith.constant 0 : i32
    %c0_i32_0 = arith.constant 0 : i32
    %c0_i32_1 = arith.constant 0 : i32
    return %c0_i32, %c0_i32_0 : i32, i32
  }
  func.func @transform_2(%arg0: i32) -> (i32, i32) {
    %c0_i32 = arith.constant 0 : i32
    %c0_i32_0 = arith.constant 0 : i32
    %c0_i32_1 = arith.constant 0 : i32
    return %c0_i32, %c0_i32_0 : i32, i32
  }
  func.func @transform_3(%arg0: i32) -> (i32, i32) {
    %c0_i32 = arith.constant 0 : i32
    %c0_i32_0 = arith.constant 0 : i32
    %c0_i32_1 = arith.constant 0 : i32
    return %c0_i32, %c0_i32_0 : i32, i32
  }
  func.func @transform_4(%arg0: i32) -> (i32, i32, i32) {
    %c0_i32 = arith.constant 0 : i32
    %c0_i32_0 = arith.constant 0 : i32
    %c0_i32_1 = arith.constant 0 : i32
    return %arg0, %c0_i32, %c0_i32_0 : i32, i32, i32
  }
}

</mosaic_0001>

<bundles_post_ra>
// kernel: forward.12
= control target key start
LH: loop header
LB: loop body
LE: loop exit
PB: predicated region body
PF: predicated region fallthrough
CT: control target
= control target key end

     0   :  { %s1510_s12 = smov 0   ;;  %s1736_s0 = inlined_call_operand.vmem [shape: bf16[2,9,9,128], index: 0, kind: input, shape index: {}]   ;;  %s1737_s1 = inlined_call_operand.vmem [shape: bf16[4,128,128], index: 1, kind: input, shape index: {}]   ;;  %s1738_s2 = inlined_call_operand.vmem [shape: f32[1,128], index: 2, kind: input, shape index: {}]   ;;  %s1739_s3 = inlined_call_operand.vmem [shape: f32[2,8,8,128], index: 3, kind: output, shape index: {}]  }
   0x1 LB: > { %s1157_s13 = sadd.s32 4294967295, %s1488_s12   ;;  %p1161_p0 = scmp.ge.s32.totalorder %s1488_s12, 1  ;;  %s1488_s12 = sphi %s1510_s12, %s13_s12  }
   0x2   : > { %p137_p1 = scmp.lt.s32.totalorder %s1488_s12, 3 }
   0x4   : > { %p138_p2 = pnand %p1161_p0, %p137_p1 }
   0x5   : > { %p161_p3 = scmp.lt.s32.totalorder (!%p138_p2), %s1157_s13, 1 }
   0x6   : > { %141 = sbr.rel (%p138_p2) target bundleno = 293 (0x125), region = 32 }
   0xb   : > { %v1442_v0 = vld [vmem:[%s1737_s1 + $0x78] sm:$0xff]   ;;  %v1444_v2 = vld [vmem:[%s1737_s1 + $0x70] sm:$0xff]   ;;  %v1446_v4 = vld [vmem:[%s1737_s1 + $0x68] sm:$0xff]   ;;  %s1743_s13 = smov (!%p161_p3, %s1157_s13), 1  ;;  %vm204_vm0 = vsmask.f32 3328 }
   0xc   : > { %v1443_v1 = vld [vmem:[%s1737_s1 + $0x38] sm:$0xff]   ;;  %1337 = vmatprep.subr.bf16.mxu0 %v1442_v0  ;;  %v1445_v3 = vld [vmem:[%s1737_s1 + $0x30] sm:$0xff]   ;;  %v1447_v5 = vld [vmem:[%s1737_s1 + $0x28] sm:$0xff]   ;;  %s1433_s30 = smul.u32 72, %s1743_s13  ;;  %vm205_vm1 = vsmask.f32 7440 }
   0xd   : > { %1361 = vmatprep.subr.bf16.mxu1 %v1443_v1  ;;  %1338 = vmatpush3.bf16.msra.mxu0 %v1442_v0  ;;  %v1448_v6 = vld [vmem:[%s1737_s1 + $0x60] sm:$0xff]   ;;  %v1450_v8 = vld [vmem:[%s1737_s1 + $0x58] sm:$0xff]   ;;  %v1452_v10 = vld [vmem:[%s1737_s1 + $0x50] sm:$0xff]   ;;  %s1288_s7 = sshll.u32 %s1743_s13, 6 }
   0xe   : > { %1362 = vmatpush3.bf16.msra.mxu1 %v1443_v1  ;;  %1339 = vmatprep.subr.bf16.mxu0 %v1444_v2  ;;  %v1449_v7 = vld [vmem:[%s1737_s1 + $0x20] sm:$0xff]   ;;  %v1451_v9 = vld [vmem:[%s1737_s1 + $0x18] sm:$0xff]   ;;  %s1554_s10 = scalar_lea.vmem %s1736_s0, %s1433_s30  ;;  %v1453_v11 = vld [vmem:[%s1737_s1 + $0x10] sm:$0xff]   ;;  %s1716_s11 = scalar_lea.vmem %s1739_s3, %s1288_s7 }
   0xf   : > { %1363 = vmatprep.subr.bf16.mxu1 %v1445_v3  ;;  %v172_v12 = vld [vmem:[%s1554_s10] sm:$0xf]  ;;  %v173_v13 = vld [vmem:[%s1554_s10 + $0x8] sm:$0xf]  ;;  %v196_v14 = vld [vmem:[%s1554_s10 + $0x4] sm:$0x1] }
  0x10   : > { %v197_v15 = vld [vmem:[%s1554_s10 + $0xc] sm:$0x1]  ;;  %v1193_v16 = vcombine.low %v172_v12, %v173_v13  ;;  %v208_v18 = vshrl.u32 %v172_v12, 16  ;;  %v211_v19 = vshll.u32 %v172_v12, 16  ;;  %v217_v20 = vshll.u32 %v196_v14, 16  ;;  %v1456_v41 = vld [vmem:[%s1737_s1 + $0x40] sm:$0xff]   ;;  %vm1589_vm2 = vmor %vm204_vm0, %vm205_vm1 }
  0x11   : > { %1340 = vmatpush3.bf16.msra.mxu0 %v1444_v2  ;;  %v1454_v17 = vld [vmem:[%s1737_s1 + $0x48] sm:$0xff]   ;;  %v222_v21 = vshrl.u32 %v173_v13, 16  ;;  %v1570_v22 = vld [vmem:[%s1554_s10 + $0x10] sm:$0xf]  ;;  %v225_v24 = vshll.u32 %v173_v13, 16  ;;  %v231_v25 = vshll.u32 %v197_v15, 16 }
  0x12   : > { %1364 = vmatpush3.bf16.msra.mxu1 %v1445_v3  ;;  %1341 = vmatprep.subr.bf16.mxu0 %v1446_v4  ;;  %v1455_v23 = vld [vmem:[%s1737_s1 + $0x8] sm:$0xff]   ;;  %v1576_v26 = vld [vmem:[%s1554_s10 + $0x18] sm:$0xf]  ;;  %v198_v27 = vld [vmem:[%s1554_s10 + $0x14] sm:$0x1]  ;;  %v210_v28 = vrot.slane %v208_v18, 4 }
  0x13   : > { %1365 = vmatprep.subr.bf16.mxu1 %v1447_v5  ;;  %1377 = vmatprep.mubr.bf16.mxu1 %v1193_v16  ;;  %v213_v29 = vrot.slane %v211_v19, 5  ;;  %v219_v30 = vrot.slane %v217_v20, 5  ;;  %v224_v31 = vrot.slane %v222_v21, 4  ;;  %v199_v32 = vld [vmem:[%s1554_s10 + $0x1c] sm:$0x1]  ;;  %v227_v33 = vrot.slane %v225_v24, 5 }
  0x14   : > { %v233_v34 = vrot.slane %v231_v25, 5  ;;  %v236_v35 = vshrl.u32 %v1570_v22, 16  ;;  %v239_v36 = vshll.u32 %v1570_v22, 16  ;;  %v245_v38 = vshll.u32 %v198_v27, 16  ;;  %v1457_v47 = vld [vmem:[%s1737_s1] sm:$0xff]   ;;  %v1460_v61 = vld [vmem:[%s1737_s1 + $0xb8] sm:$0xff]  }
  0x15   : > { %1342 = vmatpush3.bf16.msra.mxu0 %v1446_v4  ;;  %v214_v37 = vor.u32 %v213_v29, %v210_v28  ;;  %v250_v39 = vshrl.u32 %v1576_v26, 16  ;;  %v253_v40 = vshll.u32 %v1576_v26, 16  ;;  %v228_v43 = vor.u32 %v227_v33, %v224_v31  ;;  %v1461_v63 = vld [vmem:[%s1737_s1 + $0xf8] sm:$0xff]   ;;  %v1462_v3 = vld [vmem:[%s1737_s1 + $0xb0] sm:$0xff]   ;;  %v1465_v13 = vld [vmem:[%s1737_s1 + $0xe8] sm:$0xff]  }
  0x16   : > { %1366 = vmatpush3.bf16.msra.mxu1 %v1447_v5  ;;  %1343 = vmatprep.subr.bf16.mxu0 %v1448_v6  ;;  %v238_v44 = vrot.slane %v236_v35, 4  ;;  %v241_v45 = vrot.slane %v239_v36, 5  ;;  %v259_v46 = vshll.u32 %v199_v32, 16  ;;  %v247_v53 = vrot.slane %v245_v38, 5  ;;  %v1463_v4 = vld [vmem:[%s1737_s1 + $0xf0] sm:$0xff]   ;;  %v1466_v36 = vld [vmem:[%s1737_s1 + $0xa0] sm:$0xff]  }
  0x17   : > { %1367 = vmatprep.subr.bf16.mxu1 %v1449_v7  ;;  %v215_v48 = vrot.slane %v214_v37, 4  ;;  %v252_v49 = vrot.slane %v250_v39, 4  ;;  %v255_v50 = vrot.slane %v253_v40, 5  ;;  %v229_v51 = vrot.slane %v228_v43, 4  ;;  %v176_v5 = vld [vmem:[%s1554_s10 + $0x20] sm:$0xf] }
  0x18   : > { %v242_v52 = vor.u32 %v241_v45, %v238_v44  ;;  %v261_v56 = vrot.slane %v259_v46, 5  ;;  %v1194_v2 = vcombine.low %v1570_v22, %v1576_v26  ;;  %v178_v18 = vld [vmem:[%s1554_s10 + $0x30] sm:$0xf]  ;;  %v179_v21 = vld [vmem:[%s1554_s10 + $0x38] sm:$0xf]  ;;  %v1467_v40 = vld [vmem:[%s1737_s1 + $0xe0] sm:$0xff]  }
  0x19   : > { %1344 = vmatpush3.bf16.msra.mxu0 %v1448_v6  ;;  %v220_v54 = vsel %vm1589_vm2, %v215_v48, %v219_v30  ;;  %v256_v55 = vor.u32 %v255_v50, %v252_v49  ;;  %v234_v57 = vsel %vm1589_vm2, %v229_v51, %v233_v34  ;;  %v177_v6 = vld [vmem:[%s1554_s10 + $0x28] sm:$0xf]  ;;  %v202_v22 = vld [vmem:[%s1554_s10 + $0x34] sm:$0x1]  ;;  %v203_v27 = vld [vmem:[%s1554_s10 + $0x3c] sm:$0x1]  ;;  %v1196_v48 = vcombine.low %v178_v18, %v179_v21 }
  0x1a   : > { %1368 = vmatpush3.bf16.msra.mxu1 %v1449_v7  ;;  %1345 = vmatprep.subr.bf16.mxu0 %v1450_v8  ;;  %v243_v58 = vrot.slane %v242_v52, 4  ;;  %v1181_v59 = vcombine.low %v220_v54, %v234_v57  ;;  %v1464_v7 = vld [vmem:[%s1737_s1 + $0xa8] sm:$0xff]   ;;  %v1195_v12 = vcombine.low %v176_v5, %v177_v6  ;;  %v278_v15 = vshrl.u32 %v177_v6, 16  ;;  %v1468_v52 = vld [vmem:[%s1737_s1 + $0x98] sm:$0xff]  }
  0x1b   : > { %1369 = vmatprep.subr.bf16.mxu1 %v1451_v9  ;;  %v257_v60 = vrot.slane %v256_v55, 4  ;;  %v281_v16 = vshll.u32 %v177_v6, 16  ;;  %v292_v29 = vshrl.u32 %v178_v18, 16  ;;  %v295_v30 = vshll.u32 %v178_v18, 16  ;;  %v1469_v55 = vld [vmem:[%s1737_s1 + $0xd8] sm:$0xff]  }
  0x1c   : > { %v248_v62 = vsel %vm1589_vm2, %v243_v58, %v247_v53  ;;  %1353 = vmatprep.mubr.bf16.mxu0 %v1181_v59  ;;  %v280_v24 = vrot.slane %v278_v15, 4  ;;  %v301_v31 = vshll.u32 %v202_v22, 16  ;;  %v306_v33 = vshrl.u32 %v179_v21, 16  ;;  %v1478_v58 = vld [vmem:[%s1554_s10 + $0x8] ss:$8 sps:$4 sm:$0xff]  }
  0x1d   : > { %1346 = vmatpush3.bf16.msra.mxu0 %v1450_v8  ;;  %v262_v0 = vsel %vm1589_vm2, %v257_v60, %v261_v56  ;;  %v200_v8 = vld [vmem:[%s1554_s10 + $0x24] sm:$0x1]  ;;  %v283_v25 = vrot.slane %v281_v16, 5  ;;  %v309_v34 = vshll.u32 %v179_v21, 16  ;;  %v315_v35 = vshll.u32 %v203_v27, 16 }
  0x1e   : > { %1370 = vmatpush3.bf16.msra.mxu1 %v1451_v9  ;;  %1347 = vmatprep.subr.bf16.mxu0 %v1452_v10  ;;  %v1182_v1 = vcombine.low %v248_v62, %v262_v0  ;;  %v201_v9 = vld [vmem:[%s1554_s10 + $0x2c] sm:$0x1]  ;;  %v273_v14 = vshll.u32 %v200_v8, 16  ;;  %v294_v38 = vrot.slane %v292_v29, 4  ;;  %v297_v39 = vrot.slane %v295_v30, 5  ;;  %v1472_v0 = vld [vmem:[%s1737_s1 + $0x90] sm:$0xff]  }
  0x1f   : > { %1371 = vmatprep.subr.bf16.mxu1 %v1453_v11  ;;  %v284_v32 = vor.u32 %v283_v25, %v280_v24  ;;  %v308_v43 = vrot.slane %v306_v33, 4  ;;  %v311_v44 = vrot.slane %v309_v34, 5  ;;  %v317_v51 = vrot.slane %v315_v35, 5  ;;  %v1241_v60 = vld [vmem:[%s1554_s10 + $0x8] sm:$0xf]  ;;  %v1476_v34 = vld [vmem:[%s1737_s1 + $0x80] sm:$0xff]  }
  0x20   : > { %v298_v46 = vor.u32 %v297_v39, %v294_v38  ;;  %v1243_v62 = vld [vmem:[%s1554_s10 + $0x10] sm:$0xf]  ;;  %v1246_v18 = vld [vmem:[%s1554_s10 + $0x1c] sm:$0x1]  ;;  %v1248_v22 = vld [vmem:[%s1554_s10 + $0x24] sm:$0x1] }
  0x21   : > { %1348 = vmatpush3.bf16.msra.mxu0 %v1452_v10  ;;  %v264_v10 = vshrl.u32 %v176_v5, 16  ;;  %v312_v50 = vor.u32 %v311_v44, %v308_v43  ;;  %v804_v6 = vshrl.u32 %v1243_v62, 16  ;;  %v827_v25 = vshll.u32 %v1246_v18, 16  ;;  %v1477_v35 = vld [vmem:[%s1737_s1 + $0xc0] sm:$0xff]   ;;  %v1249_v43 = vld [vmem:[%s1554_s10 + $0x28] sm:$0xf] }
  0x22   : > { %1372 = vmatpush3.bf16.msra.mxu1 %v1453_v11  ;;  %1349 = vmatprep.subr.bf16.mxu0 %v1454_v17  ;;  %v267_v11 = vshll.u32 %v176_v5, 16  ;;  %v299_v54 = vrot.slane %v298_v46, 4  ;;  %v1473_v5 = vld [vmem:[%s1737_s1 + $0xd0] sm:$0xff]   ;;  %v841_v29 = vshll.u32 %v1248_v22, 16  ;;  %v1250_v44 = vld [vmem:[%s1554_s10 + $0x2c] sm:$0x1] }
  0x23   : > { %1373 = vmatprep.subr.bf16.mxu1 %v1455_v23  ;;  %v266_v19 = vrot.slane %v264_v10, 4  ;;  %v313_v56 = vrot.slane %v312_v50, 4  ;;  %v829_v33 = vrot.slane %v827_v25, 5  ;;  %v849_v50 = vshll.u32 %v1249_v43, 16 }
  0x24   : > { %v269_v20 = vrot.slane %v267_v11, 5  ;;  %v1474_v11 = vld [vmem:[%s1737_s1 + $0x88] sm:$0xff]   ;;  %v843_v39 = vrot.slane %v841_v29, 5 }
  0x25   : > { %1350 = vmatpush3.bf16.msra.mxu0 %v1454_v17  ;;  %v287_v17 = vshll.u32 %v201_v9, 16  ;;  %v318_v59 = vsel %vm1589_vm2, %v313_v56, %v317_v51 }
  0x26   : > { %1374 = vmatpush3.bf16.msra.mxu1 %v1455_v23  ;;  %1351 = vmatprep.subr.bf16.mxu0 %v1456_v41  ;;  %v275_v23 = vrot.slane %v273_v14, 5  ;;  %v270_v28 = vor.u32 %v269_v20, %v266_v19  ;;  %v1247_v19 = vld [vmem:[%s1554_s10 + $0x20] sm:$0xf]  ;;  %v1475_v20 = vld [vmem:[%s1737_s1 + $0xc8] sm:$0xff]  }
  0x27   : > { %1375 = vmatprep.subr.bf16.mxu1 %v1457_v47  ;;  %v289_v26 = vrot.slane %v287_v17, 5  ;;  %v1245_v17 = vld [vmem:[%s1554_s10 + $0x18] sm:$0xf]  ;;  %v832_v27 = vshrl.u32 %v1247_v19, 16 }
  0x28   : > { %v271_v37 = vrot.slane %v270_v28, 4  ;;  %v821_v24 = vshll.u32 %v1245_v17, 16  ;;  %v835_v28 = vshll.u32 %v1247_v19, 16 }
  0x29   : > { %1352 = vmatpush3.bf16.msra.mxu0 %v1456_v41  ;;  %v285_v41 = vrot.slane %v284_v32, 4 }
  0x2a   : > { %1376 = vmatpush3.bf16.msra.mxu1 %v1457_v47  ;;  %1385 = vmatprep.subr.bf16.mxu0 %v1460_v61  ;;  %v276_v45 = vsel %vm1589_vm2, %v271_v37, %v275_v23  ;;  %v303_v47 = vrot.slane %v301_v31, 5  ;;  %v818_v23 = vshrl.u32 %v1245_v17, 16  ;;  %v823_v32 = vrot.slane %v821_v24, 5 }
  0x2b   : > { %1409 = vmatprep.subr.bf16.mxu1 %v1461_v63  ;;  %v290_v49 = vsel %vm1589_vm2, %v285_v41, %v289_v26  ;;  %v834_v37 = vrot.slane %v832_v27, 4  ;;  %v837_v38 = vrot.slane %v835_v28, 5 }
  0x2c   : > { %1354 = vmatmul.mubr.bf16.vlgmr.msra.gmra.mxu0 %v1182_v1  ;;  %v1183_v53 = vcombine.low %v276_v45, %v290_v49  ;;  %v304_v57 = vsel %vm1589_vm2, %v299_v54, %v303_v47  ;;  %v1244_v1 = vld [vmem:[%s1554_s10 + $0x14] sm:$0x1]  ;;  %v820_v31 = vrot.slane %v818_v23, 4  ;;  %v1251_v45 = vld [vmem:[%s1554_s10 + $0x30] sm:$0xf]  ;;  %v846_v49 = vshrl.u32 %v1249_v43, 16 }
  0x2d   : > { %1378 = vmatmul.mubr.bf16.vlgmr.msra.gmra.mxu1 %v1194_v2  ;;  %1386 = vmatpush3.bf16.msra.mxu0 %v1460_v61  ;;  %v1242_v61 = vld [vmem:[%s1554_s10 + $0xc] sm:$0x1]  ;;  %v790_v2 = vshrl.u32 %v1241_v60, 16  ;;  %v813_v8 = vshll.u32 %v1244_v1, 16  ;;  %v838_v47 = vor.u32 %v837_v38, %v834_v37  ;;  %v863_v54 = vshll.u32 %v1251_v45, 16 }
  0x2e   : > { %1410 = vmatpush3.bf16.msra.mxu1 %v1461_v63  ;;  %1387 = vmatprep.subr.bf16.mxu0 %v1462_v3  ;;  %v1184_v63 = vcombine.low %v304_v57, %v318_v59  ;;  %v824_v41 = vor.u32 %v823_v32, %v820_v31  ;;  %v848_v57 = vrot.slane %v846_v49, 4 }
  0x2f   : > { %1411 = vmatprep.subr.bf16.mxu1 %v1463_v4  ;;  %1381 = vmatprep.mubr.bf16.mxu1 %v1195_v12  ;;  %v792_v9 = vrot.slane %v790_v2, 4  ;;  %v815_v15 = vrot.slane %v813_v8, 5  ;;  %v839_v56 = vrot.slane %v838_v47, 4  ;;  %v1480_v8 = vld [vmem:[%s1554_s10 + $0x28] ss:$8 sps:$4 sm:$0xff]  }
  0x30   : > { %1357 = vmatprep.mubr.bf16.mxu0 %v1183_v53  ;;  %v825_v51 = vrot.slane %v824_v41, 4  ;;  %v860_v53 = vshrl.u32 %v1251_v45, 16 }
  0x31   : > { %1388 = vmatpush3.bf16.msra.mxu0 %v1462_v3  ;;  %v793_v3 = vshll.u32 %v1241_v60, 16  ;;  %v844_v1 = vsel %vm1589_vm2, %v839_v56, %v843_v39  ;;  %v1709_v56 = vld [vmem:[%s1738_s2] ss:$0 sm:$0xff] }
  0x32   : > { %1412 = vmatpush3.bf16.msra.mxu1 %v1463_v4  ;;  %1389 = vmatprep.subr.bf16.mxu0 %v1464_v7  ;;  %v799_v4 = vshll.u32 %v1242_v61, 16  ;;  %v830_v60 = vsel %vm1589_vm2, %v825_v51, %v829_v33 }
  0x33   : > { %1413 = vmatprep.subr.bf16.mxu1 %v1465_v13  ;;  %v795_v10 = vrot.slane %v793_v3, 5 }
  0x34   : > { %1358 = vmatmul.mubr.bf16.gmra.mxu0 %v1184_v63  ;;  %v801_v12 = vrot.slane %v799_v4, 5  ;;  %v865_v63 = vrot.slane %v863_v54, 5  ;;  %v1254_v4 = vld [vmem:[%s1554_s10 + $0x3c] sm:$0x1] }
  0x35   : > { %1390 = vmatpush3.bf16.msra.mxu0 %v1464_v7  ;;  %1382 = vmatmul.mubr.bf16.gmra.mxu1 %v1196_v48  ;;  %v807_v7 = vshll.u32 %v1243_v62, 16  ;;  %v796_v16 = vor.u32 %v795_v10, %v792_v9  ;;  %v1252_v48 = vld [vmem:[%s1554_s10 + $0x34] sm:$0x1]  ;;  %v862_v62 = vrot.slane %v860_v53, 4  ;;  %v1256_v10 = vld [vmem:[%s1554_s10 + $0x44] sm:$0x1] }
  0x36   : > { %1414 = vmatpush3.bf16.msra.mxu1 %v1465_v13  ;;  %1391 = vmatprep.subr.bf16.mxu0 %v1466_v36  ;;  %v806_v13 = vrot.slane %v804_v6, 4  ;;  %v869_v59 = vshll.u32 %v1252_v48, 16  ;;  %v897_v19 = vshll.u32 %v1256_v10, 16 }
  0x37   : > { %1415 = vmatprep.subr.bf16.mxu1 %v1467_v40  ;;  %1401 = vmatprep.mubr.bf16.mxu0 %v1478_v58  ;;  %v809_v14 = vrot.slane %v807_v7, 5  ;;  %v797_v26 = vrot.slane %v796_v16, 4  ;;  %v851_v58 = vrot.slane %v849_v50, 5  ;;  %v1274_v7 = vcombine.low %v830_v60, %v844_v1 }
  0x38   : > { %v871_v3 = vrot.slane %v869_v59, 5  ;;  %v866_v9 = vor.u32 %v865_v63, %v862_v62  ;;  %v899_v28 = vrot.slane %v897_v19, 5 }
  0x39   : > { %1392 = vmatpush3.bf16.msra.mxu0 %v1466_v36  ;;  %v810_v21 = vor.u32 %v809_v14, %v806_v13  ;;  %v802_v36 = vsel %vm1589_vm2, %v797_v26, %v801_v12  ;;  %v852_v2 = vor.u32 %v851_v58, %v848_v57  ;;  %v883_v12 = vshll.u32 %v1254_v4, 16 }
  0x3a   : > { %1416 = vmatpush3.bf16.msra.mxu1 %v1467_v40  ;;  %1393 = vmatprep.subr.bf16.mxu0 %v1468_v52  ;;  %v867_v17 = vrot.slane %v866_v9, 4 }
  0x3b   : > { %1417 = vmatprep.subr.bf16.mxu1 %v1469_v55  ;;  %v811_v30 = vrot.slane %v810_v21, 4  ;;  %v853_v13 = vrot.slane %v852_v2, 4  ;;  %v885_v25 = vrot.slane %v883_v12, 5 }
  0x3c   : > { %v872_v23 = vsel %vm1589_vm2, %v867_v17, %v871_v3 }
  0x3d   : > { %1394 = vmatpush3.bf16.msra.mxu0 %v1468_v52  ;;  %v816_v40 = vsel %vm1589_vm2, %v811_v30, %v815_v15  ;;  %v855_v52 = vshll.u32 %v1250_v44, 16  ;;  %v1481_v30 = vld [vmem:[%s1554_s10 + $0x38] ss:$8 sps:$4 sm:$0xff]  }
  0x3e   : > { %1418 = vmatpush3.bf16.msra.mxu1 %v1469_v55  ;;  %1395 = vmatprep.subr.bf16.mxu0 %v1472_v0  ;;  %v1273_v46 = vcombine.low %v802_v36, %v816_v40  ;;  %v1479_v55 = vld [vmem:[%s1554_s10 + $0x18] ss:$8 sps:$4 sm:$0xff]  }
  0x3f   : > { %1419 = vmatprep.subr.bf16.mxu1 %v1473_v5  ;;  %v857_v61 = vrot.slane %v855_v52, 5 }
  0x40   : > { %1425 = vmatprep.mubr.bf16.mxu1 %v1273_v46 }
  0x41   : > { %1396 = vmatpush3.bf16.msra.mxu0 %v1472_v0  ;;  %v1253_v0 = vld [vmem:[%s1554_s10 + $0x38] sm:$0xf] }
  0x42   : > { %1420 = vmatpush3.bf16.msra.mxu1 %v1473_v5  ;;  %1397 = vmatprep.subr.bf16.mxu0 %v1474_v11  ;;  %v1255_v5 = vld [vmem:[%s1554_s10 + $0x40] sm:$0xf]  ;;  %v874_v6 = vshrl.u32 %v1253_v0, 16 }
  0x43   : > { %1421 = vmatprep.subr.bf16.mxu1 %v1475_v20  ;;  %v888_v15 = vshrl.u32 %v1255_v5, 16  ;;  %v891_v16 = vshll.u32 %v1255_v5, 16 }
  0x44   : > { %v876_v14 = vrot.slane %v874_v6, 4 }
  0x45   : > { %1398 = vmatpush3.bf16.msra.mxu0 %v1474_v11  ;;  %v877_v11 = vshll.u32 %v1253_v0, 16  ;;  %v890_v21 = vrot.slane %v888_v15, 4  ;;  %v893_v22 = vrot.slane %v891_v16, 5 }
  0x46   : > { %1422 = vmatpush3.bf16.msra.mxu1 %v1475_v20  ;;  %1399 = vmatprep.subr.bf16.mxu0 %v1476_v34  ;;  %v858_v20 = vsel %vm1589_vm2, %v853_v13, %v857_v61 }
  0x47   : > { %1423 = vmatprep.subr.bf16.mxu1 %v1477_v35  ;;  %v879_v18 = vrot.slane %v877_v11, 5  ;;  %v1275_v26 = vcombine.low %v858_v20, %v872_v23  ;;  %v894_v27 = vor.u32 %v893_v22, %v890_v21 }
  0x49   : > { %1400 = vmatpush3.bf16.msra.mxu0 %v1476_v34  ;;  %v880_v24 = vor.u32 %v879_v18, %v876_v14  ;;  %v895_v31 = vrot.slane %v894_v27, 4 }
  0x4a   : > { %1424 = vmatpush3.bf16.msra.mxu1 %v1477_v35 }
  0x4b   : > { %v881_v29 = vrot.slane %v880_v24, 4  ;;  %v900_v33 = vsel %vm1589_vm2, %v895_v31, %v899_v28 }
  0x4c   : > { %1402 = vmatmul.mubr.bf16.vlgmr.msra.gmra.mxu0 %v1479_v55 }
  0x4d   : > { %1426 = vmatmul.mubr.bf16.vlgmr.msra.gmra.mxu1 %v1274_v7  ;;  %1405 = vmatprep.mubr.bf16.mxu0 %v1480_v8  ;;  %v886_v32 = vsel %vm1589_vm2, %v881_v29, %v885_v25 }
  0x4e   : > { %1429 = vmatprep.mubr.bf16.mxu1 %v1275_v26  ;;  %v1276_v34 = vcombine.low %v886_v32, %v900_v33 }
  0x54   : > { %1406 = vmatmul.mubr.bf16.gmra.mxu0 %v1481_v30 }
  0x55   : > { %1430 = vmatmul.mubr.bf16.gmra.mxu1 %v1276_v34 }
  0xec   : > { %v1355_v35 = vpop.f32.mrf.mxu0 }
  0xed   : > { %v1379_v36 = vpop.f32.mrf.mxu1 }
  0xee   : > { %v434_v37 = vpop.f32.mrf.mxu0  ;;  %v580_v50 = vadd.f32 %v1379_v36, %v1355_v35 }
  0xef   : > { %v571_v38 = vpop.f32.mrf.mxu1 }
  0xf0   : > { %v1356_v39 = vpop.f32.mrf.mxu0  ;;  %v572_v53 = vadd.f32 %v571_v38, %v434_v37 }
  0xf1   : > { %v1380_v40 = vpop.f32.mrf.mxu1 }
  0xf2   : > { %v437_v41 = vpop.f32.mrf.mxu0  ;;  %v583_v58 = vadd.f32 %v1380_v40, %v1356_v39 }
  0xf3   : > { %v574_v43 = vpop.f32.mrf.mxu1 }
  0xf4   : > { %v1359_v44 = vpop.f32.mrf.mxu0  ;;  %v575_v3 = vadd.f32 %v574_v43, %v437_v41 }
  0xf5   : > { %v1383_v45 = vpop.f32.mrf.mxu1 }
  0xf6   : > { %v450_v46 = vpop.f32.mrf.mxu0  ;;  %v596_v9 = vadd.f32 %v1383_v45, %v1359_v44 }
  0xf7   : > { %v587_v47 = vpop.f32.mrf.mxu1 }
  0xf8   : > { %v1360_v48 = vpop.f32.mrf.mxu0  ;;  %v588_v10 = vadd.f32 %v587_v47, %v450_v46 }
  0xf9   : > { %v1384_v49 = vpop.f32.mrf.mxu1 }
  0xfa   : > { %v453_v42 = vpop.f32.mrf.mxu0  ;;  %v599_v17 = vadd.f32 %v1384_v49, %v1360_v48 }
  0xfb   : > { %v590_v51 = vpop.f32.mrf.mxu1 }
  0xfc   : > { %v591_v28 = vadd.f32 %v590_v51, %v453_v42 }
 0x10c   : > { %v1403_v52 = vpop.f32.mrf.mxu0 }
 0x10d   : > { %v767_v54 = vadd.f32 %v1403_v52, %v580_v50  ;;  %v1427_v55 = vpop.f32.mrf.mxu1 }
 0x10e   : > { %v734_v57 = vpop.f32.mrf.mxu0 }
 0x10f   : > { %v1049_v59 = vadd.f32 %v1427_v55, %v767_v54  ;;  %v765_v60 = vadd.f32 %v734_v57, %v572_v53  ;;  %v1016_v61 = vpop.f32.mrf.mxu1 }
 0x110   : > { %v1404_v62 = vpop.f32.mrf.mxu0 }
 0x111   : > { %v1064_v63 = vadd.f32 %v1709_v56, %v1049_v59  ;;  %v1047_v0 = vadd.f32 %v1016_v61, %v765_v60  ;;  %v768_v1 = vadd.f32 %v1404_v62, %v583_v58  ;;  %v1428_v2 = vpop.f32.mrf.mxu1 }
 0x112   : > { %v737_v4 = vpop.f32.mrf.mxu0 }
 0x113   : > { %vm1072_vm3 = vcmp.gt.f32.partialorder %v1064_v63, 0.0  ;;  %v1080_v5 = vmul.f32 0.1, %v1064_v63  ;;  %v1062_v6 = vadd.f32 %v1709_v56, %v1047_v0  ;;  %v1050_v7 = vadd.f32 %v1428_v2, %v768_v1  ;;  %v1019_v8 = vpop.f32.mrf.mxu1 }
 0x114   : > { %v766_v11 = vadd.f32 %v737_v4, %v575_v3  ;;  %v1407_v12 = vpop.f32.mrf.mxu0 }
 0x115   : > { %v1088_v13 = vsel %vm1072_vm3, %v1064_v63, %v1080_v5  ;;  %vm1070_vm4 = vcmp.gt.f32.partialorder %v1062_v6, 0.0  ;;  %v1078_v14 = vmul.f32 0.1, %v1062_v6  ;;  %v1065_v15 = vadd.f32 %v1709_v56, %v1050_v7  ;;  %v1431_v16 = vpop.f32.mrf.mxu1 }
 0x116   : > { %1096 = vst [vmem:[%s1716_s11 + $0x10] sm:$0xff] %v1088_v13  ;;  %v1048_v18 = vadd.f32 %v1019_v8, %v766_v11  ;;  %v771_v19 = vadd.f32 %v1407_v12, %v596_v9  ;;  %v750_v20 = vpop.f32.mrf.mxu0 }
 0x117   : > { %v1086_v21 = vsel %vm1070_vm4, %v1062_v6, %v1078_v14  ;;  %vm1073_vm5 = vcmp.gt.f32.partialorder %v1065_v15, 0.0  ;;  %v1081_v22 = vmul.f32 0.1, %v1065_v15  ;;  %v769_v23 = vadd.f32 %v750_v20, %v588_v10  ;;  %v1032_v24 = vpop.f32.mrf.mxu1 }
 0x118   : > { %1094 = vst [vmem:[%s1716_s11] sm:$0xff] %v1086_v21  ;;  %v1063_v25 = vadd.f32 %v1709_v56, %v1048_v18  ;;  %v1053_v26 = vadd.f32 %v1431_v16, %v771_v19  ;;  %v1408_v27 = vpop.f32.mrf.mxu0 }
 0x119   : > { %v1089_v29 = vsel %vm1073_vm5, %v1065_v15, %v1081_v22  ;;  %v1051_v30 = vadd.f32 %v1032_v24, %v769_v23  ;;  %v772_v31 = vadd.f32 %v1408_v27, %v599_v17  ;;  %v1432_v32 = vpop.f32.mrf.mxu1 }
 0x11a   : > { %1097 = vst [vmem:[%s1716_s11 + $0x18] sm:$0xff] %v1089_v29  ;;  %vm1071_vm6 = vcmp.gt.f32.partialorder %v1063_v25, 0.0  ;;  %v1079_v33 = vmul.f32 0.1, %v1063_v25  ;;  %v1068_v34 = vadd.f32 %v1709_v56, %v1053_v26  ;;  %v753_v35 = vpop.f32.mrf.mxu0 }
 0x11b   : > { %v1066_v36 = vadd.f32 %v1709_v56, %v1051_v30  ;;  %v1054_v37 = vadd.f32 %v1432_v32, %v772_v31  ;;  %v770_v38 = vadd.f32 %v753_v35, %v591_v28  ;;  %v1035_v41 = vpop.f32.mrf.mxu1 }
 0x11c   : > { %v1087_v39 = vsel %vm1071_vm6, %v1063_v25, %v1079_v33  ;;  %vm1076_vm7 = vcmp.gt.f32.partialorder %v1068_v34, 0.0  ;;  %v1084_v40 = vmul.f32 0.1, %v1068_v34 }
 0x11d   : > { %1095 = vst [vmem:[%s1716_s11 + $0x8] sm:$0xff] %v1087_v39  ;;  %vm1074_vm8 = vcmp.gt.f32.partialorder %v1066_v36, 0.0  ;;  %v1082_v43 = vmul.f32 0.1, %v1066_v36  ;;  %v1069_v44 = vadd.f32 %v1709_v56, %v1054_v37  ;;  %v1052_v45 = vadd.f32 %v1035_v41, %v770_v38 }
 0x11e   : > { %v1092_v46 = vsel %vm1076_vm7, %v1068_v34, %v1084_v40 }
 0x11f   : > { %1100 = vst [vmem:[%s1716_s11 + $0x30] sm:$0xff] %v1092_v46  ;;  %v1090_v47 = vsel %vm1074_vm8, %v1066_v36, %v1082_v43  ;;  %vm1077_vm9 = vcmp.gt.f32.partialorder %v1069_v44, 0.0  ;;  %v1085_v48 = vmul.f32 0.1, %v1069_v44  ;;  %v1067_v49 = vadd.f32 %v1709_v56, %v1052_v45 }
 0x120   : > { %1098 = vst [vmem:[%s1716_s11 + $0x20] sm:$0xff] %v1090_v47 }
 0x121   : > { %v1093_v42 = vsel %vm1077_vm9, %v1069_v44, %v1085_v48  ;;  %vm1075_vm10 = vcmp.gt.f32.partialorder %v1067_v49, 0.0  ;;  %v1083_v50 = vmul.f32 0.1, %v1067_v49 }
 0x122   : > { %1101 = vst [vmem:[%s1716_s11 + $0x38] sm:$0xff] %v1093_v42 }
 0x123   : > { %v1091_v51 = vsel %vm1075_vm10, %v1067_v49, %v1083_v50 }
 0x124   : > { %1099 = vst [vmem:[%s1716_s11 + $0x28] sm:$0xff] %v1091_v51 }
 0x125 PF: > { %s13_s12 = sadd.s32 1, %s1488_s12  }
 0x126   : > { %p10_p4 = scmp.ge.s32.totalorder %s13_s12, 4  }
 0x128   :  { %12 = sbr.rel (!%p10_p4) target bundleno = 1 (0x1), region = 66 }

// kernel: forward.14
= control target key start
LH: loop header
LB: loop body
LE: loop exit
PB: predicated region body
PF: predicated region fallthrough
CT: control target
= control target key end

     0   :  { %s313_s9 = smov 0   ;;  %s343_s0 = inlined_call_operand.vmem [shape: f32[128,128], index: 0, kind: input, shape index: {}]   ;;  %s344_s1 = inlined_call_operand.vmem [shape: f32[128,128], index: 1, kind: input, shape index: {}]   ;;  %s345_s2 = inlined_call_operand.vmem [shape: f32[128,128], index: 2, kind: output, shape index: {}]  }
   0x1 LB: > { %s269_s10 = sadd.s32 4294967295, %s296_s9   ;;  %p273_p0 = scmp.ge.s32.totalorder %s296_s9, 1  ;;  %s296_s9 = sphi %s313_s9, %s12_s9  }
   0x2   : > { %p124_p1 = scmp.lt.s32.totalorder %s296_s9, 3 }
   0x4   : > { %p125_p2 = pnand %p273_p0, %p124_p1 }
   0x5   : > { %s274_s11 = sshll.u32 (!%p125_p2), %s269_s10, 3 }
   0x6   : > { %128 = sbr.rel (%p125_p2) target bundleno = 23 (0x17), region = 28  ;;  %p152_p3 = scmp.lt.s32.totalorder (!%p125_p2), %s274_s11, 15 }
   0xb   : > { %s347_s11 = smov (!%p152_p3, %s274_s11), 15 }
   0xc   : > { %s275_s12 = sshll.u32 %s347_s11, 3 }
   0xd   : > { %s155_s15 = scalar_lea.vmem %s343_s0, %s275_s12  ;;  %s161_s18 = scalar_lea.vmem %s344_s1, %s275_s12 }
   0xe   : > { %s330_s21 = scalar_lea.vmem %s345_s2, %s275_s12  ;;  %v169_v0 = vld [vmem:[%s155_s15] sm:$0xff]  ;;  %v170_v2 = vld [vmem:[%s155_s15 + $0x8] sm:$0xff]  ;;  %v171_v5 = vld [vmem:[%s155_s15 + $0x10] sm:$0xff] }
   0xf   : > { %v177_v1 = vld [vmem:[%s161_s18] sm:$0xff]  ;;  %v178_v4 = vld [vmem:[%s161_s18 + $0x8] sm:$0xff]  ;;  %v179_v6 = vld [vmem:[%s161_s18 + $0x10] sm:$0xff] }
  0x10   : > { %v185_v3 = vadd.f32 %v177_v1, %v169_v0  ;;  %v186_v7 = vadd.f32 %v178_v4, %v170_v2  ;;  %v187_v8 = vadd.f32 %v179_v6, %v171_v5  ;;  %v172_v9 = vld [vmem:[%s155_s15 + $0x18] sm:$0xff]  ;;  %v173_v11 = vld [vmem:[%s155_s15 + $0x20] sm:$0xff]  ;;  %v174_v14 = vld [vmem:[%s155_s15 + $0x28] sm:$0xff] }
  0x11   : > { %v180_v10 = vld [vmem:[%s161_s18 + $0x18] sm:$0xff]  ;;  %v181_v13 = vld [vmem:[%s161_s18 + $0x20] sm:$0xff]  ;;  %v182_v15 = vld [vmem:[%s161_s18 + $0x28] sm:$0xff] }
  0x12   : > { %193 = vst [vmem:[%s330_s21] sm:$0xff] %v185_v3  ;;  %v188_v12 = vadd.f32 %v180_v10, %v172_v9  ;;  %194 = vst [vmem:[%s330_s21 + $0x8] sm:$0xff] %v186_v7  ;;  %v189_v16 = vadd.f32 %v181_v13, %v173_v11  ;;  %v190_v17 = vadd.f32 %v182_v15, %v174_v14  ;;  %v175_v18 = vld [vmem:[%s155_s15 + $0x30] sm:$0xff]  ;;  %v176_v20 = vld [vmem:[%s155_s15 + $0x38] sm:$0xff] }
  0x13   : > { %195 = vst [vmem:[%s330_s21 + $0x10] sm:$0xff] %v187_v8  ;;  %v183_v19 = vld [vmem:[%s161_s18 + $0x30] sm:$0xff]  ;;  %v184_v22 = vld [vmem:[%s161_s18 + $0x38] sm:$0xff] }
  0x14   : > { %196 = vst [vmem:[%s330_s21 + $0x18] sm:$0xff] %v188_v12  ;;  %v191_v21 = vadd.f32 %v183_v19, %v175_v18  ;;  %197 = vst [vmem:[%s330_s21 + $0x20] sm:$0xff] %v189_v16  ;;  %v192_v23 = vadd.f32 %v184_v22, %v176_v20 }
  0x15   : > { %198 = vst [vmem:[%s330_s21 + $0x28] sm:$0xff] %v190_v17 }
  0x16   : > { %199 = vst [vmem:[%s330_s21 + $0x30] sm:$0xff] %v191_v21  ;;  %200 = vst [vmem:[%s330_s21 + $0x38] sm:$0xff] %v192_v23 }
  0x17 PF: > { %s12_s9 = sadd.s32 1, %s296_s9  }
  0x18   : > { %p9_p4 = scmp.ge.s32.totalorder %s12_s9, 4  }
  0x1a   :  { %11 = sbr.rel (!%p9_p4) target bundleno = 1 (0x1), region = 61 }

// kernel: forward.15
= control target key start
LH: loop header
LB: loop body
LE: loop exit
PB: predicated region body
PF: predicated region fallthrough
CT: control target
= control target key end

     0   :  { %s529_s12 = smov 0   ;;  %s583_s0 = inlined_call_operand.vmem [shape: bf16[2,8,8,128], index: 0, kind: input, shape index: {}]   ;;  %s584_s1 = inlined_call_operand.vmem [shape: bf16[1,128,128], index: 1, kind: input, shape index: {}]   ;;  %s585_s2 = inlined_call_operand.vmem [shape: f32[1,128], index: 2, kind: input, shape index: {}]   ;;  %s586_s3 = inlined_call_operand.vmem [shape: f32[2,8,8,128], index: 3, kind: output, shape index: {}]  }
   0x1 LB: > { %s403_s13 = sadd.s32 4294967295, %s507_s12   ;;  %p407_p0 = scmp.ge.s32.totalorder %s507_s12, 1  ;;  %s507_s12 = sphi %s529_s12, %s13_s12  }
   0x2   : > { %p137_p1 = scmp.lt.s32.totalorder %s507_s12, 3 }
   0x4   : > { %p138_p2 = pnand %p407_p0, %p137_p1 }
   0x5   : > { %p161_p3 = scmp.lt.s32.totalorder (!%p138_p2), %s403_s13, 1 }
   0x6   : > { %141 = sbr.rel (%p138_p2) target bundleno = 246 (0xf6), region = 32 }
   0xb   : > { %v489_v0 = vld [vmem:[%s584_s1 + $0x38] sm:$0xff]   ;;  %v490_v1 = vld [vmem:[%s584_s1 + $0x30] sm:$0xff]   ;;  %s588_s13 = smov (!%p161_p3, %s403_s13), 1  ;;  %v491_v2 = vld [vmem:[%s584_s1 + $0x28] sm:$0xff]  }
   0xc   : > { %441 = vmatprep.subr.bf16.mxu0 %v489_v0  ;;  %465 = vmatprep.subr.bf16.mxu1 %v489_v0  ;;  %s427_s20 = sshll.u32 %s588_s13, 5  ;;  %v492_v3 = vld [vmem:[%s584_s1 + $0x20] sm:$0xff]   ;;  %v493_v6 = vld [vmem:[%s584_s1 + $0x18] sm:$0xff]   ;;  %v494_v7 = vld [vmem:[%s584_s1 + $0x10] sm:$0xff]   ;;  %s428_s7 = sshll.u32 %s588_s13, 6 }
   0xd   : > { %442 = vmatpush3.bf16.msra.mxu0 %v489_v0  ;;  %473 = vmatpush3.bf16.msra.mxu1 %v489_v0  ;;  %s552_s23 = scalar_lea.vmem %s583_s0, %s427_s20  ;;  %v495_v8 = vld [vmem:[%s584_s1 + $0x8] sm:$0xff]   ;;  %v496_v9 = vld [vmem:[%s584_s1] sm:$0xff]   ;;  %s170_s14 = scalar_lea.vmem %s586_s3, %s428_s7 }
   0xe   : > { %443 = vmatprep.subr.bf16.mxu0 %v490_v1  ;;  %466 = vmatprep.subr.bf16.mxu1 %v490_v1  ;;  %v497_v4 = vld [vmem:[%s552_s23] sm:$0xff]   ;;  %v498_v5 = vld [vmem:[%s552_s23 + $0x10] sm:$0xff]   ;;  %v499_v10 = vld [vmem:[%s552_s23 + $0x8] sm:$0xff]  }
   0xf   : > { %457 = vmatprep.mubr.bf16.mxu0 %v497_v4  ;;  %461 = vmatprep.mubr.bf16.mxu1 %v498_v5  ;;  %v500_v11 = vld [vmem:[%s552_s23 + $0x18] sm:$0xff]   ;;  %v412_v12 = vld [vmem:[%s585_s2] ss:$0 sm:$0xff] }
  0x11   : > { %444 = vmatpush3.bf16.msra.mxu0 %v490_v1  ;;  %474 = vmatpush3.bf16.msra.mxu1 %v490_v1 }
  0x12   : > { %445 = vmatprep.subr.bf16.mxu0 %v491_v2  ;;  %467 = vmatprep.subr.bf16.mxu1 %v491_v2 }
  0x15   : > { %446 = vmatpush3.bf16.msra.mxu0 %v491_v2  ;;  %475 = vmatpush3.bf16.msra.mxu1 %v491_v2 }
  0x16   : > { %447 = vmatprep.subr.bf16.mxu0 %v492_v3  ;;  %468 = vmatprep.subr.bf16.mxu1 %v492_v3 }
  0x19   : > { %448 = vmatpush3.bf16.msra.mxu0 %v492_v3  ;;  %476 = vmatpush3.bf16.msra.mxu1 %v492_v3 }
  0x1a   : > { %449 = vmatprep.subr.bf16.mxu0 %v493_v6  ;;  %469 = vmatprep.subr.bf16.mxu1 %v493_v6 }
  0x1d   : > { %450 = vmatpush3.bf16.msra.mxu0 %v493_v6  ;;  %477 = vmatpush3.bf16.msra.mxu1 %v493_v6 }
  0x1e   : > { %451 = vmatprep.subr.bf16.mxu0 %v494_v7  ;;  %470 = vmatprep.subr.bf16.mxu1 %v494_v7 }
  0x21   : > { %452 = vmatpush3.bf16.msra.mxu0 %v494_v7  ;;  %478 = vmatpush3.bf16.msra.mxu1 %v494_v7 }
  0x22   : > { %453 = vmatprep.subr.bf16.mxu0 %v495_v8  ;;  %471 = vmatprep.subr.bf16.mxu1 %v495_v8 }
  0x25   : > { %454 = vmatpush3.bf16.msra.mxu0 %v495_v8  ;;  %479 = vmatpush3.bf16.msra.mxu1 %v495_v8 }
  0x26   : > { %455 = vmatprep.subr.bf16.mxu0 %v496_v9  ;;  %472 = vmatprep.subr.bf16.mxu1 %v496_v9 }
  0x29   : > { %456 = vmatpush3.bf16.msra.mxu0 %v496_v9  ;;  %480 = vmatpush3.bf16.msra.mxu1 %v496_v9 }
  0x2c   : > { %458 = vmatmul.mubr.bf16.vlgmr.msra.gmra.mxu0 %v499_v10  ;;  %462 = vmatmul.mubr.bf16.vlgmr.msra.gmra.mxu1 %v500_v11 }
  0xec   : > { %v459_v13 = vpop.f32.mrf.mxu0  ;;  %v463_v14 = vpop.f32.mrf.mxu1 }
  0xed   : > { %v318_v15 = vadd.f32 %v459_v13, %v412_v12  ;;  %v334_v16 = vadd.f32 %v463_v14, %v412_v12 }
  0xee   : > { %v309_v17 = vpop.f32.mrf.mxu0  ;;  %v325_v18 = vpop.f32.mrf.mxu1 }
  0xef   : > { %342 = vst [vmem:[%s170_s14 + $0x10] sm:$0xff] %v318_v15  ;;  %346 = vst [vmem:[%s170_s14 + $0x30] sm:$0xff] %v334_v16  ;;  %v310_v19 = vadd.f32 %v412_v12, %v309_v17  ;;  %v326_v20 = vadd.f32 %v412_v12, %v325_v18 }
  0xf0   : > { %v460_v21 = vpop.f32.mrf.mxu0  ;;  %v464_v22 = vpop.f32.mrf.mxu1 }
  0xf1   : > { %340 = vst [vmem:[%s170_s14] sm:$0xff] %v310_v19  ;;  %344 = vst [vmem:[%s170_s14 + $0x20] sm:$0xff] %v326_v20  ;;  %v321_v23 = vadd.f32 %v460_v21, %v412_v12  ;;  %v337_v24 = vadd.f32 %v464_v22, %v412_v12 }
  0xf2   : > { %v312_v25 = vpop.f32.mrf.mxu0  ;;  %v328_v26 = vpop.f32.mrf.mxu1 }
  0xf3   : > { %343 = vst [vmem:[%s170_s14 + $0x18] sm:$0xff] %v321_v23  ;;  %347 = vst [vmem:[%s170_s14 + $0x38] sm:$0xff] %v337_v24  ;;  %v313_v27 = vadd.f32 %v412_v12, %v312_v25  ;;  %v329_v28 = vadd.f32 %v412_v12, %v328_v26 }
  0xf5   : > { %341 = vst [vmem:[%s170_s14 + $0x8] sm:$0xff] %v313_v27  ;;  %345 = vst [vmem:[%s170_s14 + $0x28] sm:$0xff] %v329_v28 }
  0xf6 PF: > { %s13_s12 = sadd.s32 1, %s507_s12  }
  0xf7   : > { %p10_p4 = scmp.ge.s32.totalorder %s13_s12, 4  }
  0xf9   :  { %12 = sbr.rel (!%p10_p4) target bundleno = 1 (0x1), region = 62 }

// kernel: forward.11
= control target key start
LH: loop header
LB: loop body
LE: loop exit
PB: predicated region body
PF: predicated region fallthrough
CT: control target
= control target key end

     0   :  { %s6629_s12 = smov 0   ;;  %s9351_s0 = inlined_call_operand.vmem [shape: bf16[2,18,18,128], index: 0, kind: input, shape index: {}]   ;;  %s9352_s1 = inlined_call_operand.vmem [shape: bf16[9,128,128], index: 1, kind: input, shape index: {}]   ;;  %s9353_s2 = inlined_call_operand.vmem [shape: f32[1,128], index: 2, kind: input, shape index: {}]   ;;  %s9354_s3 = inlined_call_operand.vmem [shape: f32[2,16,16,128], index: 3, kind: output, shape index: {}]  }
   0x1 LB: > { %s5203_s13 = sadd.s32 4294967295, %s6607_s12   ;;  %p5207_p0 = scmp.ge.s32.totalorder %s6607_s12, 1  ;;  %s6607_s12 = sphi %s6629_s12, %s13_s12  }
   0x2   : > { %p137_p1 = scmp.lt.s32.totalorder %s6607_s12, 3 }
   0x4   : > { %p138_p2 = pnand %p5207_p0, %p137_p1 }
   0x6   : > { %141 = sbr.rel (%p138_p2) target bundleno = 557 (0x22d), region = 32 }
   0xb   : > { %v6472_v0 = vld [vmem:[%s9352_s1 + $0x78] sm:$0xff]   ;;  %p161_p3 = scmp.lt.s32.totalorder %s5203_s13, 1  ;;  %v6473_v1 = vld [vmem:[%s9352_s1 + $0x70] sm:$0xff]   ;;  %v6474_v2 = vld [vmem:[%s9352_s1 + $0x68] sm:$0xff]   ;;  %vm236_vm0 = vsmask.f32 3328 }
   0xc   : > { %6015 = vmatprep.subr.bf16.mxu0 %v6472_v0  ;;  %6447 = vmatprep.subr.bf16.mxu1 %v6472_v0  ;;  %v6475_v3 = vld [vmem:[%s9352_s1 + $0x60] sm:$0xff]   ;;  %vm237_vm1 = vsmask.f32 7440  ;;  %v6476_v17 = vld [vmem:[%s9352_s1 + $0x58] sm:$0xff]   ;;  %v6477_v33 = vld [vmem:[%s9352_s1 + $0x50] sm:$0xff]   ;;  %vm1266_vm3 = vcmask 1042432  }
   0xd   : > { %s9601_s13 = smov (!%p161_p3, %s5203_s13), 1  ;;  %6016 = vmatpush3.bf16.msra.mxu0 %v6472_v0  ;;  %6455 = vmatpush3.bf16.msra.mxu1 %v6472_v0  ;;  %vm6683_vm2 = vmor %vm236_vm0, %vm237_vm1  ;;  %v6478_v58 = vld [vmem:[%s9352_s1 + $0x48] sm:$0xff]   ;;  %vm1267_vm4 = vcmask 1046532  }
   0xe   : > { %6017 = vmatprep.subr.bf16.mxu0 %v6473_v1  ;;  %6448 = vmatprep.subr.bf16.mxu1 %v6473_v1  ;;  %s6463_s20 = smul.u32 216, %s9601_s13  ;;  %vm6994_vm5 = vmor %vm1266_vm3, %vm1267_vm4  ;;  %s5798_s18 = sshll.u32 %s9601_s13, 8 }
   0xf   : > { %s9207_s21 = scalar_lea.vmem %s9354_s3, %s5798_s18 }
  0x10   : > { %s6652_s23 = scalar_lea.vmem %s9351_s0, %s6463_s20 }
  0x11   : > { %6018 = vmatpush3.bf16.msra.mxu0 %v6473_v1  ;;  %6456 = vmatpush3.bf16.msra.mxu1 %v6473_v1  ;;  %v6658_v4 = vld [vmem:[%s6652_s23] sm:$0xf]  ;;  %v6661_v5 = vld [vmem:[%s6652_s23 + $0x4] sm:$0xf]  ;;  %v6664_v6 = vld [vmem:[%s6652_s23 + $0x8] sm:$0x1] }
  0x12   : > { %6019 = vmatprep.subr.bf16.mxu0 %v6474_v2  ;;  %6449 = vmatprep.subr.bf16.mxu1 %v6474_v2  ;;  %v240_v7 = vshrl.u32 %v6658_v4, 16  ;;  %v243_v8 = vshll.u32 %v6658_v4, 16  ;;  %v249_v9 = vshll.u32 %v6661_v5, 16  ;;  %v253_v10 = vshrl.u32 %v6661_v5, 16  ;;  %v188_v12 = vld [vmem:[%s6652_s23 + $0x60] sm:$0xf] }
  0x13   : > { %v259_v11 = vshll.u32 %v6664_v6, 16  ;;  %v189_v15 = vld [vmem:[%s6652_s23 + $0x64] sm:$0xf]  ;;  %v228_v16 = vld [vmem:[%s6652_s23 + $0x68] sm:$0x1]  ;;  %v432_v21 = vshrl.u32 %v188_v12, 16 }
  0x14   : > { %v242_v13 = vrot.slane %v240_v7, 4  ;;  %v245_v14 = vrot.slane %v243_v8, 5  ;;  %v251_v18 = vrot.slane %v249_v9, 5  ;;  %v255_v19 = vrot.slane %v253_v10, 4  ;;  %v6679_v26 = vld [vmem:[%s6652_s23 + $0xc] sm:$0xf] }
  0x15   : > { %6020 = vmatpush3.bf16.msra.mxu0 %v6474_v2  ;;  %6457 = vmatpush3.bf16.msra.mxu1 %v6474_v2  ;;  %v435_v23 = vshll.u32 %v188_v12, 16  ;;  %v441_v24 = vshll.u32 %v189_v15, 16  ;;  %v445_v25 = vshrl.u32 %v189_v15, 16  ;;  %v261_v29 = vrot.slane %v259_v11, 5  ;;  %v6688_v32 = vld [vmem:[%s6652_s23 + $0x10] sm:$0xf] }
  0x16   : > { %6021 = vmatprep.subr.bf16.mxu0 %v6475_v3  ;;  %6450 = vmatprep.subr.bf16.mxu1 %v6475_v3  ;;  %v246_v22 = vor.u32 %v245_v14, %v242_v13  ;;  %v256_v28 = vor.u32 %v255_v19, %v251_v18  ;;  %v434_v30 = vrot.slane %v432_v21, 4  ;;  %v451_v31 = vshll.u32 %v228_v16, 16  ;;  %v6694_v40 = vld [vmem:[%s6652_s23 + $0x14] sm:$0x1]  ;;  %v190_v47 = vld [vmem:[%s6652_s23 + $0x6c] sm:$0xf] }
  0x17   : > { %v437_v35 = vrot.slane %v435_v23, 5  ;;  %v443_v36 = vrot.slane %v441_v24, 5  ;;  %v447_v37 = vrot.slane %v445_v25, 4  ;;  %v264_v41 = vshrl.u32 %v6679_v26, 16  ;;  %v191_v52 = vld [vmem:[%s6652_s23 + $0x70] sm:$0xf] }
  0x18   : > { %v247_v34 = vrot.slane %v246_v22, 4  ;;  %v257_v38 = vrot.slane %v256_v28, 4  ;;  %v453_v39 = vrot.slane %v451_v31, 5  ;;  %v267_v42 = vshll.u32 %v6679_v26, 16  ;;  %v229_v57 = vld [vmem:[%s6652_s23 + $0x74] sm:$0x1] }
  0x19   : > { %6022 = vmatpush3.bf16.msra.mxu0 %v6475_v3  ;;  %6458 = vmatpush3.bf16.msra.mxu1 %v6475_v3  ;;  %v438_v44 = vor.u32 %v437_v35, %v434_v30  ;;  %v448_v45 = vor.u32 %v447_v37, %v443_v36  ;;  %v273_v46 = vshll.u32 %v6688_v32, 16  ;;  %v266_v49 = vrot.slane %v264_v41, 4  ;;  %v6717_v14 = vld [vmem:[%s6652_s23 + $0x18] sm:$0xf]  ;;  %v6479_v15 = vld [vmem:[%s9352_s1 + $0x40] sm:$0xff]  }
  0x1a   : > { %6023 = vmatprep.subr.bf16.mxu0 %v6476_v17  ;;  %6451 = vmatprep.subr.bf16.mxu1 %v6476_v17  ;;  %v252_v43 = vsel %vm6683_vm2, %v247_v34, %v251_v18  ;;  %v262_v48 = vsel %vm6683_vm2, %v257_v38, %v261_v29  ;;  %v269_v50 = vrot.slane %v267_v42, 5  ;;  %v277_v51 = vshrl.u32 %v6688_v32, 16  ;;  %v6725_v19 = vld [vmem:[%s6652_s23 + $0x1c] sm:$0xf]  ;;  %v6730_v25 = vld [vmem:[%s6652_s23 + $0x20] sm:$0x1] }
  0x1b   : > { %v5227_v53 = vcombine.low %v252_v43, %v262_v48  ;;  %v439_v54 = vrot.slane %v438_v44, 4  ;;  %v449_v55 = vrot.slane %v448_v45, 4  ;;  %v275_v56 = vrot.slane %v273_v46, 5  ;;  %v192_v34 = vld [vmem:[%s6652_s23 + $0x78] sm:$0xf] }
  0x1c   : > { %v270_v59 = vor.u32 %v269_v50, %v266_v49  ;;  %v279_v60 = vrot.slane %v277_v51, 4  ;;  %v283_v61 = vshll.u32 %v6694_v40, 16  ;;  %v456_v1 = vshrl.u32 %v190_v47, 16  ;;  %v6480_v41 = vld [vmem:[%s9352_s1 + $0x38] sm:$0xff]   ;;  %v230_v49 = vld [vmem:[%s6652_s23 + $0x80] sm:$0x1] }
  0x1d   : > { %6024 = vmatpush3.bf16.msra.mxu0 %v6476_v17  ;;  %6459 = vmatpush3.bf16.msra.mxu1 %v6476_v17  ;;  %v444_v63 = vsel %vm6683_vm2, %v439_v54, %v443_v36  ;;  %v454_v0 = vsel %vm6683_vm2, %v449_v55, %v453_v39  ;;  %v459_v2 = vshll.u32 %v190_v47, 16  ;;  %v465_v12 = vshll.u32 %v191_v52, 16  ;;  %v6739_v39 = vld [vmem:[%s6652_s23 + $0x7c] sm:$0xf] }
  0x1e   : > { %6025 = vmatprep.subr.bf16.mxu0 %v6477_v33  ;;  %6452 = vmatprep.subr.bf16.mxu1 %v6477_v33  ;;  %v5235_v3 = vcombine.low %v444_v63, %v454_v0  ;;  %v271_v7 = vrot.slane %v270_v59, 4  ;;  %v280_v8 = vor.u32 %v279_v60, %v275_v56  ;;  %v285_v9 = vrot.slane %v283_v61, 5  ;;  %v6481_v42 = vld [vmem:[%s9352_s1 + $0xb8] sm:$0xff]   ;;  %v6483_v59 = vld [vmem:[%s9352_s1 + $0xb0] sm:$0xff]   ;;  %v6766_v0 = vld [vmem:[%s6652_s23 + $0x28] sm:$0xf] }
  0x1f   : > { %6031 = vmatprep.mubr.bf16.mxu0 %v5227_v53  ;;  %v458_v10 = vrot.slane %v456_v1, 4  ;;  %v461_v11 = vrot.slane %v459_v2, 5  ;;  %v469_v13 = vshrl.u32 %v191_v52, 16  ;;  %v475_v18 = vshll.u32 %v229_v57, 16  ;;  %v6482_v52 = vld [vmem:[%s9352_s1 + $0x30] sm:$0xff]  }
  0x20   : > { %v276_v16 = vsel %vm6683_vm2, %v271_v7, %v275_v56  ;;  %v281_v17 = vrot.slane %v280_v8, 4  ;;  %6047 = vmatprep.mubr.bf16.mxu1 %v5235_v3  ;;  %v467_v23 = vrot.slane %v465_v12, 5  ;;  %v288_v28 = vshrl.u32 %v6717_v14, 16  ;;  %v6757_v57 = vld [vmem:[%s6652_s23 + $0x24] sm:$0xf] }
  0x21   : > { %6026 = vmatpush3.bf16.msra.mxu0 %v6477_v33  ;;  %6460 = vmatpush3.bf16.msra.mxu1 %v6477_v33  ;;  %v462_v22 = vor.u32 %v461_v11, %v458_v10  ;;  %v471_v24 = vrot.slane %v469_v13, 4  ;;  %v477_v30 = vrot.slane %v475_v18, 5  ;;  %v291_v31 = vshll.u32 %v6717_v14, 16  ;;  %v6769_v8 = vld [vmem:[%s6652_s23 + $0x2c] sm:$0x1] }
  0x22   : > { %6027 = vmatprep.subr.bf16.mxu0 %v6478_v58  ;;  %6453 = vmatprep.subr.bf16.mxu1 %v6478_v58  ;;  %v286_v29 = vsel %vm6683_vm2, %v281_v17, %v285_v9  ;;  %v297_v33 = vshll.u32 %v6725_v19, 16  ;;  %v290_v38 = vrot.slane %v288_v28, 4  ;;  %v301_v45 = vshrl.u32 %v6725_v19, 16  ;;  %v6773_v13 = vld [vmem:[%s6652_s23 + $0x84] sm:$0xf] }
  0x23   : > { %v5228_v35 = vcombine.low %v276_v16, %v286_v29  ;;  %v463_v36 = vrot.slane %v462_v22, 4  ;;  %v472_v37 = vor.u32 %v471_v24, %v467_v23  ;;  %v293_v43 = vrot.slane %v291_v31, 5  ;;  %v6780_v22 = vld [vmem:[%s6652_s23 + $0x88] sm:$0xf] }
  0x24   : > { %v299_v44 = vrot.slane %v297_v33, 5  ;;  %v307_v46 = vshll.u32 %v6730_v25, 16  ;;  %v480_v50 = vshrl.u32 %v192_v34, 16  ;;  %v483_v51 = vshll.u32 %v192_v34, 16 }
  0x25   : > { %6028 = vmatpush3.bf16.msra.mxu0 %v6478_v58  ;;  %6461 = vmatpush3.bf16.msra.mxu1 %v6478_v58  ;;  %v468_v47 = vsel %vm6683_vm2, %v463_v36, %v467_v23  ;;  %v473_v48 = vrot.slane %v472_v37, 4  ;;  %v294_v53 = vor.u32 %v293_v43, %v290_v38  ;;  %v303_v54 = vrot.slane %v301_v45, 4  ;;  %v6789_v36 = vld [vmem:[%s6652_s23 + $0x8c] sm:$0x1] }
  0x26   : > { %6029 = vmatprep.subr.bf16.mxu0 %v6479_v15  ;;  %6454 = vmatprep.subr.bf16.mxu1 %v6479_v15  ;;  %v309_v55 = vrot.slane %v307_v46, 5  ;;  %v489_v56 = vshll.u32 %v6739_v39, 16  ;;  %v482_v60 = vrot.slane %v480_v50, 4  ;;  %v485_v61 = vrot.slane %v483_v51, 5  ;;  %v6485_v37 = vld [vmem:[%s9352_s1 + $0xa8] sm:$0xff]  }
  0x27   : > { %v478_v58 = vsel %vm6683_vm2, %v473_v48, %v477_v30  ;;  %v493_v63 = vshrl.u32 %v6739_v39, 16  ;;  %v295_v2 = vrot.slane %v294_v53, 4  ;;  %v304_v3 = vor.u32 %v303_v54, %v299_v44  ;;  %v6484_v30 = vld [vmem:[%s9352_s1 + $0x28] sm:$0xff]   ;;  %v6804_v53 = vld [vmem:[%s6652_s23 + $0x30] sm:$0xf] }
  0x28   : > { %v5236_v1 = vcombine.low %v468_v47, %v478_v58  ;;  %v491_v7 = vrot.slane %v489_v56, 5  ;;  %v486_v9 = vor.u32 %v485_v61, %v482_v60  ;;  %v499_v11 = vshll.u32 %v230_v49, 16  ;;  %v6813_v60 = vld [vmem:[%s6652_s23 + $0x34] sm:$0xf] }
  0x29   : > { %6030 = vmatpush3.bf16.msra.mxu0 %v6479_v15  ;;  %6462 = vmatpush3.bf16.msra.mxu1 %v6479_v15  ;;  %v495_v10 = vrot.slane %v493_v63, 4  ;;  %v312_v12 = vshrl.u32 %v6757_v57, 16  ;;  %v300_v15 = vsel %vm6683_vm2, %v295_v2, %v299_v44  ;;  %v305_v16 = vrot.slane %v304_v3, 4 }
  0x2a   : > { %6063 = vmatprep.subr.bf16.mxu1 %v6480_v41  ;;  %6111 = vmatprep.subr.bf16.mxu0 %v6481_v42  ;;  %v315_v17 = vshll.u32 %v6757_v57, 16  ;;  %v321_v18 = vshll.u32 %v6766_v0, 16  ;;  %v487_v23 = vrot.slane %v486_v9, 4  ;;  %v501_v28 = vrot.slane %v499_v11, 5 }
  0x2b   : > { %v496_v24 = vor.u32 %v495_v10, %v491_v7  ;;  %v314_v29 = vrot.slane %v312_v12, 4  ;;  %v310_v31 = vsel %vm6683_vm2, %v305_v16, %v309_v55  ;;  %v331_v43 = vshll.u32 %v6769_v8, 16  ;;  %v6821_v16 = vld [vmem:[%s6652_s23 + $0x38] sm:$0x1] }
  0x2c   : > { %6032 = vmatmul.mubr.bf16.vlgmr.msra.gmra.mxu0 %v5228_v35  ;;  %6048 = vmatmul.mubr.bf16.vlgmr.msra.gmra.mxu1 %v5236_v1  ;;  %v317_v33 = vrot.slane %v315_v17, 5  ;;  %v323_v34 = vrot.slane %v321_v18, 5  ;;  %v325_v35 = vshrl.u32 %v6766_v0, 16  ;;  %v5229_v38 = vcombine.low %v300_v15, %v310_v31  ;;  %v6825_v18 = vld [vmem:[%s6652_s23 + $0x90] sm:$0xf] }
  0x2d   : > { %6064 = vmatpush3.bf16.msra.mxu1 %v6480_v41  ;;  %6112 = vmatpush3.bf16.msra.mxu0 %v6481_v42  ;;  %v492_v41 = vsel %vm6683_vm2, %v487_v23, %v491_v7  ;;  %v497_v42 = vrot.slane %v496_v24, 4  ;;  %v504_v46 = vshrl.u32 %v6773_v13, 16  ;;  %v507_v47 = vshll.u32 %v6773_v13, 16  ;;  %v6831_v31 = vld [vmem:[%s6652_s23 + $0x94] sm:$0xf] }
  0x2e   : > { %6065 = vmatprep.subr.bf16.mxu1 %v6482_v52  ;;  %6113 = vmatprep.subr.bf16.mxu0 %v6483_v59  ;;  %v318_v44 = vor.u32 %v317_v33, %v314_v29  ;;  %v327_v45 = vrot.slane %v325_v35, 4  ;;  %v333_v49 = vrot.slane %v331_v43, 5  ;;  %v513_v50 = vshll.u32 %v6780_v22, 16 }
  0x2f   : > { %v502_v48 = vsel %vm6683_vm2, %v497_v42, %v501_v28  ;;  %v517_v51 = vshrl.u32 %v6780_v22, 16  ;;  %6035 = vmatprep.mubr.bf16.mxu0 %v5229_v38  ;;  %v506_v58 = vrot.slane %v504_v46, 4  ;;  %v509_v61 = vrot.slane %v507_v47, 5  ;;  %v6489_v38 = vld [vmem:[%s9352_s1 + $0x98] sm:$0xff]   ;;  %v6490_v46 = vld [vmem:[%s9352_s1 + $0x10] sm:$0xff]  }
  0x30   : > { %v5237_v54 = vcombine.low %v492_v41, %v502_v48  ;;  %v319_v55 = vrot.slane %v318_v44, 4  ;;  %v328_v56 = vor.u32 %v327_v45, %v323_v34  ;;  %v515_v63 = vrot.slane %v513_v50, 5  ;;  %v6841_v44 = vld [vmem:[%s6652_s23 + $0x98] sm:$0x1] }
  0x31   : > { %6066 = vmatpush3.bf16.msra.mxu1 %v6482_v52  ;;  %6114 = vmatpush3.bf16.msra.mxu0 %v6483_v59  ;;  %v6486_v52 = vld [vmem:[%s9352_s1 + $0x20] sm:$0xff]   ;;  %v519_v1 = vrot.slane %v517_v51, 4  ;;  %v523_v2 = vshll.u32 %v6789_v36, 16  ;;  %v336_v9 = vshrl.u32 %v6804_v53, 16  ;;  %v339_v10 = vshll.u32 %v6804_v53, 16 }
  0x32   : > { %6067 = vmatprep.subr.bf16.mxu1 %v6484_v30  ;;  %v6487_v59 = vld [vmem:[%s9352_s1 + $0xa0] sm:$0xff]   ;;  %6115 = vmatprep.subr.bf16.mxu0 %v6485_v37  ;;  %v324_v3 = vsel %vm6683_vm2, %v319_v55, %v323_v34  ;;  %v329_v7 = vrot.slane %v328_v56, 4  ;;  %v510_v11 = vor.u32 %v509_v61, %v506_v58  ;;  %v345_v17 = vshll.u32 %v6813_v60, 16  ;;  %v6854_v51 = vld [vmem:[%s6652_s23 + $0x3c] sm:$0xf]  ;;  %v6491_v55 = vld [vmem:[%s9352_s1 + $0x90] sm:$0xff]  }
  0x33   : > { %6051 = vmatprep.mubr.bf16.mxu1 %v5237_v54  ;;  %v520_v12 = vor.u32 %v519_v1, %v515_v63  ;;  %v525_v15 = vrot.slane %v523_v2, 5  ;;  %v338_v24 = vrot.slane %v336_v9, 4  ;;  %v341_v28 = vrot.slane %v339_v10, 5  ;;  %v6857_v54 = vld [vmem:[%s6652_s23 + $0x40] sm:$0xf] }
  0x34   : > { %v334_v23 = vsel %vm6683_vm2, %v329_v7, %v333_v49  ;;  %v349_v29 = vshrl.u32 %v6813_v60, 16  ;;  %v511_v34 = vrot.slane %v510_v11, 4  ;;  %v355_v43 = vshll.u32 %v6821_v16, 16  ;;  %v6864_v7 = vld [vmem:[%s6652_s23 + $0x44] sm:$0x1] }
  0x35   : > { %6068 = vmatpush3.bf16.msra.mxu1 %v6484_v30  ;;  %6116 = vmatpush3.bf16.msra.mxu0 %v6485_v37  ;;  %v6488_v30 = vld [vmem:[%s9352_s1 + $0x18] sm:$0xff]   ;;  %v5230_v33 = vcombine.low %v324_v3, %v334_v23  ;;  %v521_v35 = vrot.slane %v520_v12, 4  ;;  %v347_v37 = vrot.slane %v345_v17, 5  ;;  %v342_v41 = vor.u32 %v341_v28, %v338_v24  ;;  %v6876_v28 = vld [vmem:[%s6652_s23 + $0xa0] sm:$0xf] }
  0x36   : > { %6069 = vmatprep.subr.bf16.mxu1 %v6486_v52  ;;  %6117 = vmatprep.subr.bf16.mxu0 %v6487_v59  ;;  %v351_v42 = vrot.slane %v349_v29, 4  ;;  %v528_v45 = vshrl.u32 %v6825_v18, 16  ;;  %v516_v47 = vsel %vm6683_vm2, %v511_v34, %v515_v63  ;;  %v531_v49 = vshll.u32 %v6825_v18, 16  ;;  %v6867_v9 = vld [vmem:[%s6652_s23 + $0x9c] sm:$0xf]  ;;  %v6492_v29 = vld [vmem:[%s9352_s1 + $0x8] sm:$0xff]  }
  0x37   : > { %6036 = vmatmul.mubr.bf16.gmra.mxu0 %v5230_v33  ;;  %v526_v48 = vsel %vm6683_vm2, %v521_v35, %v525_v15  ;;  %v537_v50 = vshll.u32 %v6831_v31, 16  ;;  %v343_v58 = vrot.slane %v342_v41, 4  ;;  %v357_v63 = vrot.slane %v355_v43, 5  ;;  %v6493_v41 = vld [vmem:[%s9352_s1 + $0x88] sm:$0xff]  }
  0x38   : > { %v5238_v56 = vcombine.low %v516_v47, %v526_v48  ;;  %v352_v61 = vor.u32 %v351_v42, %v347_v37  ;;  %v533_v1 = vrot.slane %v531_v49, 5  ;;  %v541_v3 = vshrl.u32 %v6831_v31, 16 }
  0x39   : > { %6070 = vmatpush3.bf16.msra.mxu1 %v6486_v52  ;;  %6118 = vmatpush3.bf16.msra.mxu0 %v6487_v59  ;;  %v530_v52 = vrot.slane %v528_v45, 4  ;;  %v539_v2 = vrot.slane %v537_v50, 5  ;;  %v348_v10 = vsel %vm6683_vm2, %v343_v58, %v347_v37  ;;  %v547_v11 = vshll.u32 %v6841_v44, 16 }
  0x3a   : > { %6071 = vmatprep.subr.bf16.mxu1 %v6488_v30  ;;  %6119 = vmatprep.subr.bf16.mxu0 %v6489_v38  ;;  %v353_v59 = vrot.slane %v352_v61, 4  ;;  %v360_v12 = vshrl.u32 %v6854_v51, 16  ;;  %v543_v17 = vrot.slane %v541_v3, 4  ;;  %v363_v23 = vshll.u32 %v6854_v51, 16  ;;  %v6892_v61 = vld [vmem:[%s6652_s23 + $0xa4] sm:$0x1] }
  0x3b   : > { %6052 = vmatmul.mubr.bf16.gmra.mxu1 %v5238_v56  ;;  %v534_v15 = vor.u32 %v533_v1, %v530_v52  ;;  %v369_v24 = vshll.u32 %v6857_v54, 16  ;;  %v549_v34 = vrot.slane %v547_v11, 5  ;;  %v373_v37 = vshrl.u32 %v6857_v54, 16 }
  0x3c   : > { %v358_v33 = vsel %vm6683_vm2, %v353_v59, %v357_v63  ;;  %v362_v35 = vrot.slane %v360_v12, 4  ;;  %v544_v43 = vor.u32 %v543_v17, %v539_v2  ;;  %v365_v45 = vrot.slane %v363_v23, 5  ;;  %v6897_v59 = vld [vmem:[%s6652_s23 + $0x48] sm:$0xf]  ;;  %v6906_v17 = vld [vmem:[%s6652_s23 + $0x4c] sm:$0xf] }
  0x3d   : > { %6072 = vmatpush3.bf16.msra.mxu1 %v6488_v30  ;;  %6120 = vmatpush3.bf16.msra.mxu0 %v6489_v38  ;;  %v5231_v42 = vcombine.low %v348_v10, %v358_v33  ;;  %v535_v30 = vrot.slane %v534_v15, 4  ;;  %v371_v47 = vrot.slane %v369_v24, 5  ;;  %v375_v48 = vrot.slane %v373_v37, 4 }
  0x3e   : > { %6073 = vmatprep.subr.bf16.mxu1 %v6490_v46  ;;  %6121 = vmatprep.subr.bf16.mxu0 %v6491_v55  ;;  %v379_v49 = vshll.u32 %v6864_v7, 16  ;;  %v552_v50 = vshrl.u32 %v6867_v9, 16  ;;  %v545_v56 = vrot.slane %v544_v43, 4  ;;  %v366_v58 = vor.u32 %v365_v45, %v362_v35 }
  0x3f   : > { %6039 = vmatprep.mubr.bf16.mxu0 %v5231_v42  ;;  %v540_v38 = vsel %vm6683_vm2, %v535_v30, %v539_v2  ;;  %v555_v63 = vshll.u32 %v6867_v9, 16  ;;  %v376_v52 = vor.u32 %v375_v48, %v371_v47  ;;  %v561_v10 = vshll.u32 %v6876_v28, 16  ;;  %v6494_v2 = vld [vmem:[%s9352_s1] sm:$0xff]   ;;  %v6915_v30 = vld [vmem:[%s6652_s23 + $0x50] sm:$0x1] }
  0x40   : > { %v381_v1 = vrot.slane %v379_v49, 5  ;;  %v554_v3 = vrot.slane %v552_v50, 4  ;;  %v550_v11 = vsel %vm6683_vm2, %v545_v56, %v549_v34  ;;  %v367_v12 = vrot.slane %v366_v58, 4 }
  0x41   : > { %6074 = vmatpush3.bf16.msra.mxu1 %v6490_v46  ;;  %6122 = vmatpush3.bf16.msra.mxu0 %v6491_v55  ;;  %v557_v15 = vrot.slane %v555_v63, 5  ;;  %v565_v46 = vshrl.u32 %v6876_v28, 16  ;;  %v6495_v55 = vld [vmem:[%s9352_s1 + $0x80] sm:$0xff]   ;;  %v5239_v23 = vcombine.low %v540_v38, %v550_v11  ;;  %v377_v24 = vrot.slane %v376_v52, 4  ;;  %v6923_v38 = vld [vmem:[%s6652_s23 + $0xa8] sm:$0xf] }
  0x42   : > { %6075 = vmatprep.subr.bf16.mxu1 %v6492_v29  ;;  %6123 = vmatprep.subr.bf16.mxu0 %v6493_v41  ;;  %v563_v33 = vrot.slane %v561_v10, 5  ;;  %v571_v35 = vshll.u32 %v6892_v61, 16  ;;  %v372_v34 = vsel %vm6683_vm2, %v367_v12, %v371_v47  ;;  %v384_v43 = vshrl.u32 %v6897_v59, 16  ;;  %9381 = vst [vmem:[#allocation2_spill] sm:$0xff] %v6923_v38  ;;  %v6928_v47 = vld [vmem:[%s9352_s1 + $0xf8] sm:$0xff]  }
  0x43   : > { %v558_v37 = vor.u32 %v557_v15, %v554_v3  ;;  %v567_v42 = vrot.slane %v565_v46, 4  ;;  %6055 = vmatprep.mubr.bf16.mxu1 %v5239_v23  ;;  %v382_v45 = vsel %vm6683_vm2, %v377_v24, %v381_v1  ;;  %v387_v49 = vshll.u32 %v6897_v59, 16  ;;  %v6931_v52 = vld [vmem:[%s6652_s23 + $0xac] sm:$0xf]  ;;  %v6936_v1 = vld [vmem:[%s9352_s1 + $0x138] sm:$0xff]  }
  0x44   : > { %v573_v48 = vrot.slane %v571_v35, 5  ;;  %v393_v50 = vshll.u32 %v6906_v17, 16  ;;  %v386_v63 = vrot.slane %v384_v43, 4  ;;  %v397_v10 = vshrl.u32 %v6906_v17, 16  ;;  %v6941_v12 = vld [vmem:[%s6652_s23 + $0xb0] sm:$0x1] }
  0x45   : > { %6076 = vmatpush3.bf16.msra.mxu1 %v6492_v29  ;;  %6124 = vmatpush3.bf16.msra.mxu0 %v6493_v41  ;;  %v5232_v29 = vcombine.low %v372_v34, %v382_v45  ;;  %v559_v56 = vrot.slane %v558_v37, 4  ;;  %v568_v58 = vor.u32 %v567_v42, %v563_v33  ;;  %v389_v41 = vrot.slane %v387_v49, 5  ;;  %9382 = vst [vmem:[#allocation3_spill] sm:$0xff] %v6941_v12  ;;  %v6944_v15 = vld [vmem:[%s6652_s23 + $0x54] sm:$0xf] }
  0x46   : > { %6077 = vmatprep.subr.bf16.mxu1 %v6494_v2  ;;  %6125 = vmatprep.subr.bf16.mxu0 %v6495_v55  ;;  %v395_v3 = vrot.slane %v393_v50, 5  ;;  %v403_v11 = vshll.u32 %v6915_v30, 16  ;;  %v576_v24 = vshrl.u32 %v6923_v38, 16  ;;  %v579_v35 = vshll.u32 %v6923_v38, 16  ;;  %v6951_v34 = vld [vmem:[%s6652_s23 + $0x58] sm:$0xf] }
  0x47   : > { %6040 = vmatmul.mubr.bf16.gmra.mxu0 %v5232_v29  ;;  %v564_v46 = vsel %vm6683_vm2, %v559_v56, %v563_v33  ;;  %v569_v23 = vrot.slane %v568_v58, 4  ;;  %v390_v37 = vor.u32 %v389_v41, %v386_v63  ;;  %v399_v42 = vrot.slane %v397_v10, 4 }
  0x48   : > { %v405_v43 = vrot.slane %v403_v11, 5  ;;  %v585_v45 = vshll.u32 %v6931_v52, 16  ;;  %v578_v49 = vrot.slane %v576_v24, 4  ;;  %v581_v50 = vrot.slane %v579_v35, 5 }
  0x49   : > { %6078 = vmatpush3.bf16.msra.mxu1 %v6494_v2  ;;  %6126 = vmatpush3.bf16.msra.mxu0 %v6495_v55  ;;  %v574_v33 = vsel %vm6683_vm2, %v569_v23, %v573_v48  ;;  %v589_v29 = vshrl.u32 %v6931_v52, 16  ;;  %v391_v56 = vrot.slane %v390_v37, 4  ;;  %v400_v58 = vor.u32 %v399_v42, %v395_v3  ;;  %v6960_v55 = vld [vmem:[%s6652_s23 + $0x5c] sm:$0x1]  ;;  %v6965_v48 = vld [vmem:[%s6652_s23 + $0xb4] sm:$0xf] }
  0x4a   : > { %6159 = vmatprep.subr.bf16.mxu1 %v6928_v47  ;;  %6207 = vmatprep.subr.bf16.mxu0 %v6936_v1  ;;  %v5240_v2 = vcombine.low %v564_v46, %v574_v33  ;;  %v587_v63 = vrot.slane %v585_v45, 5  ;;  %v582_v41 = vor.u32 %v581_v50, %v578_v49  ;;  %v595_v11 = vshll.u32 %v6941_v12, 16  ;;  %9383 = vst [vmem:[#allocation4_spill] sm:$0xff] %v6965_v48  ;;  %v6972_v37 = vld [vmem:[%s6652_s23 + $0xb8] sm:$0xf] }
  0x4b   : > { %v591_v10 = vrot.slane %v589_v29, 4  ;;  %v408_v21 = vshrl.u32 %v6944_v15, 16  ;;  %v396_v23 = vsel %vm6683_vm2, %v391_v56, %v395_v3  ;;  %v401_v24 = vrot.slane %v400_v58, 4  ;;  %9384 = vst [vmem:[#allocation5_spill] sm:$0xff] %v6972_v37  ;;  %v6978_v3 = vld [vmem:[%s6652_s23 + $0xbc] sm:$0x1] }
  0x4c   : > { %6056 = vmatmul.mubr.bf16.gmra.mxu1 %v5240_v2  ;;  %v411_v46 = vshll.u32 %v6944_v15, 16  ;;  %v417_v35 = vshll.u32 %v6951_v34, 16  ;;  %v583_v42 = vrot.slane %v582_v41, 4  ;;  %v597_v33 = vrot.slane %v595_v11, 5  ;;  %9385 = vst [vmem:[#allocation6_spill] sm:$0xff] %v6978_v3 }
  0x4d   : > { %v592_v45 = vor.u32 %v591_v10, %v587_v63  ;;  %v410_v49 = vrot.slane %v408_v21, 4  ;;  %v406_v50 = vsel %vm6683_vm2, %v401_v24, %v405_v43  ;;  %v421_v62 = vshrl.u32 %v6951_v34, 16  ;;  %v1218_v10 = vld [vmem:[%s6652_s23] sm:$0xe] }
  0x4e   : > { %v413_v29 = vrot.slane %v411_v46, 5  ;;  %v419_v2 = vrot.slane %v417_v35, 5  ;;  %v5233_v56 = vcombine.low %v396_v23, %v406_v50  ;;  %v588_v58 = vsel %vm6683_vm2, %v583_v42, %v587_v63 }
  0x4f   : > { %v593_v20 = vrot.slane %v592_v45, 4  ;;  %v427_v41 = vshll.u32 %v6960_v55, 16  ;;  %v423_v21 = vrot.slane %v421_v62, 4  ;;  %v600_v12 = vshrl.u32 %v6965_v48, 16 }
  0x50   : > { %v414_v11 = vor.u32 %v413_v29, %v410_v49  ;;  %v603_v43 = vshll.u32 %v6965_v48, 16  ;;  %6043 = vmatprep.mubr.bf16.mxu0 %v5233_v56  ;;  %v609_v46 = vshll.u32 %v6972_v37, 16  ;;  %v613_v63 = vshrl.u32 %v6972_v37, 16  ;;  %v1219_v49 = vld [vmem:[%s6652_s23 + $0xc] sm:$0xe] }
  0x51   : > { %v598_v24 = vsel %vm6683_vm2, %v593_v20, %v597_v33  ;;  %v429_v23 = vrot.slane %v427_v41, 5  ;;  %v424_v45 = vor.u32 %v423_v21, %v419_v2  ;;  %v602_v50 = vrot.slane %v600_v12, 4  ;;  %v1220_v20 = vld [vmem:[%s6652_s23 + $0x18] sm:$0xe] }
  0x52   : > { %v5241_v35 = vcombine.low %v588_v58, %v598_v24  ;;  %v415_v42 = vrot.slane %v414_v11, 4  ;;  %v605_v62 = vrot.slane %v603_v43, 5  ;;  %v611_v29 = vrot.slane %v609_v46, 5 }
  0x53   : > { %v615_v38 = vrot.slane %v613_v63, 4  ;;  %v619_v48 = vshll.u32 %v6978_v3, 16  ;;  %v425_v58 = vrot.slane %v424_v45, 4  ;;  %v5275_v41 = vrot.slane %v1218_v10, 9 }
  0x54   : > { %6059 = vmatprep.mubr.bf16.mxu1 %v5241_v35  ;;  %v420_v33 = vsel %vm6683_vm2, %v415_v42, %v419_v2  ;;  %v1271_v12 = vrot.slane %v6661_v5, 5  ;;  %v606_v11 = vor.u32 %v605_v62, %v602_v50  ;;  %v5276_v24 = vrot.slane %v1219_v49, 9 }
  0x55   : > { %v616_v21 = vor.u32 %v615_v38, %v611_v29  ;;  %v621_v43 = vrot.slane %v619_v48, 5  ;;  %v430_v46 = vsel %vm6683_vm2, %v425_v58, %v429_v23  ;;  %v1278_v35 = vrot.slane %v6688_v32, 5 }
  0x56   : > { %v1272_v63 = vsel %vm6994_vm5, %v5275_v41, %v1271_v12  ;;  %v1273_v3 = vrot.slane %v1271_v12, 4  ;;  %v5234_v37 = vcombine.low %v420_v33, %v430_v46  ;;  %v607_v2 = vrot.slane %v606_v11, 4  ;;  %v1222_v12 = vld [vmem:[%s6652_s23 + $0x30] sm:$0xe]  ;;  %v1224_v46 = vld [vmem:[%s6652_s23 + $0x48] sm:$0xe] }
  0x57   : > { %v617_v42 = vrot.slane %v616_v21, 4  ;;  %v5251_v10 = vcombine.low %v6658_v4, %v6661_v5  ;;  %v9388_v38 = vrot.slane %v6664_v6, 5  ;;  %v1280_v45 = vrot.slane %v1278_v35, 4 }
  0x58   : > { %v5277_v23 = vrot.slane %v1220_v20, 9  ;;  %6044 = vmatmul.mubr.bf16.gmra.mxu0 %v5234_v37  ;;  %v612_v50 = vsel %vm6683_vm2, %v607_v2, %v611_v29  ;;  %v1285_v33 = vrot.slane %v6725_v19, 5  ;;  %v1279_v4 = vsel %vm6994_vm5, %v5276_v24, %v1278_v35  ;;  %v1223_v24 = vld [vmem:[%s6652_s23 + $0x3c] sm:$0xe] }
  0x59   : > { %v1275_v48 = vsel %vm6994_vm5, %v1273_v3, %v9388_v38  ;;  %v622_v49 = vsel %vm6683_vm2, %v617_v42, %v621_v43  ;;  %v9389_v5 = vrot.slane %v6694_v40, 5  ;;  %v1288_v37 = vrot.slane %v6730_v25, 5  ;;  %v1221_v3 = vld [vmem:[%s6652_s23 + $0x24] sm:$0xe]  ;;  %v6503_v25 = vld [vmem:[%s9352_s1 + $0x130] sm:$0xff]  }
  0x5a   : > { %v5307_v62 = vcombine.low %v1272_v63, %v1275_v48  ;;  %v5242_v58 = vcombine.low %v612_v50, %v622_v49  ;;  %v1286_v29 = vsel %vm6994_vm5, %v5277_v23, %v1285_v33  ;;  %v1287_v20 = vrot.slane %v1285_v33, 4  ;;  %v6502_v23 = vld [vmem:[%s9352_s1 + $0xf0] sm:$0xff]  }
  0x5b   : > { %v1282_v6 = vsel %vm6994_vm5, %v1280_v45, %v9389_v5  ;;  %v1292_v41 = vrot.slane %v6766_v0, 5  ;;  %v5278_v21 = vrot.slane %v1221_v3, 9  ;;  %v1299_v43 = vrot.slane %v6813_v60, 5  ;;  %v7069_v3 = vld [vmem:[%s6652_s23 + $0x68] sm:$0x1] }
  0x5c   : > { %6127 = vmatprep.mubr.bf16.mxu0 %v5307_v62  ;;  %6060 = vmatmul.mubr.bf16.gmra.mxu1 %v5242_v58  ;;  %v5308_v11 = vcombine.low %v1279_v4, %v1282_v6  ;;  %v1289_v40 = vsel %vm6994_vm5, %v1287_v20, %v1288_v37  ;;  %v1295_v2 = vrot.slane %v6769_v8, 5  ;;  %v5279_v42 = vrot.slane %v1222_v12, 9  ;;  %v1225_v37 = vld [vmem:[%s6652_s23 + $0x54] sm:$0xe]  ;;  %v7093_v12 = vld [vmem:[%s6652_s23 + $0x60] sm:$0xe] }
  0x5d   : > { %6079 = vmatprep.mubr.bf16.mxu1 %v5251_v10  ;;  %v5309_v63 = vcombine.low %v1286_v29, %v1289_v40  ;;  %v1294_v35 = vrot.slane %v1292_v41, 4  ;;  %v1301_v38 = vrot.slane %v1299_v43, 4  ;;  %v1302_v10 = vrot.slane %v6821_v16, 5 }
  0x5e   : > { %v1306_v48 = vrot.slane %v6857_v54, 5  ;;  %v5253_v45 = vcombine.low %v6717_v14, %v6725_v19  ;;  %v1313_v50 = vrot.slane %v6906_v17, 5  ;;  %v5280_v49 = vrot.slane %v1223_v24, 9  ;;  %v6511_v24 = vld [vmem:[%s9352_s1 + $0x120] sm:$0xff]  }
  0x5f   : > { %v1309_v8 = vrot.slane %v6864_v7, 5  ;;  %v5281_v33 = vrot.slane %v1224_v46, 9  ;;  %v1293_v14 = vsel %vm6994_vm5, %v5278_v21, %v1292_v41  ;;  %v1296_v19 = vsel %vm6994_vm5, %v1294_v35, %v1295_v2  ;;  %v7105_v46 = vld [vmem:[%s6652_s23 + $0x78] sm:$0xe]  ;;  %v6510_v2 = vld [vmem:[%s9352_s1 + $0xe0] sm:$0xff]  }
  0x60   : > { %6128 = vmatmul.mubr.bf16.vlgmr.msra.gmra.mxu0 %v5308_v11  ;;  %v1308_v62 = vrot.slane %v1306_v48, 4  ;;  %v1315_v16 = vrot.slane %v1313_v50, 4  ;;  %v1316_v58 = vrot.slane %v6915_v30, 5  ;;  %v1300_v4 = vsel %vm6994_vm5, %v5279_v42, %v1299_v43  ;;  %v7096_v11 = vld [vmem:[%s6652_s23 + $0x6c] sm:$0xe] }
  0x61   : > { %6208 = vmatpush3.bf16.msra.mxu0 %v6936_v1  ;;  %6131 = vmatprep.mubr.bf16.mxu0 %v5309_v63  ;;  %v1303_v7 = vsel %vm6994_vm5, %v1301_v38, %v1302_v10  ;;  %v6507_v1 = vld [vmem:[%s9352_s1 + $0x128] sm:$0xff]   ;;  %v1320_v5 = vrot.slane %v6951_v34, 5  ;;  %v9390_v6 = vcombine.low %v6679_v26, %v6688_v32  ;;  %v5254_v30 = vcombine.low %v6757_v57, %v6766_v0  ;;  %v1229_v63 = vld [vmem:[%s6652_s23 + $0x84] sm:$0xe]  ;;  %v1230_v42 = vld [vmem:[%s6652_s23 + $0x90] sm:$0xe] }
  0x62   : > { %6209 = vmatprep.subr.bf16.mxu0 %v6503_v25  ;;  %v1330_v29 = vrot.slane %v7069_v3, 5  ;;  %v5310_v20 = vcombine.low %v1293_v14, %v1296_v19  ;;  %v7075_v41 = vsel %vm6994_vm5, %v5280_v49, %v1306_v48  ;;  %v7079_v26 = vsel %vm6994_vm5, %v1308_v62, %v1309_v8  ;;  %v6506_v32 = vld [vmem:[%s9352_s1 + $0xe8] sm:$0xff]   ;;  %v7124_v48 = vld [vmem:[%s6652_s23 + $0x64] sm:$0xf]  ;;  %v1231_v49 = vld [vmem:[%s6652_s23 + $0x9c] sm:$0xe] }
  0x63   : > { %v5311_v57 = vcombine.low %v1300_v4, %v1303_v7  ;;  %v7086_v0 = vsel %vm6994_vm5, %v5281_v33, %v1313_v50  ;;  %v5255_v40 = vcombine.low %v6804_v53, %v6813_v60  ;;  %v5282_v21 = vrot.slane %v1225_v37, 9  ;;  %v7146_v4 = vld [vmem:[%s6652_s23 + $0x74] sm:$0x1] }
  0x64   : > { %6080 = vmatmul.mubr.bf16.vlgmr.msra.gmra.mxu1 %v9390_v6  ;;  %v1323_v43 = vrot.slane %v6960_v55, 5  ;;  %v5256_v35 = vcombine.low %v6854_v51, %v6857_v54  ;;  %v5312_v53 = vcombine.low %v7075_v41, %v7079_v26  ;;  %v5257_v60 = vcombine.low %v6897_v59, %v6906_v17  ;;  %v6596_v54 = vld [vmem:[%s6652_s23 + $0x80] sm:$0x1] }
  0x65   : > { %6160 = vmatpush3.bf16.msra.mxu1 %v6928_v47  ;;  %6083 = vmatprep.mubr.bf16.mxu1 %v5253_v45  ;;  %v7090_v47 = vsel %vm6994_vm5, %v1315_v16, %v1316_v58  ;;  %v5258_v55 = vcombine.low %v6944_v15, %v6951_v34  ;;  %v5283_v10 = vrot.slane %v7093_v12, 9  ;;  %v1327_v45 = vrot.slane %v7124_v48, 5  ;;  %v7142_v16 = vld [vmem:[%s6652_s23 + $0x70] sm:$0xf]  ;;  %v6597_v17 = vld [vmem:[%s6652_s23 + $0x60] sm:$0xf] }
  0x66   : > { %6161 = vmatprep.subr.bf16.mxu1 %v6502_v23  ;;  %6210 = vmatpush3.bf16.msra.mxu0 %v6503_v25  ;;  %v1322_v25 = vrot.slane %v1320_v5, 4  ;;  %v5313_v38 = vcombine.low %v7086_v0, %v7090_v47  ;;  %v5284_v62 = vrot.slane %v7096_v11, 9  ;;  %v1348_v8 = vrot.slane %v6780_v22, 5  ;;  %v1232_v0 = vld [vmem:[%s6652_s23 + $0xa8] sm:$0xe]  ;;  %v7326_v15 = vld [vmem:[%s9352_s1 + $0x1b8] sm:$0xff]  }
  0x67   : > { %6211 = vmatprep.subr.bf16.mxu0 %v6507_v1  ;;  %v1351_v33 = vrot.slane %v6789_v36, 5  ;;  %v7135_v14 = vsel %vm6994_vm5, %v5282_v21, %v1320_v5  ;;  %v1334_v58 = vrot.slane %v7142_v16, 5  ;;  %v1337_v7 = vrot.slane %v7146_v4, 5  ;;  %v6514_v36 = vld [vmem:[%s9352_s1 + $0xd8] sm:$0xff]  }
  0x68   : > { %6132 = vmatmul.mubr.bf16.gmra.mxu0 %v5310_v20  ;;  %v7139_v19 = vsel %vm6994_vm5, %v1322_v25, %v1323_v43  ;;  %v5285_v5 = vrot.slane %v7105_v46, 9  ;;  %v1350_v37 = vrot.slane %v1348_v8, 4  ;;  %v5287_v41 = vrot.slane %v1230_v42, 9  ;;  %v5403_v42 = vld [vmem:[%s6652_s23 + $0xc] sm:$0xf] }
  0x69   : > { %6162 = vmatpush3.bf16.msra.mxu1 %v6502_v23  ;;  %6135 = vmatprep.mubr.bf16.mxu0 %v5311_v57  ;;  %v5286_v23 = vrot.slane %v1229_v63, 9  ;;  %v1355_v26 = vrot.slane %v6831_v31, 5  ;;  %v1358_v57 = vrot.slane %v6841_v44, 5  ;;  %v1341_v47 = vrot.slane %v6739_v39, 5 }
  0x6a   : > { %6163 = vmatprep.subr.bf16.mxu1 %v6506_v32  ;;  %6212 = vmatpush3.bf16.msra.mxu0 %v6507_v1  ;;  %v6515_v1 = vld [vmem:[%s9352_s1 + $0x118] sm:$0xff]   ;;  %v7170_v21 = vsel %vm6994_vm5, %v1350_v37, %v1351_v33  ;;  %v1362_v63 = vrot.slane %v6876_v28, 5  ;;  %v5289_v33 = vrot.slane %v1232_v0, 9  ;;  %v1369_v37 = vrot.slane %v6931_v52, 5  ;;  %v6518_v0 = vld [vmem:[%s9352_s1 + $0xd0] sm:$0xff]  }
  0x6b   : > { %6213 = vmatprep.subr.bf16.mxu0 %v6511_v24  ;;  %v7158_v6 = vsel %vm6994_vm5, %v5286_v23, %v1348_v8  ;;  %v7178_v44 = vsel %vm6994_vm5, %v5287_v41, %v1355_v26  ;;  %v1357_v43 = vrot.slane %v1355_v26, 4  ;;  %v6519_v23 = vld [vmem:[%s9352_s1 + $0x110] sm:$0xff]   ;;  %v1365_v8 = vrot.slane %v6892_v61, 5  ;;  %v9392_v61 = vld [vmem:[#allocation3_spill] sm:$0xff] }
  0x6c   : > { %6084 = vmatmul.mubr.bf16.gmra.mxu1 %v5254_v30  ;;  %v1329_v30 = vrot.slane %v1327_v45, 4  ;;  %v1364_v20 = vrot.slane %v1362_v63, 4  ;;  %v1372_v50 = vrot.slane %v9392_v61, 5  ;;  %v1328_v61 = vsel %vm6994_vm5, %v5283_v10, %v1327_v45  ;;  %v5406_v45 = vld [vmem:[%s6652_s23 + $0x18] sm:$0xf] }
  0x6d   : > { %6087 = vmatprep.mubr.bf16.mxu1 %v5255_v40  ;;  %6164 = vmatpush3.bf16.msra.mxu1 %v6506_v32  ;;  %v5288_v40 = vrot.slane %v1231_v49, 9  ;;  %v7190_v32 = vld [vmem:[%s6652_s23 + $0x10] sm:$0xf]  ;;  %v7194_v41 = vsel %vm6994_vm5, %v1357_v43, %v1358_v57  ;;  %v1371_v57 = vrot.slane %v1369_v37, 4  ;;  %v2139_v12 = vshrl.u32 %v5403_v42, 16 }
  0x6e   : > { %6165 = vmatprep.subr.bf16.mxu1 %v6510_v2  ;;  %6214 = vmatpush3.bf16.msra.mxu0 %v6511_v24  ;;  %v9391_v24 = vld [vmem:[#allocation2_spill] sm:$0xff]  ;;  %v9394_v43 = vld [vmem:[#allocation4_spill] sm:$0xff]  ;;  %v2142_v10 = vshll.u32 %v5403_v42, 16  ;;  %v1336_v51 = vrot.slane %v1334_v58, 4  ;;  %v2148_v59 = vshll.u32 %v7190_v32, 16  ;;  %v1342_v4 = vsel %vm6994_vm5, %v5285_v5, %v1341_v47 }
  0x6f   : > { %6215 = vmatprep.subr.bf16.mxu0 %v6515_v1  ;;  %v7198_v26 = vsel %vm6994_vm5, %v5288_v40, %v1362_v63  ;;  %v9393_v40 = vld [vmem:[#allocation5_spill] sm:$0xff]  ;;  %v7264_v42 = vld [vmem:[%s6652_s23 + $0x14] sm:$0x1]  ;;  %v2141_v63 = vrot.slane %v2139_v12, 4  ;;  %v9396_v5 = vld [vmem:[#allocation6_spill] sm:$0xff] }
  0x70   : > { %6136 = vmatmul.mubr.bf16.gmra.mxu0 %v5312_v53  ;;  %v2144_v49 = vrot.slane %v2142_v10, 5  ;;  %v5409_v53 = vld [vmem:[%s6652_s23 + $0x24] sm:$0xf]  ;;  %v1338_v11 = vsel %vm6994_vm5, %v1336_v51, %v1337_v7 }
  0x71   : > { %6166 = vmatpush3.bf16.msra.mxu1 %v6510_v2  ;;  %6139 = vmatprep.mubr.bf16.mxu0 %v5313_v38  ;;  %v7208_v2 = vsel %vm6994_vm5, %v5289_v33, %v1369_v37  ;;  %v5314_v38 = vcombine.low %v7135_v14, %v7139_v19  ;;  %v1331_v33 = vsel %vm6994_vm5, %v1329_v30, %v1330_v29  ;;  %v6523_v14 = vld [vmem:[%s9352_s1 + $0x108] sm:$0xff]   ;;  %v6527_v30 = vld [vmem:[%s9352_s1 + $0x100] sm:$0xff]   ;;  %v7283_v19 = vrot.slane %v2148_v59, 5 }
  0x72   : > { %6167 = vmatprep.subr.bf16.mxu1 %v6514_v36  ;;  %6216 = vmatpush3.bf16.msra.mxu0 %v6515_v1  ;;  %v7226_v37 = vsel %vm6994_vm5, %v1364_v20, %v1365_v8  ;;  %v7238_v29 = vsel %vm6994_vm5, %v1371_v57, %v1372_v50  ;;  %v6522_v50 = vld [vmem:[%s9352_s1 + $0xc8] sm:$0xff]   ;;  %v7253_v1 = vld [vmem:[%s6652_s23 + $0xb4] sm:$0xe]  ;;  %v5315_v20 = vcombine.low %v1328_v61, %v1331_v33  ;;  %v2152_v8 = vshrl.u32 %v7190_v32, 16  ;;  %v7281_v61 = vld [vmem:[%s6652_s23 + $0x1c] sm:$0xf] }
  0x73   : > { %6217 = vmatprep.subr.bf16.mxu0 %v6519_v23  ;;  %v7268_v57 = vld [vmem:[%s6652_s23 + $0x6c] sm:$0xf]  ;;  %v2163_v33 = vshrl.u32 %v5406_v45, 16  ;;  %v2172_v51 = vshll.u32 %v7281_v61, 16  ;;  %v2176_v39 = vshrl.u32 %v7281_v61, 16  ;;  %v2187_v59 = vshrl.u32 %v5409_v53, 16 }
  0x74   : > { %6088 = vmatmul.mubr.bf16.gmra.mxu1 %v5256_v35  ;;  %v1344_v35 = vrot.slane %v6596_v54, 5  ;;  %v5260_v54 = vcombine.low %v7268_v57, %v7142_v16  ;;  %v2154_v3 = vrot.slane %v2152_v8, 4  ;;  %v2190_v46 = vshll.u32 %v5409_v53, 16  ;;  %v6600_v8 = vld [vmem:[%s6652_s23 + $0x7c] sm:$0xf] }
  0x75   : > { %6091 = vmatprep.mubr.bf16.mxu1 %v5257_v60  ;;  %6168 = vmatpush3.bf16.msra.mxu1 %v6514_v36  ;;  %v5259_v60 = vcombine.low %v6597_v17, %v7124_v48  ;;  %v1343_v36 = vrot.slane %v1341_v47, 4  ;;  %v7278_v48 = vsel %vm6994_vm5, %v5284_v62, %v1334_v58  ;;  %v2166_v17 = vshll.u32 %v5406_v45, 16  ;;  %v6526_v58 = vld [vmem:[%s9352_s1 + $0xc0] sm:$0xff]   ;;  %v7308_v45 = vld [vmem:[%s6652_s23 + $0x28] sm:$0xf] }
  0x76   : > { %6169 = vmatprep.subr.bf16.mxu1 %v6518_v0  ;;  %6218 = vmatpush3.bf16.msra.mxu0 %v6519_v23  ;;  %v9364_v62 = vrot.slane %v9393_v40, 5  ;;  %v7295_v23 = vld [vmem:[%s6652_s23 + $0x20] sm:$0x1]  ;;  %v2165_v12 = vrot.slane %v2163_v33, 4  ;;  %9395 = vst [vmem:[#allocation2_spill] sm:$0xff] %v7308_v45  ;;  %v5316_v34 = vcombine.low %v7278_v48, %v1338_v11  ;;  %v2196_v53 = vshll.u32 %v7308_v45, 16 }
  0x77   : > { %6219 = vmatprep.subr.bf16.mxu0 %v6523_v14  ;;  %v2168_v10 = vrot.slane %v2166_v17, 5  ;;  %v1345_v7 = vsel %vm6994_vm5, %v1343_v36, %v1344_v35  ;;  %v2145_v35 = vor.u32 %v2144_v49, %v2141_v63  ;;  %v7321_v36 = vld [vmem:[%s9352_s1 + $0x178] sm:$0xff]   ;;  %v5412_v63 = vld [vmem:[%s6652_s23 + $0x30] sm:$0xf]  ;;  %v7342_v48 = vld [vmem:[%s6652_s23 + $0x34] sm:$0xf] }
  0x78   : > { %6140 = vmatmul.mubr.bf16.gmra.mxu0 %v5314_v38  ;;  %v2158_v38 = vshll.u32 %v7264_v42, 16  ;;  %v5317_v17 = vcombine.low %v1342_v4, %v1345_v7  ;;  %9398 = vst [vmem:[#allocation5_spill] sm:$0xff] %v7342_v48  ;;  %v7344_v11 = vrot.slane %v2172_v51, 5  ;;  %v2192_v47 = vrot.slane %v2190_v46, 5  ;;  %v7363_v46 = vld [vmem:[%s6652_s23 + $0x40] sm:$0xf] }
  0x79   : > { %6170 = vmatpush3.bf16.msra.mxu1 %v6518_v0  ;;  %6143 = vmatprep.mubr.bf16.mxu0 %v5315_v20  ;;  %v2155_v20 = vor.u32 %v2154_v3, %v7283_v19  ;;  %v2169_v49 = vor.u32 %v2168_v10, %v2165_v12  ;;  %v6599_v3 = vld [vmem:[%s6652_s23 + $0x78] sm:$0xf]  ;;  %v2178_v12 = vrot.slane %v2176_v39, 4  ;;  %v2189_v10 = vrot.slane %v2187_v59, 4  ;;  %9399 = vst [vmem:[#allocation4_spill] sm:$0xff] %v7363_v46 }
  0x7a   : > { %6171 = vmatprep.subr.bf16.mxu1 %v6522_v50  ;;  %6220 = vmatpush3.bf16.msra.mxu0 %v6523_v14  ;;  %v2182_v14 = vshll.u32 %v7295_v23, 16  ;;  %v5261_v33 = vcombine.low %v6599_v3, %v6600_v8  ;;  %v7335_v25 = vrot.slane %v2158_v38, 5  ;;  %v7347_v0 = vld [vmem:[%s6652_s23 + $0x38] sm:$0x1]  ;;  %v7349_v4 = vrot.slane %v2145_v35, 4 }
  0x7b   : > { %6221 = vmatprep.subr.bf16.mxu0 %v6527_v30  ;;  %v7351_v7 = vrot.slane %v2155_v20, 4  ;;  %v2211_v3 = vshrl.u32 %v5412_v63, 16  ;;  %v5415_v8 = vld [vmem:[%s6652_s23 + $0x3c] sm:$0xf]  ;;  %v7359_v51 = vrot.slane %v2196_v53, 5  ;;  %v2214_v39 = vshll.u32 %v5412_v63, 16 }
  0x7c   : > { %6092 = vmatmul.mubr.bf16.gmra.mxu1 %v5258_v55  ;;  %v1378_v55 = vrot.slane %v9364_v62, 4  ;;  %v7353_v38 = vrot.slane %v2182_v14, 5  ;;  %v2220_v59 = vshll.u32 %v7342_v48, 16  ;;  %v2224_v20 = vshrl.u32 %v7342_v48, 16 }
  0x7d   : > { %6095 = vmatprep.mubr.bf16.mxu1 %v5259_v60  ;;  %6172 = vmatpush3.bf16.msra.mxu1 %v6522_v50  ;;  %v7338_v60 = vld [vmem:[%s6652_s23 + $0x2c] sm:$0x1]  ;;  %v2200_v50 = vshrl.u32 %v7308_v45, 16  ;;  %v2179_v14 = vor.u32 %v2178_v12, %v7344_v11  ;;  %v2213_v53 = vrot.slane %v2211_v3, 4  ;;  %v2216_v63 = vrot.slane %v2214_v39, 5 }
  0x7e   : > { %6173 = vmatprep.subr.bf16.mxu1 %v6526_v58  ;;  %9397 = vst [vmem:[#allocation3_spill] sm:$0xff] %v7338_v60  ;;  %6222 = vmatpush3.bf16.msra.mxu0 %v6527_v30  ;;  %v7357_v30 = vrot.slane %v2169_v49, 4  ;;  %v2235_v49 = vshrl.u32 %v5415_v8, 16  ;;  %v2238_v62 = vshll.u32 %v5415_v8, 16  ;;  %v2226_v48 = vrot.slane %v2224_v20, 4 }
  0x7f   : > { %6303 = vmatprep.subr.bf16.mxu0 %v7326_v15  ;;  %v2202_v35 = vrot.slane %v2200_v50, 4  ;;  %v7373_v50 = vrot.slane %v2220_v59, 5  ;;  %v7376_v45 = vld [vmem:[%s6652_s23 + $0x44] sm:$0x1]  ;;  %v2248_v12 = vshrl.u32 %v7363_v46, 16  ;;  %v9400_v16 = vrot.slane %v9393_v40, 5 }
  0x80   : > { %6144 = vmatmul.mubr.bf16.gmra.mxu0 %v5316_v34  ;;  %v2206_v34 = vshll.u32 %v7338_v60, 16  ;;  %v9401_v57 = vrot.slane %v7253_v1, 9  ;;  %v7397_v39 = vld [vmem:[%s6652_s23 + $0x4c] sm:$0xf]  ;;  %v2237_v59 = vrot.slane %v2235_v49, 4  ;;  %v2240_v20 = vrot.slane %v2238_v62, 5 }
  0x81   : > { %6174 = vmatpush3.bf16.msra.mxu1 %v6526_v58  ;;  %6147 = vmatprep.mubr.bf16.mxu0 %v5317_v17  ;;  %v2193_v58 = vor.u32 %v2192_v47, %v2189_v10  ;;  %v2230_v17 = vshll.u32 %v7347_v0, 16  ;;  %v2244_v47 = vshll.u32 %v7363_v46, 16  ;;  %v5418_v10 = vld [vmem:[%s6652_s23 + $0x48] sm:$0xf]  ;;  %v2203_v8 = vor.u32 %v2202_v35, %v7359_v51 }
  0x82   : > { %6255 = vmatprep.subr.bf16.mxu1 %v7321_v36  ;;  %v2250_v1 = vrot.slane %v2248_v12, 4  ;;  %v7401_v46 = vrot.slane %v2179_v14, 4  ;;  %v2151_v62 = vsel %vm6683_vm2, %v7349_v4, %v7283_v19  ;;  %v2161_v35 = vsel %vm6683_vm2, %v7351_v7, %v7335_v25  ;;  %v5421_v4 = vld [vmem:[%s6652_s23 + $0x54] sm:$0xf] }
  0x83   : > { %v7399_v60 = vrot.slane %v2244_v47, 5  ;;  %v2262_v14 = vshll.u32 %v5418_v10, 16  ;;  %v2254_v49 = vshll.u32 %v7376_v45, 16  ;;  %v2272_v19 = vshrl.u32 %v7397_v39, 16 }
  0x84   : > { %6096 = vmatmul.mubr.bf16.gmra.mxu1 %v5260_v54  ;;  %v7387_v54 = vsel %vm6994_vm5, %v9401_v57, %v9400_v16  ;;  %v7403_v16 = vrot.slane %v2193_v58, 4  ;;  %v7405_v57 = vrot.slane %v2206_v34, 5  ;;  %v2268_v58 = vshll.u32 %v7397_v39, 16 }
  0x85   : > { %6099 = vmatprep.mubr.bf16.mxu1 %v5261_v33  ;;  %v9402_v33 = vrot.slane %v9396_v5, 5  ;;  %v2259_v5 = vshrl.u32 %v5418_v10, 16  ;;  %v9404_v34 = vcombine.low %v7178_v44, %v7194_v41  ;;  %v7426_v47 = vrot.slane %v2203_v8, 4  ;;  %v7432_v10 = vld [vmem:[%s6652_s23 + $0x58] sm:$0xf] }
  0x86   : > { %v7428_v12 = vrot.slane %v2230_v17, 5  ;;  %v2241_v25 = vor.u32 %v2240_v20, %v2237_v59  ;;  %v2251_v7 = vor.u32 %v2250_v1, %v7399_v60  ;;  %v9405_v44 = vcombine.low %v6773_v13, %v6780_v22  ;;  %v7438_v41 = vld [vmem:[%s6652_s23 + $0x50] sm:$0x1] }
  0x87   : > { %v7393_v3 = vsel %vm6994_vm5, %v1378_v55, %v9402_v33  ;;  %v9403_v55 = vcombine.low %v7158_v6, %v7170_v21  ;;  %v2217_v6 = vor.u32 %v2216_v63, %v2213_v53  ;;  %v2227_v21 = vor.u32 %v2226_v48, %v7373_v50 }
  0x88   : > { %v2261_v48 = vrot.slane %v2259_v5, 4  ;;  %v2264_v53 = vrot.slane %v2262_v14, 5  ;;  %v7440_v63 = vrot.slane %v2268_v58, 5  ;;  %v2274_v17 = vrot.slane %v2272_v19, 4  ;;  %v5424_v5 = vld [vmem:[%s6652_s23 + $0x60] sm:$0xf] }
  0x89   : > { %6148 = vmatmul.mubr.bf16.gmra.mxu0 %v9403_v55  ;;  %v9406_v33 = vcombine.low %v6825_v18, %v6831_v31  ;;  %v2283_v8 = vshrl.u32 %v5421_v4, 16  ;;  %v2286_v59 = vshll.u32 %v5421_v4, 16  ;;  %v7445_v20 = vrot.slane %v2217_v6, 4  ;;  %v7462_v31 = vld [vmem:[%s6652_s23 + $0x64] sm:$0xf] }
  0x8a   : > { %6151 = vmatprep.mubr.bf16.mxu0 %v9404_v34  ;;  %v7447_v1 = vrot.slane %v2227_v21, 4  ;;  %v7449_v13 = vrot.slane %v2254_v49, 5  ;;  %v2292_v22 = vshll.u32 %v7432_v10, 16  ;;  %v5322_v55 = vcombine.low %v7387_v54, %v7393_v3  ;;  %v7458_v34 = vld [vmem:[%s6652_s23 + $0x5c] sm:$0x1] }
  0x8b   : > { %v5467_v14 = vcombine.low %v2151_v62, %v2161_v35  ;;  %v7455_v58 = vrot.slane %v2241_v25, 4  ;;  %v2296_v18 = vshrl.u32 %v7432_v10, 16  ;;  %v7464_v6 = vrot.slane %v2251_v7, 4 }
  0x8c   : > { %6100 = vmatmul.mubr.bf16.gmra.mxu1 %v9405_v44  ;;  %v2278_v21 = vshll.u32 %v7438_v41, 16  ;;  %v2307_v49 = vshrl.u32 %v5424_v5, 16  ;;  %v2310_v19 = vshll.u32 %v5424_v5, 16  ;;  %v9407_v4 = vcombine.low %v7198_v26, %v7226_v37 }
  0x8d   : > { %6103 = vmatprep.mubr.bf16.mxu1 %v9406_v33  ;;  %v2265_v54 = vor.u32 %v2264_v53, %v2261_v48  ;;  %v2275_v3 = vor.u32 %v2274_v17, %v7440_v63  ;;  %v2285_v62 = vrot.slane %v2283_v8, 4  ;;  %v2288_v35 = vrot.slane %v2286_v59, 5  ;;  %v7502_v8 = vld [vmem:[%s6652_s23 + $0x70] sm:$0xf] }
  0x8e   : > { %v9408_v25 = vcombine.low %v7208_v2, %v7238_v29  ;;  %v7474_v7 = vrot.slane %v2292_v22, 5  ;;  %v2298_v44 = vrot.slane %v2296_v18, 4  ;;  %v2302_v33 = vshll.u32 %v7458_v34, 16 }
  0x8f   : > { %v2316_v26 = vshll.u32 %v7462_v31, 16  ;;  %v2175_v37 = vsel %vm6683_vm2, %v7357_v30, %v7344_v11  ;;  %v2185_v2 = vsel %vm6683_vm2, %v7401_v46, %v7353_v38  ;;  %v2309_v29 = vrot.slane %v2307_v49, 4  ;;  %v5427_v46 = vld [vmem:[%s6652_s23 + $0x6c] sm:$0xf] }
  0x90   : > { %v2312_v48 = vrot.slane %v2310_v19, 5  ;;  %v9409_v53 = vcombine.low %v6867_v9, %v6876_v28  ;;  %v2199_v17 = vsel %vm6683_vm2, %v7403_v16, %v7359_v51  ;;  %v2209_v11 = vsel %vm6683_vm2, %v7426_v47, %v7405_v57  ;;  %v7510_v16 = vld [vmem:[%s6652_s23 + $0x68] sm:$0x1] }
  0x91   : > { %6152 = vmatmul.mubr.bf16.gmra.mxu0 %v9407_v4  ;;  %v7497_v30 = vrot.slane %v2278_v21, 5  ;;  %v2320_v38 = vshrl.u32 %v7462_v31, 16  ;;  %v9410_v9 = vcombine.low %v9391_v24, %v6931_v52  ;;  %v7507_v28 = vrot.slane %v2265_v54, 4  ;;  %v6528_v52 = vld [vmem:[%s6652_s23 + $0xc] sm:$0xff]  }
  0x92   : > { %6155 = vmatprep.mubr.bf16.mxu0 %v9408_v25  ;;  %v2289_v51 = vor.u32 %v2288_v35, %v2285_v62  ;;  %v2331_v59 = vshrl.u32 %v5427_v46, 16  ;;  %v2334_v57 = vshll.u32 %v5427_v46, 16  ;;  %v7512_v47 = vrot.slane %v2275_v3, 4  ;;  %v7523_v62 = vld [vmem:[%s6652_s23 + $0x74] sm:$0x1] }
  0x93   : > { %v2299_v22 = vor.u32 %v2298_v44, %v7474_v7  ;;  %v7515_v5 = vrot.slane %v2302_v33, 5  ;;  %v2340_v18 = vshll.u32 %v7502_v8, 16  ;;  %v2313_v24 = vor.u32 %v2312_v48, %v2309_v29  ;;  %v5430_v25 = vld [vmem:[%s6652_s23 + $0x78] sm:$0xf]  ;;  %v7527_v44 = vld [vmem:[%s6652_s23 + $0x7c] sm:$0xf] }
  0x94   : > { %6104 = vmatmul.mubr.bf16.gmra.mxu1 %v9409_v53  ;;  %v7519_v21 = vrot.slane %v2316_v26, 5  ;;  %v2322_v49 = vrot.slane %v2320_v38, 4  ;;  %v2344_v19 = vshrl.u32 %v7502_v8, 16  ;;  %v5468_v4 = vcombine.low %v2175_v37, %v2185_v2  ;;  %v7534_v26 = vld [vmem:[%s6652_s23 + $0x80] sm:$0x1] }
  0x95   : > { %6107 = vmatprep.mubr.bf16.mxu1 %v9410_v9  ;;  %v5469_v54 = vcombine.low %v2199_v17, %v2209_v11  ;;  %v2333_v3 = vrot.slane %v2331_v59, 4  ;;  %v2336_v35 = vrot.slane %v2334_v57, 5  ;;  %v7529_v33 = vrot.slane %v2289_v51, 4 }
  0x96   : > { %v7531_v53 = vrot.slane %v2340_v18, 5  ;;  %v2346_v29 = vrot.slane %v2344_v19, 4  ;;  %v2355_v48 = vshrl.u32 %v5430_v25, 16  ;;  %v2326_v37 = vshll.u32 %v7510_v16, 16  ;;  %v5433_v19 = vld [vmem:[%s6652_s23 + $0x84] sm:$0xf] }
  0x97   : > { %v2358_v2 = vshll.u32 %v5430_v25, 16  ;;  %v2364_v17 = vshll.u32 %v7527_v44, 16  ;;  %v2368_v11 = vshrl.u32 %v7527_v44, 16  ;;  %v7539_v38 = vrot.slane %v2299_v22, 4  ;;  %v6532_v25 = vld [vmem:[%s6652_s23 + $0x24] sm:$0xff]  }
  0x98   : > { %v7541_v46 = vrot.slane %v2313_v24, 4  ;;  %v2357_v9 = vrot.slane %v2355_v48, 4  ;;  %v9411_v51 = vcombine.low %v9394_v43, %v9393_v40  ;;  %v2223_v22 = vsel %vm6683_vm2, %v7445_v20, %v7373_v50 }
  0x99   : > { %6156 = vmatmul.mubr.bf16.gmra.mxu0 %v5322_v55  ;;  %v2323_v55 = vor.u32 %v2322_v49, %v7519_v21  ;;  %v2360_v59 = vrot.slane %v2358_v2, 5  ;;  %v7547_v57 = vrot.slane %v2364_v17, 5  ;;  %v2370_v18 = vrot.slane %v2368_v11, 4  ;;  %v7596_v17 = vld [vmem:[%s6652_s23 + $0x8c] sm:$0x1] }
  0x9a   : > { %6223 = vmatprep.mubr.bf16.mxu0 %v5467_v14  ;;  %v2337_v14 = vor.u32 %v2336_v35, %v2333_v3  ;;  %v2347_v24 = vor.u32 %v2346_v29, %v7531_v53  ;;  %v2350_v49 = vshll.u32 %v7523_v62, 16  ;;  %v2374_v40 = vshll.u32 %v7534_v26, 16  ;;  %v7570_v3 = vld [vmem:[%s6652_s23 + $0x88] sm:$0xf]  ;;  %v6529_v35 = vld [vmem:[%s6652_s23 + $0x18] sm:$0xff]  }
  0x9b   : > { %v2233_v43 = vsel %vm6683_vm2, %v7447_v1, %v7428_v12  ;;  %v2257_v50 = vsel %vm6683_vm2, %v7464_v6, %v7449_v13  ;;  %v2361_v20 = vor.u32 %v2360_v59, %v2357_v9  ;;  %v6535_v12 = vld [vmem:[%s9352_s1 + $0x1b0] sm:$0xff]   ;;  %v7577_v1 = vrot.slane %v2326_v37, 5  ;;  %v7601_v11 = vld [vmem:[%s9352_s1 + $0x1a8] sm:$0xff]  }
  0x9c   : > { %6108 = vmatmul.mubr.bf16.gmra.mxu1 %v9411_v51  ;;  %v2382_v29 = vshll.u32 %v5433_v19, 16  ;;  %v6534_v13 = vld [vmem:[%s9352_s1 + $0x170] sm:$0xff]   ;;  %v2271_v6 = vsel %vm6683_vm2, %v7507_v28, %v7440_v63  ;;  %v2281_v48 = vsel %vm6683_vm2, %v7512_v47, %v7497_v30  ;;  %v7591_v37 = vrot.slane %v2323_v55, 4 }
  0x9d   : > { %6175 = vmatprep.mubr.bf16.mxu1 %v6528_v52  ;;  %v2247_v52 = vsel %vm6683_vm2, %v7455_v58, %v7399_v60  ;;  %v2371_v60 = vor.u32 %v2370_v18, %v7547_v57  ;;  %v2379_v58 = vshrl.u32 %v5433_v19, 16  ;;  %v7593_v2 = vrot.slane %v2337_v14, 4  ;;  %v5436_v14 = vld [vmem:[%s6652_s23 + $0x90] sm:$0xf]  ;;  %v7624_v59 = vld [vmem:[%s6652_s23 + $0x94] sm:$0xf] }
  0x9e   : > { %v7603_v63 = vrot.slane %v2347_v24, 4  ;;  %v7605_v28 = vrot.slane %v2350_v49, 5  ;;  %v2388_v30 = vshll.u32 %v7570_v3, 16  ;;  %v2392_v47 = vshrl.u32 %v7570_v3, 16  ;;  %9412 = vst [vmem:[#allocation6_spill] sm:$0xff] %v7624_v59 }
  0x9f   : > { %v2305_v55 = vsel %vm6683_vm2, %v7539_v38, %v7515_v5  ;;  %v7618_v9 = vrot.slane %v2361_v20, 4  ;;  %v7620_v51 = vrot.slane %v2374_v40, 5  ;;  %v2384_v18 = vrot.slane %v2382_v29, 5  ;;  %v6538_v5 = vld [vmem:[%s9352_s1 + $0x168] sm:$0xff]  }
  0xa0   : > { %v2406_v38 = vshll.u32 %v5436_v14, 16  ;;  %v2412_v24 = vshll.u32 %v7624_v59, 16  ;;  %v2416_v49 = vshrl.u32 %v7624_v59, 16  ;;  %v5470_v40 = vcombine.low %v2223_v22, %v2233_v43 }
  0xa1   : > { %6224 = vmatmul.mubr.bf16.vlgmr.msra.gmra.mxu0 %v5468_v4  ;;  %v2295_v4 = vsel %vm6683_vm2, %v7529_v33, %v7474_v7  ;;  %v2398_v7 = vshll.u32 %v7596_v17, 16  ;;  %v2403_v33 = vshrl.u32 %v5436_v14, 16  ;;  %v5471_v20 = vcombine.low %v2247_v52, %v2257_v50 }
  0xa2   : > { %6304 = vmatpush3.bf16.msra.mxu0 %v7326_v15  ;;  %6227 = vmatprep.mubr.bf16.mxu0 %v5469_v54  ;;  %v7626_v15 = vrot.slane %v2371_v60, 4  ;;  %v2381_v54 = vrot.slane %v2379_v58, 4  ;;  %v7635_v19 = vrot.slane %v2388_v30, 5  ;;  %v6533_v60 = vld [vmem:[%s6652_s23 + $0x30] sm:$0xff]   ;;  %v6543_v58 = vld [vmem:[%s9352_s1 + $0x1a0] sm:$0xff]   ;;  %v2408_v14 = vrot.slane %v2406_v38, 5 }
  0xa3   : > { %6305 = vmatprep.subr.bf16.mxu0 %v6535_v12  ;;  %v2405_v29 = vrot.slane %v2403_v33, 4  ;;  %v2418_v22 = vrot.slane %v2416_v49, 4  ;;  %v7643_v43 = vcombine.low %v2271_v6, %v2281_v48  ;;  %v7646_v52 = vcombine.low %v2295_v4, %v2305_v55  ;;  %v5439_v30 = vld [vmem:[%s6652_s23 + $0x9c] sm:$0xf]  ;;  %v7668_v4 = vld [vmem:[%s6652_s23 + $0xa4] sm:$0x1] }
  0xa4   : > { %6176 = vmatmul.mubr.bf16.vlgmr.msra.gmra.mxu1 %v6529_v35  ;;  %v2394_v35 = vrot.slane %v2392_v47, 4  ;;  %v2385_v48 = vor.u32 %v2384_v18, %v2381_v54  ;;  %v7665_v47 = vld [vmem:[%s6652_s23 + $0xa0] sm:$0xf]  ;;  %9415 = vst [vmem:[#allocation9_spill] sm:$0xff] %v7668_v4  ;;  %v2427_v55 = vshrl.u32 %v5439_v30, 16  ;;  %v2430_v33 = vshll.u32 %v5439_v30, 16 }
  0xa5   : > { %6256 = vmatpush3.bf16.msra.mxu1 %v7321_v36  ;;  %6179 = vmatprep.mubr.bf16.mxu1 %v6532_v25  ;;  %v7641_v36 = vrot.slane %v2412_v24, 5  ;;  %v2329_v25 = vsel %vm6683_vm2, %v7591_v37, %v7577_v1  ;;  %9414 = vst [vmem:[#allocation8_spill] sm:$0xff] %v7665_v47  ;;  %v6536_v38 = vld [vmem:[%s6652_s23 + $0x3c] sm:$0xff]   ;;  %v2436_v37 = vshll.u32 %v7665_v47, 16  ;;  %v2440_v24 = vshrl.u32 %v7665_v47, 16 }
  0xa6   : > { %6257 = vmatprep.subr.bf16.mxu1 %v6534_v13  ;;  %6306 = vmatpush3.bf16.msra.mxu0 %v6535_v12  ;;  %v7657_v12 = vld [vmem:[%s6652_s23 + $0x98] sm:$0x1]  ;;  %v2395_v1 = vor.u32 %v2394_v35, %v7635_v19  ;;  %v6542_v54 = vld [vmem:[%s9352_s1 + $0x160] sm:$0xff]   ;;  %v2409_v18 = vor.u32 %v2408_v14, %v2405_v29  ;;  %v2429_v30 = vrot.slane %v2427_v55, 4  ;;  %v2432_v49 = vrot.slane %v2430_v33, 5 }
  0xa7   : > { %6307 = vmatprep.subr.bf16.mxu0 %v7601_v11  ;;  %9413 = vst [vmem:[#allocation7_spill] sm:$0xff] %v7657_v12  ;;  %v2422_v35 = vshll.u32 %v7657_v12, 16  ;;  %v2442_v6 = vrot.slane %v2440_v24, 4  ;;  %v2446_v50 = vshll.u32 %v7668_v4, 16  ;;  %v5442_v47 = vld [vmem:[%s6652_s23 + $0xa8] sm:$0xf] }
  0xa8   : > { %v6546_v29 = vld [vmem:[%s9352_s1 + $0x158] sm:$0xff]   ;;  %v7691_v14 = vrot.slane %v2385_v48, 4  ;;  %v2451_v55 = vshrl.u32 %v5442_v47, 16  ;;  %v2454_v33 = vshll.u32 %v5442_v47, 16  ;;  %v7704_v4 = vld [vmem:[%s6652_s23 + $0xb0] sm:$0x1] }
  0xa9   : > { %6228 = vmatmul.mubr.bf16.gmra.mxu0 %v5470_v40  ;;  %6258 = vmatpush3.bf16.msra.mxu1 %v6534_v13  ;;  %v6547_v13 = vld [vmem:[%s9352_s1 + $0x198] sm:$0xff]   ;;  %v2419_v40 = vor.u32 %v2418_v22, %v7641_v36  ;;  %v7693_v22 = vrot.slane %v2398_v7, 5  ;;  %v6537_v48 = vld [vmem:[%s6652_s23 + $0x48] sm:$0xff]   ;;  %v7707_v7 = vrot.slane %v2395_v1, 4  ;;  %v7709_v12 = vrot.slane %v2409_v18, 4 }
  0xaa   : > { %6231 = vmatprep.mubr.bf16.mxu0 %v5471_v20  ;;  %6259 = vmatprep.subr.bf16.mxu1 %v6538_v5  ;;  %v7684_v20 = vrot.slane %v2436_v37, 5  ;;  %v2433_v37 = vor.u32 %v2432_v49, %v2429_v30  ;;  %v7711_v59 = vrot.slane %v2422_v35, 5  ;;  %v6550_v49 = vld [vmem:[%s9352_s1 + $0x150] sm:$0xff]   ;;  %v7728_v18 = vrot.slane %v2454_v33, 5 }
  0xab   : > { %6308 = vmatpush3.bf16.msra.mxu0 %v7601_v11  ;;  %v7696_v11 = vld [vmem:[%s6652_s23 + $0xac] sm:$0xf]  ;;  %v2470_v35 = vshll.u32 %v7704_v4, 16 }
  0xac   : > { %6180 = vmatmul.mubr.bf16.gmra.mxu1 %v6533_v60  ;;  %6309 = vmatprep.subr.bf16.mxu0 %v6543_v58  ;;  %9416 = vst [vmem:[#allocation10_spill] sm:$0xff] %v7696_v11  ;;  %v2353_v60 = vsel %vm6683_vm2, %v7603_v63, %v7605_v28  ;;  %v2443_v24 = vor.u32 %v2442_v6, %v7684_v20  ;;  %v2460_v47 = vshll.u32 %v7696_v11, 16  ;;  %v6540_v63 = vld [vmem:[%s6652_s23 + $0x54] sm:$0xff]   ;;  %v7718_v28 = vrot.slane %v2419_v40, 4 }
  0xad   : > { %6183 = vmatprep.mubr.bf16.mxu1 %v6536_v38  ;;  %6260 = vmatpush3.bf16.msra.mxu1 %v6538_v5  ;;  %v6551_v5 = vld [vmem:[%s9352_s1 + $0x190] sm:$0xff]   ;;  %v7720_v6 = vrot.slane %v2446_v50, 5  ;;  %v7722_v38 = vrot.slane %v2451_v55, 4  ;;  %v2464_v1 = vshrl.u32 %v7696_v11, 16  ;;  %v7737_v40 = vrot.slane %v2433_v37, 4 }
  0xae   : > { %6261 = vmatprep.subr.bf16.mxu1 %v6542_v54  ;;  %v7739_v30 = vrot.slane %v2443_v24, 4  ;;  %v5445_v55 = vld [vmem:[%s6652_s23 + $0xb4] sm:$0xf]  ;;  %v7743_v11 = vld [vmem:[%s6652_s23 + $0xb8] sm:$0xf]  ;;  %v6554_v24 = vld [vmem:[%s9352_s1 + $0x148] sm:$0xff]  }
  0xaf   : > { %6310 = vmatpush3.bf16.msra.mxu0 %v6543_v58  ;;  %v9417_v58 = vsel %vm6683_vm2, %v7541_v46, %v7519_v21  ;;  %9418 = vst [vmem:[#allocation11_spill] sm:$0xff] %v7743_v11  ;;  %v2367_v21 = vsel %vm6683_vm2, %v7618_v9, %v7547_v57  ;;  %v7755_v46 = vrot.slane %v2460_v47, 5  ;;  %v5448_v37 = vld [vmem:[%s6652_s23 + $0xc0] sm:$0xf]  ;;  %v2377_v57 = vsel %vm6683_vm2, %v7626_v15, %v7620_v51  ;;  %v7782_v47 = vld [vmem:[%s6652_s23 + $0xc4] sm:$0xf] }
  0xb0   : > { %6311 = vmatprep.subr.bf16.mxu0 %v6547_v13  ;;  %v5474_v50 = vcombine.low %v9417_v58, %v2329_v25  ;;  %v2475_v25 = vshrl.u32 %v5445_v55, 16  ;;  %v2391_v9 = vsel %vm6683_vm2, %v7691_v14, %v7635_v19  ;;  %9421 = vst [vmem:[#allocation13_spill] sm:$0xff] %v7782_v47  ;;  %v7785_v51 = vld [vmem:[%s6652_s23 + $0xc8] sm:$0x1]  ;;  %v2508_v58 = vshll.u32 %v7782_v47, 16 }
  0xb1   : > { %6232 = vmatmul.mubr.bf16.gmra.mxu0 %v7643_v43  ;;  %6262 = vmatpush3.bf16.msra.mxu1 %v6542_v54  ;;  %v9419_v43 = vsel %vm6683_vm2, %v7593_v2, %v7531_v53  ;;  %v2466_v54 = vrot.slane %v2464_v1, 4  ;;  %v2478_v53 = vshll.u32 %v5445_v55, 16  ;;  %v2484_v2 = vshll.u32 %v7743_v11, 16 }
  0xb2   : > { %6235 = vmatprep.mubr.bf16.mxu0 %v7646_v52  ;;  %v5475_v33 = vcombine.low %v9419_v43, %v2353_v60  ;;  %6263 = vmatprep.subr.bf16.mxu1 %v6546_v29  ;;  %v6555_v52 = vld [vmem:[%s9352_s1 + $0x188] sm:$0xff]   ;;  %v2488_v60 = vshrl.u32 %v7743_v11, 16  ;;  %v2477_v15 = vrot.slane %v2475_v25, 4  ;;  %v9422_v55 = vrot.slane %v7190_v32, 5 }
  0xb3   : > { %6312 = vmatpush3.bf16.msra.mxu0 %v6547_v13  ;;  %v2401_v13 = vsel %vm6683_vm2, %v7707_v7, %v7693_v22  ;;  %v2480_v19 = vrot.slane %v2478_v53, 5  ;;  %v7787_v14 = vrot.slane %v2484_v2, 5  ;;  %v2499_v22 = vshrl.u32 %v5448_v37, 16  ;;  %v6541_v2 = vld [vmem:[%s6652_s23 + $0x60] sm:$0xff]  }
  0xb4   : > { %6184 = vmatmul.mubr.bf16.gmra.mxu1 %v6537_v48  ;;  %6313 = vmatprep.subr.bf16.mxu0 %v6551_v5  ;;  %v7779_v48 = vld [vmem:[%s6652_s23 + $0xbc] sm:$0x1]  ;;  %v2490_v1 = vrot.slane %v2488_v60, 4  ;;  %v2502_v7 = vshll.u32 %v5448_v37, 16  ;;  %v7792_v43 = vrot.slane %v9422_v55, 4  ;;  %v7797_v25 = vrot.slane %v2470_v35, 5 }
  0xb5   : > { %9420 = vst [vmem:[#allocation12_spill] sm:$0xff] %v7779_v48  ;;  %6187 = vmatprep.mubr.bf16.mxu1 %v6540_v63  ;;  %6264 = vmatpush3.bf16.msra.mxu1 %v6546_v29  ;;  %v2457_v63 = vor.u32 %v7728_v18, %v7722_v38  ;;  %v2467_v29 = vor.u32 %v2466_v54, %v7755_v46  ;;  %v2512_v53 = vshrl.u32 %v7782_v47, 16  ;;  %v2494_v60 = vshll.u32 %v7779_v48, 16  ;;  %v6544_v38 = vld [vmem:[%s6652_s23 + $0x6c] sm:$0xff]   ;;  %v7817_v48 = vld [vmem:[%s6652_s23 + $0x18] sm:$0xe] }
  0xb6   : > { %6265 = vmatprep.subr.bf16.mxu1 %v6550_v49  ;;  %v2501_v37 = vrot.slane %v2499_v22, 4  ;;  %v2504_v11 = vrot.slane %v2502_v7, 5  ;;  %v7802_v55 = vrot.slane %v2508_v58, 5  ;;  %v2481_v18 = vor.u32 %v2480_v19, %v2477_v15  ;;  %v6558_v22 = vld [vmem:[%s9352_s1 + $0x140] sm:$0xff]   ;;  %v7814_v58 = vld [vmem:[%s6652_s23 + $0xc] sm:$0xe] }
  0xb7   : > { %6314 = vmatpush3.bf16.msra.mxu0 %v6551_v5  ;;  %v6559_v5 = vld [vmem:[%s9352_s1 + $0x180] sm:$0xff]   ;;  %v2491_v35 = vor.u32 %v2490_v1, %v7787_v14  ;;  %v2514_v54 = vrot.slane %v2512_v53, 4  ;;  %v2518_v47 = vshll.u32 %v7785_v51, 16  ;;  %v5476_v15 = vcombine.low %v2367_v21, %v2377_v57 }
  0xb8   : > { %6315 = vmatprep.subr.bf16.mxu0 %v6555_v52  ;;  %v2505_v7 = vor.u32 %v2504_v11, %v2501_v37  ;;  %v5477_v19 = vcombine.low %v2391_v9, %v2401_v13  ;;  %v7825_v1 = vrot.slane %v2457_v63, 4  ;;  %v7827_v11 = vrot.slane %v2467_v29, 4  ;;  %v6545_v9 = vld [vmem:[%s6652_s23 + $0x78] sm:$0xff]   ;;  %v6548_v37 = vld [vmem:[%s6652_s23 + $0x84] sm:$0xff]  }
  0xb9   : > { %6236 = vmatmul.mubr.bf16.gmra.mxu0 %v5474_v50  ;;  %6266 = vmatpush3.bf16.msra.mxu1 %v6550_v49  ;;  %v7822_v49 = vld [vmem:[%s9352_s1 + $0x238] sm:$0xff]   ;;  %v2515_v50 = vor.u32 %v2514_v54, %v7802_v55  ;;  %v7836_v53 = vrot.slane %v2491_v35, 4  ;;  %v7838_v21 = vrot.slane %v2494_v60, 5  ;;  %v7844_v63 = vrot.slane %v2518_v47, 5  ;;  %v5494_v60 = vld [vmem:[%s6652_s23 + $0x30] sm:$0xe] }
  0xba   : > { %6239 = vmatprep.mubr.bf16.mxu0 %v5475_v33  ;;  %6267 = vmatprep.subr.bf16.mxu1 %v6554_v24  ;;  %v7832_v33 = vld [vmem:[%s9352_s1 + $0x1f8] sm:$0xff]   ;;  %v7842_v13 = vrot.slane %v2505_v7, 4  ;;  %v2913_v29 = vrot.slane %v7264_v42, 5  ;;  %v9423_v35 = vld [vmem:[#allocation2_spill] sm:$0xff]  ;;  %v5510_v47 = vrot.slane %v5494_v60, 9  ;;  %v9426_v60 = vld [vmem:[#allocation3_spill] sm:$0xff] }
  0xbb   : > { %6316 = vmatpush3.bf16.msra.mxu0 %v6555_v52  ;;  %v7834_v52 = vrot.slane %v2481_v18, 4  ;;  %v9424_v7 = vld [vmem:[#allocation5_spill] sm:$0xff]  ;;  %v2934_v18 = vrot.slane %v7347_v0, 5  ;;  %v2449_v0 = vsel %vm6683_vm2, %v7739_v30, %v7720_v6  ;;  %v2948_v30 = vrot.slane %v7438_v41, 5 }
  0xbc   : > { %6188 = vmatmul.mubr.bf16.gmra.mxu1 %v6541_v2  ;;  %6317 = vmatprep.subr.bf16.mxu0 %v6559_v5  ;;  %v2931_v57 = vrot.slane %v9424_v7, 5  ;;  %v9425_v2 = vld [vmem:[#allocation4_spill] sm:$0xff] }
  0xbd   : > { %6191 = vmatprep.mubr.bf16.mxu1 %v6544_v38  ;;  %6268 = vmatpush3.bf16.msra.mxu1 %v6554_v24  ;;  %v7849_v24 = vrot.slane %v2515_v50, 4  ;;  %v2917_v38 = vrot.slane %v7281_v61, 5  ;;  %v2415_v50 = vsel %vm6683_vm2, %v7709_v12, %v7641_v36  ;;  %v2938_v54 = vrot.slane %v9425_v2, 5  ;;  %v5495_v12 = vld [vmem:[%s6652_s23 + $0x3c] sm:$0xe] }
  0xbe   : > { %6269 = vmatprep.subr.bf16.mxu1 %v6558_v22  ;;  %v7871_v7 = vsel %vm6994_vm5, %v5510_v47, %v2931_v57  ;;  %v2933_v36 = vrot.slane %v2931_v57, 4  ;;  %v5511_v2 = vrot.slane %v5495_v12, 9  ;;  %v6549_v47 = vld [vmem:[%s6652_s23 + $0x90] sm:$0xff]   ;;  %v2955_v12 = vrot.slane %v7458_v34, 5 }
  0xbf   : > { %6318 = vmatpush3.bf16.msra.mxu0 %v6559_v5  ;;  %v2425_v5 = vsel %vm6683_vm2, %v7718_v28, %v7711_v59  ;;  %v2439_v59 = vsel %vm6683_vm2, %v7737_v40, %v7684_v20  ;;  %v2940_v28 = vrot.slane %v2938_v54, 4  ;;  %v2945_v20 = vrot.slane %v7397_v39, 5 }
  0xc0   : > { %6399 = vmatprep.subr.bf16.mxu0 %v7822_v49  ;;  %v7885_v57 = vsel %vm6994_vm5, %v2933_v36, %v2934_v18  ;;  %v5479_v18 = vcombine.low %v2439_v59, %v2449_v0  ;;  %v7900_v39 = vsel %vm6994_vm5, %v5511_v2, %v2938_v54  ;;  %v2463_v36 = vsel %vm6683_vm2, %v7825_v1, %v7755_v46  ;;  %v5497_v54 = vld [vmem:[%s6652_s23 + $0x54] sm:$0xe] }
  0xc1   : > { %6240 = vmatmul.mubr.bf16.gmra.mxu0 %v5476_v15  ;;  %6270 = vmatpush3.bf16.msra.mxu1 %v6558_v22  ;;  %v2927_v15 = vrot.slane %v9426_v60, 5  ;;  %v2941_v22 = vrot.slane %v7376_v45, 5  ;;  %v5542_v40 = vcombine.low %v7871_v7, %v7885_v57  ;;  %v5496_v45 = vld [vmem:[%s6652_s23 + $0x48] sm:$0xe]  ;;  %v2473_v46 = vsel %vm6683_vm2, %v7827_v11, %v7797_v25  ;;  %v6569_v7 = vld [vmem:[%s6652_s23 + $0x54] sm:$0xff]  }
  0xc2   : > { %6243 = vmatprep.mubr.bf16.mxu0 %v5477_v19  ;;  %6351 = vmatprep.subr.bf16.mxu1 %v7832_v33  ;;  %v5478_v19 = vcombine.low %v2415_v50, %v2425_v5  ;;  %v2947_v50 = vrot.slane %v2945_v20, 4  ;;  %v6552_v5 = vld [vmem:[%s6652_s23 + $0x9c] sm:$0xff]   ;;  %v2959_v2 = vrot.slane %v7462_v31, 5  ;;  %v2487_v34 = vsel %vm6683_vm2, %v7834_v52, %v7787_v14 }
  0xc3   : > { %v7892_v6 = vsel %vm6994_vm5, %v2940_v28, %v2941_v22  ;;  %v5513_v28 = vrot.slane %v5497_v54, 9  ;;  %v5498_v22 = vld [vmem:[%s6652_s23 + $0x60] sm:$0xe]  ;;  %v2962_v25 = vrot.slane %v7510_v16, 5  ;;  %v2497_v11 = vsel %vm6683_vm2, %v7836_v53, %v7838_v21 }
  0xc4   : > { %6192 = vmatmul.mubr.bf16.gmra.mxu1 %v6545_v9  ;;  %v2952_v9 = vrot.slane %v7432_v10, 5  ;;  %v5543_v41 = vcombine.low %v7900_v39, %v7892_v6  ;;  %v7915_v59 = vsel %vm6994_vm5, %v2947_v50, %v2948_v30  ;;  %v2966_v14 = vrot.slane %v7502_v8, 5  ;;  %v5724_v6 = vld [vmem:[%s6652_s23 + $0x24] sm:$0xe] }
  0xc5   : > { %6195 = vmatprep.mubr.bf16.mxu1 %v6548_v37  ;;  %v5512_v37 = vrot.slane %v5496_v45, 9  ;;  %v2961_v45 = vrot.slane %v2959_v2, 4  ;;  %v5480_v52 = vcombine.low %v2463_v36, %v2473_v46  ;;  %v2969_v8 = vrot.slane %v7523_v62, 5  ;;  %v5500_v36 = vld [vmem:[%s6652_s23 + $0x78] sm:$0xe] }
  0xc6   : > { %v2954_v0 = vrot.slane %v2952_v9, 4  ;;  %v7942_v31 = vsel %vm6994_vm5, %v5513_v28, %v2952_v9  ;;  %v2968_v9 = vrot.slane %v2966_v14, 4  ;;  %v2973_v54 = vrot.slane %v7527_v44, 5 }
  0xc7   : > { %v7911_v10 = vsel %vm6994_vm5, %v5512_v37, %v2945_v20  ;;  %v5514_v20 = vrot.slane %v5498_v22, 9  ;;  %v7954_v53 = vsel %vm6994_vm5, %v2961_v45, %v2962_v25  ;;  %v5481_v37 = vcombine.low %v2487_v34, %v2497_v11 }
  0xc8   : > { %v7970_v46 = vsel %vm6994_vm5, %v2968_v9, %v2969_v8  ;;  %v5516_v62 = vrot.slane %v5500_v36, 9  ;;  %v2980_v28 = vrot.slane %v7570_v3, 5  ;;  %v2975_v44 = vrot.slane %v2973_v54, 4  ;;  %v6560_v8 = vld [vmem:[%s6652_s23 + $0x18] sm:$0xff]   ;;  %v9431_v36 = vld [vmem:[#allocation8_spill] sm:$0xff] }
  0xc9   : > { %6244 = vmatmul.mubr.bf16.gmra.mxu0 %v5478_v19  ;;  %v7933_v19 = vsel %vm6994_vm5, %v2954_v0, %v2955_v12  ;;  %v7949_v16 = vsel %vm6994_vm5, %v5514_v20, %v2959_v2  ;;  %v2976_v0 = vrot.slane %v7534_v26, 5  ;;  %v2983_v26 = vrot.slane %v7596_v17, 5  ;;  %v5501_v20 = vld [vmem:[%s6652_s23 + $0x84] sm:$0xe] }
  0xca   : > { %6247 = vmatprep.mubr.bf16.mxu0 %v5479_v18  ;;  %v5499_v18 = vld [vmem:[%s6652_s23 + $0x6c] sm:$0xe]  ;;  %v2511_v2 = vsel %vm6683_vm2, %v7842_v13, %v7802_v55  ;;  %v7982_v34 = vsel %vm6994_vm5, %v5516_v62, %v2973_v54  ;;  %v2521_v3 = vsel %vm6683_vm2, %v7849_v24, %v7844_v63  ;;  %v5517_v25 = vrot.slane %v5501_v20, 9  ;;  %v9429_v63 = vld [vmem:[#allocation6_spill] sm:$0xff] }
  0xcb   : > { %v5515_v21 = vrot.slane %v5499_v18, 9  ;;  %v7991_v17 = vsel %vm6994_vm5, %v2975_v44, %v2976_v0  ;;  %v2982_v11 = vrot.slane %v2980_v28, 4  ;;  %v9427_v45 = vrot.slane %v7190_v32, 5  ;;  %v5502_v18 = vld [vmem:[%s6652_s23 + $0x90] sm:$0xe]  ;;  %v6572_v62 = vld [vmem:[%s6652_s23 + $0x60] sm:$0xff]  }
  0xcc   : > { %6196 = vmatmul.mubr.bf16.gmra.mxu1 %v6549_v47  ;;  %v6553_v47 = vld [vmem:[%s6652_s23 + $0xa8] sm:$0xff]   ;;  %v9428_v55 = vrot.slane %v7814_v58, 9  ;;  %v2987_v24 = vrot.slane %v9429_v63, 5  ;;  %v8008_v32 = vsel %vm6994_vm5, %v5517_v25, %v2980_v28  ;;  %v2994_v54 = vrot.slane %v9431_v36, 5 }
  0xcd   : > { %6199 = vmatprep.mubr.bf16.mxu1 %v6552_v5  ;;  %v6556_v5 = vld [vmem:[%s6652_s23 + $0xb4] sm:$0xff]   ;;  %v7966_v12 = vsel %vm6994_vm5, %v5515_v21, %v2966_v14  ;;  %v5493_v14 = vld [vmem:[%s6652_s23 + $0x24] sm:$0xe]  ;;  %v9430_v21 = vld [vmem:[#allocation7_spill] sm:$0xff]  ;;  %v8012_v58 = vsel %vm6994_vm5, %v2982_v11, %v2983_v26  ;;  %v5482_v0 = vcombine.low %v2511_v2, %v2521_v3  ;;  %v2914_v28 = vsel %vm6994_vm5, %v7792_v43, %v2913_v29 }
  0xce   : > { %v2911_v13 = vsel %vm6994_vm5, %v9428_v55, %v9427_v45  ;;  %v2990_v9 = vrot.slane %v9430_v21, 5  ;;  %v2989_v44 = vrot.slane %v2987_v24, 4  ;;  %v6557_v45 = vld [vmem:[%s6652_s23 + $0xc0] sm:$0xff]   ;;  %v2919_v26 = vrot.slane %v2917_v38, 4  ;;  %v5503_v2 = vld [vmem:[%s6652_s23 + $0x9c] sm:$0xe] }
  0xcf   : > { %v2996_v3 = vrot.slane %v2994_v54, 4  ;;  %v5519_v11 = vrot.slane %v5503_v2, 9  ;;  %v9433_v55 = vld [vmem:[#allocation10_spill] sm:$0xff]  ;;  %v5504_v63 = vld [vmem:[%s6652_s23 + $0xa8] sm:$0xe]  ;;  %v5539_v21 = vcombine.low %v2911_v13, %v2914_v28  ;;  %v9437_v28 = vrot.slane %v7817_v48, 9 }
  0xd0   : > { %v8033_v25 = vsel %vm6994_vm5, %v2989_v44, %v2990_v9  ;;  %v3001_v42 = vrot.slane %v9433_v55, 5  ;;  %v8156_v43 = vld [vmem:[%s6652_s23 + $0x34] sm:$0xf] }
  0xd1   : > { %6248 = vmatmul.mubr.bf16.gmra.mxu0 %v5480_v52  ;;  %v8046_v9 = vsel %vm6994_vm5, %v5519_v11, %v2994_v54  ;;  %v5505_v54 = vld [vmem:[%s6652_s23 + $0xb4] sm:$0xe]  ;;  %v3835_v39 = vshll.u32 %v8156_v43, 16 }
  0xd2   : > { %6251 = vmatprep.mubr.bf16.mxu0 %v5481_v37  ;;  %v5518_v37 = vrot.slane %v5502_v18, 9  ;;  %v5509_v18 = vrot.slane %v5493_v14, 9  ;;  %v3003_v36 = vrot.slane %v3001_v42, 4  ;;  %v9434_v14 = vrot.slane %v9423_v35, 5 }
  0xd3   : > { %v5521_v55 = vrot.slane %v5505_v54, 9 }
  0xd4   : > { %6200 = vmatmul.mubr.bf16.gmra.mxu1 %v6553_v47  ;;  %v9432_v47 = vld [vmem:[#allocation9_spill] sm:$0xff]  ;;  %v2926_v44 = vrot.slane %v9434_v14, 4  ;;  %v9439_v61 = vmov %v9434_v14  ;;  %v3018_v14 = vrot.slane %v7785_v51, 5  ;;  %v5641_v51 = vld [vmem:[%s6652_s23 + $0x30] sm:$0xf] }
  0xd5   : > { %6203 = vmatprep.mubr.bf16.mxu1 %v6556_v5  ;;  %v2997_v20 = vrot.slane %v9432_v47, 5  ;;  %v8028_v5 = vsel %vm6994_vm5, %v5518_v37, %v2987_v24  ;;  %v3004_v24 = vrot.slane %v7704_v4, 5  ;;  %v5520_v37 = vrot.slane %v5504_v63, 9 }
  0xd6   : > { %v9438_v63 = vrot.slane %v7295_v23, 5  ;;  %v2925_v48 = vsel %vm6994_vm5, %v5509_v18, %v9439_v61  ;;  %v2928_v23 = vsel %vm6994_vm5, %v2926_v44, %v2927_v15  ;;  %v8126_v61 = vld [vmem:[%s6652_s23 + $0x28] sm:$0xf] }
  0xd7   : > { %v8040_v29 = vsel %vm6994_vm5, %v2996_v3, %v2997_v20  ;;  %v9435_v20 = vld [vmem:[#allocation11_spill] sm:$0xff]  ;;  %v8055_v4 = vsel %vm6994_vm5, %v5520_v37, %v3001_v42  ;;  %v8059_v13 = vsel %vm6994_vm5, %v3003_v36, %v3004_v24  ;;  %v2918_v3 = vsel %vm6994_vm5, %v9437_v28, %v2917_v38  ;;  %v5506_v37 = vld [vmem:[%s6652_s23 + $0xc0] sm:$0xe]  ;;  %v9440_v38 = vld [vmem:[#allocation13_spill] sm:$0xff] }
  0xd8   : > { %v3008_v2 = vrot.slane %v9435_v20, 5  ;;  %v2921_v24 = vsel %vm6994_vm5, %v2919_v26, %v9438_v63  ;;  %v3015_v36 = vrot.slane %v9440_v38, 5  ;;  %v5522_v18 = vrot.slane %v5506_v37, 9  ;;  %v6567_v20 = vld [vmem:[%s9352_s1 + $0x230] sm:$0xff]   ;;  %v5638_v63 = vld [vmem:[%s6652_s23 + $0x24] sm:$0xf] }
  0xd9   : > { %6252 = vmatmul.mubr.bf16.gmra.mxu0 %v5482_v0  ;;  %v5540_v15 = vcombine.low %v2918_v3, %v2921_v24  ;;  %v5541_v54 = vcombine.low %v2925_v48, %v2928_v23  ;;  %v6566_v28 = vld [vmem:[%s9352_s1 + $0x1f0] sm:$0xff]   ;;  %v6565_v48 = vld [vmem:[%s6652_s23 + $0x3c] sm:$0xff]   ;;  %v3802_v37 = vshrl.u32 %v5638_v63, 16  ;;  %v6568_v38 = vld [vmem:[%s6652_s23 + $0x48] sm:$0xff]   ;;  %v3811_v23 = vshll.u32 %v8126_v61, 16 }
  0xda   : > { %6319 = vmatprep.mubr.bf16.mxu0 %v6560_v8  ;;  %v9436_v8 = vld [vmem:[#allocation12_spill] sm:$0xff]  ;;  %v3010_v42 = vrot.slane %v3008_v2, 4  ;;  %v8090_v26 = vsel %vm6994_vm5, %v5521_v55, %v3008_v2  ;;  %v3017_v60 = vrot.slane %v3015_v36, 4  ;;  %v8103_v44 = vsel %vm6994_vm5, %v5522_v18, %v3015_v36  ;;  %v5635_v2 = vld [vmem:[%s6652_s23 + $0x18] sm:$0xf]  ;;  %v6571_v55 = vld [vmem:[%s9352_s1 + $0x228] sm:$0xff]  }
  0xdb   : > { %v3011_v0 = vrot.slane %v9436_v8, 5  ;;  %v3781_v24 = vshll.u32 %v5635_v2, 16  ;;  %v6570_v36 = vld [vmem:[%s9352_s1 + $0x1e8] sm:$0xff]   ;;  %v5637_v18 = vld [vmem:[%s6652_s23 + $0x20] sm:$0x1]  ;;  %v3804_v11 = vrot.slane %v3802_v37, 4 }
  0xdc   : > { %6204 = vmatmul.mubr.bf16.gmra.mxu1 %v6557_v45  ;;  %v6561_v45 = vld [vmem:[%s6652_s23 + $0x24] sm:$0xff]   ;;  %v8108_v8 = vsel %vm6994_vm5, %v3017_v60, %v3018_v14  ;;  %v3805_v14 = vshll.u32 %v5638_v63, 16  ;;  %v8146_v63 = vld [vmem:[%s6652_s23 + $0x2c] sm:$0x1]  ;;  %v3826_v37 = vshrl.u32 %v5641_v51, 16 }
  0xdd   : > { %6271 = vmatprep.mubr.bf16.mxu1 %v5539_v21  ;;  %v6564_v21 = vld [vmem:[%s6652_s23 + $0x30] sm:$0xff]   ;;  %v8094_v35 = vsel %vm6994_vm5, %v3010_v42, %v3011_v0  ;;  %v8111_v0 = vld [vmem:[%s6652_s23 + $0x1c] sm:$0xf]  ;;  %v3778_v42 = vshrl.u32 %v5635_v2, 16 }
  0xde   : > { %v4549_v3 = vrot.slane %v8111_v0, 5  ;;  %v3807_v47 = vrot.slane %v3805_v14, 5 }
  0xdf   : > { %v3780_v60 = vrot.slane %v3778_v42, 4  ;;  %v6574_v42 = vld [vmem:[%s9352_s1 + $0x1e0] sm:$0xff]  }
  0xe1   : > { %6320 = vmatmul.mubr.bf16.vlgmr.msra.gmra.mxu0 %v6561_v45  ;;  %v3791_v45 = vshrl.u32 %v8111_v0, 16 }
  0xe2   : > { %6400 = vmatpush3.bf16.msra.mxu0 %v7822_v49  ;;  %6323 = vmatprep.mubr.bf16.mxu0 %v6564_v21  ;;  %v3787_v49 = vshll.u32 %v8111_v0, 16  ;;  %v3815_v21 = vshrl.u32 %v8126_v61, 16 }
  0xe3   : > { %6401 = vmatprep.subr.bf16.mxu0 %v6567_v20 }
  0xe4   : > { %6272 = vmatmul.mubr.bf16.vlgmr.msra.gmra.mxu1 %v5540_v15  ;;  %v5723_v15 = vld [vmem:[%s6652_s23 + $0x18] sm:$0xe]  ;;  %v8141_v2 = vrot.slane %v3787_v49, 5  ;;  %v3797_v49 = vshll.u32 %v5637_v18, 16  ;;  %v3817_v0 = vrot.slane %v3815_v21, 4 }
  0xe5   : > { %6352 = vmatpush3.bf16.msra.mxu1 %v7832_v33  ;;  %6275 = vmatprep.mubr.bf16.mxu1 %v5541_v54  ;;  %v6575_v33 = vld [vmem:[%s9352_s1 + $0x220] sm:$0xff]   ;;  %v3793_v54 = vrot.slane %v3791_v45, 4  ;;  %v8153_v45 = vrot.slane %v3811_v23, 5  ;;  %v6579_v23 = vld [vmem:[%s9352_s1 + $0x218] sm:$0xff]  }
  0xe6   : > { %6353 = vmatprep.subr.bf16.mxu1 %v6566_v28  ;;  %6402 = vmatpush3.bf16.msra.mxu0 %v6567_v20  ;;  %v3783_v20 = vrot.slane %v3781_v24, 5 }
  0xe7   : > { %6403 = vmatprep.subr.bf16.mxu0 %v6571_v55  ;;  %v3794_v21 = vor.u32 %v3793_v54, %v8141_v2  ;;  %v3818_v54 = vor.u32 %v3817_v0, %v8153_v45 }
  0xe9   : > { %6324 = vmatmul.mubr.bf16.gmra.mxu0 %v6565_v48  ;;  %6354 = vmatpush3.bf16.msra.mxu1 %v6566_v28  ;;  %v5739_v48 = vrot.slane %v5723_v15, 9  ;;  %v4552_v28 = vrot.slane %v5637_v18, 5  ;;  %v4551_v18 = vrot.slane %v4549_v3, 4  ;;  %v3821_v15 = vshll.u32 %v8146_v63, 16 }
  0xea   : > { %6327 = vmatprep.mubr.bf16.mxu0 %v6568_v38  ;;  %6355 = vmatprep.subr.bf16.mxu1 %v6570_v36  ;;  %v3829_v38 = vshll.u32 %v5641_v51, 16  ;;  %v4556_v51 = vrot.slane %v8126_v61, 5  ;;  %v3839_v61 = vshrl.u32 %v8156_v43, 16 }
  0xeb   : > { %6404 = vmatpush3.bf16.msra.mxu0 %v6571_v55  ;;  %v3784_v55 = vor.u32 %v3783_v20, %v3780_v60  ;;  %v6578_v60 = vld [vmem:[%s9352_s1 + $0x1d8] sm:$0xff]   ;;  %v8179_v20 = vrot.slane %v3797_v49, 5  ;;  %v6583_v49 = vld [vmem:[%s9352_s1 + $0x210] sm:$0xff]  }
  0xec   : > { %v8151_v24 = vpop.f32.mrf.mxu0  ;;  %6276 = vmatmul.mubr.bf16.gmra.mxu1 %v5542_v40  ;;  %6405 = vmatprep.subr.bf16.mxu0 %v6575_v33  ;;  %v8161_v14 = vpop.f32.mrf.mxu1  ;;  %v3808_v40 = vor.u32 %v3807_v47, %v3804_v11  ;;  %v3828_v47 = vrot.slane %v3826_v37, 4  ;;  %v3831_v11 = vrot.slane %v3829_v38, 5  ;;  %v8206_v37 = vld [vmem:[%s6652_s23 + $0x40] sm:$0xf]  ;;  %v4558_v50 = vrot.slane %v4556_v51, 4 }
  0xed   : > { %9441 = vst [vmem:[#allocation2_spill] sm:$0xff] %v8161_v14  ;;  %6279 = vmatprep.mubr.bf16.mxu1 %v5543_v41  ;;  %6356 = vmatpush3.bf16.msra.mxu1 %v6570_v36  ;;  %v8186_v41 = vsel %vm6994_vm5, %v5739_v48, %v4549_v3  ;;  %v5644_v36 = vld [vmem:[%s6652_s23 + $0x3c] sm:$0xf]  ;;  %v8195_v0 = vrot.slane %v3784_v55, 4  ;;  %v8201_v3 = vsel %vm6994_vm5, %v4551_v18, %v4552_v28  ;;  %v8203_v48 = vrot.slane %v3821_v15, 5  ;;  %v6582_v55 = vld [vmem:[%s9352_s1 + $0x1d0] sm:$0xff]  }
  0xee   : > { %v8172_v57 = vpop.f32.mrf.mxu0  ;;  %6357 = vmatprep.subr.bf16.mxu1 %v6574_v42  ;;  %v8190_v52 = vpop.f32.mrf.mxu1  ;;  %v8213_v22 = vrot.slane %v3808_v40, 4  ;;  %v4559_v28 = vrot.slane %v8146_v63, 5  ;;  %v3819_v18 = vrot.slane %v3818_v54, 4  ;;  %v8217_v15 = vld [vmem:[%s6652_s23 + $0x38] sm:$0x1]  ;;  %v3853_v30 = vshll.u32 %v5644_v36, 16 }
  0xef   : > { %6406 = vmatpush3.bf16.msra.mxu0 %v6575_v33  ;;  %9442 = vst [vmem:[#allocation5_spill] sm:$0xff] %v8190_v52  ;;  %v8197_v33 = vrot.slane %v3794_v21, 4  ;;  %v5740_v21 = vrot.slane %v5724_v6, 9  ;;  %v3832_v1 = vor.u32 %v3831_v11, %v3828_v47  ;;  %v8221_v52 = vrot.slane %v3839_v61, 4  ;;  %v5725_v40 = vld [vmem:[%s6652_s23 + $0x30] sm:$0xe] }
  0xf0   : > { %6407 = vmatprep.subr.bf16.mxu0 %v6579_v23  ;;  %v8208_v38 = vpop.f32.mrf.mxu0  ;;  %v3859_v6 = vshll.u32 %v8206_v37, 16  ;;  %v3863_v63 = vshrl.u32 %v8206_v37, 16  ;;  %v8229_v54 = vpop.f32.mrf.mxu1  ;;  %v9445_v11 = vcombine.low %v7942_v31, %v7933_v19  ;;  %v6573_v61 = vld [vmem:[%s6652_s23 + $0x6c] sm:$0xff]   ;;  %v8262_v19 = vsel %vm6994_vm5, %v4558_v50, %v4559_v28  ;;  %v8280_v28 = vld [vmem:[%s6652_s23 + $0x44] sm:$0x1] }
  0xf1   : > { %6328 = vmatmul.mubr.bf16.gmra.mxu0 %v6569_v7  ;;  %6358 = vmatpush3.bf16.msra.mxu1 %v6574_v42  ;;  %v8219_v7 = vrot.slane %v3835_v39, 5  ;;  %v3850_v42 = vshrl.u32 %v5644_v36, 16  ;;  %9444 = vst [vmem:[#allocation4_spill] sm:$0xff] %v8229_v54  ;;  %v3790_v39 = vsel %vm6683_vm2, %v8195_v0, %v8141_v2  ;;  %v3800_v47 = vsel %vm6683_vm2, %v8197_v33, %v8179_v20  ;;  %v6576_v36 = vld [vmem:[%s6652_s23 + $0x78] sm:$0xff]   ;;  %v8273_v33 = vld [vmem:[%s6652_s23 + $0x4c] sm:$0xf] }
  0xf2   : > { %6331 = vmatprep.mubr.bf16.mxu0 %v6572_v62  ;;  %6359 = vmatprep.subr.bf16.mxu1 %v6578_v60  ;;  %v9443_v62 = vcombine.low %v7911_v10, %v7915_v59  ;;  %v4563_v59 = vrot.slane %v8156_v43, 5  ;;  %v3814_v2 = vsel %vm6683_vm2, %v8213_v22, %v8153_v45  ;;  %v8258_v20 = vsel %vm6994_vm5, %v5740_v21, %v4556_v51  ;;  %v5647_v43 = vld [vmem:[%s6652_s23 + $0x48] sm:$0xf]  ;;  %v8284_v54 = vpop.f32.mrf.mxu1  ;;  %v5726_v14 = vld [vmem:[%s6652_s23 + $0x3c] sm:$0xe] }
  0xf3   : > { %6408 = vmatpush3.bf16.msra.mxu0 %v6579_v23  ;;  %v6587_v23 = vld [vmem:[%s9352_s1 + $0x208] sm:$0xff]   ;;  %v3845_v31 = vshll.u32 %v8217_v15, 16  ;;  %v3824_v22 = vsel %vm6683_vm2, %v3819_v18, %v8203_v48  ;;  %v5741_v45 = vrot.slane %v5725_v40, 9  ;;  %v3852_v0 = vrot.slane %v3850_v42, 4  ;;  %9447 = vst [vmem:[#allocation6_spill] sm:$0xff] %v8284_v54  ;;  %v6590_v42 = vld [vmem:[%s9352_s1 + $0x1c0] sm:$0xff]  }
  0xf4   : > { %6280 = vmatmul.mubr.bf16.gmra.mxu1 %v9443_v62  ;;  %6409 = vmatprep.subr.bf16.mxu0 %v6583_v49  ;;  %v8250_v62 = vpop.f32.mrf.mxu0  ;;  %v3855_v51 = vrot.slane %v3853_v30, 5  ;;  %v8275_v50 = vrot.slane %v3832_v1, 4  ;;  %v3842_v21 = vor.u32 %v8221_v52, %v8219_v7  ;;  %v3865_v10 = vrot.slane %v3863_v63, 4  ;;  %v6591_v30 = vld [vmem:[%s9352_s1 + $0x200] sm:$0xff]  }
  0xf5   : > { %6283 = vmatprep.mubr.bf16.mxu1 %v9445_v11  ;;  %6360 = vmatpush3.bf16.msra.mxu1 %v6578_v60  ;;  %9446 = vst [vmem:[#allocation3_spill] sm:$0xff] %v8250_v62  ;;  %v6586_v60 = vld [vmem:[%s9352_s1 + $0x1c8] sm:$0xff]   ;;  %v8282_v11 = vrot.slane %v3859_v6, 5  ;;  %v4565_v48 = vrot.slane %v4563_v59, 4  ;;  %v3874_v1 = vshrl.u32 %v5647_v43, 16  ;;  %v3877_v18 = vshll.u32 %v5647_v43, 16 }
  0xf6   : > { %6361 = vmatprep.subr.bf16.mxu1 %v6582_v55  ;;  %v8295_v40 = vcombine.low %v3790_v39, %v3800_v47  ;;  %v3887_v63 = vshrl.u32 %v8273_v33, 16  ;;  %v8303_v43 = vrot.slane %v3845_v31, 5  ;;  %v3869_v54 = vshll.u32 %v8280_v28, 16  ;;  %v5650_v39 = vld [vmem:[%s6652_s23 + $0x54] sm:$0xf]  ;;  %v6577_v6 = vld [vmem:[%s6652_s23 + $0x84] sm:$0xff]  }
  0xf7   : > { %6410 = vmatpush3.bf16.msra.mxu0 %v6583_v49  ;;  %v4566_v49 = vrot.slane %v8217_v15, 5  ;;  %v8290_v52 = vpop.f32.mrf.mxu0  ;;  %v3883_v15 = vshll.u32 %v8273_v33, 16  ;;  %v4570_v31 = vrot.slane %v8206_v37, 5  ;;  %v9451_v37 = vcombine.low %v7966_v12, %v7970_v46  ;;  %v6580_v47 = vld [vmem:[%s6652_s23 + $0x90] sm:$0xff]  }
  0xf8   : > { %6411 = vmatprep.subr.bf16.mxu0 %v6587_v23  ;;  %9448 = vst [vmem:[#allocation7_spill] sm:$0xff] %v8290_v52 }
  0xf9   : > { %6332 = vmatmul.mubr.bf16.gmra.mxu0 %v6573_v61  ;;  %6362 = vmatpush3.bf16.msra.mxu1 %v6582_v55  ;;  %v8301_v61 = vcombine.low %v3814_v2, %v3824_v22  ;;  %v3856_v55 = vor.u32 %v3855_v51, %v3852_v0  ;;  %v3866_v2 = vor.u32 %v3865_v10, %v8282_v11  ;;  %v8319_v22 = vld [vmem:[%s6652_s23 + $0x58] sm:$0xf]  ;;  %v8326_v51 = vrot.slane %v3842_v21, 4 }
  0xfa   : > { %6335 = vmatprep.mubr.bf16.mxu0 %v6576_v36  ;;  %6363 = vmatprep.subr.bf16.mxu1 %v6586_v60  ;;  %v8314_v36 = vsel %vm6994_vm5, %v5741_v45, %v4563_v59  ;;  %v9449_v0 = vcombine.low %v7949_v16, %v7954_v53  ;;  %v8330_v59 = vsel %vm6994_vm5, %v4565_v48, %v4566_v49  ;;  %v3876_v45 = vrot.slane %v3874_v1, 4  ;;  %v8337_v16 = vpop.f32.mrf.mxu0  ;;  %v5649_v1 = vld [vmem:[%s6652_s23 + $0x50] sm:$0x1] }
  0xfb   : > { %6412 = vmatpush3.bf16.msra.mxu0 %v6587_v23  ;;  %v8324_v23 = vpop.f32.mrf.mxu1  ;;  %v3879_v10 = vrot.slane %v3877_v18, 5  ;;  %9452 = vst [vmem:[#allocation9_spill] sm:$0xff] %v8337_v16  ;;  %v5742_v53 = vrot.slane %v5726_v14, 9  ;;  %v3889_v21 = vrot.slane %v3887_v63, 4  ;;  %v3857_v48 = vrot.slane %v3856_v55, 4 }
  0xfc   : > { %6284 = vmatmul.mubr.bf16.gmra.mxu1 %v9449_v0  ;;  %9450 = vst [vmem:[#allocation8_spill] sm:$0xff] %v8324_v23  ;;  %6413 = vmatprep.subr.bf16.mxu0 %v6591_v30  ;;  %v8339_v0 = vrot.slane %v3883_v15, 5  ;;  %v3898_v23 = vshrl.u32 %v5650_v39, 16  ;;  %v3871_v49 = vrot.slane %v3869_v54, 5  ;;  %v3901_v18 = vshll.u32 %v5650_v39, 16  ;;  %v8355_v39 = vpop.f32.mrf.mxu0 }
  0xfd   : > { %6287 = vmatprep.mubr.bf16.mxu1 %v9451_v37  ;;  %6364 = vmatpush3.bf16.msra.mxu1 %v6586_v60  ;;  %v3907_v52 = vshll.u32 %v8319_v22, 16  ;;  %v3867_v12 = vrot.slane %v3866_v2, 4  ;;  %v4572_v46 = vrot.slane %v4570_v31, 4  ;;  %v4573_v37 = vrot.slane %v8280_v28, 5  ;;  %v8345_v60 = vpop.f32.mrf.mxu1  ;;  %v5653_v55 = vld [vmem:[%s6652_s23 + $0x60] sm:$0xf] }
  0xfe   : > { %6365 = vmatprep.subr.bf16.mxu1 %v6590_v42  ;;  %v3911_v14 = vshrl.u32 %v8319_v22, 16  ;;  %9453 = vst [vmem:[#allocation10_spill] sm:$0xff] %v8345_v60  ;;  %v3848_v15 = vsel %vm6683_vm2, %v8326_v51, %v8303_v43  ;;  %v3880_v63 = vor.u32 %v3879_v10, %v3876_v45  ;;  %v3890_v28 = vor.u32 %v3889_v21, %v8339_v0  ;;  %v5727_v60 = vld [vmem:[%s6652_s23 + $0x48] sm:$0xe] }
  0xff   : > { %6414 = vmatpush3.bf16.msra.mxu0 %v6591_v30  ;;  %v4577_v30 = vrot.slane %v8273_v33, 5  ;;  %v3893_v2 = vshll.u32 %v5649_v1, 16  ;;  %v3900_v16 = vrot.slane %v3898_v23, 4  ;;  %v3903_v62 = vrot.slane %v3901_v18, 5  ;;  %v8380_v10 = vpop.f32.mrf.mxu1 }
 0x100   : > { %v3862_v43 = vsel %vm6683_vm2, %v3857_v48, %v8282_v11  ;;  %v8364_v33 = vsel %vm6994_vm5, %v5742_v53, %v4570_v31  ;;  %v3872_v51 = vsel %vm6683_vm2, %v3867_v12, %v3871_v49  ;;  %v8372_v23 = vsel %vm6994_vm5, %v4572_v46, %v4573_v37  ;;  %9455 = vst [vmem:[#allocation11_spill] sm:$0xff] %v8380_v10  ;;  %v8383_v49 = vld [vmem:[%s6652_s23 + $0x64] sm:$0xf]  ;;  %v6581_v12 = vld [vmem:[%s6652_s23 + $0x9c] sm:$0xff]   ;;  %v8389_v46 = vpop.f32.mrf.mxu0 }
 0x101   : > { %6336 = vmatmul.mubr.bf16.gmra.mxu0 %v6577_v6  ;;  %6366 = vmatpush3.bf16.msra.mxu1 %v6590_v42  ;;  %v8366_v6 = vrot.slane %v3907_v52, 5  ;;  %v3913_v42 = vrot.slane %v3911_v14, 4  ;;  %v3922_v45 = vshrl.u32 %v5653_v55, 16  ;;  %v3925_v11 = vshll.u32 %v5653_v55, 16  ;;  %v6584_v55 = vld [vmem:[%s6652_s23 + $0xa8] sm:$0xff]  }
 0x102   : > { %6339 = vmatprep.mubr.bf16.mxu0 %v6580_v47  ;;  %v8375_v47 = vld [vmem:[%s6652_s23 + $0x5c] sm:$0x1]  ;;  %v9454_v31 = vcombine.low %v7982_v34, %v7991_v17  ;;  %v3881_v52 = vrot.slane %v3880_v63, 4  ;;  %v5743_v53 = vrot.slane %v5727_v60, 9  ;;  %v4579_v21 = vrot.slane %v4577_v30, 4 }
 0x103   : > { %v4580_v48 = vrot.slane %v5649_v1, 5  ;;  %v9456_v18 = vcombine.low %v8008_v32, %v8012_v58  ;;  %v3891_v37 = vrot.slane %v3890_v28, 4  ;;  %v3895_v14 = vrot.slane %v3893_v2, 5  ;;  %v5728_v63 = vld [vmem:[%s6652_s23 + $0x54] sm:$0xe]  ;;  %v8407_v28 = vpop.f32.mrf.mxu1 }
 0x104   : > { %6288 = vmatmul.mubr.bf16.gmra.mxu1 %v9454_v31  ;;  %v3904_v34 = vor.u32 %v3903_v62, %v3900_v16  ;;  %v4584_v17 = vrot.slane %v8319_v22, 5  ;;  %v3914_v60 = vor.u32 %v3913_v42, %v8366_v6  ;;  %v3917_v1 = vshll.u32 %v8375_v47, 16  ;;  %9458 = vst [vmem:[#allocation12_spill] sm:$0xff] %v8407_v28  ;;  %v5729_v62 = vld [vmem:[%s6652_s23 + $0x60] sm:$0xe] }
 0x105   : > { %6291 = vmatprep.mubr.bf16.mxu1 %v9456_v18  ;;  %v3924_v31 = vrot.slane %v3922_v45, 4  ;;  %v3927_v54 = vrot.slane %v3925_v11, 5  ;;  %v9457_v32 = vsel %vm6683_vm2, %v8275_v50, %v8219_v7  ;;  %v3931_v22 = vshll.u32 %v8383_v49, 16 }
 0x106   : > { %v8401_v58 = vcombine.low %v9457_v32, %v3848_v15  ;;  %v3935_v16 = vshrl.u32 %v8383_v49, 16  ;;  %v8409_v2 = vcombine.low %v3862_v43, %v3872_v51  ;;  %v3886_v42 = vsel %vm6683_vm2, %v3881_v52, %v8339_v0  ;;  %v5656_v15 = vld [vmem:[%s6652_s23 + $0x6c] sm:$0xf]  ;;  %v8427_v32 = vld [vmem:[%s6652_s23 + $0x70] sm:$0xf] }
 0x107   : > { %v8416_v7 = vsel %vm6994_vm5, %v5743_v53, %v4577_v30  ;;  %v8420_v50 = vsel %vm6994_vm5, %v4579_v21, %v4580_v48  ;;  %v8423_v45 = vpop.f32.mrf.mxu0  ;;  %v3905_v43 = vrot.slane %v3904_v34, 4  ;;  %v5744_v51 = vrot.slane %v5728_v63, 9  ;;  %v5655_v53 = vld [vmem:[%s6652_s23 + $0x68] sm:$0x1] }
 0x108   : > { %9459 = vst [vmem:[#allocation13_spill] sm:$0xff] %v8423_v45  ;;  %v4586_v11 = vrot.slane %v4584_v17, 4  ;;  %v4587_v18 = vrot.slane %v8375_v47, 5  ;;  %v3896_v0 = vsel %vm6683_vm2, %v3891_v37, %v3895_v14  ;;  %v3915_v30 = vrot.slane %v3914_v60, 4  ;;  %v5731_v45 = vld [vmem:[%s6652_s23 + $0x78] sm:$0xe] }
 0x109   : > { %6340 = vmatmul.mubr.bf16.gmra.mxu0 %v6581_v12  ;;  %v3919_v52 = vrot.slane %v3917_v1, 5  ;;  %v3928_v21 = vor.u32 %v3927_v54, %v3924_v31  ;;  %v8432_v48 = vrot.slane %v3931_v22, 5  ;;  %v3937_v12 = vrot.slane %v3935_v16, 4  ;;  %v6585_v31 = vld [vmem:[%s6652_s23 + $0xb4] sm:$0xff]  }
 0x10a   : > { %6343 = vmatprep.mubr.bf16.mxu0 %v6584_v55  ;;  %v3946_v34 = vshrl.u32 %v5656_v15, 16  ;;  %v3949_v63 = vshll.u32 %v5656_v15, 16  ;;  %v9460_v47 = vcombine.low %v8028_v5, %v8033_v25  ;;  %v4591_v14 = vrot.slane %v8383_v49, 5  ;;  %v8449_v5 = vpop.f32.mrf.mxu0 }
 0x10b   : > { %v3955_v54 = vshll.u32 %v8427_v32, 16  ;;  %v3959_v60 = vshrl.u32 %v8427_v32, 16  ;;  %v9462_v1 = vcombine.low %v8046_v9, %v8040_v29  ;;  %9463 = vst [vmem:[#allocation15_spill] sm:$0xff] %v8449_v5  ;;  %v8451_v25 = vcombine.low %v3886_v42, %v3896_v0  ;;  %v5659_v29 = vld [vmem:[%s6652_s23 + $0x78] sm:$0xf]  ;;  %v6588_v9 = vld [vmem:[%s6652_s23 + $0xc0] sm:$0xff]  }
 0x10c   : > { %6292 = vmatmul.mubr.bf16.gmra.mxu1 %v9460_v47  ;;  %v8438_v55 = vpop.f32.mrf.mxu1  ;;  %v3910_v22 = vsel %vm6683_vm2, %v3905_v43, %v8366_v6  ;;  %v8458_v49 = vsel %vm6994_vm5, %v5744_v51, %v4584_v17  ;;  %v8462_v16 = vsel %vm6994_vm5, %v4586_v11, %v4587_v18  ;;  %v3920_v15 = vsel %vm6683_vm2, %v3915_v30, %v3919_v52  ;;  %v8475_v43 = vld [vmem:[%s6652_s23 + $0x74] sm:$0x1]  ;;  %v8532_v5 = vld [vmem:[%s6652_s23 + $0x8c] sm:$0x1] }
 0x10d   : > { %9461 = vst [vmem:[#allocation14_spill] sm:$0xff] %v8438_v55  ;;  %6295 = vmatprep.mubr.bf16.mxu1 %v9462_v1  ;;  %v8468_v47 = vrot.slane %v3928_v21, 4  ;;  %v3941_v42 = vshll.u32 %v5655_v53, 16  ;;  %v5745_v0 = vrot.slane %v5729_v62, 9  ;;  %v8471_v1 = vld [vmem:[%s6652_s23 + $0x7c] sm:$0xf]  ;;  %v3938_v6 = vor.u32 %v3937_v12, %v8432_v48  ;;  %v8481_v21 = vpop.f32.mrf.mxu0 }
 0x10e   : > { %v4594_v17 = vrot.slane %v5655_v53, 5  ;;  %v3948_v51 = vrot.slane %v3946_v34, 4  ;;  %v3951_v11 = vrot.slane %v3949_v63, 5  ;;  %v8477_v18 = vpop.f32.mrf.mxu1  ;;  %v4593_v37 = vrot.slane %v4591_v14, 4  ;;  %9465 = vst [vmem:[#allocation17_spill] sm:$0xff] %v8481_v21 }
 0x10f   : > { %9464 = vst [vmem:[#allocation16_spill] sm:$0xff] %v8477_v18  ;;  %v8479_v55 = vrot.slane %v3955_v54, 5  ;;  %v3961_v30 = vrot.slane %v3959_v60, 4  ;;  %v3970_v52 = vshrl.u32 %v5659_v29, 16  ;;  %v5730_v53 = vld [vmem:[%s6652_s23 + $0x6c] sm:$0xe]  ;;  %v8488_v18 = vcombine.low %v3910_v22, %v3920_v15 }
 0x110   : > { %v3973_v12 = vshll.u32 %v5659_v29, 16  ;;  %v3979_v34 = vshll.u32 %v8471_v1, 16  ;;  %v3983_v63 = vshrl.u32 %v8471_v1, 16  ;;  %v8490_v54 = vrot.slane %v3941_v42, 5  ;;  %v5662_v62 = vld [vmem:[%s6652_s23 + $0x84] sm:$0xf]  ;;  %v8511_v42 = vpop.f32.mrf.mxu1 }
 0x111   : > { %6344 = vmatmul.mubr.bf16.gmra.mxu0 %v6585_v31  ;;  %9466 = vst [vmem:[#allocation18_spill] sm:$0xff] %v8488_v18  ;;  %v8494_v60 = vsel %vm6994_vm5, %v5745_v0, %v4591_v14  ;;  %v3965_v31 = vshll.u32 %v8475_v43, 16  ;;  %v8502_v28 = vrot.slane %v3938_v6, 4  ;;  %v4598_v22 = vrot.slane %v8427_v32, 5  ;;  %v8506_v15 = vld [vmem:[%s6652_s23 + $0x88] sm:$0xf] }
 0x112   : > { %6347 = vmatprep.mubr.bf16.mxu0 %v6588_v9  ;;  %v3952_v9 = vor.u32 %v3951_v11, %v3948_v51  ;;  %v9467_v14 = vcombine.low %v8055_v4, %v8059_v13  ;;  %9468 = vst [vmem:[#allocation19_spill] sm:$0xff] %v8511_v42  ;;  %v6589_v0 = vld [vmem:[%s6652_s23 + $0xcc] sm:$0xff]   ;;  %v8516_v10 = vsel %vm6994_vm5, %v4593_v37, %v4594_v17  ;;  %v5746_v6 = vrot.slane %v5730_v53, 9  ;;  %v8519_v11 = vpop.f32.mrf.mxu0  ;;  %v8525_v4 = vld [vmem:[%s6652_s23 + $0x80] sm:$0x1] }
 0x113   : > { %v3962_v29 = vor.u32 %v3961_v30, %v8479_v55  ;;  %v3972_v51 = vrot.slane %v3970_v52, 4  ;;  %9469 = vst [vmem:[#allocation20_spill] sm:$0xff] %v8519_v11  ;;  %v9470_v32 = vcombine.low %v8090_v26, %v8094_v35  ;;  %v3975_v13 = vrot.slane %v3973_v12, 5 }
 0x114   : > { %6296 = vmatmul.mubr.bf16.gmra.mxu1 %v9467_v14  ;;  %v8527_v14 = vrot.slane %v3979_v34, 5  ;;  %v3985_v42 = vrot.slane %v3983_v63, 4  ;;  %v3994_v21 = vshrl.u32 %v5662_v62, 16  ;;  %v3967_v37 = vrot.slane %v3965_v31, 5 }
 0x115   : > { %6299 = vmatprep.mubr.bf16.mxu1 %v9470_v32  ;;  %v4601_v17 = vrot.slane %v8475_v43, 5  ;;  %v3997_v30 = vshll.u32 %v5662_v62, 16  ;;  %v4003_v52 = vshll.u32 %v8506_v15, 16  ;;  %v3953_v53 = vrot.slane %v3952_v9, 4  ;;  %v8535_v32 = vpop.f32.mrf.mxu1 }
 0x116   : > { %v4600_v11 = vrot.slane %v4598_v22, 4  ;;  %v3996_v26 = vrot.slane %v3994_v21, 4  ;;  %v4007_v35 = vshrl.u32 %v8506_v15, 16  ;;  %v3963_v12 = vrot.slane %v3962_v29, 4 }
 0x117   : > { %v3989_v34 = vshll.u32 %v8525_v4, 16  ;;  %v3999_v63 = vrot.slane %v3997_v30, 5  ;;  %v8538_v31 = vrot.slane %v4003_v52, 5  ;;  %v3976_v62 = vor.u32 %v3975_v13, %v3972_v51  ;;  %v5732_v52 = vld [vmem:[%s6652_s23 + $0x84] sm:$0xe] }
 0x118   : > { %v8540_v43 = vpop.f32.mrf.mxu0  ;;  %v3986_v9 = vor.u32 %v3985_v42, %v8527_v14  ;;  %v4605_v21 = vrot.slane %v8471_v1, 5  ;;  %v4009_v18 = vrot.slane %v4007_v35, 4  ;;  %v9471_v29 = vcombine.low %v8186_v41, %v8201_v3 }
 0x119   : > { %6348 = vmatmul.mubr.bf16.gmra.mxu0 %v6589_v0  ;;  %v3944_v30 = vsel %vm6683_vm2, %v8502_v28, %v8490_v54  ;;  %v8556_v51 = vsel %vm6994_vm5, %v5746_v6, %v4598_v22  ;;  %v4013_v42 = vshll.u32 %v8532_v5, 16  ;;  %v3958_v41 = vsel %vm6683_vm2, %v3953_v53, %v8479_v55  ;;  %v5665_v54 = vld [vmem:[%s6652_s23 + $0x90] sm:$0xf] }
 0x11a   : > { %6415 = vmatprep.mubr.bf16.mxu0 %v9471_v29  ;;  %v8559_v1 = vpop.f32.mrf.mxu0  ;;  %v4000_v3 = vor.u32 %v3999_v63, %v3996_v26  ;;  %v4010_v13 = vor.u32 %v4009_v18, %v8538_v31  ;;  %v4612_v28 = vrot.slane %v8506_v15, 5  ;;  %v9473_v22 = vcombine.low %v8103_v44, %v8108_v8 }
 0x11b   : > { %v3968_v6 = vsel %vm6683_vm2, %v3963_v12, %v3967_v37  ;;  %v8577_v55 = vsel %vm6994_vm5, %v4600_v11, %v4601_v17  ;;  %v3991_v53 = vrot.slane %v3989_v34, 5  ;;  %v5747_v18 = vrot.slane %v5731_v45, 9  ;;  %v8586_v12 = vld [vmem:[%s6652_s23 + $0x94] sm:$0xf] }
 0x11c   : > { %v8568_v35 = vpop.f32.mrf.mxu1  ;;  %6300 = vmatmul.mubr.bf16.gmra.mxu1 %v9473_v22  ;;  %v8579_v26 = vpop.f32.mrf.mxu0  ;;  %v3977_v15 = vrot.slane %v3976_v62, 4  ;;  %v3987_v63 = vrot.slane %v3986_v9, 4  ;;  %v4607_v29 = vrot.slane %v4605_v21, 4  ;;  %v4608_v0 = vrot.slane %v8525_v4, 5 }
 0x11d   : > { %9472 = vst [vmem:[#allocation21_spill] sm:$0xff] %v8568_v35  ;;  %6367 = vmatprep.mubr.bf16.mxu1 %v8295_v40  ;;  %v4015_v8 = vrot.slane %v4013_v42, 5  ;;  %v5748_v37 = vrot.slane %v5732_v52, 9  ;;  %v4018_v11 = vshrl.u32 %v5665_v54, 16  ;;  %v4021_v17 = vshll.u32 %v5665_v54, 16 }
 0x11e   : > { %v8583_v44 = vpop.f32.mrf.mxu1  ;;  %v8588_v34 = vpop.f32.mrf.mxu0  ;;  %v4001_v45 = vrot.slane %v4000_v3, 4  ;;  %v4011_v22 = vrot.slane %v4010_v13, 4  ;;  %v4614_v40 = vrot.slane %v4612_v28, 4  ;;  %v4615_v62 = vrot.slane %v8532_v5, 5  ;;  %v8609_v54 = vld [vmem:[%s6652_s23 + $0x98] sm:$0x1] }
 0x11f   : > { %9474 = vst [vmem:[#allocation22_spill] sm:$0xff] %v8583_v44  ;;  %v9476_v4 = vsel %vm6683_vm2, %v8468_v47, %v8432_v48  ;;  %v8600_v52 = vcombine.low %v3958_v41, %v3968_v6  ;;  %v8606_v13 = vsel %vm6994_vm5, %v5747_v18, %v4605_v21  ;;  %v3982_v48 = vsel %vm6683_vm2, %v3977_v15, %v8527_v14  ;;  %v5668_v41 = vld [vmem:[%s6652_s23 + $0x9c] sm:$0xf]  ;;  %v8626_v6 = vld [vmem:[%s6652_s23 + $0xa0] sm:$0xf] }
 0x120   : > { %v8591_v9 = vpop.f32.mrf.mxu1  ;;  %v8598_v42 = vcombine.low %v9476_v4, %v3944_v30  ;;  %v6129_v5 = vpop.f32.mrf.mxu0  ;;  %v3992_v47 = vsel %vm6683_vm2, %v3987_v63, %v3991_v53  ;;  %v8621_v30 = vsel %vm6994_vm5, %v4607_v29, %v4608_v0  ;;  %v4027_v21 = vshll.u32 %v8586_v12, 16  ;;  %v8713_v35 = vld [vmem:[%s6652_s23 + $0xb0] sm:$0x1] }
 0x121   : > { %9475 = vst [vmem:[#allocation23_spill] sm:$0xff] %v8591_v9  ;;  %v9477_v9 = vcombine.low %v8258_v20, %v8262_v19  ;;  %v9479_v20 = vcombine.low %v8314_v36, %v8330_v59  ;;  %v8635_v19 = vsel %vm6994_vm5, %v5748_v37, %v4612_v28  ;;  %v4020_v14 = vrot.slane %v4018_v11, 4  ;;  %v8650_v37 = vld [vmem:[%s6652_s23 + $0x90] sm:$0xe] }
 0x122   : > { %v8628_v18 = vpop.f32.mrf.mxu1  ;;  %v4023_v53 = vrot.slane %v4021_v17, 5  ;;  %v4031_v0 = vshrl.u32 %v8586_v12, 16  ;;  %v1544_v15 = vpop.f32.mrf.mxu0  ;;  %v4006_v63 = vsel %vm6683_vm2, %v4001_v45, %v8538_v31  ;;  %v4016_v29 = vsel %vm6683_vm2, %v4011_v22, %v4015_v8 }
 0x123   : > { %6416 = vmatmul.mubr.bf16.vlgmr.msra.gmra.mxu0 %v9477_v9  ;;  %9478 = vst [vmem:[#allocation24_spill] sm:$0xff] %v8628_v18  ;;  %v8645_v36 = vsel %vm6994_vm5, %v4614_v40, %v4615_v62  ;;  %v4037_v59 = vshll.u32 %v8609_v54, 16  ;;  %v4042_v11 = vshrl.u32 %v5668_v41, 16  ;;  %v4045_v17 = vshll.u32 %v5668_v41, 16 }
 0x124   : > { %6419 = vmatprep.mubr.bf16.mxu0 %v9479_v20  ;;  %v6081_v28 = vpop.f32.mrf.mxu1  ;;  %6368 = vmatmul.mubr.bf16.vlgmr.msra.gmra.mxu1 %v8301_v61  ;;  %v4051_v9 = vshll.u32 %v8626_v6, 16  ;;  %v4055_v31 = vshrl.u32 %v8626_v6, 16  ;;  %v6130_v45 = vpop.f32.mrf.mxu0  ;;  %v8656_v22 = vcombine.low %v3982_v48, %v3992_v47  ;;  %v8660_v40 = vrot.slane %v4027_v21, 5  ;;  %v8674_v61 = vld [vmem:[%s6652_s23 + $0xa4] sm:$0x1] }
 0x125   : > { %v1100_v8 = vadd.f32 %v6081_v28, %v8151_v24  ;;  %6371 = vmatprep.mubr.bf16.mxu1 %v8401_v58  ;;  %v8662_v4 = vcombine.low %v4006_v63, %v4016_v29  ;;  %v4024_v20 = vor.u32 %v4023_v53, %v4020_v14  ;;  %v4033_v24 = vrot.slane %v4031_v0, 4  ;;  %v5671_v28 = vld [vmem:[%s6652_s23 + $0xa8] sm:$0xf]  ;;  %v8679_v14 = vld [vmem:[%s6652_s23 + $0xac] sm:$0xf] }
 0x126   : > { %v1091_v62 = vpop.f32.mrf.mxu1  ;;  %v1547_v48 = vpop.f32.mrf.mxu0  ;;  %v8670_v47 = vrot.slane %v4037_v59, 5  ;;  %v5749_v21 = vrot.slane %v8650_v37, 9  ;;  %v4044_v29 = vrot.slane %v4042_v11, 4  ;;  %v4047_v18 = vrot.slane %v4045_v17, 5 }
 0x127   : > { %v8667_v3 = vadd.f32 %v6129_v5, %v1100_v8  ;;  %v1092_v58 = vadd.f32 %v1091_v62, %v8172_v57  ;;  %v8676_v44 = vrot.slane %v4051_v9, 5  ;;  %v4057_v41 = vrot.slane %v4055_v31, 4  ;;  %v9485_v62 = vld [vmem:[#allocation3_spill] sm:$0xff] }
 0x128   : > { %v6082_v63 = vpop.f32.mrf.mxu1  ;;  %v6133_v5 = vpop.f32.mrf.mxu0  ;;  %v9482_v0 = vcombine.low %v8364_v33, %v8372_v23  ;;  %v4066_v59 = vshrl.u32 %v5671_v28, 16  ;;  %v4069_v37 = vshll.u32 %v5671_v28, 16  ;;  %v9483_v11 = vcombine.low %v8416_v7, %v8420_v50 }
 0x129   : > { %9480 = vst [vmem:[#allocation25_spill] sm:$0xff] %v8667_v3  ;;  %v8681_v53 = vadd.f32 %v1544_v15, %v1092_v58  ;;  %v1103_v57 = vadd.f32 %v6082_v63, %v8208_v38  ;;  %v8690_v17 = vrot.slane %v4024_v20, 4  ;;  %v4034_v15 = vor.u32 %v4033_v24, %v8660_v40  ;;  %v5734_v58 = vld [vmem:[%s6652_s23 + $0x9c] sm:$0xe] }
 0x12a   : > { %v1094_v8 = vpop.f32.mrf.mxu1  ;;  %v4619_v9 = vrot.slane %v8586_v12, 5  ;;  %v4061_v38 = vshll.u32 %v8674_v61, 16  ;;  %v1560_v23 = vpop.f32.mrf.mxu0  ;;  %v4622_v28 = vrot.slane %v8609_v54, 5  ;;  %v4075_v63 = vshll.u32 %v8679_v14, 16 }
 0x12b   : > { %9481 = vst [vmem:[#allocation26_spill] sm:$0xff] %v8681_v53  ;;  %6420 = vmatmul.mubr.bf16.gmra.mxu0 %v9482_v0  ;;  %v8695_v31 = vadd.f32 %v6130_v45, %v1103_v57  ;;  %v1095_v33 = vadd.f32 %v1094_v8, %v9485_v62  ;;  %v4048_v50 = vor.u32 %v4047_v18, %v4044_v29  ;;  %v4626_v12 = vrot.slane %v8626_v6, 5  ;;  %v9486_v57 = vld [vmem:[#allocation7_spill] sm:$0xff]  ;;  %v9487_v6 = vld [vmem:[#allocation9_spill] sm:$0xff] }
 0x12c   : > { %6423 = vmatprep.mubr.bf16.mxu0 %v9483_v11  ;;  %v6085_v7 = vpop.f32.mrf.mxu1  ;;  %6372 = vmatmul.mubr.bf16.gmra.mxu1 %v8409_v2  ;;  %v4058_v20 = vor.u32 %v4057_v41, %v8676_v44  ;;  %v4079_v45 = vshrl.u32 %v8679_v14, 16  ;;  %v6134_v8 = vpop.f32.mrf.mxu0  ;;  %v4068_v54 = vrot.slane %v4066_v59, 4  ;;  %v4071_v11 = vrot.slane %v4069_v37, 5 }
 0x12d   : > { %9484 = vst [vmem:[#allocation27_spill] sm:$0xff] %v8695_v31  ;;  %v8705_v24 = vadd.f32 %v1547_v48, %v1095_v33  ;;  %v1116_v0 = vadd.f32 %v6085_v7, %v9486_v57  ;;  %6375 = vmatprep.mubr.bf16.mxu1 %v8451_v25  ;;  %v4035_v31 = vrot.slane %v4034_v15, 4  ;;  %v4621_v2 = vrot.slane %v4619_v9, 4 }
 0x12e   : > { %v1107_v62 = vpop.f32.mrf.mxu1  ;;  %v4063_v18 = vrot.slane %v4061_v38, 5  ;;  %v5750_v29 = vrot.slane %v5734_v58, 9  ;;  %v1563_v3 = vpop.f32.mrf.mxu0  ;;  %v8715_v48 = vrot.slane %v4075_v63, 5  ;;  %v4081_v33 = vrot.slane %v4079_v45, 4 }
 0x12f   : > { %v8709_v41 = vadd.f32 %v6133_v5, %v1116_v0  ;;  %v1108_v53 = vadd.f32 %v1107_v62, %v9487_v6  ;;  %v4049_v57 = vrot.slane %v4048_v50, 4  ;;  %v4059_v25 = vrot.slane %v4058_v20, 4 }
 0x130   : > { %v6086_v7 = vpop.f32.mrf.mxu1  ;;  %v4628_v59 = vrot.slane %v4626_v12, 4  ;;  %v4629_v37 = vrot.slane %v8674_v61, 5  ;;  %v6137_v38 = vpop.f32.mrf.mxu0  ;;  %v9488_v58 = vcombine.low %v8458_v49, %v8462_v16  ;;  %v8726_v63 = vsel %vm6994_vm5, %v5749_v21, %v4619_v9  ;;  %v5735_v21 = vld [vmem:[%s6652_s23 + $0xa8] sm:$0xe] }
 0x131   : > { %v8718_v15 = vadd.f32 %v1560_v23, %v1108_v53  ;;  %v1119_v5 = vadd.f32 %v6086_v7, %v8355_v39  ;;  %v4072_v50 = vor.u32 %v4071_v11, %v4068_v54  ;;  %v9489_v20 = vcombine.low %v8494_v60, %v8516_v10 }
 0x132   : > { %v1110_v45 = vpop.f32.mrf.mxu1  ;;  %v4030_v39 = vsel %vm6683_vm2, %v8690_v17, %v8660_v40  ;;  %v4040_v49 = vsel %vm6683_vm2, %v4035_v31, %v8670_v47  ;;  %v8740_v16 = vsel %vm6994_vm5, %v4621_v2, %v4622_v28  ;;  %v4085_v61 = vshll.u32 %v8713_v35, 16  ;;  %v1576_v60 = vpop.f32.mrf.mxu0  ;;  %v5674_v17 = vld [vmem:[%s6652_s23 + $0xb4] sm:$0xf]  ;;  %v9490_v47 = vld [vmem:[#allocation18_spill] sm:$0xff]  ;;  %v8769_v2 = vld [vmem:[%s6652_s23 + $0xb8] sm:$0xf] }
 0x133   : > { %6424 = vmatmul.mubr.bf16.gmra.mxu0 %v9488_v58  ;;  %v8744_v53 = vadd.f32 %v6134_v8, %v1119_v5  ;;  %v1111_v10 = vadd.f32 %v1110_v45, %v8389_v46  ;;  %v4082_v9 = vor.u32 %v4081_v33, %v8715_v48  ;;  %v4633_v40 = vrot.slane %v8679_v14, 5  ;;  %v9491_v8 = vld [vmem:[#allocation13_spill] sm:$0xff] }
 0x134   : > { %6427 = vmatprep.mubr.bf16.mxu0 %v9489_v20  ;;  %v6089_v23 = vpop.f32.mrf.mxu1  ;;  %6376 = vmatmul.mubr.bf16.gmra.mxu1 %v9490_v47  ;;  %v4054_v31 = vsel %vm6683_vm2, %v4049_v57, %v8676_v44  ;;  %v4064_v28 = vsel %vm6683_vm2, %v4059_v25, %v4063_v18  ;;  %v8758_v46 = vsel %vm6994_vm5, %v5750_v29, %v4626_v12  ;;  %v6138_v11 = vpop.f32.mrf.mxu0  ;;  %v4073_v62 = vrot.slane %v4072_v50, 4  ;;  %v9492_v57 = vld [vmem:[#allocation15_spill] sm:$0xff]  ;;  %v9496_v47 = vld [vmem:[#allocation20_spill] sm:$0xff] }
 0x135   : > { %v8762_v0 = vsel %vm6994_vm5, %v4628_v59, %v4629_v37  ;;  %v8764_v14 = vadd.f32 %v1563_v3, %v1111_v10  ;;  %v1132_v54 = vadd.f32 %v6089_v23, %v9491_v8  ;;  %6379 = vmatprep.mubr.bf16.mxu1 %v8598_v42  ;;  %v5751_v44 = vrot.slane %v5735_v21, 9 }
 0x136   : > { %v1123_v18 = vpop.f32.mrf.mxu1  ;;  %v4087_v6 = vrot.slane %v4085_v61, 5  ;;  %v4636_v12 = vrot.slane %v8713_v35, 5  ;;  %v4090_v29 = vshrl.u32 %v5674_v17, 16  ;;  %v4093_v33 = vshll.u32 %v5674_v17, 16  ;;  %v1579_v25 = vpop.f32.mrf.mxu0 }
 0x137   : > { %v8772_v7 = vadd.f32 %v6137_v38, %v1132_v54  ;;  %v1124_v3 = vadd.f32 %v1123_v18, %v9492_v57  ;;  %v4083_v59 = vrot.slane %v4082_v9, 4  ;;  %v4635_v37 = vrot.slane %v4633_v40, 4  ;;  %v9493_v38 = vld [vmem:[#allocation17_spill] sm:$0xff] }
 0x138   : > { %v6090_v42 = vpop.f32.mrf.mxu1  ;;  %v8775_v5 = vcombine.low %v4030_v39, %v4040_v49  ;;  %v5781_v58 = vcombine.low %v8726_v63, %v8740_v16  ;;  %v8779_v50 = vcombine.low %v4054_v31, %v4064_v28  ;;  %v4099_v35 = vshll.u32 %v8769_v2, 16  ;;  %v6141_v61 = vpop.f32.mrf.mxu0  ;;  %v5677_v49 = vld [vmem:[%s6652_s23 + $0xc0] sm:$0xf]  ;;  %v8793_v16 = vld [vmem:[%s6652_s23 + $0xc4] sm:$0xf] }
 0x139   : > { %v8782_v45 = vadd.f32 %v1576_v60, %v1124_v3  ;;  %v1135_v20 = vadd.f32 %v6090_v42, %v9493_v38  ;;  %v9494_v21 = vcombine.low %v8556_v51, %v8577_v55  ;;  %v5782_v39 = vcombine.low %v8758_v46, %v8762_v0  ;;  %v9501_v46 = vld [vmem:[#allocation6_spill] sm:$0xff] }
 0x13a   : > { %v4103_v63 = vshrl.u32 %v8769_v2, 16  ;;  %v1126_v10 = vpop.f32.mrf.mxu1  ;;  %v9495_v60 = vcombine.low %v8606_v13, %v8621_v30  ;;  %v4078_v51 = vsel %vm6683_vm2, %v4073_v62, %v8715_v48  ;;  %v8803_v55 = vsel %vm6994_vm5, %v5751_v44, %v4633_v40  ;;  %v1592_v28 = vpop.f32.mrf.mxu0  ;;  %v8815_v30 = vld [vmem:[%s6652_s23 + $0xbc] sm:$0x1]  ;;  %v5736_v48 = vld [vmem:[%s6652_s23 + $0xb4] sm:$0xe] }
 0x13b   : > { %6428 = vmatmul.mubr.bf16.gmra.mxu0 %v9494_v21  ;;  %v4092_v9 = vrot.slane %v4090_v29, 4  ;;  %v4095_v17 = vrot.slane %v4093_v33, 5  ;;  %v8805_v23 = vadd.f32 %v6138_v11, %v1135_v20  ;;  %v1127_v31 = vadd.f32 %v1126_v10, %v9496_v47  ;;  %v8837_v20 = vld [vmem:[%s6652_s23 + $0xc8] sm:$0x1] }
 0x13c   : > { %6431 = vmatprep.mubr.bf16.mxu0 %v9495_v60  ;;  %v4088_v8 = vsel %vm6683_vm2, %v4083_v59, %v4087_v6  ;;  %v8812_v13 = vsel %vm6994_vm5, %v4635_v37, %v4636_v12  ;;  %v6093_v54 = vpop.f32.mrf.mxu1  ;;  %6380 = vmatmul.mubr.bf16.gmra.mxu1 %v8600_v52  ;;  %v8819_v40 = vrot.slane %v4099_v35, 5  ;;  %v4114_v11 = vshrl.u32 %v5677_v49, 16  ;;  %v6142_v29 = vpop.f32.mrf.mxu0 }
 0x13d   : > { %v4117_v62 = vshll.u32 %v5677_v49, 16  ;;  %v4123_v44 = vshll.u32 %v8793_v16, 16  ;;  %v8822_v18 = vadd.f32 %v1579_v25, %v1127_v31  ;;  %v1148_v6 = vadd.f32 %v6093_v54, %v8540_v43  ;;  %6383 = vmatprep.mubr.bf16.mxu1 %v8656_v22 }
 0x13e   : > { %v4105_v12 = vrot.slane %v4103_v63, 4  ;;  %v4127_v33 = vshrl.u32 %v8793_v16, 16  ;;  %v1139_v57 = vpop.f32.mrf.mxu1  ;;  %v4096_v3 = vor.u32 %v4095_v17, %v4092_v9  ;;  %v4109_v52 = vshll.u32 %v8815_v30, 16  ;;  %v1595_v43 = vpop.f32.mrf.mxu0  ;;  %v5680_v9 = vld [vmem:[%s6652_s23 + $0xcc] sm:$0xf] }
 0x13f   : > { %v5752_v59 = vrot.slane %v5736_v48, 9  ;;  %v4640_v37 = vrot.slane %v8769_v2, 5  ;;  %v8829_v42 = vadd.f32 %v6141_v61, %v1148_v6  ;;  %v1140_v25 = vadd.f32 %v1139_v57, %v8559_v1  ;;  %v5737_v48 = vld [vmem:[%s6652_s23 + $0xc0] sm:$0xe] }
 0x140   : > { %v8832_v35 = vcombine.low %v4078_v51, %v4088_v8  ;;  %v5783_v22 = vcombine.low %v8803_v55, %v8812_v13  ;;  %v6094_v38 = vpop.f32.mrf.mxu1  ;;  %v4116_v21 = vrot.slane %v4114_v11, 4  ;;  %v4119_v63 = vrot.slane %v4117_v62, 5  ;;  %v6145_v10 = vpop.f32.mrf.mxu0  ;;  %v8859_v8 = vld [vmem:[%s6652_s23 + $0xd0] sm:$0xf] }
 0x141   : > { %v8839_v49 = vrot.slane %v4123_v44, 5  ;;  %v4129_v2 = vrot.slane %v4127_v33, 4  ;;  %v8841_v61 = vadd.f32 %v1592_v28, %v1140_v25  ;;  %v1151_v1 = vadd.f32 %v6094_v38, %v8579_v26 }
 0x142   : > { %v9497_v60 = vcombine.low %v8635_v19, %v8645_v36  ;;  %v4106_v51 = vor.u32 %v4105_v12, %v8819_v40  ;;  %v4643_v55 = vrot.slane %v8815_v30, 5  ;;  %v1142_v17 = vpop.f32.mrf.mxu1  ;;  %v8850_v47 = vrot.slane %v4096_v3, 4  ;;  %v1608_v13 = vpop.f32.mrf.mxu0 }
 0x143   : > { %v8852_v31 = vrot.slane %v4109_v52, 5  ;;  %v8856_v26 = vsel %vm6994_vm5, %v5752_v59, %v4640_v37  ;;  %v4642_v28 = vrot.slane %v4640_v37, 4  ;;  %v8861_v19 = vadd.f32 %v6142_v29, %v1151_v1  ;;  %v9498_v29 = vld [vmem:[#allocation2_spill] sm:$0xff] }
 0x144   : > { %6432 = vmatmul.mubr.bf16.gmra.mxu0 %v9497_v60  ;;  %v1143_v36 = vadd.f32 %v1142_v17, %v8588_v34  ;;  %v4133_v30 = vshll.u32 %v8837_v20, 16  ;;  %v6097_v54 = vpop.f32.mrf.mxu1  ;;  %6384 = vmatmul.mubr.bf16.gmra.mxu1 %v8662_v4  ;;  %v4120_v11 = vor.u32 %v4119_v63, %v4116_v21  ;;  %v4130_v62 = vor.u32 %v4129_v2, %v8839_v49  ;;  %v6146_v57 = vpop.f32.mrf.mxu0 }
 0x145   : > { %6435 = vmatprep.mubr.bf16.mxu0 %v5781_v58  ;;  %v4647_v58 = vrot.slane %v8793_v16, 5  ;;  %v4138_v44 = vshrl.u32 %v5680_v9, 16  ;;  %v4141_v6 = vshll.u32 %v5680_v9, 16  ;;  %v1164_v33 = vadd.f32 %v6097_v54, %v9498_v29  ;;  %6387 = vmatprep.mubr.bf16.mxu1 %v8775_v5 }
 0x146   : > { %v8869_v12 = vadd.f32 %v1595_v43, %v1143_v36  ;;  %v4147_v34 = vshll.u32 %v8859_v8, 16  ;;  %v4151_v3 = vshrl.u32 %v8859_v8, 16  ;;  %v1155_v16 = vpop.f32.mrf.mxu1  ;;  %v4107_v52 = vrot.slane %v4106_v51, 4  ;;  %v9499_v43 = vld [vmem:[#allocation5_spill] sm:$0xff]  ;;  %v1611_v21 = vpop.f32.mrf.mxu0  ;;  %v9500_v36 = vld [vmem:[#allocation4_spill] sm:$0xff] }
 0x147   : > { %v4644_v4 = vsel %vm6994_vm5, %v4642_v28, %v4643_v55  ;;  %v5753_v59 = vrot.slane %v5737_v48, 9  ;;  %v4650_v37 = vrot.slane %v8837_v20, 5  ;;  %v8878_v25 = vadd.f32 %v6145_v10, %v1164_v33  ;;  %v5682_v20 = vld [vmem:[%s6652_s23 + $0xd4] sm:$0x1] }
 0x148   : > { %v1156_v38 = vadd.f32 %v1155_v16, %v9499_v43  ;;  %v4135_v63 = vrot.slane %v4133_v30, 5  ;;  %v4649_v5 = vrot.slane %v4647_v58, 4  ;;  %v6098_v2 = vpop.f32.mrf.mxu1  ;;  %v4121_v1 = vrot.slane %v4120_v11, 4 }
 0x149   : > { %v4131_v60 = vrot.slane %v4130_v62, 4  ;;  %v4140_v9 = vrot.slane %v4138_v44, 4  ;;  %v4143_v17 = vrot.slane %v4141_v6, 5  ;;  %v1167_v55 = vadd.f32 %v6098_v2, %v9500_v36  ;;  %v6149_v28 = vpop.f32.mrf.mxu0  ;;  %v5738_v6 = vld [vmem:[%s6652_s23 + $0xcc] sm:$0xe] }
 0x14a   : > { %v8881_v51 = vadd.f32 %v1608_v13, %v1156_v38  ;;  %v8888_v10 = vrot.slane %v4147_v34, 5  ;;  %v4153_v30 = vrot.slane %v4151_v3, 4  ;;  %v1158_v48 = vpop.f32.mrf.mxu1  ;;  %v4102_v13 = vsel %vm6683_vm2, %v8850_v47, %v8819_v40 }
 0x14b   : > { %v4112_v54 = vsel %vm6683_vm2, %v4107_v52, %v8852_v31  ;;  %v4654_v11 = vrot.slane %v8859_v8, 5  ;;  %v8898_v62 = vadd.f32 %v6146_v57, %v1167_v55  ;;  %v1159_v0 = vadd.f32 %v1158_v48, %v9501_v46  ;;  %v9502_v57 = vld [vmem:[#allocation8_spill] sm:$0xff] }
 0x14c   : > { %6436 = vmatmul.mubr.bf16.gmra.mxu0 %v5782_v39  ;;  %v1624_v39 = vpop.f32.mrf.mxu0  ;;  %v4648_v44 = vsel %vm6994_vm5, %v5753_v59, %v4647_v58  ;;  %v6101_v29 = vpop.f32.mrf.mxu1  ;;  %6388 = vmatmul.mubr.bf16.gmra.mxu1 %v8779_v50  ;;  %v5784_v40 = vcombine.low %v8856_v26, %v4644_v4  ;;  %v4126_v47 = vsel %vm6683_vm2, %v4121_v1, %v8839_v49  ;;  %v4157_v8 = vshll.u32 %v5682_v20, 16  ;;  %v9505_v48 = vld [vmem:[#allocation12_spill] sm:$0xff] }
 0x14d   : > { %6439 = vmatprep.mubr.bf16.mxu0 %v5783_v22  ;;  %v4651_v22 = vsel %vm6994_vm5, %v4649_v5, %v4650_v37  ;;  %v4144_v31 = vor.u32 %v4143_v17, %v4140_v9  ;;  %v8911_v33 = vadd.f32 %v1611_v21, %v1159_v0  ;;  %v1180_v34 = vadd.f32 %v6101_v29, %v9502_v57  ;;  %v9503_v37 = vld [vmem:[#allocation10_spill] sm:$0xff]  ;;  %v9504_v9 = vld [vmem:[#allocation11_spill] sm:$0xff] }
 0x14e   : > { %v6150_v58 = vpop.f32.mrf.mxu0  ;;  %6391 = vmatprep.mubr.bf16.mxu1 %v8832_v35  ;;  %v4136_v3 = vsel %vm6683_vm2, %v4131_v60, %v4135_v63  ;;  %v4154_v50 = vor.u32 %v4153_v30, %v8888_v10  ;;  %v1171_v16 = vpop.f32.mrf.mxu1  ;;  %v5785_v26 = vcombine.low %v4648_v44, %v4651_v22  ;;  %v5754_v52 = vrot.slane %v5738_v6, 9  ;;  %v9506_v44 = vld [vmem:[#allocation14_spill] sm:$0xff] }
 0x14f   : > { %v4656_v4 = vrot.slane %v4654_v11, 4  ;;  %v4657_v59 = vrot.slane %v5682_v20, 5  ;;  %v8918_v49 = vadd.f32 %v6149_v28, %v1180_v34  ;;  %v1172_v43 = vadd.f32 %v1171_v16, %v9503_v37  ;;  %v9509_v37 = vld [vmem:[#allocation21_spill] sm:$0xff] }
 0x150   : > { %v1627_v38 = vpop.f32.mrf.mxu0  ;;  %v6102_v21 = vpop.f32.mrf.mxu1  ;;  %v5712_v5 = vcombine.low %v4102_v13, %v4112_v54  ;;  %v5713_v2 = vcombine.low %v4126_v47, %v4136_v3  ;;  %v4145_v1 = vrot.slane %v4144_v31, 4  ;;  %v4155_v17 = vrot.slane %v4154_v50, 4  ;;  %v9507_v47 = vld [vmem:[#allocation16_spill] sm:$0xff] }
 0x151   : > { %v8921_v35 = vadd.f32 %v1624_v39, %v1172_v43  ;;  %v1183_v63 = vadd.f32 %v6102_v21, %v9504_v9  ;;  %v4159_v36 = vrot.slane %v4157_v8, 5  ;;  %v4655_v28 = vsel %vm6994_vm5, %v5754_v52, %v4654_v11 }
 0x152   : > { %v6153_v60 = vpop.f32.mrf.mxu0  ;;  %v1174_v55 = vpop.f32.mrf.mxu1  ;;  %v4658_v20 = vsel %vm6994_vm5, %v4656_v4, %v4657_v59  ;;  %v4150_v0 = vsel %vm6683_vm2, %v4145_v1, %v8888_v10  ;;  %v9508_v10 = vld [vmem:[#allocation19_spill] sm:$0xff] }
 0x153   : > { %v8928_v30 = vadd.f32 %v6150_v58, %v1183_v63  ;;  %v1175_v13 = vadd.f32 %v1174_v55, %v9505_v48  ;;  %v4160_v56 = vsel %vm6683_vm2, %v4155_v17, %v4159_v36  ;;  %v5786_v11 = vcombine.low %v4655_v28, %v4658_v20  ;;  %v9511_v17 = vld [vmem:[#allocation23_spill] sm:$0xff]  ;;  %v9512_v20 = vld [vmem:[#allocation24_spill] sm:$0xff] }
 0x154   : > { %6440 = vmatmul.mubr.bf16.gmra.mxu0 %v5784_v40  ;;  %v1640_v54 = vpop.f32.mrf.mxu0  ;;  %v6105_v46 = vpop.f32.mrf.mxu1  ;;  %6392 = vmatmul.mubr.bf16.gmra.mxu1 %v5712_v5  ;;  %v5714_v34 = vcombine.low %v4150_v0, %v4160_v56  ;;  %v9513_v0 = vld [vmem:[#allocation25_spill] sm:$0xff] }
 0x155   : > { %6443 = vmatprep.mubr.bf16.mxu0 %v5785_v26  ;;  %v8934_v39 = vadd.f32 %v1627_v38, %v1175_v13  ;;  %v1196_v22 = vadd.f32 %v6105_v46, %v9506_v44  ;;  %6395 = vmatprep.mubr.bf16.mxu1 %v5713_v2  ;;  %v9510_v2 = vld [vmem:[#allocation22_spill] sm:$0xff] }
 0x156   : > { %v6154_v6 = vpop.f32.mrf.mxu0  ;;  %v1187_v29 = vpop.f32.mrf.mxu1 }
 0x157   : > { %v8939_v40 = vadd.f32 %v6153_v60, %v1196_v22  ;;  %v1188_v31 = vadd.f32 %v1187_v29, %v9507_v47 }
 0x158   : > { %v1643_v8 = vpop.f32.mrf.mxu0  ;;  %v6106_v57 = vpop.f32.mrf.mxu1 }
 0x159   : > { %v8942_v58 = vadd.f32 %v1640_v54, %v1188_v31  ;;  %v1199_v3 = vadd.f32 %v6106_v57, %v9508_v10  ;;  %v9515_v57 = vld [vmem:[#allocation27_spill] sm:$0xff] }
 0x15a   : > { %v6157_v50 = vpop.f32.mrf.mxu0  ;;  %v1190_v16 = vpop.f32.mrf.mxu1 }
 0x15b   : > { %v8945_v26 = vadd.f32 %v6154_v6, %v1199_v3  ;;  %v1191_v27 = vadd.f32 %v1190_v16, %v8535_v32 }
 0x15c   : > { %6444 = vmatmul.mubr.bf16.gmra.mxu0 %v5786_v11  ;;  %v1656_v52 = vpop.f32.mrf.mxu0  ;;  %v6109_v4 = vpop.f32.mrf.mxu1  ;;  %6396 = vmatmul.mubr.bf16.gmra.mxu1 %v5714_v34  ;;  %v9514_v11 = vld [vmem:[#allocation26_spill] sm:$0xff] }
 0x15d   : > { %v8948_v59 = vadd.f32 %v1643_v8, %v1191_v27  ;;  %v1212_v43 = vadd.f32 %v6109_v4, %v9509_v37 }
 0x15e   : > { %v6158_v38 = vpop.f32.mrf.mxu0  ;;  %v1203_v21 = vpop.f32.mrf.mxu1 }
 0x15f   : > { %v8951_v5 = vadd.f32 %v6157_v50, %v1212_v43  ;;  %v1204_v1 = vadd.f32 %v1203_v21, %v9510_v2 }
 0x160   : > { %v1659_v9 = vpop.f32.mrf.mxu0  ;;  %v6110_v63 = vpop.f32.mrf.mxu1 }
 0x161   : > { %v8954_v60 = vadd.f32 %v1656_v52, %v1204_v1  ;;  %v1215_v36 = vadd.f32 %v6110_v63, %v9511_v17 }
 0x162   : > { %v6225_v32 = vpop.f32.mrf.mxu0  ;;  %v1206_v55 = vpop.f32.mrf.mxu1 }
 0x163   : > { %v8957_v28 = vadd.f32 %v6158_v38, %v1215_v36  ;;  %v1207_v48 = vadd.f32 %v1206_v55, %v9512_v20 }
 0x164   : > { %v2685_v13 = vpop.f32.mrf.mxu0  ;;  %v6177_v54 = vpop.f32.mrf.mxu1 }
 0x165   : > { %v8960_v46 = vadd.f32 %v1659_v9, %v1207_v48  ;;  %v2060_v44 = vadd.f32 %v6177_v54, %v9513_v0 }
 0x166   : > { %v6226_v22 = vpop.f32.mrf.mxu0  ;;  %v1931_v6 = vpop.f32.mrf.mxu1 }
 0x167   : > { %v8963_v56 = vadd.f32 %v6225_v32, %v2060_v44  ;;  %v2058_v29 = vadd.f32 %v1931_v6, %v9514_v11 }
 0x168   : > { %v2688_v47 = vpop.f32.mrf.mxu0  ;;  %v6178_v31 = vpop.f32.mrf.mxu1 }
 0x169   : > { %v8966_v8 = vadd.f32 %v2685_v13, %v2058_v29  ;;  %v2061_v34 = vadd.f32 %v6178_v31, %v9515_v57 }
 0x16a   : > { %v6229_v10 = vpop.f32.mrf.mxu0  ;;  %v1934_v3 = vpop.f32.mrf.mxu1 }
 0x16b   : > { %v8969_v50 = vadd.f32 %v6226_v22, %v2061_v34  ;;  %v2059_v16 = vadd.f32 %v1934_v3, %v8705_v24 }
 0x16c   : > { %v2701_v27 = vpop.f32.mrf.mxu0  ;;  %v6181_v52 = vpop.f32.mrf.mxu1 }
 0x16d   : > { %v8972_v4 = vadd.f32 %v2688_v47, %v2059_v16  ;;  %v2064_v37 = vadd.f32 %v6181_v52, %v8709_v41 }
 0x16e   : > { %v6230_v43 = vpop.f32.mrf.mxu0  ;;  %v1947_v38 = vpop.f32.mrf.mxu1 }
 0x16f   : > { %v8975_v21 = vadd.f32 %v6229_v10, %v2064_v37  ;;  %v2062_v2 = vadd.f32 %v1947_v38, %v8718_v15 }
 0x170   : > { %v2704_v1 = vpop.f32.mrf.mxu0  ;;  %v6182_v9 = vpop.f32.mrf.mxu1 }
 0x171   : > { %v8978_v63 = vadd.f32 %v2701_v27, %v2062_v2  ;;  %v2065_v17 = vadd.f32 %v6182_v9, %v8744_v53 }
 0x172   : > { %v6233_v36 = vpop.f32.mrf.mxu0  ;;  %v1950_v24 = vpop.f32.mrf.mxu1 }
 0x173   : > { %v8981_v32 = vadd.f32 %v6230_v43, %v2065_v17  ;;  %v2063_v55 = vadd.f32 %v1950_v24, %v8764_v14 }
 0x174   : > { %v2717_v20 = vpop.f32.mrf.mxu0  ;;  %v6185_v41 = vpop.f32.mrf.mxu1 }
 0x175   : > { %v8984_v48 = vadd.f32 %v2704_v1, %v2063_v55  ;;  %v2068_v13 = vadd.f32 %v6185_v41, %v8772_v7 }
 0x176   : > { %v6234_v54 = vpop.f32.mrf.mxu0  ;;  %v1963_v15 = vpop.f32.mrf.mxu1 }
 0x177   : > { %v8987_v0 = vadd.f32 %v6233_v36, %v2068_v13  ;;  %v2066_v44 = vadd.f32 %v1963_v15, %v8782_v45 }
 0x178   : > { %v2720_v22 = vpop.f32.mrf.mxu0  ;;  %v6186_v53 = vpop.f32.mrf.mxu1 }
 0x179   : > { %v8990_v6 = vadd.f32 %v2717_v20, %v2066_v44  ;;  %v2069_v11 = vadd.f32 %v6186_v53, %v8805_v23 }
 0x17a   : > { %v6237_v29 = vpop.f32.mrf.mxu0  ;;  %v1966_v14 = vpop.f32.mrf.mxu1 }
 0x17b   : > { %v8993_v47 = vadd.f32 %v6234_v54, %v2069_v11  ;;  %v2067_v31 = vadd.f32 %v1966_v14, %v8822_v18 }
 0x17c   : > { %v2733_v57 = vpop.f32.mrf.mxu0  ;;  %v6189_v7 = vpop.f32.mrf.mxu1 }
 0x17d   : > { %v8996_v34 = vadd.f32 %v2720_v22, %v2067_v31  ;;  %v2072_v10 = vadd.f32 %v6189_v7, %v8829_v42 }
 0x17e   : > { %v6238_v3 = vpop.f32.mrf.mxu0  ;;  %v1979_v45 = vpop.f32.mrf.mxu1 }
 0x17f   : > { %v8999_v16 = vadd.f32 %v6237_v29, %v2072_v10  ;;  %v2070_v27 = vadd.f32 %v1979_v45, %v8841_v61 }
 0x180   : > { %v2736_v52 = vpop.f32.mrf.mxu0  ;;  %v6190_v23 = vpop.f32.mrf.mxu1 }
 0x181   : > { %v9002_v37 = vadd.f32 %v2733_v57, %v2070_v27  ;;  %v2073_v43 = vadd.f32 %v6190_v23, %v8861_v19 }
 0x182   : > { %v6241_v38 = vpop.f32.mrf.mxu0  ;;  %v1982_v18 = vpop.f32.mrf.mxu1 }
 0x183   : > { %v9005_v2 = vadd.f32 %v6238_v3, %v2073_v43  ;;  %v2071_v1 = vadd.f32 %v1982_v18, %v8869_v12 }
 0x184   : > { %v2749_v9 = vpop.f32.mrf.mxu0  ;;  %v6193_v42 = vpop.f32.mrf.mxu1 }
 0x185   : > { %v9008_v17 = vadd.f32 %v2736_v52, %v2071_v1  ;;  %v2076_v36 = vadd.f32 %v6193_v42, %v8878_v25 }
 0x186   : > { %v6242_v24 = vpop.f32.mrf.mxu0  ;;  %v1995_v61 = vpop.f32.mrf.mxu1 }
 0x187   : > { %v9011_v55 = vadd.f32 %v6241_v38, %v2076_v36  ;;  %v2074_v20 = vadd.f32 %v1995_v61, %v8881_v51 }
 0x188   : > { %v2752_v41 = vpop.f32.mrf.mxu0  ;;  %v6194_v19 = vpop.f32.mrf.mxu1 }
 0x189   : > { %v9014_v13 = vadd.f32 %v2749_v9, %v2074_v20  ;;  %v2077_v54 = vadd.f32 %v6194_v19, %v8898_v62 }
 0x18a   : > { %v6245_v15 = vpop.f32.mrf.mxu0  ;;  %v1998_v12 = vpop.f32.mrf.mxu1 }
 0x18b   : > { %v9017_v44 = vadd.f32 %v6242_v24, %v2077_v54  ;;  %v2075_v22 = vadd.f32 %v1998_v12, %v8911_v33 }
 0x18c   : > { %v2765_v53 = vpop.f32.mrf.mxu0  ;;  %v6197_v25 = vpop.f32.mrf.mxu1 }
 0x18d   : > { %9516 = vst [vmem:[#allocation3_spill] sm:$0xff] %v9017_v44  ;;  %v9020_v11 = vadd.f32 %v2752_v41, %v2075_v22  ;;  %v2080_v29 = vadd.f32 %v6197_v25, %v8918_v49 }
 0x18e   : > { %v6246_v14 = vpop.f32.mrf.mxu0  ;;  %v2011_v51 = vpop.f32.mrf.mxu1 }
 0x18f   : > { %9517 = vst [vmem:[#allocation7_spill] sm:$0xff] %v9020_v11  ;;  %v9023_v31 = vadd.f32 %v6245_v15, %v2080_v29  ;;  %v2078_v57 = vadd.f32 %v2011_v51, %v8921_v35 }
 0x190   : > { %v2768_v7 = vpop.f32.mrf.mxu0  ;;  %v6198_v62 = vpop.f32.mrf.mxu1 }
 0x191   : > { %9518 = vst [vmem:[#allocation9_spill] sm:$0xff] %v9023_v31  ;;  %v9026_v10 = vadd.f32 %v2765_v53, %v2078_v57  ;;  %v2081_v3 = vadd.f32 %v6198_v62, %v8928_v30 }
 0x192   : > { %v6249_v45 = vpop.f32.mrf.mxu0  ;;  %v2014_v33 = vpop.f32.mrf.mxu1 }
 0x193   : > { %9519 = vst [vmem:[#allocation18_spill] sm:$0xff] %v9026_v10  ;;  %v9029_v27 = vadd.f32 %v6246_v14, %v2081_v3  ;;  %v2079_v52 = vadd.f32 %v2014_v33, %v8934_v39 }
 0x194   : > { %v2781_v23 = vpop.f32.mrf.mxu0  ;;  %v6201_v49 = vpop.f32.mrf.mxu1 }
 0x195   : > { %9520 = vst [vmem:[#allocation13_spill] sm:$0xff] %v9029_v27  ;;  %v9032_v43 = vadd.f32 %v2768_v7, %v2079_v52  ;;  %v2084_v38 = vadd.f32 %v6201_v49, %v8939_v40 }
 0x196   : > { %v6250_v18 = vpop.f32.mrf.mxu0  ;;  %v2027_v35 = vpop.f32.mrf.mxu1 }
 0x197   : > { %9521 = vst [vmem:[#allocation15_spill] sm:$0xff] %v9032_v43  ;;  %v9035_v1 = vadd.f32 %v6249_v45, %v2084_v38  ;;  %v2082_v9 = vadd.f32 %v2027_v35, %v8942_v58 }
 0x198   : > { %v2784_v42 = vpop.f32.mrf.mxu0  ;;  %v6202_v30 = vpop.f32.mrf.mxu1 }
 0x199   : > { %9522 = vst [vmem:[#allocation17_spill] sm:$0xff] %v9035_v1  ;;  %v9038_v36 = vadd.f32 %v2781_v23, %v2082_v9  ;;  %v2085_v24 = vadd.f32 %v6202_v30, %v8945_v26 }
 0x19a   : > { %v6253_v61 = vpop.f32.mrf.mxu0  ;;  %v2030_v39 = vpop.f32.mrf.mxu1 }
 0x19b   : > { %9523 = vst [vmem:[#allocation20_spill] sm:$0xff] %v9038_v36  ;;  %v9041_v20 = vadd.f32 %v6250_v18, %v2085_v24  ;;  %v2083_v41 = vadd.f32 %v2030_v39, %v8948_v59 }
 0x19c   : > { %v2797_v19 = vpop.f32.mrf.mxu0  ;;  %v6205_v40 = vpop.f32.mrf.mxu1 }
 0x19d   : > { %9524 = vst [vmem:[#allocation2_spill] sm:$0xff] %v9041_v20  ;;  %v9044_v54 = vadd.f32 %v2784_v42, %v2083_v41  ;;  %v2088_v15 = vadd.f32 %v6205_v40, %v8951_v5 }
 0x19e   : > { %v6254_v12 = vpop.f32.mrf.mxu0  ;;  %v2043_v58 = vpop.f32.mrf.mxu1 }
 0x19f   : > { %9525 = vst [vmem:[#allocation5_spill] sm:$0xff] %v9044_v54  ;;  %v9047_v22 = vadd.f32 %v6253_v61, %v2088_v15  ;;  %v2086_v53 = vadd.f32 %v2043_v58, %v8954_v60 }
 0x1a0   : > { %v2800_v25 = vpop.f32.mrf.mxu0  ;;  %v6206_v26 = vpop.f32.mrf.mxu1 }
 0x1a1   : > { %9526 = vst [vmem:[#allocation4_spill] sm:$0xff] %v9047_v22  ;;  %v9050_v29 = vadd.f32 %v2797_v19, %v2086_v53  ;;  %v2089_v14 = vadd.f32 %v6206_v26, %v8957_v28 }
 0x1a2   : > { %v9053_v51 = vpop.f32.mrf.mxu0  ;;  %v2046_v59 = vpop.f32.mrf.mxu1 }
 0x1a3   : > { %9527 = vst [vmem:[#allocation6_spill] sm:$0xff] %v9050_v29  ;;  %v9055_v57 = vadd.f32 %v6254_v12, %v2089_v14  ;;  %v2087_v7 = vadd.f32 %v2046_v59, %v8960_v46 }
 0x1a4   : > { %v9058_v5 = vpop.f32.mrf.mxu0  ;;  %v6273_v62 = vpop.f32.mrf.mxu1 }
 0x1a5   : > { %9528 = vst [vmem:[#allocation8_spill] sm:$0xff] %v9055_v57  ;;  %v9060_v3 = vadd.f32 %v2800_v25, %v2087_v7 }
 0x1a6   : > { %v9062_v45 = vpop.f32.mrf.mxu0  ;;  %v3183_v60 = vpop.f32.mrf.mxu1 }
 0x1a7   : > { %9529 = vst [vmem:[#allocation10_spill] sm:$0xff] %v9060_v3 }
 0x1a8   : > { %v9064_v33 = vpop.f32.mrf.mxu0  ;;  %v6274_v52 = vpop.f32.mrf.mxu1 }
 0x1aa   : > { %v9066_v23 = vpop.f32.mrf.mxu0  ;;  %v9068_v28 = vpop.f32.mrf.mxu1 }
 0x1ac   : > { %v9070_v49 = vpop.f32.mrf.mxu0  ;;  %v9072_v38 = vpop.f32.mrf.mxu1 }
 0x1ae   : > { %v9074_v46 = vpop.f32.mrf.mxu0  ;;  %v9076_v18 = vpop.f32.mrf.mxu1 }
 0x1b0   : > { %v9078_v35 = vpop.f32.mrf.mxu0  ;;  %v9080_v9 = vpop.f32.mrf.mxu1 }
 0x1b2   : > { %v9082_v42 = vpop.f32.mrf.mxu0  ;;  %v9084_v30 = vpop.f32.mrf.mxu1 }
 0x1b4   : > { %v9086_v24 = vpop.f32.mrf.mxu0  ;;  %v9088_v61 = vpop.f32.mrf.mxu1 }
 0x1b6   : > { %v9090_v39 = vpop.f32.mrf.mxu0  ;;  %v9092_v41 = vpop.f32.mrf.mxu1 }
 0x1b8   : > { %v9094_v19 = vpop.f32.mrf.mxu0  ;;  %v9096_v40 = vpop.f32.mrf.mxu1 }
 0x1ba   : > { %v9098_v15 = vpop.f32.mrf.mxu0  ;;  %v9100_v12 = vpop.f32.mrf.mxu1 }
 0x1bc   : > { %v9102_v58 = vpop.f32.mrf.mxu0  ;;  %v9104_v53 = vpop.f32.mrf.mxu1 }
 0x1be   : > { %v9106_v25 = vpop.f32.mrf.mxu0  ;;  %v9108_v26 = vpop.f32.mrf.mxu1 }
 0x1c0   : > { %v9110_v14 = vpop.f32.mrf.mxu0  ;;  %v9112_v59 = vpop.f32.mrf.mxu1 }
 0x1c2   : > { %v9114_v7 = vpop.f32.mrf.mxu0  ;;  %v9116_v3 = vpop.f32.mrf.mxu1 }
 0x1c4   : > { %v9118_v57 = vpop.f32.mrf.mxu0  ;;  %v9120_v29 = vpop.f32.mrf.mxu1 }
 0x1c5   : > { %9530 = vst [vmem:[#allocation11_spill] sm:$0xff] %v9118_v57 }
 0x1c6   : > { %v9122_v22 = vpop.f32.mrf.mxu0  ;;  %v9124_v54 = vpop.f32.mrf.mxu1 }
 0x1c7   : > { %9531 = vst [vmem:[#allocation12_spill] sm:$0xff] %v9122_v22  ;;  %9532 = vst [vmem:[#allocation14_spill] sm:$0xff] %v9124_v54 }
 0x1c8   : > { %v9126_v20 = vpop.f32.mrf.mxu0  ;;  %v9128_v36 = vpop.f32.mrf.mxu1 }
 0x1c9   : > { %9533 = vst [vmem:[#allocation16_spill] sm:$0xff] %v9126_v20  ;;  %9534 = vst [vmem:[#allocation19_spill] sm:$0xff] %v9128_v36 }
 0x1ca   : > { %v9130_v1 = vpop.f32.mrf.mxu0  ;;  %v9132_v43 = vpop.f32.mrf.mxu1 }
 0x1cb   : > { %9535 = vst [vmem:[#allocation21_spill] sm:$0xff] %v9130_v1  ;;  %9536 = vst [vmem:[#allocation22_spill] sm:$0xff] %v9132_v43 }
 0x1cc   : > { %v9134_v27 = vpop.f32.mrf.mxu0  ;;  %v9136_v10 = vpop.f32.mrf.mxu1 }
 0x1cd   : > { %9537 = vst [vmem:[#allocation23_spill] sm:$0xff] %v9134_v27  ;;  %9538 = vst [vmem:[#allocation24_spill] sm:$0xff] %v9136_v10 }
 0x1ce   : > { %v9138_v31 = vpop.f32.mrf.mxu0  ;;  %v9140_v57 = vpop.f32.mrf.mxu1 }
 0x1cf   : > { %9539 = vst [vmem:[#allocation25_spill] sm:$0xff] %v9138_v31  ;;  %9540 = vst [vmem:[#allocation26_spill] sm:$0xff] %v9140_v57 }
 0x1d0   : > { %v9142_v11 = vpop.f32.mrf.mxu0  ;;  %v9144_v22 = vpop.f32.mrf.mxu1 }
 0x1d1   : > { %9541 = vst [vmem:[#allocation27_spill] sm:$0xff] %v9142_v11  ;;  %9542 = vst [vmem:[#allocation28_spill] sm:$0xff] %v9144_v22 }
 0x1d2   : > { %v9146_v44 = vpop.f32.mrf.mxu0  ;;  %v9148_v20 = vpop.f32.mrf.mxu1 }
 0x1d3   : > { %9543 = vst [vmem:[#allocation29_spill] sm:$0xff] %v9146_v44  ;;  %9544 = vst [vmem:[#allocation30_spill] sm:$0xff] %v9148_v20 }
 0x1d4   : > { %v9150_v36 = vpop.f32.mrf.mxu0  ;;  %v9152_v1 = vpop.f32.mrf.mxu1 }
 0x1d5   : > { %9545 = vst [vmem:[#allocation31_spill] sm:$0xff] %v9150_v36  ;;  %9546 = vst [vmem:[#allocation32_spill] sm:$0xff] %v9152_v1 }
 0x1d6   : > { %v9154_v43 = vpop.f32.mrf.mxu0  ;;  %v9156_v27 = vpop.f32.mrf.mxu1 }
 0x1d7   : > { %9547 = vst [vmem:[#allocation33_spill] sm:$0xff] %v9154_v43  ;;  %9548 = vst [vmem:[#allocation34_spill] sm:$0xff] %v9156_v27  ;;  %v3312_v43 = vadd.f32 %v6273_v62, %v8963_v56  ;;  %v3311_v62 = vadd.f32 %v9068_v28, %v8972_v4  ;;  %v3317_v4 = vadd.f32 %v9080_v9, %v8981_v32 }
 0x1d8   : > { %v9158_v10 = vpop.f32.mrf.mxu0  ;;  %v9160_v31 = vpop.f32.mrf.mxu1 }
 0x1d9   : > { %9549 = vst [vmem:[#allocation35_spill] sm:$0xff] %v9158_v10  ;;  %9550 = vst [vmem:[#allocation36_spill] sm:$0xff] %v9160_v31  ;;  %v3310_v10 = vadd.f32 %v3183_v60, %v8966_v8  ;;  %v3316_v8 = vadd.f32 %v9072_v38, %v8975_v21  ;;  %v3314_v60 = vadd.f32 %v9076_v18, %v8978_v63 }
 0x1da   : > { %v9162_v57 = vpop.f32.mrf.mxu0  ;;  %v9164_v11 = vpop.f32.mrf.mxu1  ;;  %v3698_v38 = vadd.f32 %v9064_v33, %v3311_v62  ;;  %v3320_v33 = vadd.f32 %v9088_v61, %v8987_v0 }
 0x1db   : > { %9551 = vst [vmem:[#allocation37_spill] sm:$0xff] %v9162_v57  ;;  %9552 = vst [vmem:[#allocation38_spill] sm:$0xff] %v9164_v11  ;;  %v3699_v11 = vadd.f32 %v9053_v51, %v3312_v43  ;;  %v3703_v18 = vadd.f32 %v9066_v23, %v3316_v8 }
 0x1dc   : > { %v9166_v22 = vpop.f32.mrf.mxu0  ;;  %v9168_v44 = vpop.f32.mrf.mxu1 }
 0x1dd   : > { %9553 = vst [vmem:[#allocation39_spill] sm:$0xff] %v9166_v22  ;;  %9554 = vst [vmem:[#allocation40_spill] sm:$0xff] %v9168_v44  ;;  %v3313_v22 = vadd.f32 %v6274_v52, %v8969_v50  ;;  %v9194_v50 = vld [vmem:[%s9353_s2] ss:$0 sm:$0xff] }
 0x1de   : > { %v9170_v20 = vpop.f32.mrf.mxu0  ;;  %v9172_v36 = vpop.f32.mrf.mxu1 }
 0x1df   : > { %9555 = vst [vmem:[#allocation41_spill] sm:$0xff] %v9170_v20  ;;  %9556 = vst [vmem:[#allocation42_spill] sm:$0xff] %v9172_v36  ;;  %v3697_v36 = vadd.f32 %v9058_v5, %v3310_v10  ;;  %v3700_v51 = vadd.f32 %v9062_v45, %v3313_v22  ;;  %v3315_v45 = vadd.f32 %v9084_v30, %v8984_v48 }
 0x1e0   : > { %v9175_v1 = vpop.f32.mrf.mxu0  ;;  %v9177_v27 = vpop.f32.mrf.mxu1 }
 0x1e1   : > { %9557 = vst [vmem:[#allocation43_spill] sm:$0xff] %v9175_v1  ;;  %v3701_v1 = vadd.f32 %v9070_v49, %v3314_v60 }
 0x1e2   : > { %v9180_v57 = vpop.f32.mrf.mxu1 }
 0x1e3   : > { %v6417_v31 = vpop.f32.mrf.mxu0 }
 0x1e4   : > { %v6369_v20 = vpop.f32.mrf.mxu1 }
 0x1e5   : > { %v4822_v44 = vpop.f32.mrf.mxu0  ;;  %v4453_v54 = vadd.f32 %v6369_v20, %v3699_v11 }
 0x1e6   : > { %v4324_v43 = vpop.f32.mrf.mxu1 }
 0x1e7   : > { %v6418_v56 = vpop.f32.mrf.mxu0  ;;  %v4951_v10 = vadd.f32 %v6417_v31, %v4453_v54  ;;  %v4451_v11 = vadd.f32 %v4324_v43, %v3697_v36  ;;  %v3704_v54 = vadd.f32 %v9074_v46, %v3317_v4  ;;  %v3321_v46 = vadd.f32 %v9096_v40, %v8993_v47 }
 0x1e8   : > { %v6370_v5 = vpop.f32.mrf.mxu1  ;;  %v3319_v4 = vadd.f32 %v9100_v12, %v8996_v34  ;;  %v3707_v40 = vadd.f32 %v9082_v42, %v3320_v33  ;;  %v3322_v33 = vadd.f32 %v9108_v26, %v9002_v37 }
 0x1e9   : > { %v4825_v20 = vpop.f32.mrf.mxu0  ;;  %v4990_v21 = vadd.f32 %v9194_v50, %v4951_v10  ;;  %v4949_v52 = vadd.f32 %v4822_v44, %v4451_v11  ;;  %v4454_v63 = vadd.f32 %v6370_v5, %v3700_v51  ;;  %v3702_v11 = vadd.f32 %v9078_v35, %v3315_v45 }
 0x1ea   : > { %v4327_v22 = vpop.f32.mrf.mxu1  ;;  %v3708_v12 = vadd.f32 %v9090_v39, %v3321_v46  ;;  %v3324_v45 = vadd.f32 %v9104_v53, %v8999_v16  ;;  %v3323_v16 = vadd.f32 %v9116_v3, %v9008_v17  ;;  %v3709_v3 = vadd.f32 %v9102_v58, %v3322_v33  ;;  %v9564_v33 = vld [vmem:[#allocation24_spill] sm:$0xff] }
 0x1eb   : > { %v6421_v28 = vpop.f32.mrf.mxu0  ;;  %vm5022_vm6 = vcmp.gt.f32.partialorder %v4990_v21, 0.0  ;;  %v5054_v32 = vmul.f32 0.1, %v4990_v21  ;;  %v4988_v31 = vadd.f32 %v9194_v50, %v4949_v52  ;;  %v4952_v44 = vadd.f32 %v6418_v56, %v4454_v63 }
 0x1ec   : > { %v4452_v23 = vadd.f32 %v4327_v22, %v3698_v38  ;;  %v6373_v49 = vpop.f32.mrf.mxu1  ;;  %v3318_v56 = vadd.f32 %v9092_v41, %v8990_v6  ;;  %v3706_v22 = vadd.f32 %v9094_v19, %v3319_v4 }
 0x1ed   : > { %v4838_v36 = vpop.f32.mrf.mxu0  ;;  %v5086_v9 = vsel %vm5022_vm6, %v4990_v21, %v5054_v32  ;;  %vm5020_vm7 = vcmp.gt.f32.partialorder %v4988_v31, 0.0  ;;  %v5052_v62 = vmul.f32 0.1, %v4988_v31  ;;  %v4991_v8 = vadd.f32 %v9194_v50, %v4952_v44 }
 0x1ee   : > { %5118 = vst [vmem:[%s9207_s21 + $0x10] sm:$0xff] %v5086_v9  ;;  %v4950_v48 = vadd.f32 %v4825_v20, %v4452_v23  ;;  %v4457_v30 = vadd.f32 %v6373_v49, %v3703_v18  ;;  %v4340_v43 = vpop.f32.mrf.mxu1  ;;  %v3705_v63 = vadd.f32 %v9086_v24, %v3318_v56  ;;  %v3325_v56 = vadd.f32 %v9112_v59, %v9005_v2 }
 0x1ef   : > { %v6422_v60 = vpop.f32.mrf.mxu0  ;;  %v5084_v0 = vsel %vm5020_vm7, %v4988_v31, %v5052_v62  ;;  %vm5023_vm8 = vcmp.gt.f32.partialorder %v4991_v8, 0.0  ;;  %v5055_v61 = vmul.f32 0.1, %v4991_v8  ;;  %v4455_v51 = vadd.f32 %v4340_v43, %v3701_v1 }
 0x1f0   : > { %5116 = vst [vmem:[%s9207_s21] sm:$0xff] %v5084_v0  ;;  %v4989_v6 = vadd.f32 %v9194_v50, %v4950_v48  ;;  %v4955_v41 = vadd.f32 %v6421_v28, %v4457_v30  ;;  %v6374_v47 = vpop.f32.mrf.mxu1  ;;  %v3711_v0 = vadd.f32 %v9098_v15, %v3324_v45  ;;  %v9563_v45 = vld [vmem:[#allocation9_spill] sm:$0xff] }
 0x1f1   : > { %v4841_v10 = vpop.f32.mrf.mxu0  ;;  %v5087_v20 = vsel %vm5023_vm8, %v4991_v8, %v5055_v61  ;;  %v4953_v5 = vadd.f32 %v4838_v36, %v4455_v51  ;;  %v4458_v21 = vadd.f32 %v6374_v47, %v3704_v54  ;;  %v3328_v61 = vadd.f32 %v9120_v29, %v9011_v55 }
 0x1f2   : > { %5119 = vst [vmem:[%s9207_s21 + $0x18] sm:$0xff] %v5087_v20  ;;  %vm5021_vm9 = vcmp.gt.f32.partialorder %v4989_v6, 0.0  ;;  %v5053_v1 = vmul.f32 0.1, %v4989_v6  ;;  %v4994_v35 = vadd.f32 %v9194_v50, %v4955_v41  ;;  %v4343_v34 = vpop.f32.mrf.mxu1  ;;  %v3710_v29 = vadd.f32 %v9110_v14, %v3323_v16 }
 0x1f3   : > { %v6425_v52 = vpop.f32.mrf.mxu0  ;;  %v4992_v28 = vadd.f32 %v9194_v50, %v4953_v5  ;;  %v4956_v38 = vadd.f32 %v6422_v60, %v4458_v21  ;;  %v4456_v18 = vadd.f32 %v4343_v34, %v3702_v11  ;;  %v3715_v5 = vadd.f32 %v9114_v7, %v3328_v61  ;;  %v9558_v34 = vld [vmem:[#allocation14_spill] sm:$0xff] }
 0x1f4   : > { %v5085_v32 = vsel %vm5021_vm9, %v4989_v6, %v5053_v1  ;;  %vm5026_vm10 = vcmp.gt.f32.partialorder %v4994_v35, 0.0  ;;  %v5058_v24 = vmul.f32 0.1, %v4994_v35  ;;  %v6377_v31 = vpop.f32.mrf.mxu1  ;;  %v3712_v6 = vadd.f32 %v9106_v25, %v3325_v56  ;;  %v9565_v56 = vld [vmem:[#allocation11_spill] sm:$0xff] }
 0x1f5   : > { %v4854_v42 = vpop.f32.mrf.mxu0  ;;  %5117 = vst [vmem:[%s9207_s21 + $0x8] sm:$0xff] %v5085_v32  ;;  %vm5024_vm11 = vcmp.gt.f32.partialorder %v4992_v28, 0.0  ;;  %v5056_v44 = vmul.f32 0.1, %v4992_v28  ;;  %v4995_v36 = vadd.f32 %v9194_v50, %v4956_v38  ;;  %v4954_v54 = vadd.f32 %v4841_v10, %v4456_v18  ;;  %v9560_v38 = vld [vmem:[#allocation19_spill] sm:$0xff] }
 0x1f6   : > { %v5090_v19 = vsel %vm5026_vm10, %v4994_v35, %v5058_v24  ;;  %v4461_v23 = vadd.f32 %v6377_v31, %v3707_v40  ;;  %v4356_v49 = vpop.f32.mrf.mxu1 }
 0x1f7   : > { %v6426_v39 = vpop.f32.mrf.mxu0  ;;  %5122 = vst [vmem:[%s9207_s21 + $0x30] sm:$0xff] %v5090_v19  ;;  %v5088_v9 = vsel %vm5024_vm11, %v4992_v28, %v5056_v44  ;;  %vm5027_vm12 = vcmp.gt.f32.partialorder %v4995_v36, 0.0  ;;  %v5059_v62 = vmul.f32 0.1, %v4995_v36  ;;  %v4993_v8 = vadd.f32 %v9194_v50, %v4954_v54  ;;  %v9559_v28 = vld [vmem:[#allocation3_spill] sm:$0xff]  ;;  %v9562_v54 = vld [vmem:[#allocation22_spill] sm:$0xff] }
 0x1f8   : > { %5120 = vst [vmem:[%s9207_s21 + $0x20] sm:$0xff] %v5088_v9  ;;  %v4959_v53 = vadd.f32 %v6425_v52, %v4461_v23  ;;  %v4459_v37 = vadd.f32 %v4356_v49, %v3705_v63  ;;  %v6378_v26 = vpop.f32.mrf.mxu1  ;;  %v3329_v18 = vadd.f32 %v9560_v38, %v9559_v28 }
 0x1f9   : > { %v4857_v60 = vpop.f32.mrf.mxu0  ;;  %v5091_v46 = vsel %vm5027_vm12, %v4995_v36, %v5059_v62  ;;  %vm5025_vm13 = vcmp.gt.f32.partialorder %v4993_v8, 0.0  ;;  %v5057_v48 = vmul.f32 0.1, %v4993_v8  ;;  %v4462_v30 = vadd.f32 %v6378_v26, %v3708_v12  ;;  %v9561_v36 = vld [vmem:[#allocation7_spill] sm:$0xff] }
 0x1fa   : > { %5123 = vst [vmem:[%s9207_s21 + $0x38] sm:$0xff] %v5091_v46  ;;  %v4998_v2 = vadd.f32 %v9194_v50, %v4959_v53  ;;  %v4957_v59 = vadd.f32 %v4854_v42, %v4459_v37  ;;  %v4359_v17 = vpop.f32.mrf.mxu1  ;;  %v3326_v12 = vadd.f32 %v9558_v34, %v9014_v13  ;;  %v3332_v13 = vadd.f32 %v9564_v33, %v9563_v45  ;;  %v9566_v46 = vld [vmem:[#allocation12_spill] sm:$0xff]  ;;  %v9574_v34 = vld [vmem:[#allocation30_spill] sm:$0xff] }
 0x1fb   : > { %v6429_v43 = vpop.f32.mrf.mxu0  ;;  %v5089_v51 = vsel %vm5025_vm13, %v4993_v8, %v5057_v48  ;;  %v4960_v10 = vadd.f32 %v6426_v39, %v4462_v30  ;;  %v4460_v11 = vadd.f32 %v4359_v17, %v3706_v22  ;;  %v3327_v39 = vadd.f32 %v9562_v54, %v9561_v36  ;;  %v9577_v36 = vld [vmem:[#allocation32_spill] sm:$0xff] }
 0x1fc   : > { %5121 = vst [vmem:[%s9207_s21 + $0x28] sm:$0xff] %v5089_v51  ;;  %vm5030_vm14 = vcmp.gt.f32.partialorder %v4998_v2, 0.0  ;;  %v5062_v15 = vmul.f32 0.1, %v4998_v2  ;;  %v4996_v41 = vadd.f32 %v9194_v50, %v4957_v59  ;;  %v6381_v55 = vpop.f32.mrf.mxu1  ;;  %v3713_v16 = vadd.f32 %v9565_v56, %v3326_v12 }
 0x1fd   : > { %v4870_v4 = vpop.f32.mrf.mxu0  ;;  %v4999_v47 = vadd.f32 %v9194_v50, %v4960_v10  ;;  %v4958_v40 = vadd.f32 %v4857_v60, %v4460_v11  ;;  %v4465_v20 = vadd.f32 %v6381_v55, %v3711_v0  ;;  %v3716_v48 = vadd.f32 %v9566_v46, %v3329_v18  ;;  %v9568_v10 = vld [vmem:[#allocation21_spill] sm:$0xff]  ;;  %v9569_v55 = vld [vmem:[#allocation18_spill] sm:$0xff] }
 0x1fe   : > { %v5094_v21 = vsel %vm5030_vm14, %v4998_v2, %v5062_v15  ;;  %vm5028_vm15 = vcmp.gt.f32.partialorder %v4996_v41, 0.0  ;;  %v5060_v25 = vmul.f32 0.1, %v4996_v41  ;;  %v4372_v52 = vpop.f32.mrf.mxu1  ;;  %v9567_v2 = vld [vmem:[#allocation16_spill] sm:$0xff]  ;;  %v3719_v11 = vadd.f32 %v9568_v10, %v3332_v13 }
 0x1ff   : > { %v6430_v58 = vpop.f32.mrf.mxu0  ;;  %5126 = vst [vmem:[%s9207_s21 + $0x50] sm:$0xff] %v5094_v21  ;;  %vm5031_vm0 = vcmp.gt.f32.partialorder %v4999_v47, 0.0  ;;  %v5063_v63 = vmul.f32 0.1, %v4999_v47  ;;  %v4997_v1 = vadd.f32 %v9194_v50, %v4958_v40  ;;  %v4963_v35 = vadd.f32 %v6429_v43, %v4465_v20 }
 0x200   : > { %v5092_v7 = vsel %vm5028_vm15, %v4996_v41, %v5060_v25  ;;  %v4463_v42 = vadd.f32 %v4372_v52, %v3709_v3  ;;  %v6382_v22 = vpop.f32.mrf.mxu1  ;;  %v3714_v59 = vadd.f32 %v9567_v2, %v3327_v39 }
 0x201   : > { %v4873_v14 = vpop.f32.mrf.mxu0  ;;  %5124 = vst [vmem:[%s9207_s21 + $0x40] sm:$0xff] %v5092_v7  ;;  %v5095_v32 = vsel %vm5031_vm0, %v4999_v47, %v5063_v63  ;;  %vm5029_vm1 = vcmp.gt.f32.partialorder %v4997_v1, 0.0  ;;  %v5061_v24 = vmul.f32 0.1, %v4997_v1  ;;  %v5002_v31 = vadd.f32 %v9194_v50, %v4963_v35  ;;  %v9571_v63 = vld [vmem:[#allocation13_spill] sm:$0xff] }
 0x202   : > { %5127 = vst [vmem:[%s9207_s21 + $0x58] sm:$0xff] %v5095_v32  ;;  %v4961_v19 = vadd.f32 %v4870_v4, %v4463_v42  ;;  %v4466_v23 = vadd.f32 %v6382_v22, %v3712_v6  ;;  %v4375_v49 = vpop.f32.mrf.mxu1 }
 0x203   : > { %v5093_v9 = vsel %vm5029_vm1, %v4997_v1, %v5061_v24  ;;  %vm5034_vm2 = vcmp.gt.f32.partialorder %v5002_v31, 0.0  ;;  %v5066_v62 = vmul.f32 0.1, %v5002_v31  ;;  %v4464_v8 = vadd.f32 %v4375_v49, %v3710_v29  ;;  %v9570_v29 = vld [vmem:[#allocation26_spill] sm:$0xff]  ;;  %v9572_v1 = vld [vmem:[#allocation28_spill] sm:$0xff]  ;;  %v9575_v24 = vld [vmem:[#allocation23_spill] sm:$0xff] }
 0x204   : > { %v6433_v44 = vpop.f32.mrf.mxu0  ;;  %5125 = vst [vmem:[%s9207_s21 + $0x48] sm:$0xff] %v5093_v9  ;;  %v5000_v53 = vadd.f32 %v9194_v50, %v4961_v19  ;;  %v4964_v37 = vadd.f32 %v6430_v58, %v4466_v23  ;;  %v6385_v26 = vpop.f32.mrf.mxu1  ;;  %v3330_v47 = vadd.f32 %v9570_v29, %v9569_v55  ;;  %v3333_v35 = vadd.f32 %v9572_v1, %v9571_v63  ;;  %v9578_v9 = vld [vmem:[#allocation25_spill] sm:$0xff]  ;;  %v9587_v63 = vld [vmem:[#allocation38_spill] sm:$0xff] }
 0x205   : > { %v5098_v30 = vsel %vm5034_vm2, %v5002_v31, %v5066_v62  ;;  %v4962_v43 = vadd.f32 %v4873_v14, %v4464_v8  ;;  %v4469_v0 = vadd.f32 %v6385_v26, %v3715_v5  ;;  %v9573_v14 = vld [vmem:[#allocation15_spill] sm:$0xff] }
 0x206   : > { %v4886_v60 = vpop.f32.mrf.mxu0  ;;  %5130 = vst [vmem:[%s9207_s21 + $0x70] sm:$0xff] %v5098_v30  ;;  %vm5032_vm3 = vcmp.gt.f32.partialorder %v5000_v53, 0.0  ;;  %v5064_v17 = vmul.f32 0.1, %v5000_v53  ;;  %v5003_v3 = vadd.f32 %v9194_v50, %v4964_v37  ;;  %v4388_v51 = vpop.f32.mrf.mxu1  ;;  %v3331_v12 = vadd.f32 %v9574_v34, %v9573_v14  ;;  %v9580_v30 = vld [vmem:[#allocation20_spill] sm:$0xff] }
 0x207   : > { %v5001_v4 = vadd.f32 %v9194_v50, %v4962_v43  ;;  %v4967_v6 = vadd.f32 %v6433_v44, %v4469_v0  ;;  %v4467_v15 = vadd.f32 %v4388_v51, %v3713_v16  ;;  %v3717_v31 = vadd.f32 %v9575_v24, %v3330_v47  ;;  %v9576_v44 = vld [vmem:[#allocation17_spill] sm:$0xff]  ;;  %v9579_v16 = vld [vmem:[#allocation27_spill] sm:$0xff]  ;;  %v9581_v43 = vld [vmem:[#allocation34_spill] sm:$0xff] }
 0x208   : > { %v6434_v61 = vpop.f32.mrf.mxu0  ;;  %v5096_v40 = vsel %vm5032_vm3, %v5000_v53, %v5064_v17  ;;  %vm5035_vm4 = vcmp.gt.f32.partialorder %v5003_v3, 0.0  ;;  %v5067_v20 = vmul.f32 0.1, %v5003_v3  ;;  %v6386_v58 = vpop.f32.mrf.mxu1  ;;  %v3336_v54 = vadd.f32 %v9577_v36, %v9576_v44  ;;  %v9582_v17 = vld [vmem:[#allocation29_spill] sm:$0xff] }
 0x209   : > { %5128 = vst [vmem:[%s9207_s21 + $0x60] sm:$0xff] %v5096_v40  ;;  %vm5033_vm5 = vcmp.gt.f32.partialorder %v5001_v4, 0.0  ;;  %v5065_v5 = vmul.f32 0.1, %v5001_v4  ;;  %v5006_v21 = vadd.f32 %v9194_v50, %v4967_v6  ;;  %v4965_v25 = vadd.f32 %v4886_v60, %v4467_v15  ;;  %v9583_v6 = vld [vmem:[#allocation2_spill] sm:$0xff]  ;;  %v9584_v15 = vld [vmem:[#allocation36_spill] sm:$0xff] }
 0x20a   : > { %v4889_v41 = vpop.f32.mrf.mxu0  ;;  %v5099_v28 = vsel %vm5035_vm4, %v5003_v3, %v5067_v20  ;;  %v4470_v38 = vadd.f32 %v6386_v58, %v3716_v48  ;;  %v4391_v18 = vpop.f32.mrf.mxu1  ;;  %v3720_v62 = vadd.f32 %v9578_v9, %v3333_v35  ;;  %v3718_v53 = vadd.f32 %v9579_v16, %v3331_v12 }
 0x20b   : > { %5131 = vst [vmem:[%s9207_s21 + $0x78] sm:$0xff] %v5099_v28  ;;  %v5097_v7 = vsel %vm5033_vm5, %v5001_v4, %v5065_v5  ;;  %vm5038_vm6 = vcmp.gt.f32.partialorder %v5006_v21, 0.0  ;;  %v5070_v42 = vmul.f32 0.1, %v5006_v21  ;;  %v5004_v22 = vadd.f32 %v9194_v50, %v4965_v25 }
 0x20c   : > { %v6437_v52 = vpop.f32.mrf.mxu0  ;;  %5129 = vst [vmem:[%s9207_s21 + $0x68] sm:$0xff] %v5097_v7  ;;  %v4968_v39 = vadd.f32 %v6434_v61, %v4470_v38  ;;  %v4468_v45 = vadd.f32 %v4391_v18, %v3714_v59  ;;  %v6389_v33 = vpop.f32.mrf.mxu1  ;;  %v3334_v0 = vadd.f32 %v9581_v43, %v9580_v30  ;;  %v3723_v3 = vadd.f32 %v9582_v17, %v3336_v54  ;;  %v9588_v7 = vld [vmem:[#allocation33_spill] sm:$0xff] }
 0x20d   : > { %v5102_v13 = vsel %vm5038_vm6, %v5006_v21, %v5070_v42  ;;  %vm5036_vm7 = vcmp.gt.f32.partialorder %v5004_v22, 0.0  ;;  %v5068_v19 = vmul.f32 0.1, %v5004_v22  ;;  %v4473_v23 = vadd.f32 %v6389_v33, %v3719_v11  ;;  %v9585_v21 = vld [vmem:[#allocation31_spill] sm:$0xff] }
 0x20e   : > { %v4902_v32 = vpop.f32.mrf.mxu0  ;;  %5134 = vst [vmem:[%s9207_s21 + $0x90] sm:$0xff] %v5102_v13  ;;  %v5007_v8 = vadd.f32 %v9194_v50, %v4968_v39  ;;  %v4966_v60 = vadd.f32 %v4889_v41, %v4468_v45  ;;  %v4404_v56 = vpop.f32.mrf.mxu1  ;;  %v3337_v41 = vadd.f32 %v9584_v15, %v9583_v6  ;;  %v3721_v25 = vadd.f32 %v9585_v21, %v3334_v0  ;;  %v9591_v13 = vld [vmem:[#allocation35_spill] sm:$0xff]  ;;  %v9595_v0 = vld [vmem:[#allocation37_spill] sm:$0xff] }
 0x20f   : > { %v5100_v37 = vsel %vm5036_vm7, %v5004_v22, %v5068_v19  ;;  %v4971_v26 = vadd.f32 %v6437_v52, %v4473_v23  ;;  %v4471_v46 = vadd.f32 %v4404_v56, %v3717_v31  ;;  %v9586_v52 = vld [vmem:[#allocation5_spill] sm:$0xff]  ;;  %v9589_v22 = vld [vmem:[#allocation4_spill] sm:$0xff] }
 0x210   : > { %v6438_v49 = vpop.f32.mrf.mxu0  ;;  %5132 = vst [vmem:[%s9207_s21 + $0x80] sm:$0xff] %v5100_v37  ;;  %vm5039_vm8 = vcmp.gt.f32.partialorder %v5007_v8, 0.0  ;;  %v5071_v61 = vmul.f32 0.1, %v5007_v8  ;;  %v5005_v2 = vadd.f32 %v9194_v50, %v4966_v60  ;;  %v6390_v59 = vpop.f32.mrf.mxu1  ;;  %v3335_v1 = vadd.f32 %v9587_v63, %v9586_v52  ;;  %v9599_v52 = vld [vmem:[#allocation43_spill] sm:$0xff] }
 0x211   : > { %v5010_v51 = vadd.f32 %v9194_v50, %v4971_v26  ;;  %v4969_v10 = vadd.f32 %v4902_v32, %v4471_v46  ;;  %v4474_v11 = vadd.f32 %v6390_v59, %v3720_v62  ;;  %v3724_v42 = vadd.f32 %v9588_v7, %v3337_v41  ;;  %v9590_v32 = vld [vmem:[#allocation40_spill] sm:$0xff]  ;;  %v9592_v62 = vld [vmem:[#allocation6_spill] sm:$0xff] }
 0x212   : > { %v4905_v48 = vpop.f32.mrf.mxu0  ;;  %v5103_v55 = vsel %vm5039_vm8, %v5007_v8, %v5071_v61  ;;  %vm5037_vm9 = vcmp.gt.f32.partialorder %v5005_v2, 0.0  ;;  %v5069_v29 = vmul.f32 0.1, %v5005_v2  ;;  %v4407_v47 = vpop.f32.mrf.mxu1  ;;  %v3340_v24 = vadd.f32 %v9590_v32, %v9589_v22  ;;  %v9593_v8 = vld [vmem:[#allocation42_spill] sm:$0xff]  ;;  %v9594_v26 = vld [vmem:[#allocation8_spill] sm:$0xff] }
 0x213   : > { %5135 = vst [vmem:[%s9207_s21 + $0x98] sm:$0xff] %v5103_v55  ;;  %vm5042_vm10 = vcmp.gt.f32.partialorder %v5010_v51, 0.0  ;;  %v5074_v40 = vmul.f32 0.1, %v5010_v51  ;;  %v5008_v20 = vadd.f32 %v9194_v50, %v4969_v10  ;;  %v4972_v58 = vadd.f32 %v6438_v49, %v4474_v11  ;;  %v9597_v55 = vld [vmem:[#allocation39_spill] sm:$0xff] }
 0x214   : > { %v6441_v4 = vpop.f32.mrf.mxu0  ;;  %v5101_v35 = vsel %vm5037_vm9, %v5005_v2, %v5069_v29  ;;  %v4472_v14 = vadd.f32 %v4407_v47, %v3718_v53  ;;  %v6393_v34 = vpop.f32.mrf.mxu1  ;;  %v3722_v19 = vadd.f32 %v9591_v13, %v3335_v1  ;;  %v3338_v60 = vadd.f32 %v9593_v8, %v9592_v62  ;;  %v9598_v47 = vld [vmem:[#allocation41_spill] sm:$0xff] }
 0x215   : > { %5133 = vst [vmem:[%s9207_s21 + $0x88] sm:$0xff] %v5101_v35  ;;  %v5106_v12 = vsel %vm5042_vm10, %v5010_v51, %v5074_v40  ;;  %vm5040_vm11 = vcmp.gt.f32.partialorder %v5008_v20, 0.0  ;;  %v5072_v28 = vmul.f32 0.1, %v5008_v20  ;;  %v5011_v38 = vadd.f32 %v9194_v50, %v4972_v58 }
 0x216   : > { %v4918_v5 = vpop.f32.mrf.mxu0  ;;  %5138 = vst [vmem:[%s9207_s21 + $0xb0] sm:$0xff] %v5106_v12  ;;  %v4970_v31 = vadd.f32 %v4905_v48, %v4472_v14  ;;  %v4477_v44 = vadd.f32 %v6393_v34, %v3723_v3  ;;  %v4420_v36 = vpop.f32.mrf.mxu1  ;;  %v3341_v46 = vadd.f32 %v9177_v27, %v9594_v26  ;;  %v3727_v61 = vadd.f32 %v9595_v0, %v3340_v24  ;;  %v9596_v3 = vld [vmem:[#allocation10_spill] sm:$0xff] }
 0x217   : > { %v5104_v54 = vsel %vm5040_vm11, %v5008_v20, %v5072_v28  ;;  %vm5043_vm12 = vcmp.gt.f32.partialorder %v5011_v38, 0.0  ;;  %v5075_v39 = vmul.f32 0.1, %v5011_v38  ;;  %v4475_v45 = vadd.f32 %v4420_v36, %v3721_v25 }
 0x218   : > { %v6442_v18 = vpop.f32.mrf.mxu0  ;;  %5136 = vst [vmem:[%s9207_s21 + $0xa0] sm:$0xff] %v5104_v54  ;;  %v5009_v23 = vadd.f32 %v9194_v50, %v4970_v31  ;;  %v4975_v49 = vadd.f32 %v6441_v4, %v4477_v44  ;;  %v6394_v9 = vpop.f32.mrf.mxu1  ;;  %v3339_v51 = vadd.f32 %v9180_v57, %v9596_v3  ;;  %v3725_v29 = vadd.f32 %v9597_v55, %v3338_v60 }
 0x219   : > { %v5107_v56 = vsel %vm5043_vm12, %v5011_v38, %v5075_v39  ;;  %v4973_v16 = vadd.f32 %v4918_v5, %v4475_v45  ;;  %v4478_v53 = vadd.f32 %v6394_v9, %v3724_v42  ;;  %v3728_v40 = vadd.f32 %v9598_v47, %v3341_v46 }
 0x21a   : > { %v4921_v33 = vpop.f32.mrf.mxu0  ;;  %5139 = vst [vmem:[%s9207_s21 + $0xb8] sm:$0xff] %v5107_v56  ;;  %vm5041_vm13 = vcmp.gt.f32.partialorder %v5009_v23, 0.0  ;;  %v5073_v48 = vmul.f32 0.1, %v5009_v23  ;;  %v5014_v30 = vadd.f32 %v9194_v50, %v4975_v49  ;;  %v4423_v43 = vpop.f32.mrf.mxu1  ;;  %v3726_v63 = vadd.f32 %v9599_v52, %v3339_v51 }
 0x21b   : > { %v5012_v2 = vadd.f32 %v9194_v50, %v4973_v16  ;;  %v4976_v59 = vadd.f32 %v6442_v18, %v4478_v53  ;;  %v4476_v17 = vadd.f32 %v4423_v43, %v3722_v19 }
 0x21c   : > { %v6445_v37 = vpop.f32.mrf.mxu0  ;;  %v5105_v10 = vsel %vm5041_vm13, %v5009_v23, %v5073_v48  ;;  %vm5046_vm14 = vcmp.gt.f32.partialorder %v5014_v30, 0.0  ;;  %v5078_v27 = vmul.f32 0.1, %v5014_v30  ;;  %v6397_v11 = vpop.f32.mrf.mxu1 }
 0x21d   : > { %5137 = vst [vmem:[%s9207_s21 + $0xa8] sm:$0xff] %v5105_v10  ;;  %vm5044_vm15 = vcmp.gt.f32.partialorder %v5012_v2, 0.0  ;;  %v5076_v6 = vmul.f32 0.1, %v5012_v2  ;;  %v5015_v15 = vadd.f32 %v9194_v50, %v4976_v59  ;;  %v4974_v41 = vadd.f32 %v4921_v33, %v4476_v17 }
 0x21e   : > { %v4934_v4 = vpop.f32.mrf.mxu0  ;;  %v5110_v20 = vsel %vm5046_vm14, %v5014_v30, %v5078_v27  ;;  %v4481_v58 = vadd.f32 %v6397_v11, %v3727_v61  ;;  %v4436_v57 = vpop.f32.mrf.mxu1 }
 0x21f   : > { %5142 = vst [vmem:[%s9207_s21 + $0xd0] sm:$0xff] %v5110_v20  ;;  %v5108_v5 = vsel %vm5044_vm15, %v5012_v2, %v5076_v6  ;;  %vm5047_vm0 = vcmp.gt.f32.partialorder %v5015_v15, 0.0  ;;  %v5079_v21 = vmul.f32 0.1, %v5015_v15  ;;  %v5013_v25 = vadd.f32 %v9194_v50, %v4974_v41 }
 0x220   : > { %5140 = vst [vmem:[%s9207_s21 + $0xc0] sm:$0xff] %v5108_v5  ;;  %v4979_v1 = vadd.f32 %v6445_v37, %v4481_v58  ;;  %v4479_v35 = vadd.f32 %v4436_v57, %v3725_v29  ;;  %v6398_v14 = vpop.f32.mrf.mxu1  ;;  %v6446_v34 = vpop.f32.mrf.mxu0 }
 0x221   : > { %v5111_v12 = vsel %vm5047_vm0, %v5015_v15, %v5079_v21  ;;  %vm5045_vm1 = vcmp.gt.f32.partialorder %v5013_v25, 0.0  ;;  %v5077_v28 = vmul.f32 0.1, %v5013_v25  ;;  %v4482_v38 = vadd.f32 %v6398_v14, %v3728_v40 }
 0x222   : > { %5143 = vst [vmem:[%s9207_s21 + $0xd8] sm:$0xff] %v5111_v12  ;;  %v5018_v18 = vadd.f32 %v9194_v50, %v4979_v1  ;;  %v4977_v7 = vadd.f32 %v4934_v4, %v4479_v35  ;;  %v4439_v42 = vpop.f32.mrf.mxu1  ;;  %v4937_v36 = vpop.f32.mrf.mxu0 }
 0x223   : > { %v5109_v22 = vsel %vm5045_vm1, %v5013_v25, %v5077_v28  ;;  %v4980_v32 = vadd.f32 %v6446_v34, %v4482_v38  ;;  %v4480_v24 = vadd.f32 %v4439_v42, %v3726_v63 }
 0x224   : > { %5141 = vst [vmem:[%s9207_s21 + $0xc8] sm:$0xff] %v5109_v22  ;;  %vm5050_vm2 = vcmp.gt.f32.partialorder %v5018_v18, 0.0  ;;  %v5082_v31 = vmul.f32 0.1, %v5018_v18  ;;  %v5016_v44 = vadd.f32 %v9194_v50, %v4977_v7 }
 0x225   : > { %v5019_v54 = vadd.f32 %v9194_v50, %v4980_v32  ;;  %v4978_v39 = vadd.f32 %v4937_v36, %v4480_v24 }
 0x226   : > { %v5114_v45 = vsel %vm5050_vm2, %v5018_v18, %v5082_v31  ;;  %vm5048_vm3 = vcmp.gt.f32.partialorder %v5016_v44, 0.0  ;;  %v5080_v33 = vmul.f32 0.1, %v5016_v44 }
 0x227   : > { %5146 = vst [vmem:[%s9207_s21 + $0xf0] sm:$0xff] %v5114_v45  ;;  %vm5051_vm4 = vcmp.gt.f32.partialorder %v5019_v54, 0.0  ;;  %v5083_v13 = vmul.f32 0.1, %v5019_v54  ;;  %v5017_v19 = vadd.f32 %v9194_v50, %v4978_v39 }
 0x228   : > { %v5112_v23 = vsel %vm5048_vm3, %v5016_v44, %v5080_v33 }
 0x229   : > { %5144 = vst [vmem:[%s9207_s21 + $0xe0] sm:$0xff] %v5112_v23  ;;  %v5115_v49 = vsel %vm5051_vm4, %v5019_v54, %v5083_v13  ;;  %vm5049_vm5 = vcmp.gt.f32.partialorder %v5017_v19, 0.0  ;;  %v5081_v9 = vmul.f32 0.1, %v5017_v19 }
 0x22a   : > { %5147 = vst [vmem:[%s9207_s21 + $0xf8] sm:$0xff] %v5115_v49 }
 0x22b   : > { %v5113_v62 = vsel %vm5049_vm5, %v5017_v19, %v5081_v9 }
 0x22c   : > { %5145 = vst [vmem:[%s9207_s21 + $0xe8] sm:$0xff] %v5113_v62 }
 0x22d PF: > { %s13_s12 = sadd.s32 1, %s6607_s12  }
 0x22e   : > { %p10_p4 = scmp.ge.s32.totalorder %s13_s12, 4  }
 0x230   :  { %12 = sbr.rel (!%p10_p4) target bundleno = 1 (0x1), region = 72 }

// kernel: forward.13
= control target key start
LH: loop header
LB: loop body
LE: loop exit
PB: predicated region body
PF: predicated region fallthrough
CT: control target
= control target key end

     0   :  { %s3040_s12 = smov 0   ;;  %s3593_s0 = inlined_call_operand.vmem [shape: bf16[2,10,10,128], index: 0, kind: input, shape index: {}]   ;;  %s3594_s1 = inlined_call_operand.vmem [shape: bf16[9,128,128], index: 1, kind: input, shape index: {}]   ;;  %s3595_s2 = inlined_call_operand.vmem [shape: f32[1,128], index: 2, kind: input, shape index: {}]   ;;  %s3596_s3 = inlined_call_operand.vmem [shape: f32[2,8,8,128], index: 3, kind: output, shape index: {}]  }
   0x1 LB: > { %s2243_s13 = sadd.s32 4294967295, %s3018_s12   ;;  %p2247_p0 = scmp.ge.s32.totalorder %s3018_s12, 1  ;;  %s3018_s12 = sphi %s3040_s12, %s13_s12  }
   0x2   : > { %p137_p1 = scmp.lt.s32.totalorder %s3018_s12, 3 }
   0x4   : > { %p138_p2 = pnand %p2247_p0, %p137_p1 }
   0x6   : > { %141 = sbr.rel (%p138_p2) target bundleno = 382 (0x17e), region = 32 }
   0xb   : > { %v2928_v0 = vld [vmem:[%s3594_s1 + $0x78] sm:$0xff]   ;;  %p161_p3 = scmp.lt.s32.totalorder %s2243_s13, 1  ;;  %v2930_v2 = vld [vmem:[%s3594_s1 + $0x70] sm:$0xff]   ;;  %v2932_v4 = vld [vmem:[%s3594_s1 + $0x68] sm:$0xff]   ;;  %vm204_vm0 = vsmask.f32 3328 }
   0xc   : > { %v2929_v1 = vld [vmem:[%s3594_s1 + $0x38] sm:$0xff]   ;;  %2687 = vmatprep.subr.bf16.mxu0 %v2928_v0  ;;  %v2931_v3 = vld [vmem:[%s3594_s1 + $0x30] sm:$0xff]   ;;  %v2933_v5 = vld [vmem:[%s3594_s1 + $0x28] sm:$0xff]   ;;  %vm205_vm1 = vsmask.f32 7440  ;;  %vm626_vm3 = vcmask 1042432  }
   0xd   : > { %2711 = vmatprep.subr.bf16.mxu1 %v2929_v1  ;;  %2688 = vmatpush3.bf16.msra.mxu0 %v2928_v0  ;;  %s3606_s13 = smov (!%p161_p3, %s2243_s13), 1  ;;  %v2934_v6 = vld [vmem:[%s3594_s1 + $0x60] sm:$0xff]   ;;  %v2936_v8 = vld [vmem:[%s3594_s1 + $0x58] sm:$0xff]   ;;  %v2938_v10 = vld [vmem:[%s3594_s1 + $0x50] sm:$0xff]   ;;  %vm627_vm4 = vcmask 1046532  }
   0xe   : > { %2712 = vmatpush3.bf16.msra.mxu1 %v2929_v1  ;;  %2689 = vmatprep.subr.bf16.mxu0 %v2930_v2  ;;  %v2935_v7 = vld [vmem:[%s3594_s1 + $0x20] sm:$0xff]   ;;  %s2919_s30 = smul.u32 80, %s3606_s13  ;;  %v2937_v9 = vld [vmem:[%s3594_s1 + $0x18] sm:$0xff]   ;;  %v2939_v14 = vld [vmem:[%s3594_s1 + $0x10] sm:$0xff]   ;;  %s2578_s18 = sshll.u32 %s3606_s13, 6 }
   0xf   : > { %2713 = vmatprep.subr.bf16.mxu1 %v2931_v3  ;;  %v2940_v17 = vld [vmem:[%s3594_s1 + $0x48] sm:$0xff]   ;;  %vm3127_vm2 = vmor %vm204_vm0, %vm205_vm1  ;;  %v2942_v46 = vld [vmem:[%s3594_s1 + $0x40] sm:$0xff]   ;;  %s3580_s21 = scalar_lea.vmem %s3596_s3, %s2578_s18 }
  0x10   : > { %s3084_s10 = scalar_lea.vmem %s3593_s0, %s2919_s30  ;;  %v2941_v23 = vld [vmem:[%s3594_s1 + $0x8] sm:$0xff]   ;;  %v2943_v50 = vld [vmem:[%s3594_s1] sm:$0xff]   ;;  %v2946_v59 = vld [vmem:[%s3594_s1 + $0xb8] sm:$0xff]  }
  0x11   : > { %2690 = vmatpush3.bf16.msra.mxu0 %v2930_v2  ;;  %v172_v11 = vld [vmem:[%s3084_s10] sm:$0xf]  ;;  %v173_v12 = vld [vmem:[%s3084_s10 + $0x8] sm:$0xf]  ;;  %v3092_v13 = vld [vmem:[%s3084_s10 + $0x4] sm:$0x1] }
  0x12   : > { %2714 = vmatpush3.bf16.msra.mxu1 %v2931_v3  ;;  %2691 = vmatprep.subr.bf16.mxu0 %v2932_v4  ;;  %v3098_v15 = vld [vmem:[%s3084_s10 + $0xc] sm:$0x1]  ;;  %v2279_v16 = vcombine.low %v172_v11, %v173_v12  ;;  %v208_v18 = vshrl.u32 %v172_v11, 16  ;;  %v211_v19 = vshll.u32 %v172_v11, 16  ;;  %v217_v20 = vshll.u32 %v3092_v13, 16  ;;  %v2947_v62 = vld [vmem:[%s3594_s1 + $0xf8] sm:$0xff]   ;;  %vm3210_vm5 = vmor %vm626_vm3, %vm627_vm4 }
  0x13   : > { %2715 = vmatprep.subr.bf16.mxu1 %v2933_v5  ;;  %v222_v21 = vshrl.u32 %v173_v12, 16  ;;  %v3105_v22 = vld [vmem:[%s3084_s10 + $0x10] sm:$0xf]  ;;  %v225_v24 = vshll.u32 %v173_v12, 16  ;;  %v231_v25 = vshll.u32 %v3098_v15, 16  ;;  %v2951_v11 = vld [vmem:[%s3594_s1 + $0xe8] sm:$0xff]  }
  0x14   : > { %2727 = vmatprep.mubr.bf16.mxu1 %v2279_v16  ;;  %v3112_v26 = vld [vmem:[%s3084_s10 + $0x18] sm:$0xf]  ;;  %v210_v27 = vrot.slane %v208_v18, 4  ;;  %v213_v28 = vrot.slane %v211_v19, 5  ;;  %v219_v29 = vrot.slane %v217_v20, 5  ;;  %v236_v35 = vshrl.u32 %v3105_v22, 16 }
  0x15   : > { %2692 = vmatpush3.bf16.msra.mxu0 %v2932_v4  ;;  %v224_v30 = vrot.slane %v222_v21, 4  ;;  %v3115_v31 = vld [vmem:[%s3084_s10 + $0x14] sm:$0x1]  ;;  %v227_v32 = vrot.slane %v225_v24, 5  ;;  %v233_v33 = vrot.slane %v231_v25, 5  ;;  %v239_v36 = vshll.u32 %v3105_v22, 16 }
  0x16   : > { %2716 = vmatpush3.bf16.msra.mxu1 %v2933_v5  ;;  %2693 = vmatprep.subr.bf16.mxu0 %v2934_v6  ;;  %v3118_v34 = vld [vmem:[%s3084_s10 + $0x1c] sm:$0x1]  ;;  %v214_v37 = vor.u32 %v213_v28, %v210_v27  ;;  %v245_v38 = vshll.u32 %v3115_v31, 16  ;;  %v250_v39 = vshrl.u32 %v3112_v26, 16  ;;  %v253_v40 = vshll.u32 %v3112_v26, 16  ;;  %v2948_v3 = vld [vmem:[%s3594_s1 + $0xb0] sm:$0xff]  }
  0x17   : > { %2717 = vmatprep.subr.bf16.mxu1 %v2935_v7  ;;  %v228_v42 = vor.u32 %v227_v32, %v224_v30  ;;  %v238_v43 = vrot.slane %v236_v35, 4  ;;  %v241_v44 = vrot.slane %v239_v36, 5  ;;  %v259_v45 = vshll.u32 %v3118_v34, 16  ;;  %v2949_v5 = vld [vmem:[%s3594_s1 + $0xf0] sm:$0xff]   ;;  %v3183_v28 = vld [vmem:[%s3084_s10 + $0x3c] sm:$0x1] }
  0x18   : > { %v215_v47 = vrot.slane %v214_v37, 4  ;;  %v252_v48 = vrot.slane %v250_v39, 4  ;;  %v255_v49 = vrot.slane %v253_v40, 5  ;;  %v247_v53 = vrot.slane %v245_v38, 5  ;;  %v178_v18 = vld [vmem:[%s3084_s10 + $0x30] sm:$0xf] }
  0x19   : > { %2694 = vmatpush3.bf16.msra.mxu0 %v2934_v6  ;;  %v229_v51 = vrot.slane %v228_v42, 4  ;;  %v242_v52 = vor.u32 %v241_v44, %v238_v43  ;;  %v261_v56 = vrot.slane %v259_v45, 5  ;;  %v2280_v2 = vcombine.low %v3105_v22, %v3112_v26  ;;  %v176_v6 = vld [vmem:[%s3084_s10 + $0x20] sm:$0xf]  ;;  %v179_v22 = vld [vmem:[%s3084_s10 + $0x38] sm:$0xf] }
  0x1a   : > { %2718 = vmatpush3.bf16.msra.mxu1 %v2935_v7  ;;  %2695 = vmatprep.subr.bf16.mxu0 %v2936_v8  ;;  %v220_v54 = vsel %vm3127_vm2, %v215_v47, %v219_v29  ;;  %v256_v55 = vor.u32 %v255_v49, %v252_v48  ;;  %v631_v4 = vrot.slane %v3092_v13, 5  ;;  %v2950_v7 = vld [vmem:[%s3594_s1 + $0xa8] sm:$0xff]   ;;  %v264_v12 = vshrl.u32 %v176_v6, 16  ;;  %v2952_v39 = vld [vmem:[%s3594_s1 + $0xa0] sm:$0xff]   ;;  %v605_v13 = vld [vmem:[%s3084_s10 + $0x18] sm:$0xe] }
  0x1b   : > { %2719 = vmatprep.subr.bf16.mxu1 %v2937_v9  ;;  %v234_v57 = vsel %vm3127_vm2, %v229_v51, %v233_v33  ;;  %v243_v58 = vrot.slane %v242_v52, 4  ;;  %v292_v32 = vshrl.u32 %v178_v18, 16  ;;  %v295_v33 = vshll.u32 %v178_v18, 16  ;;  %v2953_v45 = vld [vmem:[%s3594_s1 + $0xe0] sm:$0xff]  }
  0x1c   : > { %v2267_v60 = vcombine.low %v220_v54, %v234_v57  ;;  %v257_v61 = vrot.slane %v256_v55, 4  ;;  %v266_v24 = vrot.slane %v264_v12, 4  ;;  %v306_v37 = vshrl.u32 %v179_v22, 16  ;;  %v2954_v57 = vld [vmem:[%s3594_s1 + $0x98] sm:$0xff]  }
  0x1d   : > { %2696 = vmatpush3.bf16.msra.mxu0 %v2936_v8  ;;  %v248_v63 = vsel %vm3127_vm2, %v243_v58, %v247_v53  ;;  %v177_v8 = vld [vmem:[%s3084_s10 + $0x28] sm:$0xf]  ;;  %v309_v38 = vshll.u32 %v179_v22, 16  ;;  %v294_v42 = vrot.slane %v292_v32, 4  ;;  %v297_v43 = vrot.slane %v295_v33, 5 }
  0x1e   : > { %2720 = vmatpush3.bf16.msra.mxu1 %v2937_v9  ;;  %2697 = vmatprep.subr.bf16.mxu0 %v2938_v10  ;;  %v262_v0 = vsel %vm3127_vm2, %v257_v61, %v261_v56  ;;  %v3167_v9 = vld [vmem:[%s3084_s10 + $0x24] sm:$0x1]  ;;  %v281_v19 = vshll.u32 %v177_v8, 16  ;;  %v2281_v21 = vcombine.low %v176_v6, %v177_v8  ;;  %v315_v44 = vshll.u32 %v3183_v28, 16 }
  0x1f   : > { %2721 = vmatprep.subr.bf16.mxu1 %v2939_v14  ;;  %2703 = vmatprep.mubr.bf16.mxu0 %v2267_v60  ;;  %v2268_v1 = vcombine.low %v248_v63, %v262_v0  ;;  %v273_v16 = vshll.u32 %v3167_v9, 16  ;;  %v308_v47 = vrot.slane %v306_v37, 4  ;;  %v311_v48 = vrot.slane %v309_v38, 5  ;;  %v602_v63 = vld [vmem:[%s3084_s10] sm:$0xe] }
  0x20   : > { %v283_v29 = vrot.slane %v281_v19, 5  ;;  %v2282_v52 = vcombine.low %v178_v18, %v179_v22  ;;  %v635_v53 = vrot.slane %v3098_v15, 5  ;;  %v317_v56 = vrot.slane %v315_v44, 5  ;;  %v2955_v15 = vld [vmem:[%s3594_s1 + $0xd8] sm:$0xff]   ;;  %v603_v0 = vld [vmem:[%s3084_s10 + $0x8] sm:$0xe] }
  0x21   : > { %2698 = vmatpush3.bf16.msra.mxu0 %v2938_v10  ;;  %v3170_v10 = vld [vmem:[%s3084_s10 + $0x2c] sm:$0x1]  ;;  %v275_v26 = vrot.slane %v273_v16, 5  ;;  %v312_v55 = vor.u32 %v311_v48, %v308_v47  ;;  %v604_v18 = vld [vmem:[%s3084_s10 + $0x10] sm:$0xe]  ;;  %v639_v19 = vrot.slane %v3115_v31, 5 }
  0x22   : > { %2722 = vmatpush3.bf16.msra.mxu1 %v2939_v14  ;;  %2699 = vmatprep.subr.bf16.mxu0 %v2940_v17  ;;  %v267_v14 = vshll.u32 %v176_v6, 16  ;;  %v287_v20 = vshll.u32 %v3170_v10, 16  ;;  %v2960_v16 = vld [vmem:[%s3594_s1 + $0x88] sm:$0xff]   ;;  %v2294_v22 = vrot.slane %v605_v13, 9  ;;  %v2963_v31 = vld [vmem:[%s3594_s1 + $0xc0] sm:$0xff]  }
  0x23   : > { %2723 = vmatprep.subr.bf16.mxu1 %v2941_v23  ;;  %v313_v61 = vrot.slane %v312_v55, 4  ;;  %v2965_v37 = vld [vmem:[%s3084_s10 + $0x18] ss:$8 sps:$4 sm:$0xff]   ;;  %v2972_v48 = vld [vmem:[%s3084_s10 + $0x28] ss:$8 sps:$4 sm:$0xff]  }
  0x24   : > { %v269_v25 = vrot.slane %v267_v14, 5  ;;  %v289_v30 = vrot.slane %v287_v20, 5  ;;  %v643_v20 = vrot.slane %v3118_v34, 5  ;;  %v651_v34 = vrot.slane %v3170_v10, 5  ;;  %v2967_v10 = vld [vmem:[%s3594_s1 + $0x178] sm:$0xff]  }
  0x25   : > { %2700 = vmatpush3.bf16.msra.mxu0 %v2940_v17  ;;  %v278_v17 = vshrl.u32 %v177_v8, 16  ;;  %v2964_v8 = vld [vmem:[%s3084_s10 + $0x8] ss:$8 sps:$4 sm:$0xff]  }
  0x26   : > { %2724 = vmatpush3.bf16.msra.mxu1 %v2941_v23  ;;  %2701 = vmatprep.subr.bf16.mxu0 %v2942_v46  ;;  %v3180_v23 = vld [vmem:[%s3084_s10 + $0x34] sm:$0x1]  ;;  %v270_v35 = vor.u32 %v269_v25, %v266_v24  ;;  %v606_v24 = vld [vmem:[%s3084_s10 + $0x20] sm:$0xe]  ;;  %v607_v25 = vld [vmem:[%s3084_s10 + $0x28] sm:$0xe] }
  0x27   : > { %2725 = vmatprep.subr.bf16.mxu1 %v2943_v50  ;;  %v280_v27 = vrot.slane %v278_v17, 4  ;;  %v301_v36 = vshll.u32 %v3180_v23, 16  ;;  %v2296_v32 = vrot.slane %v607_v25, 9  ;;  %v655_v38 = vrot.slane %v3180_v23, 5  ;;  %v2969_v23 = vld [vmem:[%s3594_s1 + $0x170] sm:$0xff]  }
  0x28   : > { %v2363_v55 = vld [vmem:[%s3084_s10 + $0x8] sm:$0xf]  ;;  %v2370_v25 = vld [vmem:[%s3084_s10 + $0x24] sm:$0x1] }
  0x29   : > { %2702 = vmatpush3.bf16.msra.mxu0 %v2942_v46  ;;  %v284_v40 = vor.u32 %v283_v29, %v280_v27  ;;  %v271_v46 = vrot.slane %v270_v35, 4  ;;  %v303_v51 = vrot.slane %v301_v36, 5  ;;  %v647_v27 = vrot.slane %v3167_v9, 5  ;;  %v2966_v29 = vld [vmem:[%s3594_s1 + $0x138] sm:$0xff]   ;;  %v608_v35 = vld [vmem:[%s3084_s10 + $0x30] sm:$0xe] }
  0x2a   : > { %2726 = vmatpush3.bf16.msra.mxu1 %v2943_v50  ;;  %2735 = vmatprep.subr.bf16.mxu0 %v2946_v59  ;;  %v298_v50 = vor.u32 %v297_v43, %v294_v42  ;;  %v644_v9 = vsel %vm3210_vm5, %v2294_v22, %v643_v20  ;;  %v609_v36 = vld [vmem:[%s3084_s10 + $0x38] sm:$0xe]  ;;  %v652_v42 = vsel %vm3210_vm5, %v2296_v32, %v651_v34  ;;  %v659_v43 = vrot.slane %v3183_v28, 5  ;;  %v2368_v20 = vld [vmem:[%s3084_s10 + $0x1c] sm:$0x1] }
  0x2b   : > { %2759 = vmatprep.subr.bf16.mxu1 %v2947_v62  ;;  %v285_v49 = vrot.slane %v284_v40, 4  ;;  %v276_v54 = vsel %vm3127_vm2, %v271_v46, %v275_v26  ;;  %v2962_v26 = vld [vmem:[%s3594_s1 + $0x80] sm:$0xff]   ;;  %v2297_v44 = vrot.slane %v608_v35, 9  ;;  %v2968_v46 = vld [vmem:[%s3594_s1 + $0x130] sm:$0xff]   ;;  %v2976_v22 = vld [vmem:[%s3594_s1 + $0x118] sm:$0xff]  }
  0x2c   : > { %2704 = vmatmul.mubr.bf16.vlgmr.msra.gmra.mxu0 %v2268_v1  ;;  %v2977_v34 = vld [vmem:[%s3594_s1 + $0x158] sm:$0xff]   ;;  %v2978_v35 = vld [vmem:[%s3594_s1 + $0x110] sm:$0xff]  }
  0x2d   : > { %2728 = vmatmul.mubr.bf16.vlgmr.msra.gmra.mxu1 %v2280_v2  ;;  %2736 = vmatpush3.bf16.msra.mxu0 %v2946_v59  ;;  %v290_v58 = vsel %vm3127_vm2, %v285_v49, %v289_v30  ;;  %v299_v59 = vrot.slane %v298_v50, 4  ;;  %v318_v2 = vsel %vm3127_vm2, %v313_v61, %v317_v56  ;;  %v2295_v30 = vrot.slane %v606_v24, 9  ;;  %v2970_v50 = vld [vmem:[%s3594_s1 + $0x128] sm:$0xff]  }
  0x2e   : > { %2760 = vmatpush3.bf16.msra.mxu1 %v2947_v62  ;;  %2737 = vmatprep.subr.bf16.mxu0 %v2948_v3  ;;  %v2269_v60 = vcombine.low %v276_v54, %v290_v58  ;;  %v656_v28 = vsel %vm3210_vm5, %v2297_v44, %v655_v38  ;;  %v2974_v54 = vld [vmem:[%s3594_s1 + $0x120] sm:$0xff]   ;;  %v2364_v56 = vld [vmem:[%s3084_s10 + $0xc] sm:$0x1]  ;;  %v2365_v58 = vld [vmem:[%s3084_s10 + $0x10] sm:$0xf] }
  0x2f   : > { %2761 = vmatprep.subr.bf16.mxu1 %v2949_v5  ;;  %2731 = vmatprep.mubr.bf16.mxu1 %v2281_v21  ;;  %v304_v62 = vsel %vm3127_vm2, %v299_v59, %v303_v51  ;;  %v2293_v21 = vrot.slane %v604_v18, 9  ;;  %v648_v40 = vsel %vm3210_vm5, %v2295_v30, %v647_v27  ;;  %v2971_v51 = vld [vmem:[%s3594_s1 + $0x168] sm:$0xff]   ;;  %v2366_v59 = vld [vmem:[%s3084_s10 + $0x14] sm:$0x1]  ;;  %v1012_v61 = vshll.u32 %v2364_v56, 16 }
  0x30   : > { %2707 = vmatprep.mubr.bf16.mxu0 %v2269_v60  ;;  %v2270_v6 = vcombine.low %v304_v62, %v318_v2  ;;  %v2317_v47 = vcombine.low %v648_v40, %v652_v42  ;;  %v1006_v60 = vshll.u32 %v2363_v55, 16  ;;  %v1017_v62 = vshrl.u32 %v2365_v58, 16  ;;  %v2407_v2 = vld [vmem:[%s3084_s10 + $0x8] sm:$0xe]  ;;  %v2979_v40 = vld [vmem:[%s3594_s1 + $0x150] sm:$0xff]  }
  0x31   : > { %2738 = vmatpush3.bf16.msra.mxu0 %v2948_v3  ;;  %v2291_v3 = vrot.slane %v602_v63, 9  ;;  %v640_v33 = vsel %vm3210_vm5, %v2293_v21, %v639_v19  ;;  %v1020_v63 = vshll.u32 %v2365_v58, 16  ;;  %v1298_v19 = vrot.slane %v2366_v59, 5  ;;  %v2369_v21 = vld [vmem:[%s3084_s10 + $0x20] sm:$0xf] }
  0x32   : > { %2762 = vmatpush3.bf16.msra.mxu1 %v2949_v5  ;;  %2739 = vmatprep.subr.bf16.mxu0 %v2950_v7  ;;  %v2292_v5 = vrot.slane %v603_v0, 9  ;;  %v1026_v0 = vshll.u32 %v2366_v59, 16  ;;  %v1045_v32 = vshrl.u32 %v2369_v21, 16  ;;  %v2371_v59 = vld [vmem:[%s3084_s10 + $0x28] sm:$0xf] }
  0x33   : > { %2763 = vmatprep.subr.bf16.mxu1 %v2951_v11  ;;  %v632_v12 = vsel %vm3210_vm5, %v2291_v3, %v631_v4  ;;  %v2961_v4 = vld [vmem:[%s3594_s1 + $0xc8] sm:$0xff]  }
  0x34   : > { %v636_v14 = vsel %vm3210_vm5, %v2292_v5, %v635_v53  ;;  %2708 = vmatmul.mubr.bf16.gmra.mxu0 %v2270_v6  ;;  %v1008_v5 = vrot.slane %v1006_v60, 5  ;;  %v2408_v6 = vld [vmem:[%s3084_s10 + $0x10] sm:$0xe]  ;;  %v1047_v44 = vrot.slane %v1045_v32, 4 }
  0x35   : > { %2740 = vmatpush3.bf16.msra.mxu0 %v2950_v7  ;;  %2732 = vmatmul.mubr.bf16.gmra.mxu1 %v2282_v52  ;;  %v2958_v7 = vld [vmem:[%s3594_s1 + $0x90] sm:$0xff]   ;;  %v2315_v17 = vcombine.low %v632_v12, %v636_v14  ;;  %v2973_v52 = vld [vmem:[%s3084_s10 + $0x38] ss:$8 sps:$4 sm:$0xff]   ;;  %v1019_v12 = vrot.slane %v1017_v62, 4  ;;  %v1022_v14 = vrot.slane %v1020_v63, 5 }
  0x36   : > { %2764 = vmatpush3.bf16.msra.mxu1 %v2951_v11  ;;  %2741 = vmatprep.subr.bf16.mxu0 %v2952_v39  ;;  %v2959_v11 = vld [vmem:[%s3594_s1 + $0xd0] sm:$0xff]  }
  0x37   : > { %2765 = vmatprep.subr.bf16.mxu1 %v2953_v45  ;;  %2775 = vmatprep.mubr.bf16.mxu1 %v2964_v8  ;;  %v1294_v8 = vrot.slane %v2364_v56, 5  ;;  %v1023_v24 = vor.u32 %v1022_v14, %v1019_v12  ;;  %v2981_v56 = vld [vmem:[%s3594_s1 + $0x148] sm:$0xff]   ;;  %v2373_v60 = vld [vmem:[%s3084_s10 + $0x30] sm:$0xf]  ;;  %v3354_v63 = vld [vmem:[%s3084_s10 + $0x34] sm:$0x1] }
  0x38   : > { %2751 = vmatprep.mubr.bf16.mxu0 %v2315_v17  ;;  %v2367_v17 = vld [vmem:[%s3084_s10 + $0x18] sm:$0xf]  ;;  %v3365_v12 = vld [vmem:[%s3084_s10 + $0x3c] sm:$0x1] }
  0x39   : > { %2742 = vmatpush3.bf16.msra.mxu0 %v2952_v39  ;;  %v2316_v39 = vcombine.low %v640_v33, %v644_v9  ;;  %v1034_v27 = vshll.u32 %v2367_v17, 16  ;;  %v1048_v33 = vshll.u32 %v2369_v21, 16  ;;  %v2409_v9 = vld [vmem:[%s3084_s10 + $0x18] sm:$0xe]  ;;  %v3370_v21 = vld [vmem:[%s3084_s10 + $0x44] sm:$0x1] }
  0x3a   : > { %2766 = vmatpush3.bf16.msra.mxu1 %v2953_v45  ;;  %2743 = vmatprep.subr.bf16.mxu0 %v2954_v57  ;;  %v2298_v45 = vrot.slane %v609_v36, 9  ;;  %v1024_v36 = vrot.slane %v1023_v24, 4  ;;  %v2983_v24 = vld [vmem:[%s3594_s1 + $0x140] sm:$0xff]  }
  0x3b   : > { %2767 = vmatprep.subr.bf16.mxu1 %v2955_v15  ;;  %v1036_v38 = vrot.slane %v1034_v27, 5 }
  0x3c   : > { %v660_v49 = vsel %vm3210_vm5, %v2298_v45, %v659_v43  ;;  %v1050_v45 = vrot.slane %v1048_v33, 5 }
  0x3d   : > { %2744 = vmatpush3.bf16.msra.mxu0 %v2954_v57  ;;  %v2318_v53 = vcombine.low %v656_v28, %v660_v49  ;;  %v2975_v57 = vld [vmem:[%s3594_s1 + $0x160] sm:$0xff]  }
  0x3e   : > { %2768 = vmatpush3.bf16.msra.mxu1 %v2955_v15  ;;  %2745 = vmatprep.subr.bf16.mxu0 %v2958_v7  ;;  %v1003_v15 = vshrl.u32 %v2363_v55, 16  ;;  %v1051_v49 = vor.u32 %v1050_v45, %v1047_v44  ;;  %v1306_v55 = vrot.slane %v2370_v25, 5 }
  0x3f   : > { %2769 = vmatprep.subr.bf16.mxu1 %v2959_v11 }
  0x40   : > { %v1005_v3 = vrot.slane %v1003_v15, 4  ;;  %v3342_v15 = vld [vmem:[%s3084_s10 + $0x2c] sm:$0x1] }
  0x41   : > { %2746 = vmatpush3.bf16.msra.mxu0 %v2958_v7  ;;  %v2415_v7 = vrot.slane %v2407_v2, 9  ;;  %v1062_v2 = vshll.u32 %v2371_v59, 16 }
  0x42   : > { %2770 = vmatpush3.bf16.msra.mxu1 %v2959_v11  ;;  %2747 = vmatprep.subr.bf16.mxu0 %v2960_v16  ;;  %v1014_v11 = vrot.slane %v1012_v61, 5  ;;  %v1009_v18 = vor.u32 %v1008_v5, %v1005_v3  ;;  %v2375_v3 = vld [vmem:[%s3084_s10 + $0x38] sm:$0xf]  ;;  %v2982_v5 = vld [vmem:[%s3594_s1 + $0x100] sm:$0xff]  }
  0x43   : > { %2771 = vmatprep.subr.bf16.mxu1 %v2961_v4  ;;  %v1295_v13 = vsel %vm3210_vm5, %v2415_v7, %v1294_v8  ;;  %v1068_v7 = vshll.u32 %v3342_v15, 16  ;;  %v1073_v8 = vshrl.u32 %v2373_v60, 16 }
  0x45   : > { %2748 = vmatpush3.bf16.msra.mxu0 %v2960_v16  ;;  %v1028_v16 = vrot.slane %v1026_v0, 5  ;;  %v1059_v0 = vshrl.u32 %v2371_v59, 16 }
  0x46   : > { %2772 = vmatpush3.bf16.msra.mxu1 %v2961_v4  ;;  %2749 = vmatprep.subr.bf16.mxu0 %v2962_v26  ;;  %v2416_v4 = vrot.slane %v2408_v6, 9 }
  0x47   : > { %2773 = vmatprep.subr.bf16.mxu1 %v2963_v31  ;;  %v1061_v14 = vrot.slane %v1059_v0, 4  ;;  %v2988_v0 = vld [vmem:[%s3594_s1 + $0x1a8] sm:$0xff]  }
  0x48   : > { %v1299_v30 = vsel %vm3210_vm5, %v2416_v4, %v1298_v19  ;;  %v1070_v4 = vrot.slane %v1068_v7, 5  ;;  %v1075_v19 = vrot.slane %v1073_v8, 4  ;;  %v2989_v8 = vld [vmem:[%s3594_s1 + $0x1e8] sm:$0xff]  }
  0x49   : > { %2750 = vmatpush3.bf16.msra.mxu0 %v2962_v26  ;;  %v1031_v26 = vshrl.u32 %v2367_v17, 16  ;;  %v1082_v17 = vshll.u32 %v3354_v63, 16 }
  0x4a   : > { %2774 = vmatpush3.bf16.msra.mxu1 %v2963_v31  ;;  %2783 = vmatprep.subr.bf16.mxu0 %v2966_v29  ;;  %v1040_v31 = vshll.u32 %v2368_v20, 16 }
  0x4b   : > { %2807 = vmatprep.subr.bf16.mxu1 %v2967_v10 }
  0x4c   : > { %2752 = vmatmul.mubr.bf16.vlgmr.msra.gmra.mxu0 %v2316_v39  ;;  %v2410_v39 = vld [vmem:[%s3084_s10 + $0x20] sm:$0xe]  ;;  %v3322_v43 = vrot.slane %v1040_v31, 5  ;;  %v1096_v31 = vshll.u32 %v3365_v12, 16 }
  0x4d   : > { %2776 = vmatmul.mubr.bf16.vlgmr.msra.gmra.mxu1 %v2965_v37  ;;  %2784 = vmatpush3.bf16.msra.mxu0 %v2966_v29  ;;  %v1010_v29 = vrot.slane %v1009_v18, 4  ;;  %v2439_v37 = vcombine.low %v1295_v13, %v1299_v30  ;;  %v2377_v18 = vld [vmem:[%s3084_s10 + $0x40] sm:$0xf]  ;;  %v1087_v13 = vshrl.u32 %v2375_v3, 16 }
  0x4e   : > { %2808 = vmatpush3.bf16.msra.mxu1 %v2967_v10  ;;  %2785 = vmatprep.subr.bf16.mxu0 %v2968_v46  ;;  %v1033_v10 = vrot.slane %v1031_v26, 4  ;;  %v1084_v26 = vrot.slane %v1082_v17, 5  ;;  %v1101_v30 = vshrl.u32 %v2377_v18, 16  ;;  %v1104_v32 = vshll.u32 %v2377_v18, 16  ;;  %v3000_v17 = vld [vmem:[%s3084_s10 + $0x10] ss:$8 sps:$4 sm:$0xff]  }
  0x4f   : > { %2809 = vmatprep.subr.bf16.mxu1 %v2969_v23  ;;  %2755 = vmatprep.mubr.bf16.mxu0 %v2317_v47  ;;  %v1015_v42 = vsel %vm3127_vm2, %v1010_v29, %v1014_v11  ;;  %v1054_v47 = vshll.u32 %v2370_v25, 16  ;;  %v1076_v11 = vshll.u32 %v2373_v60, 16  ;;  %v1089_v27 = vrot.slane %v1087_v13, 4  ;;  %v2987_v60 = vld [vmem:[%s3594_s1 + $0x1f0] sm:$0xff]  }
  0x50   : > { %2779 = vmatprep.mubr.bf16.mxu1 %v2972_v48  ;;  %v2417_v48 = vrot.slane %v2409_v9, 9  ;;  %v2984_v9 = vld [vmem:[%s3594_s1 + $0x1b8] sm:$0xff]   ;;  %v1098_v45 = vrot.slane %v1096_v31, 5  ;;  %v2487_v18 = vld [vmem:[%s3084_s10 + $0x10] sm:$0xf] }
  0x51   : > { %2786 = vmatpush3.bf16.msra.mxu0 %v2968_v46  ;;  %v1029_v46 = vsel %vm3127_vm2, %v1024_v36, %v1028_v16  ;;  %v1064_v16 = vrot.slane %v1062_v2, 5  ;;  %v1110_v36 = vshll.u32 %v3370_v21, 16  ;;  %v3430_v13 = vld [vmem:[%s3084_s10 + $0x14] sm:$0x1] }
  0x52   : > { %2810 = vmatpush3.bf16.msra.mxu1 %v2969_v23  ;;  %2787 = vmatprep.subr.bf16.mxu0 %v2970_v50  ;;  %v1037_v23 = vor.u32 %v1036_v38, %v1033_v10  ;;  %v2395_v28 = vcombine.low %v1015_v42, %v1029_v46  ;;  %v2985_v10 = vld [vmem:[%s3594_s1 + $0x1f8] sm:$0xff]   ;;  %v1106_v42 = vrot.slane %v1104_v32, 5  ;;  %v2411_v46 = vld [vmem:[%s3084_s10 + $0x28] sm:$0xe] }
  0x53   : > { %2811 = vmatprep.subr.bf16.mxu1 %v2971_v51  ;;  %v1065_v25 = vor.u32 %v1064_v16, %v1061_v14  ;;  %v2990_v14 = vld [vmem:[%s3594_s1 + $0x1a0] sm:$0xff]  }
  0x54   : > { %2756 = vmatmul.mubr.bf16.gmra.mxu0 %v2318_v53  ;;  %v3329_v53 = vrot.slane %v1037_v23, 4  ;;  %v2412_v23 = vld [vmem:[%s3084_s10 + $0x30] sm:$0xe]  ;;  %v2991_v16 = vld [vmem:[%s3594_s1 + $0x1e0] sm:$0xff]  }
  0x55   : > { %2788 = vmatpush3.bf16.msra.mxu0 %v2970_v50  ;;  %2780 = vmatmul.mubr.bf16.gmra.mxu1 %v2973_v52  ;;  %v1302_v50 = vrot.slane %v2368_v20, 5  ;;  %v2980_v52 = vld [vmem:[%s3594_s1 + $0x108] sm:$0xff]   ;;  %v1078_v20 = vrot.slane %v1076_v11, 5 }
  0x56   : > { %2812 = vmatpush3.bf16.msra.mxu1 %v2971_v51  ;;  %2789 = vmatprep.subr.bf16.mxu0 %v2974_v54  ;;  %v2418_v51 = vrot.slane %v2410_v39, 9  ;;  %v1043_v61 = vsel %vm3127_vm2, %v3329_v53, %v3322_v43  ;;  %v2414_v53 = vld [vmem:[%s3084_s10 + $0x40] sm:$0xe] }
  0x57   : > { %2813 = vmatprep.subr.bf16.mxu1 %v2975_v57  ;;  %2823 = vmatprep.mubr.bf16.mxu1 %v2439_v37  ;;  %v3338_v58 = vsel %vm3210_vm5, %v2417_v48, %v1302_v50  ;;  %v1310_v37 = vrot.slane %v3342_v15, 5  ;;  %v2986_v48 = vld [vmem:[%s3594_s1 + $0x1b0] sm:$0xff]   ;;  %v1112_v50 = vrot.slane %v1110_v36, 5  ;;  %v2422_v15 = vrot.slane %v2414_v53, 9 }
  0x58   : > { %2799 = vmatprep.mubr.bf16.mxu0 %v2395_v28  ;;  %v3351_v62 = vsel %vm3210_vm5, %v2418_v51, %v1306_v55  ;;  %v2419_v51 = vrot.slane %v2411_v46, 9  ;;  %v2420_v55 = vrot.slane %v2412_v23, 9 }
  0x59   : > { %2790 = vmatpush3.bf16.msra.mxu0 %v2974_v54  ;;  %v3331_v54 = vrot.slane %v1054_v47, 5  ;;  %v2440_v33 = vcombine.low %v3338_v58, %v3351_v62  ;;  %v1314_v47 = vrot.slane %v3354_v63, 5  ;;  %v1322_v63 = vrot.slane %v3370_v21, 5 }
  0x5a   : > { %2814 = vmatpush3.bf16.msra.mxu1 %v2975_v57  ;;  %2791 = vmatprep.subr.bf16.mxu0 %v2976_v22  ;;  %v1052_v57 = vrot.slane %v1051_v49, 4  ;;  %v1311_v59 = vsel %vm3210_vm5, %v2419_v51, %v1310_v37  ;;  %v1669_v21 = vshll.u32 %v2487_v18, 16  ;;  %v3449_v37 = vld [vmem:[%s3084_s10 + $0x24] sm:$0x1] }
  0x5b   : > { %2815 = vmatprep.subr.bf16.mxu1 %v2977_v34  ;;  %v1315_v62 = vsel %vm3210_vm5, %v2420_v55, %v1314_v47  ;;  %v1323_v7 = vsel %vm3210_vm5, %v2422_v15, %v1322_v63  ;;  %v1703_v46 = vshll.u32 %v3449_v37, 16  ;;  %v2495_v63 = vld [vmem:[%s3084_s10 + $0x30] sm:$0xf] }
  0x5c   : > { %v1057_v6 = vsel %vm3127_vm2, %v1052_v57, %v3331_v54  ;;  %v1318_v57 = vrot.slane %v3365_v12, 5  ;;  %v2441_v2 = vcombine.low %v1311_v59, %v1315_v62 }
  0x5d   : > { %2792 = vmatpush3.bf16.msra.mxu0 %v2976_v22  ;;  %v1090_v22 = vshll.u32 %v2375_v3, 16  ;;  %v2396_v43 = vcombine.low %v1043_v61, %v1057_v6  ;;  %v1705_v59 = vrot.slane %v1703_v46, 5  ;;  %v3003_v46 = vld [vmem:[%s3594_s1 + $0x230] sm:$0xff]  }
  0x5e   : > { %2816 = vmatpush3.bf16.msra.mxu1 %v2977_v34  ;;  %2793 = vmatprep.subr.bf16.mxu0 %v2978_v35  ;;  %v1079_v34 = vor.u32 %v1078_v20, %v1075_v19  ;;  %v3434_v19 = vld [vmem:[%s3084_s10 + $0x1c] sm:$0x1]  ;;  %v1666_v20 = vshrl.u32 %v2487_v18, 16 }
  0x5f   : > { %2817 = vmatprep.subr.bf16.mxu1 %v2979_v40  ;;  %v1092_v29 = vrot.slane %v1090_v22, 5  ;;  %v1675_v22 = vshll.u32 %v3430_v13, 16 }
  0x60   : > { %v1080_v38 = vrot.slane %v1079_v34, 4  ;;  %v1668_v31 = vrot.slane %v1666_v20, 4  ;;  %v1671_v34 = vrot.slane %v1669_v21, 5 }
  0x61   : > { %2794 = vmatpush3.bf16.msra.mxu0 %v2978_v35  ;;  %v1066_v35 = vrot.slane %v1065_v25, 4  ;;  %v1093_v39 = vor.u32 %v1092_v29, %v1089_v27  ;;  %v2992_v27 = vld [vmem:[%s3594_s1 + $0x198] sm:$0xff]  }
  0x62   : > { %2818 = vmatpush3.bf16.msra.mxu1 %v2979_v40  ;;  %2795 = vmatprep.subr.bf16.mxu0 %v2980_v52  ;;  %v1103_v40 = vrot.slane %v1101_v30, 4  ;;  %v1085_v28 = vsel %vm3127_vm2, %v1080_v38, %v1084_v26  ;;  %v1689_v26 = vshll.u32 %v3434_v19, 16  ;;  %v2993_v29 = vld [vmem:[%s3594_s1 + $0x1d8] sm:$0xff]   ;;  %v1677_v30 = vrot.slane %v1675_v22, 5  ;;  %v3453_v38 = vld [vmem:[%s3084_s10 + $0x2c] sm:$0x1] }
  0x63   : > { %2819 = vmatprep.subr.bf16.mxu1 %v2981_v56  ;;  %v1071_v44 = vsel %vm3127_vm2, %v1066_v35, %v1070_v4  ;;  %v1094_v54 = vrot.slane %v1093_v39, 4  ;;  %v2489_v4 = vld [vmem:[%s3084_s10 + $0x18] sm:$0xf]  ;;  %v2994_v35 = vld [vmem:[%s3594_s1 + $0x190] sm:$0xff]   ;;  %v1672_v36 = vor.u32 %v1671_v34, %v1668_v31  ;;  %v3492_v22 = vld [vmem:[%s3084_s10 + $0x44] sm:$0x1] }
  0x64   : > { %v1107_v49 = vor.u32 %v1106_v42, %v1103_v40  ;;  %v2397_v61 = vcombine.low %v1071_v44, %v1085_v28  ;;  %v1683_v25 = vshll.u32 %v2489_v4, 16  ;;  %v2995_v39 = vld [vmem:[%s3594_s1 + $0x1d0] sm:$0xff]   ;;  %v1691_v42 = vrot.slane %v1689_v26, 5 }
  0x65   : > { %2796 = vmatpush3.bf16.msra.mxu0 %v2980_v52  ;;  %v2413_v52 = vld [vmem:[%s3084_s10 + $0x38] sm:$0xe]  ;;  %v1099_v3 = vsel %vm3127_vm2, %v1094_v54, %v1098_v45  ;;  %v1673_v45 = vrot.slane %v1672_v36, 4  ;;  %v2996_v54 = vld [vmem:[%s3594_s1 + $0x188] sm:$0xff]  }
  0x66   : > { %2820 = vmatpush3.bf16.msra.mxu1 %v2981_v56  ;;  %2797 = vmatprep.subr.bf16.mxu0 %v2982_v5  ;;  %v2421_v56 = vrot.slane %v2413_v52, 9  ;;  %v1108_v58 = vrot.slane %v1107_v49, 4 }
  0x67   : > { %2821 = vmatprep.subr.bf16.mxu1 %v2983_v24  ;;  %v1678_v51 = vsel %vm3127_vm2, %v1673_v45, %v1677_v30  ;;  %v3496_v30 = vld [vmem:[%s3084_s10 + $0x4c] sm:$0x1] }
  0x68   : > { %v1319_v6 = vsel %vm3210_vm5, %v2421_v56, %v1318_v57  ;;  %v2997_v57 = vld [vmem:[%s3594_s1 + $0x1c8] sm:$0xff]  }
  0x69   : > { %2798 = vmatpush3.bf16.msra.mxu0 %v2982_v5  ;;  %v1113_v5 = vsel %vm3127_vm2, %v1108_v58, %v1112_v50  ;;  %v2442_v12 = vcombine.low %v1319_v6, %v1323_v7  ;;  %v1717_v50 = vshll.u32 %v3453_v38, 16  ;;  %v1725_v6 = vshll.u32 %v2495_v63, 16  ;;  %v2998_v7 = vld [vmem:[%s3594_s1 + $0x180] sm:$0xff]  }
  0x6a   : > { %2822 = vmatpush3.bf16.msra.mxu1 %v2983_v24  ;;  %2831 = vmatprep.subr.bf16.mxu0 %v2984_v9  ;;  %v2398_v11 = vcombine.low %v1099_v3, %v1113_v5  ;;  %v1680_v24 = vshrl.u32 %v2489_v4, 16  ;;  %v3476_v3 = vld [vmem:[%s3084_s10 + $0x3c] sm:$0x1]  ;;  %v1722_v5 = vshrl.u32 %v2495_v63, 16 }
  0x6b   : > { %2855 = vmatprep.subr.bf16.mxu1 %v2985_v10  ;;  %v1727_v20 = vrot.slane %v1725_v6, 5  ;;  %v1745_v21 = vshll.u32 %v3476_v3, 16 }
  0x6c   : > { %2800 = vmatmul.mubr.bf16.vlgmr.msra.gmra.mxu0 %v2396_v43  ;;  %v1682_v32 = vrot.slane %v1680_v24, 4  ;;  %v1724_v4 = vrot.slane %v1722_v5, 4  ;;  %v2536_v5 = vld [vmem:[%s3084_s10 + $0x38] sm:$0xe] }
  0x6d   : > { %2824 = vmatmul.mubr.bf16.vlgmr.msra.gmra.mxu1 %v2440_v33  ;;  %2832 = vmatpush3.bf16.msra.mxu0 %v2984_v9  ;;  %v1685_v33 = vrot.slane %v1683_v25, 5  ;;  %v2491_v9 = vld [vmem:[%s3084_s10 + $0x20] sm:$0xf] }
  0x6e   : > { %2856 = vmatpush3.bf16.msra.mxu1 %v2985_v10  ;;  %2833 = vmatprep.subr.bf16.mxu0 %v2986_v48  ;;  %v2493_v10 = vld [vmem:[%s3084_s10 + $0x28] sm:$0xf]  ;;  %v1694_v43 = vshrl.u32 %v2491_v9, 16  ;;  %v1697_v44 = vshll.u32 %v2491_v9, 16  ;;  %v1728_v34 = vor.u32 %v1727_v20, %v1724_v4  ;;  %v3008_v20 = vld [vmem:[%s3594_s1 + $0x218] sm:$0xff]  }
  0x6f   : > { %2857 = vmatprep.subr.bf16.mxu1 %v2987_v60  ;;  %2803 = vmatprep.mubr.bf16.mxu0 %v2397_v61  ;;  %v1686_v40 = vor.u32 %v1685_v33, %v1682_v32  ;;  %v1708_v23 = vshrl.u32 %v2493_v10, 16  ;;  %v1711_v47 = vshll.u32 %v2493_v10, 16  ;;  %v1719_v61 = vrot.slane %v1717_v50, 5  ;;  %v3001_v9 = vld [vmem:[%s3084_s10 + $0x20] ss:$8 sps:$4 sm:$0xff]  }
  0x70   : > { %2827 = vmatprep.mubr.bf16.mxu1 %v2441_v2  ;;  %v1696_v28 = vrot.slane %v1694_v43, 4  ;;  %v1699_v49 = vrot.slane %v1697_v44, 5  ;;  %v2497_v2 = vld [vmem:[%s3084_s10 + $0x38] sm:$0xf]  ;;  %v1759_v33 = vshll.u32 %v3492_v22, 16  ;;  %v1773_v44 = vshll.u32 %v3496_v30, 16 }
  0x71   : > { %2834 = vmatpush3.bf16.msra.mxu0 %v2986_v48  ;;  %v1687_v48 = vrot.slane %v1686_v40, 4  ;;  %v1710_v52 = vrot.slane %v1708_v23, 4  ;;  %v1713_v53 = vrot.slane %v1711_v47, 5 }
  0x72   : > { %2858 = vmatpush3.bf16.msra.mxu1 %v2987_v60  ;;  %2835 = vmatprep.subr.bf16.mxu0 %v2988_v0  ;;  %v1700_v56 = vor.u32 %v1699_v49, %v1696_v28  ;;  %v3004_v28 = vld [vmem:[%s3084_s10 + $0x30] ss:$8 sps:$4 sm:$0xff]  }
  0x73   : > { %2859 = vmatprep.subr.bf16.mxu1 %v2989_v8  ;;  %v1692_v55 = vsel %vm3127_vm2, %v1687_v48, %v1691_v42  ;;  %v1714_v15 = vor.u32 %v1713_v53, %v1710_v52  ;;  %v1729_v42 = vrot.slane %v1728_v34, 4  ;;  %v1775_v52 = vrot.slane %v1773_v44, 5 }
  0x74   : > { %2804 = vmatmul.mubr.bf16.gmra.mxu0 %v2398_v11  ;;  %v2519_v58 = vcombine.low %v1678_v51, %v1692_v55  ;;  %v1701_v60 = vrot.slane %v1700_v56, 4  ;;  %v1761_v51 = vrot.slane %v1759_v33, 5  ;;  %v1957_v56 = vrot.slane %v3430_v13, 5  ;;  %v3006_v13 = vld [vmem:[%s3594_s1 + $0x228] sm:$0xff]  }
  0x75   : > { %2836 = vmatpush3.bf16.msra.mxu0 %v2988_v0  ;;  %2828 = vmatmul.mubr.bf16.gmra.mxu1 %v2442_v12  ;;  %v1715_v62 = vrot.slane %v1714_v15, 4  ;;  %v3472_v0 = vld [vmem:[%s3084_s10 + $0x34] sm:$0x1]  ;;  %v1736_v12 = vshrl.u32 %v2497_v2, 16  ;;  %v2532_v15 = vld [vmem:[%s3084_s10 + $0x18] sm:$0xe] }
  0x76   : > { %2860 = vmatpush3.bf16.msra.mxu1 %v2989_v8  ;;  %2837 = vmatprep.subr.bf16.mxu0 %v2990_v14  ;;  %v1706_v8 = vsel %vm3127_vm2, %v1701_v60, %v1705_v59  ;;  %v1731_v11 = vshll.u32 %v3472_v0, 16  ;;  %v2531_v59 = vld [vmem:[%s3084_s10 + $0x10] sm:$0xe]  ;;  %v1961_v60 = vrot.slane %v3434_v19, 5  ;;  %v2540_v63 = vrot.slane %v2532_v15, 9 }
  0x77   : > { %2861 = vmatprep.subr.bf16.mxu1 %v2991_v16  ;;  %2847 = vmatprep.mubr.bf16.mxu0 %v3000_v17  ;;  %v2999_v17 = vld [vmem:[%s3594_s1 + $0x1c0] sm:$0xff]   ;;  %v1720_v18 = vsel %vm3127_vm2, %v1715_v62, %v1719_v61  ;;  %v1738_v25 = vrot.slane %v1736_v12, 4  ;;  %v2539_v62 = vrot.slane %v2531_v59, 9  ;;  %v1969_v33 = vrot.slane %v3453_v38, 5 }
  0x78   : > { %2871 = vmatprep.mubr.bf16.mxu1 %v2519_v58  ;;  %v1733_v24 = vrot.slane %v1731_v11, 5  ;;  %v2520_v45 = vcombine.low %v1706_v8, %v1720_v18  ;;  %v2544_v8 = vrot.slane %v2536_v5, 9  ;;  %v1977_v11 = vrot.slane %v3476_v3, 5  ;;  %v3005_v12 = vld [vmem:[%s3084_s10 + $0x40] ss:$8 sps:$4 sm:$0xff]  }
  0x79   : > { %2838 = vmatpush3.bf16.msra.mxu0 %v2990_v14  ;;  %v1739_v14 = vshll.u32 %v2497_v2, 16  ;;  %v2535_v2 = vld [vmem:[%s3084_s10 + $0x30] sm:$0xe]  ;;  %v3007_v3 = vld [vmem:[%s3594_s1 + $0x220] sm:$0xff]  }
  0x7a   : > { %2862 = vmatpush3.bf16.msra.mxu1 %v2991_v16  ;;  %2839 = vmatprep.subr.bf16.mxu0 %v2992_v27  ;;  %v2499_v16 = vld [vmem:[%s3084_s10 + $0x40] sm:$0xf]  ;;  %v1734_v49 = vsel %vm3127_vm2, %v1729_v42, %v1733_v24  ;;  %v2543_v19 = vrot.slane %v2535_v2, 9  ;;  %v3010_v24 = vld [vmem:[%s3594_s1 + $0x208] sm:$0xff]  }
  0x7b   : > { %2863 = vmatprep.subr.bf16.mxu1 %v2993_v29  ;;  %v1741_v26 = vrot.slane %v1739_v14, 5  ;;  %v1750_v31 = vshrl.u32 %v2499_v16, 16  ;;  %v1753_v32 = vshll.u32 %v2499_v16, 16  ;;  %v1958_v14 = vsel %vm3210_vm5, %v2539_v62, %v1957_v56 }
  0x7c   : > { %v1962_v16 = vsel %vm3210_vm5, %v2540_v63, %v1961_v60 }
  0x7d   : > { %2840 = vmatpush3.bf16.msra.mxu0 %v2992_v27  ;;  %v2501_v27 = vld [vmem:[%s3084_s10 + $0x48] sm:$0xf]  ;;  %v1742_v36 = vor.u32 %v1741_v26, %v1738_v25  ;;  %v1752_v10 = vrot.slane %v1750_v31, 4  ;;  %v1755_v43 = vrot.slane %v1753_v32, 5  ;;  %v2563_v18 = vcombine.low %v1958_v14, %v1962_v16  ;;  %v2533_v25 = vld [vmem:[%s3084_s10 + $0x20] sm:$0xe] }
  0x7e   : > { %2864 = vmatpush3.bf16.msra.mxu1 %v2993_v29  ;;  %2841 = vmatprep.subr.bf16.mxu0 %v2994_v35  ;;  %v1747_v29 = vrot.slane %v1745_v21, 5  ;;  %v1767_v40 = vshll.u32 %v2501_v27, 16  ;;  %v3009_v21 = vld [vmem:[%s3594_s1 + $0x210] sm:$0xff]   ;;  %v2534_v26 = vld [vmem:[%s3084_s10 + $0x28] sm:$0xe]  ;;  %v2541_v34 = vrot.slane %v2533_v25, 9 }
  0x7f   : > { %2865 = vmatprep.subr.bf16.mxu1 %v2995_v39  ;;  %v1743_v23 = vrot.slane %v1742_v36, 4  ;;  %v1756_v50 = vor.u32 %v1755_v43, %v1752_v10  ;;  %v2538_v31 = vld [vmem:[%s3084_s10 + $0x48] sm:$0xe]  ;;  %v2542_v32 = vrot.slane %v2534_v26, 9  ;;  %v3011_v36 = vld [vmem:[%s3594_s1 + $0x200] sm:$0xff]  }
  0x80   : > { %v1769_v48 = vrot.slane %v1767_v40, 5 }
  0x81   : > { %2842 = vmatpush3.bf16.msra.mxu0 %v2994_v35  ;;  %v3002_v35 = vld [vmem:[%s3594_s1 + $0x238] sm:$0xff]   ;;  %v1748_v53 = vsel %vm3127_vm2, %v1743_v23, %v1747_v29  ;;  %v1757_v55 = vrot.slane %v1756_v50, 4  ;;  %v1965_v29 = vrot.slane %v3449_v37, 5  ;;  %v1970_v38 = vsel %vm3210_vm5, %v2542_v32, %v1969_v33 }
  0x82   : > { %2866 = vmatpush3.bf16.msra.mxu1 %v2995_v39  ;;  %2843 = vmatprep.subr.bf16.mxu0 %v2996_v54  ;;  %v1764_v39 = vshrl.u32 %v2501_v27, 16  ;;  %v2537_v27 = vld [vmem:[%s3084_s10 + $0x40] sm:$0xe] }
  0x83   : > { %2867 = vmatprep.subr.bf16.mxu1 %v2997_v57  ;;  %v1762_v61 = vsel %vm3127_vm2, %v1757_v55, %v1761_v51  ;;  %v2545_v10 = vrot.slane %v2537_v27, 9  ;;  %v1966_v37 = vsel %vm3210_vm5, %v2541_v34, %v1965_v29 }
  0x84   : > { %v1766_v47 = vrot.slane %v1764_v39, 4  ;;  %v2546_v39 = vrot.slane %v2538_v31, 9  ;;  %v2564_v40 = vcombine.low %v1966_v37, %v1970_v38 }
  0x85   : > { %2844 = vmatpush3.bf16.msra.mxu0 %v2996_v54 }
  0x86   : > { %2868 = vmatpush3.bf16.msra.mxu1 %v2997_v57  ;;  %2845 = vmatprep.subr.bf16.mxu0 %v2998_v7  ;;  %v1770_v54 = vor.u32 %v1769_v48, %v1766_v47  ;;  %v2521_v57 = vcombine.low %v1734_v49, %v1748_v53 }
  0x87   : > { %2869 = vmatprep.subr.bf16.mxu1 %v2999_v17 }
  0x88   : > { %v1771_v58 = vrot.slane %v1770_v54, 4 }
  0x89   : > { %2846 = vmatpush3.bf16.msra.mxu0 %v2998_v7  ;;  %v1973_v7 = vrot.slane %v3472_v0, 5  ;;  %v1978_v0 = vsel %vm3210_vm5, %v2544_v8, %v1977_v11 }
  0x8a   : > { %2870 = vmatpush3.bf16.msra.mxu1 %v2999_v17  ;;  %2879 = vmatprep.subr.bf16.mxu0 %v3002_v35  ;;  %v1776_v6 = vsel %vm3127_vm2, %v1771_v58, %v1775_v52 }
  0x8b   : > { %2903 = vmatprep.subr.bf16.mxu1 %v3002_v35  ;;  %v2522_v17 = vcombine.low %v1762_v61, %v1776_v6  ;;  %v1974_v41 = vsel %vm3210_vm5, %v2543_v19, %v1973_v7 }
  0x8c   : > { %2848 = vmatmul.mubr.bf16.vlgmr.msra.gmra.mxu0 %v3001_v9  ;;  %v2565_v4 = vcombine.low %v1974_v41, %v1978_v0  ;;  %v1981_v9 = vrot.slane %v3492_v22, 5 }
  0x8d   : > { %2872 = vmatmul.mubr.bf16.vlgmr.msra.gmra.mxu1 %v2520_v45  ;;  %2880 = vmatpush3.bf16.msra.mxu0 %v3002_v35 }
  0x8e   : > { %2911 = vmatpush3.bf16.msra.mxu1 %v3002_v35  ;;  %2881 = vmatprep.subr.bf16.mxu0 %v3003_v46  ;;  %v1985_v35 = vrot.slane %v3496_v30, 5  ;;  %v1982_v22 = vsel %vm3210_vm5, %v2545_v10, %v1981_v9 }
  0x8f   : > { %2904 = vmatprep.subr.bf16.mxu1 %v3003_v46  ;;  %2851 = vmatprep.mubr.bf16.mxu0 %v3004_v28 }
  0x90   : > { %2875 = vmatprep.mubr.bf16.mxu1 %v2521_v57  ;;  %v1986_v30 = vsel %vm3210_vm5, %v2546_v39, %v1985_v35 }
  0x91   : > { %2882 = vmatpush3.bf16.msra.mxu0 %v3003_v46  ;;  %v2566_v42 = vcombine.low %v1982_v22, %v1986_v30 }
  0x92   : > { %2912 = vmatpush3.bf16.msra.mxu1 %v3003_v46  ;;  %2883 = vmatprep.subr.bf16.mxu0 %v3006_v13 }
  0x93   : > { %2905 = vmatprep.subr.bf16.mxu1 %v3006_v13 }
  0x94   : > { %2852 = vmatmul.mubr.bf16.gmra.mxu0 %v3005_v12 }
  0x95   : > { %2884 = vmatpush3.bf16.msra.mxu0 %v3006_v13  ;;  %2876 = vmatmul.mubr.bf16.gmra.mxu1 %v2522_v17 }
  0x96   : > { %2913 = vmatpush3.bf16.msra.mxu1 %v3006_v13  ;;  %2885 = vmatprep.subr.bf16.mxu0 %v3007_v3 }
  0x97   : > { %2906 = vmatprep.subr.bf16.mxu1 %v3007_v3  ;;  %2895 = vmatprep.mubr.bf16.mxu0 %v2563_v18 }
  0x98   : > { %2899 = vmatprep.mubr.bf16.mxu1 %v2565_v4 }
  0x99   : > { %2886 = vmatpush3.bf16.msra.mxu0 %v3007_v3 }
  0x9a   : > { %2914 = vmatpush3.bf16.msra.mxu1 %v3007_v3  ;;  %2887 = vmatprep.subr.bf16.mxu0 %v3008_v20 }
  0x9b   : > { %2907 = vmatprep.subr.bf16.mxu1 %v3008_v20 }
  0x9d   : > { %2888 = vmatpush3.bf16.msra.mxu0 %v3008_v20 }
  0x9e   : > { %2915 = vmatpush3.bf16.msra.mxu1 %v3008_v20  ;;  %2889 = vmatprep.subr.bf16.mxu0 %v3009_v21 }
  0x9f   : > { %2908 = vmatprep.subr.bf16.mxu1 %v3009_v21 }
  0xa1   : > { %2890 = vmatpush3.bf16.msra.mxu0 %v3009_v21 }
  0xa2   : > { %2916 = vmatpush3.bf16.msra.mxu1 %v3009_v21  ;;  %2891 = vmatprep.subr.bf16.mxu0 %v3010_v24 }
  0xa3   : > { %2909 = vmatprep.subr.bf16.mxu1 %v3010_v24 }
  0xa5   : > { %2892 = vmatpush3.bf16.msra.mxu0 %v3010_v24 }
  0xa6   : > { %2917 = vmatpush3.bf16.msra.mxu1 %v3010_v24  ;;  %2893 = vmatprep.subr.bf16.mxu0 %v3011_v36 }
  0xa7   : > { %2910 = vmatprep.subr.bf16.mxu1 %v3011_v36 }
  0xa9   : > { %2894 = vmatpush3.bf16.msra.mxu0 %v3011_v36 }
  0xaa   : > { %2918 = vmatpush3.bf16.msra.mxu1 %v3011_v36 }
  0xac   : > { %2896 = vmatmul.mubr.bf16.vlgmr.msra.gmra.mxu0 %v2564_v40 }
  0xad   : > { %2900 = vmatmul.mubr.bf16.vlgmr.msra.gmra.mxu1 %v2566_v42 }
  0xec   : > { %v2705_v43 = vpop.f32.mrf.mxu0 }
  0xed   : > { %v2729_v45 = vpop.f32.mrf.mxu1 }
  0xee   : > { %v434_v44 = vpop.f32.mrf.mxu0  ;;  %v580_v9 = vadd.f32 %v2729_v45, %v2705_v43 }
  0xef   : > { %v571_v23 = vpop.f32.mrf.mxu1 }
  0xf0   : > { %v2706_v46 = vpop.f32.mrf.mxu0  ;;  %v572_v39 = vadd.f32 %v571_v23, %v434_v44 }
  0xf1   : > { %v2730_v28 = vpop.f32.mrf.mxu1 }
  0xf2   : > { %v437_v47 = vpop.f32.mrf.mxu0  ;;  %v583_v30 = vadd.f32 %v2730_v28, %v2706_v46 }
  0xf3   : > { %v574_v50 = vpop.f32.mrf.mxu1 }
  0xf4   : > { %v2709_v48 = vpop.f32.mrf.mxu0  ;;  %v575_v40 = vadd.f32 %v574_v50, %v437_v47 }
  0xf5   : > { %v2733_v51 = vpop.f32.mrf.mxu1 }
  0xf6   : > { %v450_v49 = vpop.f32.mrf.mxu0  ;;  %v596_v10 = vadd.f32 %v2733_v51, %v2709_v48 }
  0xf7   : > { %v587_v52 = vpop.f32.mrf.mxu1 }
  0xf8   : > { %v2710_v1 = vpop.f32.mrf.mxu0  ;;  %v588_v38 = vadd.f32 %v587_v52, %v450_v49 }
  0xf9   : > { %v2734_v55 = vpop.f32.mrf.mxu1 }
  0xfa   : > { %v453_v53 = vpop.f32.mrf.mxu0  ;;  %v599_v45 = vadd.f32 %v2734_v55, %v2710_v1 }
  0xfb   : > { %v590_v57 = vpop.f32.mrf.mxu1 }
 0x10c   : > { %v2753_v54 = vpop.f32.mrf.mxu0 }
 0x10d   : > { %v2777_v58 = vpop.f32.mrf.mxu1  ;;  %v809_v37 = vadd.f32 %v2753_v54, %v580_v9 }
 0x10e   : > { %v776_v56 = vpop.f32.mrf.mxu0 }
 0x10f   : > { %v947_v15 = vpop.f32.mrf.mxu1  ;;  %v807_v42 = vadd.f32 %v776_v56, %v572_v39  ;;  %v980_v51 = vadd.f32 %v2777_v58, %v809_v37 }
 0x110   : > { %v2754_v59 = vpop.f32.mrf.mxu0 }
 0x111   : > { %v2778_v61 = vpop.f32.mrf.mxu1  ;;  %v810_v23 = vadd.f32 %v2754_v59, %v583_v30 }
 0x112   : > { %v779_v60 = vpop.f32.mrf.mxu0 }
 0x113   : > { %v950_v63 = vpop.f32.mrf.mxu1  ;;  %v808_v44 = vadd.f32 %v779_v60, %v575_v40  ;;  %v981_v50 = vadd.f32 %v2778_v61, %v810_v23 }
 0x114   : > { %v2757_v62 = vpop.f32.mrf.mxu0 }
 0x115   : > { %v2781_v5 = vpop.f32.mrf.mxu1  ;;  %v813_v22 = vadd.f32 %v2757_v62, %v596_v10  ;;  %v978_v10 = vadd.f32 %v947_v15, %v807_v42  ;;  %v979_v39 = vadd.f32 %v950_v63, %v808_v44 }
 0x116   : > { %v792_v2 = vpop.f32.mrf.mxu0 }
 0x117   : > { %v963_v6 = vpop.f32.mrf.mxu1  ;;  %v811_v48 = vadd.f32 %v792_v2, %v588_v38  ;;  %v984_v54 = vadd.f32 %v2781_v5, %v813_v22 }
 0x118   : > { %v2758_v13 = vpop.f32.mrf.mxu0 }
 0x119   : > { %v2782_v7 = vpop.f32.mrf.mxu1  ;;  %v814_v49 = vadd.f32 %v2758_v13, %v599_v45  ;;  %v982_v46 = vadd.f32 %v963_v6, %v811_v48 }
 0x11a   : > { %v795_v19 = vpop.f32.mrf.mxu0 }
 0x11b   : > { %v966_v11 = vpop.f32.mrf.mxu1  ;;  %v985_v55 = vadd.f32 %v2782_v7, %v814_v49 }
 0x12c   : > { %v2801_v8 = vpop.f32.mrf.mxu0 }
 0x12d   : > { %v2825_v14 = vpop.f32.mrf.mxu1  ;;  %v1262_v62 = vadd.f32 %v2801_v8, %v980_v51 }
 0x12e   : > { %v1229_v12 = vpop.f32.mrf.mxu0 }
 0x12f   : > { %v1439_v17 = vpop.f32.mrf.mxu1  ;;  %v1260_v56 = vadd.f32 %v1229_v12, %v978_v10  ;;  %v1472_v2 = vadd.f32 %v2825_v14, %v1262_v62 }
 0x130   : > { %v2802_v16 = vpop.f32.mrf.mxu0 }
 0x131   : > { %v2826_v0 = vpop.f32.mrf.mxu1  ;;  %v1263_v58 = vadd.f32 %v2802_v16, %v981_v50 }
 0x132   : > { %v1232_v41 = vpop.f32.mrf.mxu0 }
 0x133   : > { %v1442_v18 = vpop.f32.mrf.mxu1  ;;  %v1261_v59 = vadd.f32 %v1232_v41, %v979_v39 }
 0x134   : > { %v2805_v3 = vpop.f32.mrf.mxu0 }
 0x135   : > { %v2829_v20 = vpop.f32.mrf.mxu1  ;;  %v1266_v47 = vadd.f32 %v2805_v3, %v984_v54  ;;  %v1473_v3 = vadd.f32 %v2826_v0, %v1263_v58  ;;  %v1471_v61 = vadd.f32 %v1442_v18, %v1261_v59 }
 0x136   : > { %v1245_v4 = vpop.f32.mrf.mxu0 }
 0x137   : > { %v1455_v24 = vpop.f32.mrf.mxu1  ;;  %v1476_v37 = vadd.f32 %v2829_v20, %v1266_v47 }
 0x138   : > { %v2806_v21 = vpop.f32.mrf.mxu0 }
 0x139   : > { %v2830_v26 = vpop.f32.mrf.mxu1  ;;  %v1267_v5 = vadd.f32 %v2806_v21, %v985_v55 }
 0x13a   : > { %v1248_v25 = vpop.f32.mrf.mxu0 }
 0x13b   : > { %v1458_v31 = vpop.f32.mrf.mxu1  ;;  %v1477_v38 = vadd.f32 %v2830_v26, %v1267_v5 }
 0x14c   : > { %v2849_v27 = vpop.f32.mrf.mxu0 }
 0x14d   : > { %v2873_v34 = vpop.f32.mrf.mxu1  ;;  %v1643_v15 = vadd.f32 %v2849_v27, %v1472_v2 }
 0x14e   : > { %v1610_v29 = vpop.f32.mrf.mxu0 }
 0x14f   : > { %v3567_v32 = vpop.f32.mrf.mxu1  ;;  %v1925_v14 = vadd.f32 %v2873_v34, %v1643_v15 }
 0x150   : > { %3601 = vst [vmem:[#allocation2_spill] sm:$0xff] %v3567_v32  ;;  %v2850_v33 = vpop.f32.mrf.mxu0 }
 0x151   : > { %v3569_v35 = vpop.f32.mrf.mxu1  ;;  %v1644_v16 = vadd.f32 %v2850_v33, %v1473_v3 }
 0x152   : > { %3602 = vst [vmem:[#allocation3_spill] sm:$0xff] %v3569_v35  ;;  %v1613_v36 = vpop.f32.mrf.mxu0  ;;  %v591_v35 = vadd.f32 %v590_v57, %v453_v53  ;;  %v1264_v57 = vadd.f32 %v1245_v4, %v982_v46 }
 0x153   : > { %v1895_v32 = vpop.f32.mrf.mxu1  ;;  %v1642_v41 = vadd.f32 %v1613_v36, %v1471_v61 }
 0x154   : > { %v2853_v43 = vpop.f32.mrf.mxu0  ;;  %v812_v52 = vadd.f32 %v795_v19, %v591_v35  ;;  %v1470_v19 = vadd.f32 %v1439_v17, %v1260_v56  ;;  %v1474_v35 = vadd.f32 %v1455_v24, %v1264_v57  ;;  %v2575_v24 = vld [vmem:[%s3595_s2] ss:$0 sm:$0xff] }
 0x155   : > { %v2877_v9 = vpop.f32.mrf.mxu1  ;;  %v1647_v6 = vadd.f32 %v2853_v43, %v1476_v37  ;;  %v1924_v36 = vadd.f32 %v1895_v32, %v1642_v41 }
 0x156   : > { %v1626_v28 = vpop.f32.mrf.mxu0  ;;  %v983_v53 = vadd.f32 %v966_v11, %v812_v52  ;;  %v1641_v63 = vadd.f32 %v1610_v29, %v1470_v19 }
 0x157   : > { %v1908_v1 = vpop.f32.mrf.mxu1  ;;  %v1645_v11 = vadd.f32 %v1626_v28, %v1474_v35  ;;  %v1929_v20 = vadd.f32 %v2877_v9, %v1647_v6  ;;  %v3603_v0 = vld [vmem:[#allocation2_spill] sm:$0xff] }
 0x158   : > { %v2854_v60 = vpop.f32.mrf.mxu0  ;;  %v1265_v13 = vadd.f32 %v1248_v25, %v983_v53  ;;  %v1923_v18 = vadd.f32 %v3603_v0, %v1641_v63 }
 0x159   : > { %v2878_v8 = vpop.f32.mrf.mxu1  ;;  %v1648_v21 = vadd.f32 %v2854_v60, %v1477_v38  ;;  %v1927_v26 = vadd.f32 %v1908_v1, %v1645_v11  ;;  %v3604_v34 = vld [vmem:[#allocation3_spill] sm:$0xff] }
 0x15a   : > { %v1629_v12 = vpop.f32.mrf.mxu0  ;;  %v1475_v7 = vadd.f32 %v1458_v31, %v1265_v13  ;;  %v1926_v33 = vadd.f32 %v3604_v34, %v1644_v16 }
 0x15b   : > { %v1911_v4 = vpop.f32.mrf.mxu1  ;;  %v1930_v43 = vadd.f32 %v2878_v8, %v1648_v21 }
 0x15c   : > { %v1646_v25 = vadd.f32 %v1629_v12, %v1475_v7 }
 0x15e   : > { %v1928_v45 = vadd.f32 %v1911_v4, %v1646_v25 }
 0x16c   : > { %v2897_v17 = vpop.f32.mrf.mxu0 }
 0x16d   : > { %v2135_v27 = vadd.f32 %v2897_v17, %v1925_v14  ;;  %v2901_v29 = vpop.f32.mrf.mxu1 }
 0x16e   : > { %v2139_v31 = vadd.f32 %v2901_v29, %v1929_v20  ;;  %v2102_v22 = vpop.f32.mrf.mxu0 }
 0x16f   : > { %v2150_v30 = vadd.f32 %v2575_v24, %v2135_v27  ;;  %v2133_v40 = vadd.f32 %v2102_v22, %v1923_v18  ;;  %v2118_v42 = vpop.f32.mrf.mxu1 }
 0x170   : > { %v2154_v48 = vadd.f32 %v2575_v24, %v2139_v31  ;;  %v2137_v51 = vadd.f32 %v2118_v42, %v1927_v26  ;;  %v2898_v23 = vpop.f32.mrf.mxu0 }
 0x171   : > { %vm2158_vm6 = vcmp.gt.f32.partialorder %v2150_v30, 0.0  ;;  %v2166_v44 = vmul.f32 0.1, %v2150_v30  ;;  %v2148_v9 = vadd.f32 %v2575_v24, %v2133_v40  ;;  %v2136_v54 = vadd.f32 %v2898_v23, %v1926_v33  ;;  %v2902_v49 = vpop.f32.mrf.mxu1 }
 0x172   : > { %vm2162_vm7 = vcmp.gt.f32.partialorder %v2154_v48, 0.0  ;;  %v2170_v32 = vmul.f32 0.1, %v2154_v48  ;;  %v2152_v52 = vadd.f32 %v2575_v24, %v2137_v51  ;;  %v2140_v10 = vadd.f32 %v2902_v49, %v1930_v43  ;;  %v2105_v62 = vpop.f32.mrf.mxu0 }
 0x173   : > { %v2174_v28 = vsel %vm2158_vm6, %v2150_v30, %v2166_v44  ;;  %vm2156_vm8 = vcmp.gt.f32.partialorder %v2148_v9, 0.0  ;;  %v2164_v46 = vmul.f32 0.1, %v2148_v9  ;;  %v2151_v47 = vadd.f32 %v2575_v24, %v2136_v54  ;;  %v2121_v50 = vpop.f32.mrf.mxu1 }
 0x174   : > { %2182 = vst [vmem:[%s3580_s21 + $0x10] sm:$0xff] %v2174_v28  ;;  %v2178_v39 = vsel %vm2162_vm7, %v2154_v48, %v2170_v32  ;;  %vm2160_vm9 = vcmp.gt.f32.partialorder %v2152_v52, 0.0  ;;  %v2168_v56 = vmul.f32 0.1, %v2152_v52  ;;  %v2155_v1 = vadd.f32 %v2575_v24, %v2140_v10 }
 0x175   : > { %2186 = vst [vmem:[%s3580_s21 + $0x30] sm:$0xff] %v2178_v39  ;;  %v2172_v55 = vsel %vm2156_vm8, %v2148_v9, %v2164_v46  ;;  %vm2159_vm10 = vcmp.gt.f32.partialorder %v2151_v47, 0.0  ;;  %v2167_v53 = vmul.f32 0.1, %v2151_v47  ;;  %v2134_v57 = vadd.f32 %v2105_v62, %v1924_v36 }
 0x176   : > { %2180 = vst [vmem:[%s3580_s21] sm:$0xff] %v2172_v55  ;;  %v2176_v2 = vsel %vm2160_vm9, %v2152_v52, %v2168_v56  ;;  %vm2163_vm11 = vcmp.gt.f32.partialorder %v2155_v1, 0.0  ;;  %v2171_v58 = vmul.f32 0.1, %v2155_v1  ;;  %v2138_v59 = vadd.f32 %v2121_v50, %v1928_v45 }
 0x177   : > { %2184 = vst [vmem:[%s3580_s21 + $0x20] sm:$0xff] %v2176_v2  ;;  %v2175_v60 = vsel %vm2159_vm10, %v2151_v47, %v2167_v53  ;;  %v2149_v37 = vadd.f32 %v2575_v24, %v2134_v57 }
 0x178   : > { %2183 = vst [vmem:[%s3580_s21 + $0x18] sm:$0xff] %v2175_v60  ;;  %v2179_v5 = vsel %vm2163_vm11, %v2155_v1, %v2171_v58  ;;  %v2153_v13 = vadd.f32 %v2575_v24, %v2138_v59 }
 0x179   : > { %2187 = vst [vmem:[%s3580_s21 + $0x38] sm:$0xff] %v2179_v5  ;;  %vm2157_vm12 = vcmp.gt.f32.partialorder %v2149_v37, 0.0  ;;  %v2165_v19 = vmul.f32 0.1, %v2149_v37 }
 0x17a   : > { %vm2161_vm13 = vcmp.gt.f32.partialorder %v2153_v13, 0.0  ;;  %v2169_v15 = vmul.f32 0.1, %v2153_v13 }
 0x17b   : > { %v2173_v8 = vsel %vm2157_vm12, %v2149_v37, %v2165_v19 }
 0x17c   : > { %2181 = vst [vmem:[%s3580_s21 + $0x8] sm:$0xff] %v2173_v8  ;;  %v2177_v35 = vsel %vm2161_vm13, %v2153_v13, %v2169_v15 }
 0x17d   : > { %2185 = vst [vmem:[%s3580_s21 + $0x28] sm:$0xff] %v2177_v35 }
 0x17e PF: > { %s13_s12 = sadd.s32 1, %s3018_s12  }
 0x17f   : > { %p10_p4 = scmp.ge.s32.totalorder %s13_s12, 4  }
 0x181   :  { %12 = sbr.rel (!%p10_p4) target bundleno = 1 (0x1), region = 72 }

// kernel: forward.16
= control target key start
LH: loop header
LB: loop body
LE: loop exit
PB: predicated region body
PF: predicated region fallthrough
CT: control target
= control target key end

     0   :  { %s499_s15 = smov 0   ;;  %s563_s0 = inlined_call_operand.vmem [shape: f32[2,64,128], index: 0, kind: input, shape index: {}]   ;;  %s564_s1 = inlined_call_operand.vmem [shape: f32[1,128], index: 1, kind: input, shape index: {}]   ;;  %s565_s2 = inlined_call_operand.vmem [shape: f32[1,128], index: 2, kind: input, shape index: {}]   ;;  %s566_s3 = inlined_call_operand.vmem [shape: f32[64,128], index: 3, kind: input, shape index: {}]   ;;  %s567_s4 = inlined_call_operand.vmem [shape: f32[2,64,128], index: 4, kind: output, shape index: {}]  }
   0x1 LB: > { %s387_s16 = sadd.s32 4294967295, %s472_s15   ;;  %p391_p0 = scmp.ge.s32.totalorder %s472_s15, 1  ;;  %s472_s15 = sphi %s499_s15, %s14_s15  }
   0x2   : > { %p162_p1 = scmp.lt.s32.totalorder %s472_s15, 3 }
   0x4   : > { %p163_p2 = pnand %p391_p0, %p162_p1 }
   0x5   : > { %p188_p3 = scmp.lt.s32.totalorder (!%p163_p2), %s387_s16, 1 }
   0x6   : > { %166 = sbr.rel (%p163_p2) target bundleno = 66 (0x42), region = 36 }
   0xb   : > { %s569_s16 = smov (!%p188_p3, %s387_s16), 1  ;;  %v405_v38 = vld [vmem:[%s565_s2] ss:$0 sm:$0xff]  ;;  %v309_v57 = vld [vmem:[%s566_s3 + $0x8] sm:$0xff] }
   0xc   : > { %s408_s17 = sshll.u32 %s569_s16, 6  ;;  %v404_v42 = vld [vmem:[%s564_s1] ss:$0 sm:$0xff] }
   0xd   : > { %s192_s20 = scalar_lea.vmem %s563_s0, %s408_s17  ;;  %v308_v51 = vld [vmem:[%s566_s3] sm:$0xff]  ;;  %s529_s29 = scalar_lea.vmem %s567_s4, %s408_s17 }
   0xe   : > { %v198_v0 = vld [vmem:[%s192_s20] sm:$0xff]  ;;  %v199_v1 = vld [vmem:[%s192_s20 + $0x8] sm:$0xff]  ;;  %v200_v2 = vld [vmem:[%s192_s20 + $0x10] sm:$0xff] }
   0xf   : > { %v396_v3 = vmul.f32 -1.442695, %v198_v0  ;;  %v397_v4 = vmul.f32 -1.442695, %v199_v1  ;;  %v398_v5 = vmul.f32 -1.442695, %v200_v2 }
  0x10   : > { %v201_v6 = vld [vmem:[%s192_s20 + $0x18] sm:$0xff]  ;;  %v202_v7 = vld [vmem:[%s192_s20 + $0x20] sm:$0xff]  ;;  %v203_v9 = vld [vmem:[%s192_s20 + $0x28] sm:$0xff]  ;;  %v270_v13 = vmul.f32 1.442695, %v198_v0 }
  0x11   : > { %418 = vpow2.f32 %v396_v3  ;;  %v399_v8 = vmul.f32 -1.442695, %v201_v6  ;;  %v400_v10 = vmul.f32 -1.442695, %v202_v7  ;;  %v204_v11 = vld [vmem:[%s192_s20 + $0x30] sm:$0xff]  ;;  %v205_v14 = vld [vmem:[%s192_s20 + $0x38] sm:$0xff] }
  0x12   : > { %420 = vpow2.f32 %v397_v4  ;;  %v401_v12 = vmul.f32 -1.442695, %v203_v9  ;;  %v402_v15 = vmul.f32 -1.442695, %v204_v11  ;;  %v272_v16 = vmul.f32 1.442695, %v199_v1 }
  0x13   : > { %422 = vpow2.f32 %v398_v5  ;;  %v403_v17 = vmul.f32 -1.442695, %v205_v14  ;;  %v274_v18 = vmul.f32 1.442695, %v200_v2  ;;  %v276_v20 = vmul.f32 1.442695, %v201_v6 }
  0x14   : > { %424 = vpow2.f32 %v399_v8  ;;  %v278_v23 = vmul.f32 1.442695, %v202_v7  ;;  %v280_v26 = vmul.f32 1.442695, %v203_v9  ;;  %v282_v29 = vmul.f32 1.442695, %v204_v11 }
  0x15   : > { %426 = vpow2.f32 %v400_v10  ;;  %v284_v32 = vmul.f32 1.442695, %v205_v14  ;;  %v310_v0 = vld [vmem:[%s566_s3 + $0x10] sm:$0xff]  ;;  %v311_v7 = vld [vmem:[%s566_s3 + $0x18] sm:$0xff]  ;;  %v312_v14 = vld [vmem:[%s566_s3 + $0x20] sm:$0xff] }
  0x16   : > { %428 = vpow2.f32 %v401_v12 }
  0x17   : > { %430 = vpow2.f32 %v270_v13 }
  0x18   : > { %432 = vpow2.f32 %v402_v15 }
  0x19   : > { %434 = vpow2.f32 %v272_v16 }
  0x1a   : > { %436 = vpow2.f32 %v403_v17 }
  0x1b   : > { %438 = vpow2.f32 %v274_v18 }
  0x1e   : > { %v419_v19 = vpop.eup %418 }
  0x1f   : > { %v231_v21 = vadd.f32 1.0, %v419_v19  ;;  %v421_v22 = vpop.eup %420 }
  0x20   : > { %v232_v24 = vadd.f32 1.0, %v421_v22  ;;  %v423_v25 = vpop.eup %422 }
  0x21   : > { %440 = vrcp.f32 %v231_v21  ;;  %v233_v27 = vadd.f32 1.0, %v423_v25  ;;  %v425_v28 = vpop.eup %424 }
  0x22   : > { %442 = vpow2.f32 %v276_v20  ;;  %v234_v30 = vadd.f32 1.0, %v425_v28  ;;  %v427_v31 = vpop.eup %426  ;;  %v313_v20 = vld [vmem:[%s566_s3 + $0x28] sm:$0xff] }
  0x23   : > { %444 = vrcp.f32 %v232_v24  ;;  %v235_v33 = vadd.f32 1.0, %v427_v31  ;;  %v429_v34 = vpop.eup %428 }
  0x24   : > { %446 = vpow2.f32 %v278_v23  ;;  %v431_v35 = vpop.eup %430  ;;  %v236_v36 = vadd.f32 1.0, %v429_v34 }
  0x25   : > { %448 = vrcp.f32 %v233_v27  ;;  %v433_v37 = vpop.eup %432  ;;  %v292_v44 = vmul.f32 %v431_v35, %v405_v38 }
  0x26   : > { %450 = vpow2.f32 %v280_v26  ;;  %v435_v39 = vpop.eup %434  ;;  %v237_v40 = vadd.f32 1.0, %v433_v37  ;;  %v314_v26 = vld [vmem:[%s566_s3 + $0x30] sm:$0xff] }
  0x27   : > { %452 = vrcp.f32 %v234_v30  ;;  %v437_v41 = vpop.eup %436  ;;  %v293_v49 = vmul.f32 %v435_v39, %v405_v38  ;;  %v315_v30 = vld [vmem:[%s566_s3 + $0x38] sm:$0xff] }
  0x28   : > { %454 = vpow2.f32 %v282_v29  ;;  %v439_v43 = vpop.eup %438  ;;  %v238_v45 = vadd.f32 1.0, %v437_v41 }
  0x29   : > { %456 = vrcp.f32 %v235_v33  ;;  %v294_v55 = vmul.f32 %v439_v43, %v405_v38 }
  0x2a   : > { %458 = vpow2.f32 %v284_v32 }
  0x2b   : > { %460 = vrcp.f32 %v236_v36 }
  0x2c   : > { %462 = vrcp.f32 %v237_v40 }
  0x2d   : > { %464 = vrcp.f32 %v238_v45 }
  0x2e   : > { %v441_v46 = vpop.eup %440 }
  0x2f   : > { %v443_v47 = vpop.eup %442  ;;  %v261_v48 = vmul.f32 %v441_v46, %v404_v42 }
  0x30   : > { %v445_v50 = vpop.eup %444  ;;  %v295_v62 = vmul.f32 %v443_v47, %v405_v38 }
  0x31   : > { %v447_v52 = vpop.eup %446  ;;  %v300_v53 = vadd.f32 %v292_v44, %v261_v48  ;;  %v262_v54 = vmul.f32 %v445_v50, %v404_v42 }
  0x32   : > { %v449_v56 = vpop.eup %448  ;;  %v296_v5 = vmul.f32 %v447_v52, %v405_v38 }
  0x33   : > { %v451_v58 = vpop.eup %450  ;;  %v316_v59 = vadd.f32 %v308_v51, %v300_v53  ;;  %v301_v60 = vadd.f32 %v293_v49, %v262_v54  ;;  %v263_v61 = vmul.f32 %v449_v56, %v404_v42 }
  0x34   : > { %v453_v63 = vpop.eup %452  ;;  %v297_v12 = vmul.f32 %v451_v58, %v405_v38 }
  0x35   : > { %v455_v1 = vpop.eup %454  ;;  %324 = vst [vmem:[%s529_s29] sm:$0xff] %v316_v59  ;;  %v317_v2 = vadd.f32 %v309_v57, %v301_v60  ;;  %v302_v3 = vadd.f32 %v294_v55, %v263_v61  ;;  %v264_v4 = vmul.f32 %v453_v63, %v404_v42 }
  0x36   : > { %v457_v6 = vpop.eup %456  ;;  %v298_v18 = vmul.f32 %v455_v1, %v405_v38 }
  0x37   : > { %v459_v8 = vpop.eup %458  ;;  %325 = vst [vmem:[%s529_s29 + $0x8] sm:$0xff] %v317_v2  ;;  %v318_v9 = vadd.f32 %v310_v0, %v302_v3  ;;  %v303_v10 = vadd.f32 %v295_v62, %v264_v4  ;;  %v265_v11 = vmul.f32 %v457_v6, %v404_v42 }
  0x38   : > { %v461_v13 = vpop.eup %460  ;;  %v299_v24 = vmul.f32 %v459_v8, %v405_v38 }
  0x39   : > { %326 = vst [vmem:[%s529_s29 + $0x10] sm:$0xff] %v318_v9  ;;  %v319_v15 = vadd.f32 %v311_v7, %v303_v10  ;;  %v304_v16 = vadd.f32 %v296_v5, %v265_v11  ;;  %v266_v17 = vmul.f32 %v461_v13, %v404_v42  ;;  %v463_v19 = vpop.eup %462 }
  0x3a   : > { %v267_v23 = vmul.f32 %v463_v19, %v404_v42  ;;  %v465_v25 = vpop.eup %464 }
  0x3b   : > { %327 = vst [vmem:[%s529_s29 + $0x18] sm:$0xff] %v319_v15  ;;  %v320_v21 = vadd.f32 %v312_v14, %v304_v16  ;;  %v305_v22 = vadd.f32 %v297_v12, %v266_v17  ;;  %v268_v29 = vmul.f32 %v465_v25, %v404_v42 }
  0x3c   : > { %v306_v28 = vadd.f32 %v298_v18, %v267_v23 }
  0x3d   : > { %328 = vst [vmem:[%s529_s29 + $0x20] sm:$0xff] %v320_v21  ;;  %v321_v27 = vadd.f32 %v313_v20, %v305_v22  ;;  %v307_v32 = vadd.f32 %v299_v24, %v268_v29 }
  0x3e   : > { %v322_v31 = vadd.f32 %v314_v26, %v306_v28 }
  0x3f   : > { %329 = vst [vmem:[%s529_s29 + $0x28] sm:$0xff] %v321_v27  ;;  %v323_v33 = vadd.f32 %v315_v30, %v307_v32 }
  0x40   : > { %330 = vst [vmem:[%s529_s29 + $0x30] sm:$0xff] %v322_v31 }
  0x41   : > { %331 = vst [vmem:[%s529_s29 + $0x38] sm:$0xff] %v323_v33 }
  0x42 PF: > { %s14_s15 = sadd.s32 1, %s472_s15  }
  0x43   : > { %p11_p4 = scmp.ge.s32.totalorder %s14_s15, 4  }
  0x45   :  { %13 = sbr.rel (!%p11_p4) target bundleno = 1 (0x1), region = 66 }

// kernel: forward.17
= control target key start
LH: loop header
LB: loop body
LE: loop exit
PB: predicated region body
PF: predicated region fallthrough
CT: control target
= control target key end

     0   :  { %s553_s12 = smov 0   ;;  %s617_s0 = inlined_call_operand.vmem [shape: bf16[2,8,8,128], index: 0, kind: input, shape index: {}]   ;;  %s618_s1 = inlined_call_operand.vmem [shape: bf16[1,128,128], index: 1, kind: input, shape index: {}]   ;;  %s619_s2 = inlined_call_operand.vmem [shape: f32[1,128], index: 2, kind: input, shape index: {}]   ;;  %s620_s3 = inlined_call_operand.vmem [shape: f32[2,8,8,128], index: 3, kind: output, shape index: {}]  }
   0x1 LB: > { %s427_s13 = sadd.s32 4294967295, %s531_s12   ;;  %p431_p0 = scmp.ge.s32.totalorder %s531_s12, 1  ;;  %s531_s12 = sphi %s553_s12, %s13_s12  }
   0x2   : > { %p137_p1 = scmp.lt.s32.totalorder %s531_s12, 3 }
   0x4   : > { %p138_p2 = pnand %p431_p0, %p137_p1 }
   0x5   : > { %p161_p3 = scmp.lt.s32.totalorder (!%p138_p2), %s427_s13, 1 }
   0x6   : > { %141 = sbr.rel (%p138_p2) target bundleno = 251 (0xfb), region = 32 }
   0xb   : > { %v513_v0 = vld [vmem:[%s618_s1 + $0x38] sm:$0xff]   ;;  %v514_v1 = vld [vmem:[%s618_s1 + $0x30] sm:$0xff]   ;;  %s622_s13 = smov (!%p161_p3, %s427_s13), 1  ;;  %v515_v2 = vld [vmem:[%s618_s1 + $0x28] sm:$0xff]  }
   0xc   : > { %465 = vmatprep.subr.bf16.mxu0 %v513_v0  ;;  %489 = vmatprep.subr.bf16.mxu1 %v513_v0  ;;  %s451_s20 = sshll.u32 %s622_s13, 5  ;;  %v516_v3 = vld [vmem:[%s618_s1 + $0x20] sm:$0xff]   ;;  %v517_v6 = vld [vmem:[%s618_s1 + $0x18] sm:$0xff]   ;;  %v518_v7 = vld [vmem:[%s618_s1 + $0x10] sm:$0xff]   ;;  %s452_s9 = sshll.u32 %s622_s13, 6 }
   0xd   : > { %466 = vmatpush3.bf16.msra.mxu0 %v513_v0  ;;  %497 = vmatpush3.bf16.msra.mxu1 %v513_v0  ;;  %s576_s23 = scalar_lea.vmem %s617_s0, %s451_s20  ;;  %v519_v8 = vld [vmem:[%s618_s1 + $0x8] sm:$0xff]   ;;  %v520_v9 = vld [vmem:[%s618_s1] sm:$0xff]   ;;  %s604_s14 = scalar_lea.vmem %s620_s3, %s452_s9 }
   0xe   : > { %467 = vmatprep.subr.bf16.mxu0 %v514_v1  ;;  %490 = vmatprep.subr.bf16.mxu1 %v514_v1  ;;  %v521_v4 = vld [vmem:[%s576_s23] sm:$0xff]   ;;  %v522_v5 = vld [vmem:[%s576_s23 + $0x10] sm:$0xff]   ;;  %v523_v10 = vld [vmem:[%s576_s23 + $0x8] sm:$0xff]  }
   0xf   : > { %481 = vmatprep.mubr.bf16.mxu0 %v521_v4  ;;  %485 = vmatprep.mubr.bf16.mxu1 %v522_v5  ;;  %v524_v11 = vld [vmem:[%s576_s23 + $0x18] sm:$0xff]   ;;  %v436_v12 = vld [vmem:[%s619_s2] ss:$0 sm:$0xff] }
  0x11   : > { %468 = vmatpush3.bf16.msra.mxu0 %v514_v1  ;;  %498 = vmatpush3.bf16.msra.mxu1 %v514_v1 }
  0x12   : > { %469 = vmatprep.subr.bf16.mxu0 %v515_v2  ;;  %491 = vmatprep.subr.bf16.mxu1 %v515_v2 }
  0x15   : > { %470 = vmatpush3.bf16.msra.mxu0 %v515_v2  ;;  %499 = vmatpush3.bf16.msra.mxu1 %v515_v2 }
  0x16   : > { %471 = vmatprep.subr.bf16.mxu0 %v516_v3  ;;  %492 = vmatprep.subr.bf16.mxu1 %v516_v3 }
  0x19   : > { %472 = vmatpush3.bf16.msra.mxu0 %v516_v3  ;;  %500 = vmatpush3.bf16.msra.mxu1 %v516_v3 }
  0x1a   : > { %473 = vmatprep.subr.bf16.mxu0 %v517_v6  ;;  %493 = vmatprep.subr.bf16.mxu1 %v517_v6 }
  0x1d   : > { %474 = vmatpush3.bf16.msra.mxu0 %v517_v6  ;;  %501 = vmatpush3.bf16.msra.mxu1 %v517_v6 }
  0x1e   : > { %475 = vmatprep.subr.bf16.mxu0 %v518_v7  ;;  %494 = vmatprep.subr.bf16.mxu1 %v518_v7 }
  0x21   : > { %476 = vmatpush3.bf16.msra.mxu0 %v518_v7  ;;  %502 = vmatpush3.bf16.msra.mxu1 %v518_v7 }
  0x22   : > { %477 = vmatprep.subr.bf16.mxu0 %v519_v8  ;;  %495 = vmatprep.subr.bf16.mxu1 %v519_v8 }
  0x25   : > { %478 = vmatpush3.bf16.msra.mxu0 %v519_v8  ;;  %503 = vmatpush3.bf16.msra.mxu1 %v519_v8 }
  0x26   : > { %479 = vmatprep.subr.bf16.mxu0 %v520_v9  ;;  %496 = vmatprep.subr.bf16.mxu1 %v520_v9 }
  0x29   : > { %480 = vmatpush3.bf16.msra.mxu0 %v520_v9  ;;  %504 = vmatpush3.bf16.msra.mxu1 %v520_v9 }
  0x2c   : > { %482 = vmatmul.mubr.bf16.vlgmr.msra.gmra.mxu0 %v523_v10  ;;  %486 = vmatmul.mubr.bf16.vlgmr.msra.gmra.mxu1 %v524_v11 }
  0xec   : > { %v483_v13 = vpop.f32.mrf.mxu0  ;;  %v487_v14 = vpop.f32.mrf.mxu1 }
  0xed   : > { %v318_v15 = vadd.f32 %v483_v13, %v436_v12  ;;  %v334_v16 = vadd.f32 %v487_v14, %v436_v12 }
  0xee   : > { %v309_v17 = vpop.f32.mrf.mxu0  ;;  %v325_v18 = vpop.f32.mrf.mxu1 }
  0xef   : > { %vm342_vm0 = vcmp.gt.f32.partialorder %v318_v15, 0.0  ;;  %v350_v19 = vmul.f32 0.1, %v318_v15  ;;  %vm346_vm1 = vcmp.gt.f32.partialorder %v334_v16, 0.0  ;;  %v354_v20 = vmul.f32 0.1, %v334_v16 }
  0xf0   : > { %v310_v21 = vadd.f32 %v436_v12, %v309_v17  ;;  %v326_v22 = vadd.f32 %v436_v12, %v325_v18  ;;  %v484_v23 = vpop.f32.mrf.mxu0  ;;  %v488_v24 = vpop.f32.mrf.mxu1 }
  0xf1   : > { %v358_v25 = vsel %vm342_vm0, %v318_v15, %v350_v19  ;;  %v362_v26 = vsel %vm346_vm1, %v334_v16, %v354_v20  ;;  %v321_v27 = vadd.f32 %v484_v23, %v436_v12  ;;  %v337_v28 = vadd.f32 %v488_v24, %v436_v12 }
  0xf2   : > { %366 = vst [vmem:[%s604_s14 + $0x10] sm:$0xff] %v358_v25  ;;  %370 = vst [vmem:[%s604_s14 + $0x30] sm:$0xff] %v362_v26  ;;  %vm340_vm2 = vcmp.gt.f32.partialorder %v310_v21, 0.0  ;;  %v348_v29 = vmul.f32 0.1, %v310_v21  ;;  %vm344_vm3 = vcmp.gt.f32.partialorder %v326_v22, 0.0  ;;  %v312_v31 = vpop.f32.mrf.mxu0  ;;  %v328_v32 = vpop.f32.mrf.mxu1 }
  0xf3   : > { %v352_v30 = vmul.f32 0.1, %v326_v22  ;;  %vm343_vm4 = vcmp.gt.f32.partialorder %v321_v27, 0.0  ;;  %v351_v33 = vmul.f32 0.1, %v321_v27  ;;  %vm347_vm5 = vcmp.gt.f32.partialorder %v337_v28, 0.0 }
  0xf4   : > { %v355_v34 = vmul.f32 0.1, %v337_v28  ;;  %v356_v35 = vsel %vm340_vm2, %v310_v21, %v348_v29  ;;  %v313_v37 = vadd.f32 %v436_v12, %v312_v31  ;;  %v329_v38 = vadd.f32 %v436_v12, %v328_v32 }
  0xf5   : > { %v360_v36 = vsel %vm344_vm3, %v326_v22, %v352_v30  ;;  %364 = vst [vmem:[%s604_s14] sm:$0xff] %v356_v35  ;;  %v359_v39 = vsel %vm343_vm4, %v321_v27, %v351_v33 }
  0xf6   : > { %368 = vst [vmem:[%s604_s14 + $0x20] sm:$0xff] %v360_v36  ;;  %v363_v40 = vsel %vm347_vm5, %v337_v28, %v355_v34  ;;  %367 = vst [vmem:[%s604_s14 + $0x18] sm:$0xff] %v359_v39  ;;  %vm341_vm6 = vcmp.gt.f32.partialorder %v313_v37, 0.0  ;;  %v349_v41 = vmul.f32 0.1, %v313_v37  ;;  %vm345_vm7 = vcmp.gt.f32.partialorder %v329_v38, 0.0 }
  0xf7   : > { %371 = vst [vmem:[%s604_s14 + $0x38] sm:$0xff] %v363_v40  ;;  %v353_v42 = vmul.f32 0.1, %v329_v38 }
  0xf8   : > { %v357_v43 = vsel %vm341_vm6, %v313_v37, %v349_v41 }
  0xf9   : > { %v361_v44 = vsel %vm345_vm7, %v329_v38, %v353_v42  ;;  %365 = vst [vmem:[%s604_s14 + $0x8] sm:$0xff] %v357_v43 }
  0xfa   : > { %369 = vst [vmem:[%s604_s14 + $0x28] sm:$0xff] %v361_v44 }
  0xfb PF: > { %s13_s12 = sadd.s32 1, %s531_s12  }
  0xfc   : > { %p10_p4 = scmp.ge.s32.totalorder %s13_s12, 4  }
  0xfe   :  { %12 = sbr.rel (!%p10_p4) target bundleno = 1 (0x1), region = 62 }

// kernel: forward.18
= control target key start
LH: loop header
LB: loop body
LE: loop exit
PB: predicated region body
PF: predicated region fallthrough
CT: control target
= control target key end

     0   :  { %s789_s9 = smov 0   ;;  %s982_s0 = inlined_call_operand.vmem [shape: f32[256,64], index: 0, kind: input, shape index: {}]   ;;  %s983_s1 = inlined_call_operand.vmem [shape: f32[2,64,128], index: 1, kind: input, shape index: {}]   ;;  %s984_s2 = inlined_call_operand.vmem [shape: f32[2,256,128], index: 2, kind: output, shape index: {}]  }
   0x1 LB: > { %s593_s10 = sadd.s32 4294967295, %s772_s9   ;;  %p597_p0 = scmp.ge.s32.totalorder %s772_s9, 1  ;;  %s772_s9 = sphi %s789_s9, %s12_s9  }
   0x2   : > { %p112_p1 = scmp.lt.s32.totalorder %s772_s9, 3 }
   0x4   : > { %p113_p2 = pnand %p597_p0, %p112_p1 }
   0x5   : > { %p134_p3 = scmp.lt.s32.totalorder (!%p113_p2), %s593_s10, 1 }
   0x6   : > { %116 = sbr.rel (%p113_p2) target bundleno = 255 (0xff), region = 28 }
   0xb   : > { %v144_v0 = vld [vmem:[%s982_s0] sm:$0xff]  ;;  %vm184_vm0 = vcmask 523264   ;;  %s986_s10 = smov (!%p134_p3, %s593_s10), 1  ;;  %v145_v10 = vld [vmem:[%s982_s0 + $0x8] sm:$0xff]  ;;  %v146_v12 = vld [vmem:[%s982_s0 + $0x10] sm:$0xff] }
   0xc   : > { %v160_v1 = vld [vmem:[%s982_s0 + $0x80] sm:$0xff]  ;;  %694 = vmatprep.mubr.msk.f32.mxu0 %vm184_vm0, %v144_v0  ;;  %s636_s15 = sshll.u32 %s986_s10, 6  ;;  %v161_v11 = vld [vmem:[%s982_s0 + $0x88] sm:$0xff]  ;;  %v162_v13 = vld [vmem:[%s982_s0 + $0x90] sm:$0xff]  ;;  %s637_s27 = sshll.u32 %s986_s10, 8 }
   0xd   : > { %718 = vmatprep.mubr.msk.f32.mxu1 %vm184_vm0, %v160_v1  ;;  %s811_s18 = scalar_lea.vmem %s983_s1, %s636_s15  ;;  %v147_v14 = vld [vmem:[%s982_s0 + $0x18] sm:$0xff]  ;;  %v148_v16 = vld [vmem:[%s982_s0 + $0x20] sm:$0xff]  ;;  %v149_v18 = vld [vmem:[%s982_s0 + $0x28] sm:$0xff]  ;;  %s945_s30 = scalar_lea.vmem %s984_s2, %s637_s27 }
   0xe   : > { %v183_v2 = vld [vmem:[%s811_s18 + $0x38] sm:$0xff]  ;;  %v182_v3 = vld [vmem:[%s811_s18 + $0x30] sm:$0xff]  ;;  %v181_v4 = vld [vmem:[%s811_s18 + $0x28] sm:$0xff] }
   0xf   : > { %678 = vmatprep.subr.mxu0 %v183_v2  ;;  %742 = vmatprep.subr.mxu1 %v183_v2  ;;  %v180_v5 = vld [vmem:[%s811_s18 + $0x20] sm:$0xff]  ;;  %v179_v6 = vld [vmem:[%s811_s18 + $0x18] sm:$0xff]  ;;  %v178_v7 = vld [vmem:[%s811_s18 + $0x10] sm:$0xff] }
  0x10   : > { %679 = vmatpush3.msra.mxu0 %v183_v2  ;;  %750 = vmatpush3.msra.mxu1 %v183_v2  ;;  %v177_v8 = vld [vmem:[%s811_s18 + $0x8] sm:$0xff]  ;;  %v176_v9 = vld [vmem:[%s811_s18] sm:$0xff]  ;;  %v163_v15 = vld [vmem:[%s982_s0 + $0x98] sm:$0xff] }
  0x11   : > { %680 = vmatprep.subr.mxu0 %v182_v3  ;;  %743 = vmatprep.subr.mxu1 %v182_v3  ;;  %v164_v17 = vld [vmem:[%s982_s0 + $0xa0] sm:$0xff]  ;;  %v165_v19 = vld [vmem:[%s982_s0 + $0xa8] sm:$0xff]  ;;  %v150_v20 = vld [vmem:[%s982_s0 + $0x30] sm:$0xff] }
  0x12   : > { %681 = vmatpush3.msra.mxu0 %v182_v3  ;;  %751 = vmatpush3.msra.mxu1 %v182_v3  ;;  %v166_v21 = vld [vmem:[%s982_s0 + $0xb0] sm:$0xff]  ;;  %v151_v22 = vld [vmem:[%s982_s0 + $0x38] sm:$0xff]  ;;  %v152_v24 = vld [vmem:[%s982_s0 + $0x40] sm:$0xff] }
  0x13   : > { %682 = vmatprep.subr.mxu0 %v181_v4  ;;  %744 = vmatprep.subr.mxu1 %v181_v4  ;;  %v167_v23 = vld [vmem:[%s982_s0 + $0xb8] sm:$0xff]  ;;  %v168_v25 = vld [vmem:[%s982_s0 + $0xc0] sm:$0xff]  ;;  %v153_v26 = vld [vmem:[%s982_s0 + $0x48] sm:$0xff] }
  0x14   : > { %683 = vmatpush3.msra.mxu0 %v181_v4  ;;  %752 = vmatpush3.msra.mxu1 %v181_v4  ;;  %v169_v27 = vld [vmem:[%s982_s0 + $0xc8] sm:$0xff]  ;;  %v154_v28 = vld [vmem:[%s982_s0 + $0x50] sm:$0xff]  ;;  %v155_v30 = vld [vmem:[%s982_s0 + $0x58] sm:$0xff] }
  0x15   : > { %684 = vmatprep.subr.mxu0 %v180_v5  ;;  %745 = vmatprep.subr.mxu1 %v180_v5  ;;  %v170_v29 = vld [vmem:[%s982_s0 + $0xd0] sm:$0xff]  ;;  %v171_v31 = vld [vmem:[%s982_s0 + $0xd8] sm:$0xff]  ;;  %v156_v32 = vld [vmem:[%s982_s0 + $0x60] sm:$0xff] }
  0x16   : > { %685 = vmatpush3.msra.mxu0 %v180_v5  ;;  %753 = vmatpush3.msra.mxu1 %v180_v5  ;;  %v172_v33 = vld [vmem:[%s982_s0 + $0xe0] sm:$0xff]  ;;  %v157_v34 = vld [vmem:[%s982_s0 + $0x68] sm:$0xff]  ;;  %v158_v36 = vld [vmem:[%s982_s0 + $0x70] sm:$0xff] }
  0x17   : > { %686 = vmatprep.subr.mxu0 %v179_v6  ;;  %746 = vmatprep.subr.mxu1 %v179_v6  ;;  %v173_v35 = vld [vmem:[%s982_s0 + $0xe8] sm:$0xff]  ;;  %v174_v37 = vld [vmem:[%s982_s0 + $0xf0] sm:$0xff]  ;;  %v159_v38 = vld [vmem:[%s982_s0 + $0x78] sm:$0xff] }
  0x18   : > { %687 = vmatpush3.msra.mxu0 %v179_v6  ;;  %754 = vmatpush3.msra.mxu1 %v179_v6  ;;  %v175_v39 = vld [vmem:[%s982_s0 + $0xf8] sm:$0xff] }
  0x19   : > { %688 = vmatprep.subr.mxu0 %v178_v7  ;;  %747 = vmatprep.subr.mxu1 %v178_v7 }
  0x1a   : > { %689 = vmatpush3.msra.mxu0 %v178_v7  ;;  %755 = vmatpush3.msra.mxu1 %v178_v7 }
  0x1b   : > { %690 = vmatprep.subr.mxu0 %v177_v8  ;;  %748 = vmatprep.subr.mxu1 %v177_v8 }
  0x1c   : > { %691 = vmatpush3.msra.mxu0 %v177_v8  ;;  %756 = vmatpush3.msra.mxu1 %v177_v8 }
  0x1d   : > { %692 = vmatprep.subr.mxu0 %v176_v9  ;;  %749 = vmatprep.subr.mxu1 %v176_v9 }
  0x1e   : > { %693 = vmatpush3.msra.mxu0 %v176_v9  ;;  %757 = vmatpush3.msra.mxu1 %v176_v9 }
  0x1f   : > { %695 = vmatmul.mubr.msk.f32.vlgmr.msra.gmra.mxu0 %vm184_vm0, %v145_v10  ;;  %719 = vmatmul.mubr.msk.f32.vlgmr.msra.gmra.mxu1 %vm184_vm0, %v161_v11 }
  0x20   : > { %697 = vmatprep.mubr.msk.f32.mxu0 %vm184_vm0, %v146_v12  ;;  %721 = vmatprep.mubr.msk.f32.mxu1 %vm184_vm0, %v162_v13 }
  0x23   : > { %698 = vmatmul.mubr.msk.f32.gmra.mxu0 %vm184_vm0, %v147_v14  ;;  %722 = vmatmul.mubr.msk.f32.gmra.mxu1 %vm184_vm0, %v163_v15 }
  0x24   : > { %700 = vmatprep.mubr.msk.f32.mxu0 %vm184_vm0, %v148_v16  ;;  %724 = vmatprep.mubr.msk.f32.mxu1 %vm184_vm0, %v164_v17 }
  0x27   : > { %701 = vmatmul.mubr.msk.f32.gmra.mxu0 %vm184_vm0, %v149_v18  ;;  %725 = vmatmul.mubr.msk.f32.gmra.mxu1 %vm184_vm0, %v165_v19 }
  0x28   : > { %703 = vmatprep.mubr.msk.f32.mxu0 %vm184_vm0, %v150_v20  ;;  %727 = vmatprep.mubr.msk.f32.mxu1 %vm184_vm0, %v166_v21 }
  0x2b   : > { %704 = vmatmul.mubr.msk.f32.gmra.mxu0 %vm184_vm0, %v151_v22  ;;  %728 = vmatmul.mubr.msk.f32.gmra.mxu1 %vm184_vm0, %v167_v23 }
  0x2c   : > { %706 = vmatprep.mubr.msk.f32.mxu0 %vm184_vm0, %v152_v24  ;;  %730 = vmatprep.mubr.msk.f32.mxu1 %vm184_vm0, %v168_v25 }
  0x2f   : > { %707 = vmatmul.mubr.msk.f32.gmra.mxu0 %vm184_vm0, %v153_v26  ;;  %731 = vmatmul.mubr.msk.f32.gmra.mxu1 %vm184_vm0, %v169_v27 }
  0x30   : > { %709 = vmatprep.mubr.msk.f32.mxu0 %vm184_vm0, %v154_v28  ;;  %733 = vmatprep.mubr.msk.f32.mxu1 %vm184_vm0, %v170_v29 }
  0x33   : > { %710 = vmatmul.mubr.msk.f32.gmra.mxu0 %vm184_vm0, %v155_v30  ;;  %734 = vmatmul.mubr.msk.f32.gmra.mxu1 %vm184_vm0, %v171_v31 }
  0x34   : > { %712 = vmatprep.mubr.msk.f32.mxu0 %vm184_vm0, %v156_v32  ;;  %736 = vmatprep.mubr.msk.f32.mxu1 %vm184_vm0, %v172_v33 }
  0x37   : > { %713 = vmatmul.mubr.msk.f32.gmra.mxu0 %vm184_vm0, %v157_v34  ;;  %737 = vmatmul.mubr.msk.f32.gmra.mxu1 %vm184_vm0, %v173_v35 }
  0x38   : > { %715 = vmatprep.mubr.msk.f32.mxu0 %vm184_vm0, %v158_v36  ;;  %739 = vmatprep.mubr.msk.f32.mxu1 %vm184_vm0, %v174_v37 }
  0x3b   : > { %716 = vmatmul.mubr.msk.f32.gmra.mxu0 %vm184_vm0, %v159_v38  ;;  %740 = vmatmul.mubr.msk.f32.gmra.mxu1 %vm184_vm0, %v175_v39 }
  0xdf   : > { %v696_v40 = vpop.f32.mrf.mxu0  ;;  %v720_v41 = vpop.f32.mrf.mxu1 }
  0xe0   : > { %507 = vst [vmem:[%s945_s30 + $0x8] sm:$0xff] %v696_v40  ;;  %523 = vst [vmem:[%s945_s30 + $0x88] sm:$0xff] %v720_v41 }
  0xe1   : > { %v347_v42 = vpop.f32.mrf.mxu0  ;;  %v427_v43 = vpop.f32.mrf.mxu1 }
  0xe2   : > { %506 = vst [vmem:[%s945_s30] sm:$0xff] %v347_v42  ;;  %522 = vst [vmem:[%s945_s30 + $0x80] sm:$0xff] %v427_v43 }
  0xe3   : > { %v699_v44 = vpop.f32.mrf.mxu0  ;;  %v723_v45 = vpop.f32.mrf.mxu1 }
  0xe4   : > { %509 = vst [vmem:[%s945_s30 + $0x18] sm:$0xff] %v699_v44  ;;  %525 = vst [vmem:[%s945_s30 + $0x98] sm:$0xff] %v723_v45 }
  0xe5   : > { %v357_v46 = vpop.f32.mrf.mxu0  ;;  %v437_v47 = vpop.f32.mrf.mxu1 }
  0xe6   : > { %508 = vst [vmem:[%s945_s30 + $0x10] sm:$0xff] %v357_v46  ;;  %524 = vst [vmem:[%s945_s30 + $0x90] sm:$0xff] %v437_v47 }
  0xe7   : > { %v702_v48 = vpop.f32.mrf.mxu0  ;;  %v726_v49 = vpop.f32.mrf.mxu1 }
  0xe8   : > { %511 = vst [vmem:[%s945_s30 + $0x28] sm:$0xff] %v702_v48  ;;  %527 = vst [vmem:[%s945_s30 + $0xa8] sm:$0xff] %v726_v49 }
  0xe9   : > { %v367_v50 = vpop.f32.mrf.mxu0  ;;  %v447_v51 = vpop.f32.mrf.mxu1 }
  0xea   : > { %510 = vst [vmem:[%s945_s30 + $0x20] sm:$0xff] %v367_v50  ;;  %526 = vst [vmem:[%s945_s30 + $0xa0] sm:$0xff] %v447_v51 }
  0xeb   : > { %v705_v52 = vpop.f32.mrf.mxu0  ;;  %v729_v53 = vpop.f32.mrf.mxu1 }
  0xec   : > { %513 = vst [vmem:[%s945_s30 + $0x38] sm:$0xff] %v705_v52  ;;  %529 = vst [vmem:[%s945_s30 + $0xb8] sm:$0xff] %v729_v53 }
  0xed   : > { %v377_v54 = vpop.f32.mrf.mxu0  ;;  %v457_v55 = vpop.f32.mrf.mxu1 }
  0xee   : > { %512 = vst [vmem:[%s945_s30 + $0x30] sm:$0xff] %v377_v54  ;;  %528 = vst [vmem:[%s945_s30 + $0xb0] sm:$0xff] %v457_v55 }
  0xef   : > { %v708_v56 = vpop.f32.mrf.mxu0  ;;  %v732_v57 = vpop.f32.mrf.mxu1 }
  0xf0   : > { %515 = vst [vmem:[%s945_s30 + $0x48] sm:$0xff] %v708_v56  ;;  %531 = vst [vmem:[%s945_s30 + $0xc8] sm:$0xff] %v732_v57 }
  0xf1   : > { %v387_v58 = vpop.f32.mrf.mxu0  ;;  %v467_v59 = vpop.f32.mrf.mxu1 }
  0xf2   : > { %514 = vst [vmem:[%s945_s30 + $0x40] sm:$0xff] %v387_v58  ;;  %530 = vst [vmem:[%s945_s30 + $0xc0] sm:$0xff] %v467_v59 }
  0xf3   : > { %v711_v60 = vpop.f32.mrf.mxu0  ;;  %v735_v61 = vpop.f32.mrf.mxu1 }
  0xf4   : > { %517 = vst [vmem:[%s945_s30 + $0x58] sm:$0xff] %v711_v60  ;;  %533 = vst [vmem:[%s945_s30 + $0xd8] sm:$0xff] %v735_v61 }
  0xf5   : > { %v397_v62 = vpop.f32.mrf.mxu0  ;;  %v477_v63 = vpop.f32.mrf.mxu1 }
  0xf6   : > { %516 = vst [vmem:[%s945_s30 + $0x50] sm:$0xff] %v397_v62  ;;  %532 = vst [vmem:[%s945_s30 + $0xd0] sm:$0xff] %v477_v63 }
  0xf7   : > { %v714_v0 = vpop.f32.mrf.mxu0  ;;  %v738_v1 = vpop.f32.mrf.mxu1 }
  0xf8   : > { %519 = vst [vmem:[%s945_s30 + $0x68] sm:$0xff] %v714_v0  ;;  %535 = vst [vmem:[%s945_s30 + $0xe8] sm:$0xff] %v738_v1 }
  0xf9   : > { %v407_v2 = vpop.f32.mrf.mxu0  ;;  %v487_v3 = vpop.f32.mrf.mxu1 }
  0xfa   : > { %518 = vst [vmem:[%s945_s30 + $0x60] sm:$0xff] %v407_v2  ;;  %534 = vst [vmem:[%s945_s30 + $0xe0] sm:$0xff] %v487_v3 }
  0xfb   : > { %v717_v4 = vpop.f32.mrf.mxu0  ;;  %v741_v5 = vpop.f32.mrf.mxu1 }
  0xfc   : > { %521 = vst [vmem:[%s945_s30 + $0x78] sm:$0xff] %v717_v4  ;;  %537 = vst [vmem:[%s945_s30 + $0xf8] sm:$0xff] %v741_v5 }
  0xfd   : > { %v417_v6 = vpop.f32.mrf.mxu0  ;;  %v497_v7 = vpop.f32.mrf.mxu1 }
  0xfe   : > { %520 = vst [vmem:[%s945_s30 + $0x70] sm:$0xff] %v417_v6  ;;  %536 = vst [vmem:[%s945_s30 + $0xf0] sm:$0xff] %v497_v7 }
  0xff PF: > { %s12_s9 = sadd.s32 1, %s772_s9  }
 0x100   : > { %p9_p4 = scmp.ge.s32.totalorder %s12_s9, 4  }
 0x102   :  { %11 = sbr.rel (!%p9_p4) target bundleno = 1 (0x1), region = 58 }

// kernel: forward.20
= control target key start
LH: loop header
LB: loop body
LE: loop exit
PB: predicated region body
PF: predicated region fallthrough
CT: control target
= control target key end

     0   :  { %s805_s12 = smov 0   ;;  %s939_s0 = inlined_call_operand.vmem [shape: bf16[2,16,16,128], index: 0, kind: input, shape index: {}]   ;;  %s940_s1 = inlined_call_operand.vmem [shape: bf16[1,128,128], index: 1, kind: input, shape index: {}]   ;;  %s941_s2 = inlined_call_operand.vmem [shape: f32[1,128], index: 2, kind: input, shape index: {}]   ;;  %s942_s3 = inlined_call_operand.vmem [shape: f32[2,16,16,128], index: 3, kind: output, shape index: {}]  }
   0x1 LB: > { %s619_s13 = sadd.s32 4294967295, %s783_s12   ;;  %p623_p0 = scmp.ge.s32.totalorder %s783_s12, 1  ;;  %s783_s12 = sphi %s805_s12, %s13_s12  }
   0x2   : > { %p137_p1 = scmp.lt.s32.totalorder %s783_s12, 3 }
   0x4   : > { %p138_p2 = pnand %p623_p0, %p137_p1 }
   0x5   : > { %p161_p3 = scmp.lt.s32.totalorder (!%p138_p2), %s619_s13, 1 }
   0x6   : > { %141 = sbr.rel (%p138_p2) target bundleno = 270 (0x10e), region = 32 }
   0xb   : > { %v753_v0 = vld [vmem:[%s940_s1 + $0x38] sm:$0xff]   ;;  %v754_v1 = vld [vmem:[%s940_s1 + $0x30] sm:$0xff]   ;;  %s944_s13 = smov (!%p161_p3, %s619_s13), 1  ;;  %v755_v2 = vld [vmem:[%s940_s1 + $0x28] sm:$0xff]  }
   0xc   : > { %681 = vmatprep.subr.bf16.mxu0 %v753_v0  ;;  %729 = vmatprep.subr.bf16.mxu1 %v753_v0  ;;  %s655_s20 = sshll.u32 %s944_s13, 7  ;;  %v756_v3 = vld [vmem:[%s940_s1 + $0x20] sm:$0xff]   ;;  %v757_v6 = vld [vmem:[%s940_s1 + $0x18] sm:$0xff]   ;;  %v758_v7 = vld [vmem:[%s940_s1 + $0x10] sm:$0xff]   ;;  %s656_s7 = sshll.u32 %s944_s13, 8 }
   0xd   : > { %682 = vmatpush3.bf16.msra.mxu0 %v753_v0  ;;  %737 = vmatpush3.bf16.msra.mxu1 %v753_v0  ;;  %s828_s23 = scalar_lea.vmem %s939_s0, %s655_s20  ;;  %v759_v8 = vld [vmem:[%s940_s1 + $0x8] sm:$0xff]   ;;  %v760_v9 = vld [vmem:[%s940_s1] sm:$0xff]   ;;  %s870_s14 = scalar_lea.vmem %s942_s3, %s656_s7 }
   0xe   : > { %683 = vmatprep.subr.bf16.mxu0 %v754_v1  ;;  %730 = vmatprep.subr.bf16.mxu1 %v754_v1  ;;  %v761_v4 = vld [vmem:[%s828_s23] sm:$0xff]   ;;  %v763_v10 = vld [vmem:[%s828_s23 + $0x8] sm:$0xff]   ;;  %v765_v12 = vld [vmem:[%s828_s23 + $0x10] sm:$0xff]  }
   0xf   : > { %v762_v5 = vld [vmem:[%s828_s23 + $0x40] sm:$0xff]   ;;  %697 = vmatprep.mubr.bf16.mxu0 %v761_v4  ;;  %v764_v11 = vld [vmem:[%s828_s23 + $0x48] sm:$0xff]   ;;  %v766_v13 = vld [vmem:[%s828_s23 + $0x50] sm:$0xff]  }
  0x10   : > { %713 = vmatprep.mubr.bf16.mxu1 %v762_v5  ;;  %v767_v14 = vld [vmem:[%s828_s23 + $0x18] sm:$0xff]   ;;  %v769_v16 = vld [vmem:[%s828_s23 + $0x20] sm:$0xff]   ;;  %v771_v18 = vld [vmem:[%s828_s23 + $0x28] sm:$0xff]  }
  0x11   : > { %684 = vmatpush3.bf16.msra.mxu0 %v754_v1  ;;  %738 = vmatpush3.bf16.msra.mxu1 %v754_v1  ;;  %v768_v15 = vld [vmem:[%s828_s23 + $0x58] sm:$0xff]   ;;  %v770_v17 = vld [vmem:[%s828_s23 + $0x60] sm:$0xff]   ;;  %v772_v19 = vld [vmem:[%s828_s23 + $0x68] sm:$0xff]  }
  0x12   : > { %685 = vmatprep.subr.bf16.mxu0 %v755_v2  ;;  %731 = vmatprep.subr.bf16.mxu1 %v755_v2  ;;  %v773_v20 = vld [vmem:[%s828_s23 + $0x30] sm:$0xff]   ;;  %v775_v22 = vld [vmem:[%s828_s23 + $0x38] sm:$0xff]   ;;  %v865_v24 = vld [vmem:[%s941_s2] ss:$0 sm:$0xff] }
  0x13   : > { %v774_v21 = vld [vmem:[%s828_s23 + $0x70] sm:$0xff]   ;;  %v776_v23 = vld [vmem:[%s828_s23 + $0x78] sm:$0xff]  }
  0x15   : > { %686 = vmatpush3.bf16.msra.mxu0 %v755_v2  ;;  %739 = vmatpush3.bf16.msra.mxu1 %v755_v2 }
  0x16   : > { %687 = vmatprep.subr.bf16.mxu0 %v756_v3  ;;  %732 = vmatprep.subr.bf16.mxu1 %v756_v3 }
  0x19   : > { %688 = vmatpush3.bf16.msra.mxu0 %v756_v3  ;;  %740 = vmatpush3.bf16.msra.mxu1 %v756_v3 }
  0x1a   : > { %689 = vmatprep.subr.bf16.mxu0 %v757_v6  ;;  %733 = vmatprep.subr.bf16.mxu1 %v757_v6 }
  0x1d   : > { %690 = vmatpush3.bf16.msra.mxu0 %v757_v6  ;;  %741 = vmatpush3.bf16.msra.mxu1 %v757_v6 }
  0x1e   : > { %691 = vmatprep.subr.bf16.mxu0 %v758_v7  ;;  %734 = vmatprep.subr.bf16.mxu1 %v758_v7 }
  0x21   : > { %692 = vmatpush3.bf16.msra.mxu0 %v758_v7  ;;  %742 = vmatpush3.bf16.msra.mxu1 %v758_v7 }
  0x22   : > { %693 = vmatprep.subr.bf16.mxu0 %v759_v8  ;;  %735 = vmatprep.subr.bf16.mxu1 %v759_v8 }
  0x25   : > { %694 = vmatpush3.bf16.msra.mxu0 %v759_v8  ;;  %743 = vmatpush3.bf16.msra.mxu1 %v759_v8 }
  0x26   : > { %695 = vmatprep.subr.bf16.mxu0 %v760_v9  ;;  %736 = vmatprep.subr.bf16.mxu1 %v760_v9 }
  0x29   : > { %696 = vmatpush3.bf16.msra.mxu0 %v760_v9  ;;  %744 = vmatpush3.bf16.msra.mxu1 %v760_v9 }
  0x2c   : > { %698 = vmatmul.mubr.bf16.vlgmr.msra.gmra.mxu0 %v763_v10  ;;  %714 = vmatmul.mubr.bf16.vlgmr.msra.gmra.mxu1 %v764_v11 }
  0x2d   : > { %701 = vmatprep.mubr.bf16.mxu0 %v765_v12  ;;  %717 = vmatprep.mubr.bf16.mxu1 %v766_v13 }
  0x34   : > { %702 = vmatmul.mubr.bf16.gmra.mxu0 %v767_v14  ;;  %718 = vmatmul.mubr.bf16.gmra.mxu1 %v768_v15 }
  0x35   : > { %705 = vmatprep.mubr.bf16.mxu0 %v769_v16  ;;  %721 = vmatprep.mubr.bf16.mxu1 %v770_v17 }
  0x3c   : > { %706 = vmatmul.mubr.bf16.gmra.mxu0 %v771_v18  ;;  %722 = vmatmul.mubr.bf16.gmra.mxu1 %v772_v19 }
  0x3d   : > { %709 = vmatprep.mubr.bf16.mxu0 %v773_v20  ;;  %725 = vmatprep.mubr.bf16.mxu1 %v774_v21 }
  0x44   : > { %710 = vmatmul.mubr.bf16.gmra.mxu0 %v775_v22  ;;  %726 = vmatmul.mubr.bf16.gmra.mxu1 %v776_v23 }
  0xec   : > { %v699_v25 = vpop.f32.mrf.mxu0  ;;  %v715_v26 = vpop.f32.mrf.mxu1 }
  0xed   : > { %v414_v27 = vadd.f32 %v699_v25, %v865_v24  ;;  %v478_v28 = vadd.f32 %v715_v26, %v865_v24 }
  0xee   : > { %v405_v29 = vpop.f32.mrf.mxu0  ;;  %v469_v30 = vpop.f32.mrf.mxu1 }
  0xef   : > { %534 = vst [vmem:[%s870_s14 + $0x10] sm:$0xff] %v414_v27  ;;  %550 = vst [vmem:[%s870_s14 + $0x90] sm:$0xff] %v478_v28  ;;  %v406_v31 = vadd.f32 %v865_v24, %v405_v29  ;;  %v470_v32 = vadd.f32 %v865_v24, %v469_v30 }
  0xf0   : > { %v700_v33 = vpop.f32.mrf.mxu0  ;;  %v716_v34 = vpop.f32.mrf.mxu1 }
  0xf1   : > { %532 = vst [vmem:[%s870_s14] sm:$0xff] %v406_v31  ;;  %548 = vst [vmem:[%s870_s14 + $0x80] sm:$0xff] %v470_v32  ;;  %v417_v35 = vadd.f32 %v700_v33, %v865_v24  ;;  %v481_v36 = vadd.f32 %v716_v34, %v865_v24 }
  0xf2   : > { %v408_v37 = vpop.f32.mrf.mxu0  ;;  %v472_v38 = vpop.f32.mrf.mxu1 }
  0xf3   : > { %535 = vst [vmem:[%s870_s14 + $0x18] sm:$0xff] %v417_v35  ;;  %551 = vst [vmem:[%s870_s14 + $0x98] sm:$0xff] %v481_v36  ;;  %v409_v39 = vadd.f32 %v865_v24, %v408_v37  ;;  %v473_v40 = vadd.f32 %v865_v24, %v472_v38 }
  0xf4   : > { %v703_v41 = vpop.f32.mrf.mxu0  ;;  %v719_v42 = vpop.f32.mrf.mxu1 }
  0xf5   : > { %533 = vst [vmem:[%s870_s14 + $0x8] sm:$0xff] %v409_v39  ;;  %549 = vst [vmem:[%s870_s14 + $0x88] sm:$0xff] %v473_v40  ;;  %v430_v43 = vadd.f32 %v703_v41, %v865_v24  ;;  %v494_v44 = vadd.f32 %v719_v42, %v865_v24 }
  0xf6   : > { %v421_v45 = vpop.f32.mrf.mxu0  ;;  %v485_v46 = vpop.f32.mrf.mxu1 }
  0xf7   : > { %538 = vst [vmem:[%s870_s14 + $0x30] sm:$0xff] %v430_v43  ;;  %554 = vst [vmem:[%s870_s14 + $0xb0] sm:$0xff] %v494_v44  ;;  %v422_v47 = vadd.f32 %v865_v24, %v421_v45  ;;  %v486_v48 = vadd.f32 %v865_v24, %v485_v46 }
  0xf8   : > { %v704_v49 = vpop.f32.mrf.mxu0  ;;  %v720_v50 = vpop.f32.mrf.mxu1 }
  0xf9   : > { %536 = vst [vmem:[%s870_s14 + $0x20] sm:$0xff] %v422_v47  ;;  %552 = vst [vmem:[%s870_s14 + $0xa0] sm:$0xff] %v486_v48  ;;  %v433_v51 = vadd.f32 %v704_v49, %v865_v24  ;;  %v497_v52 = vadd.f32 %v720_v50, %v865_v24 }
  0xfa   : > { %v424_v53 = vpop.f32.mrf.mxu0  ;;  %v488_v54 = vpop.f32.mrf.mxu1 }
  0xfb   : > { %539 = vst [vmem:[%s870_s14 + $0x38] sm:$0xff] %v433_v51  ;;  %555 = vst [vmem:[%s870_s14 + $0xb8] sm:$0xff] %v497_v52  ;;  %v425_v55 = vadd.f32 %v865_v24, %v424_v53  ;;  %v489_v56 = vadd.f32 %v865_v24, %v488_v54 }
  0xfc   : > { %v707_v57 = vpop.f32.mrf.mxu0  ;;  %v723_v58 = vpop.f32.mrf.mxu1 }
  0xfd   : > { %537 = vst [vmem:[%s870_s14 + $0x28] sm:$0xff] %v425_v55  ;;  %553 = vst [vmem:[%s870_s14 + $0xa8] sm:$0xff] %v489_v56  ;;  %v446_v59 = vadd.f32 %v707_v57, %v865_v24  ;;  %v510_v60 = vadd.f32 %v723_v58, %v865_v24 }
  0xfe   : > { %v437_v61 = vpop.f32.mrf.mxu0  ;;  %v501_v62 = vpop.f32.mrf.mxu1 }
  0xff   : > { %542 = vst [vmem:[%s870_s14 + $0x50] sm:$0xff] %v446_v59  ;;  %558 = vst [vmem:[%s870_s14 + $0xd0] sm:$0xff] %v510_v60  ;;  %v438_v63 = vadd.f32 %v865_v24, %v437_v61  ;;  %v502_v0 = vadd.f32 %v865_v24, %v501_v62 }
 0x100   : > { %v708_v1 = vpop.f32.mrf.mxu0  ;;  %v724_v2 = vpop.f32.mrf.mxu1 }
 0x101   : > { %540 = vst [vmem:[%s870_s14 + $0x40] sm:$0xff] %v438_v63  ;;  %556 = vst [vmem:[%s870_s14 + $0xc0] sm:$0xff] %v502_v0  ;;  %v449_v3 = vadd.f32 %v708_v1, %v865_v24  ;;  %v513_v4 = vadd.f32 %v724_v2, %v865_v24 }
 0x102   : > { %v440_v5 = vpop.f32.mrf.mxu0  ;;  %v504_v6 = vpop.f32.mrf.mxu1 }
 0x103   : > { %543 = vst [vmem:[%s870_s14 + $0x58] sm:$0xff] %v449_v3  ;;  %559 = vst [vmem:[%s870_s14 + $0xd8] sm:$0xff] %v513_v4  ;;  %v441_v7 = vadd.f32 %v865_v24, %v440_v5  ;;  %v505_v8 = vadd.f32 %v865_v24, %v504_v6 }
 0x104   : > { %v711_v9 = vpop.f32.mrf.mxu0  ;;  %v727_v10 = vpop.f32.mrf.mxu1 }
 0x105   : > { %541 = vst [vmem:[%s870_s14 + $0x48] sm:$0xff] %v441_v7  ;;  %557 = vst [vmem:[%s870_s14 + $0xc8] sm:$0xff] %v505_v8  ;;  %v462_v11 = vadd.f32 %v711_v9, %v865_v24  ;;  %v526_v12 = vadd.f32 %v727_v10, %v865_v24 }
 0x106   : > { %v453_v13 = vpop.f32.mrf.mxu0  ;;  %v517_v14 = vpop.f32.mrf.mxu1 }
 0x107   : > { %546 = vst [vmem:[%s870_s14 + $0x70] sm:$0xff] %v462_v11  ;;  %562 = vst [vmem:[%s870_s14 + $0xf0] sm:$0xff] %v526_v12  ;;  %v454_v15 = vadd.f32 %v865_v24, %v453_v13  ;;  %v518_v16 = vadd.f32 %v865_v24, %v517_v14 }
 0x108   : > { %v712_v17 = vpop.f32.mrf.mxu0  ;;  %v728_v18 = vpop.f32.mrf.mxu1 }
 0x109   : > { %544 = vst [vmem:[%s870_s14 + $0x60] sm:$0xff] %v454_v15  ;;  %560 = vst [vmem:[%s870_s14 + $0xe0] sm:$0xff] %v518_v16  ;;  %v465_v19 = vadd.f32 %v712_v17, %v865_v24  ;;  %v529_v20 = vadd.f32 %v728_v18, %v865_v24 }
 0x10a   : > { %v456_v21 = vpop.f32.mrf.mxu0  ;;  %v520_v22 = vpop.f32.mrf.mxu1 }
 0x10b   : > { %547 = vst [vmem:[%s870_s14 + $0x78] sm:$0xff] %v465_v19  ;;  %563 = vst [vmem:[%s870_s14 + $0xf8] sm:$0xff] %v529_v20  ;;  %v457_v23 = vadd.f32 %v865_v24, %v456_v21  ;;  %v521_v25 = vadd.f32 %v865_v24, %v520_v22 }
 0x10d   : > { %545 = vst [vmem:[%s870_s14 + $0x68] sm:$0xff] %v457_v23  ;;  %561 = vst [vmem:[%s870_s14 + $0xe8] sm:$0xff] %v521_v25 }
 0x10e PF: > { %s13_s12 = sadd.s32 1, %s783_s12  }
 0x10f   : > { %p10_p4 = scmp.ge.s32.totalorder %s13_s12, 4  }
 0x111   :  { %12 = sbr.rel (!%p10_p4) target bundleno = 1 (0x1), region = 62 }

// kernel: forward.21
= control target key start
LH: loop header
LB: loop body
LE: loop exit
PB: predicated region body
PF: predicated region fallthrough
CT: control target
= control target key end

     0   :  { %s1027_s15 = smov 0   ;;  %s1361_s0 = inlined_call_operand.vmem [shape: f32[2,256,128], index: 0, kind: input, shape index: {}]   ;;  %s1362_s1 = inlined_call_operand.vmem [shape: f32[1,128], index: 1, kind: input, shape index: {}]   ;;  %s1363_s2 = inlined_call_operand.vmem [shape: f32[1,128], index: 2, kind: input, shape index: {}]   ;;  %s1364_s3 = inlined_call_operand.vmem [shape: f32[256,128], index: 3, kind: input, shape index: {}]   ;;  %s1365_s4 = inlined_call_operand.vmem [shape: f32[2,256,128], index: 4, kind: output, shape index: {}]  }
   0x1 LB: > { %s747_s16 = sadd.s32 4294967295, %s1000_s15   ;;  %p751_p0 = scmp.ge.s32.totalorder %s1000_s15, 1  ;;  %s1000_s15 = sphi %s1027_s15, %s14_s15  }
   0x2   : > { %p162_p1 = scmp.lt.s32.totalorder %s1000_s15, 3 }
   0x4   : > { %p163_p2 = pnand %p751_p0, %p162_p1 }
   0x5   : > { %p188_p3 = scmp.lt.s32.totalorder (!%p163_p2), %s747_s16, 1 }
   0x6   : > { %166 = sbr.rel (%p163_p2) target bundleno = 142 (0x8e), region = 36 }
   0xb   : > { %s1367_s16 = smov (!%p188_p3, %s747_s16), 1  ;;  %v1060_v49 = vld [vmem:[%s1363_s2] ss:$0 sm:$0xff] }
   0xc   : > { %s792_s17 = sshll.u32 %s1367_s16, 8  ;;  %v1066_v55 = vld [vmem:[%s1362_s1] ss:$0 sm:$0xff] }
   0xd   : > { %s1043_s20 = scalar_lea.vmem %s1361_s0, %s792_s17  ;;  %s1088_s29 = scalar_lea.vmem %s1365_s4, %s792_s17 }
   0xe   : > { %v198_v0 = vld [vmem:[%s1043_s20] sm:$0xff]  ;;  %v199_v1 = vld [vmem:[%s1043_s20 + $0x8] sm:$0xff]  ;;  %v200_v2 = vld [vmem:[%s1043_s20 + $0x10] sm:$0xff] }
   0xf   : > { %v756_v3 = vmul.f32 -1.442695, %v198_v0  ;;  %v757_v4 = vmul.f32 -1.442695, %v199_v1  ;;  %v758_v5 = vmul.f32 -1.442695, %v200_v2 }
  0x10   : > { %v201_v6 = vld [vmem:[%s1043_s20 + $0x18] sm:$0xff]  ;;  %v462_v7 = vmul.f32 1.442695, %v198_v0  ;;  %v202_v8 = vld [vmem:[%s1043_s20 + $0x20] sm:$0xff]  ;;  %v464_v10 = vmul.f32 1.442695, %v199_v1 }
  0x11   : > { %802 = vpow2.f32 %v756_v3  ;;  %v759_v9 = vmul.f32 -1.442695, %v201_v6  ;;  %v203_v11 = vld [vmem:[%s1043_s20 + $0x28] sm:$0xff]  ;;  %v760_v12 = vmul.f32 -1.442695, %v202_v8  ;;  %v204_v14 = vld [vmem:[%s1043_s20 + $0x30] sm:$0xff] }
  0x12   : > { %804 = vpow2.f32 %v757_v4  ;;  %v466_v13 = vmul.f32 1.442695, %v200_v2  ;;  %v761_v15 = vmul.f32 -1.442695, %v203_v11  ;;  %v468_v16 = vmul.f32 1.442695, %v201_v6 }
  0x13   : > { %806 = vpow2.f32 %v758_v5  ;;  %v205_v17 = vld [vmem:[%s1043_s20 + $0x38] sm:$0xff]  ;;  %v762_v18 = vmul.f32 -1.442695, %v204_v14  ;;  %v470_v19 = vmul.f32 1.442695, %v202_v8  ;;  %v206_v21 = vld [vmem:[%s1043_s20 + $0x40] sm:$0xff] }
  0x14   : > { %808 = vpow2.f32 %v462_v7  ;;  %v763_v20 = vmul.f32 -1.442695, %v205_v17  ;;  %v472_v22 = vmul.f32 1.442695, %v203_v11  ;;  %v764_v24 = vmul.f32 -1.442695, %v206_v21 }
  0x15   : > { %810 = vpow2.f32 %v759_v9  ;;  %v207_v26 = vld [vmem:[%s1043_s20 + $0x48] sm:$0xff]  ;;  %v474_v28 = vmul.f32 1.442695, %v204_v14  ;;  %v208_v34 = vld [vmem:[%s1043_s20 + $0x50] sm:$0xff]  ;;  %v476_v36 = vmul.f32 1.442695, %v205_v17 }
  0x16   : > { %812 = vpow2.f32 %v464_v10  ;;  %v765_v31 = vmul.f32 -1.442695, %v207_v26  ;;  %v766_v40 = vmul.f32 -1.442695, %v208_v34  ;;  %v209_v43 = vld [vmem:[%s1043_s20 + $0x58] sm:$0xff]  ;;  %v210_v51 = vld [vmem:[%s1043_s20 + $0x60] sm:$0xff] }
  0x17   : > { %814 = vpow2.f32 %v760_v12  ;;  %v478_v45 = vmul.f32 1.442695, %v206_v21  ;;  %v767_v50 = vmul.f32 -1.442695, %v209_v43  ;;  %v480_v56 = vmul.f32 1.442695, %v207_v26 }
  0x18   : > { %816 = vpow2.f32 %v466_v13  ;;  %v768_v60 = vmul.f32 -1.442695, %v210_v51  ;;  %v211_v61 = vld [vmem:[%s1043_s20 + $0x68] sm:$0xff]  ;;  %v1073_v2 = vld [vmem:[%s1043_s20 + $0x70] sm:$0xff]  ;;  %v596_v4 = vld [vmem:[%s1364_s3] sm:$0xff] }
  0x19   : > { %818 = vpow2.f32 %v761_v15  ;;  %v482_v6 = vmul.f32 1.442695, %v208_v34  ;;  %v769_v7 = vmul.f32 -1.442695, %v211_v61  ;;  %v1081_v12 = vld [vmem:[%s1043_s20 + $0x78] sm:$0xff]  ;;  %v597_v14 = vld [vmem:[%s1364_s3 + $0x8] sm:$0xff] }
  0x1a   : > { %820 = vpow2.f32 %v468_v16  ;;  %v484_v15 = vmul.f32 1.442695, %v209_v43  ;;  %v770_v16 = vmul.f32 -1.442695, %v1073_v2  ;;  %v771_v26 = vmul.f32 -1.442695, %v1081_v12 }
  0x1b   : > { %822 = vpow2.f32 %v762_v18  ;;  %v600_v43 = vld [vmem:[%s1364_s3 + $0x20] sm:$0xff] }
  0x1c   : > { %824 = vpow2.f32 %v470_v19 }
  0x1d   : > { %826 = vpow2.f32 %v763_v20 }
  0x1e   : > { %v803_v23 = vpop.eup %802  ;;  %828 = vpow2.f32 %v472_v22 }
  0x1f   : > { %v327_v25 = vadd.f32 1.0, %v803_v23  ;;  %v805_v27 = vpop.eup %804  ;;  %v598_v23 = vld [vmem:[%s1364_s3 + $0x10] sm:$0xff] }
  0x20   : > { %v328_v29 = vadd.f32 1.0, %v805_v27  ;;  %v807_v30 = vpop.eup %806 }
  0x21   : > { %830 = vrcp.f32 %v327_v25  ;;  %v809_v32 = vpop.eup %808  ;;  %v329_v33 = vadd.f32 1.0, %v807_v30 }
  0x22   : > { %832 = vpow2.f32 %v764_v24  ;;  %v811_v35 = vpop.eup %810  ;;  %v532_v58 = vmul.f32 %v809_v32, %v1060_v49 }
  0x23   : > { %834 = vrcp.f32 %v328_v29  ;;  %v813_v37 = vpop.eup %812  ;;  %v330_v38 = vadd.f32 1.0, %v811_v35  ;;  %v486_v35 = vmul.f32 1.442695, %v210_v51 }
  0x24   : > { %836 = vpow2.f32 %v474_v28  ;;  %v815_v39 = vpop.eup %814  ;;  %v533_v1 = vmul.f32 %v813_v37, %v1060_v49 }
  0x25   : > { %838 = vrcp.f32 %v329_v33  ;;  %v817_v41 = vpop.eup %816  ;;  %v331_v42 = vadd.f32 1.0, %v815_v39  ;;  %v599_v33 = vld [vmem:[%s1364_s3 + $0x18] sm:$0xff] }
  0x26   : > { %840 = vpow2.f32 %v765_v31  ;;  %v819_v44 = vpop.eup %818  ;;  %v534_v11 = vmul.f32 %v817_v41, %v1060_v49  ;;  %v1104_v31 = vld [vmem:[%s1043_s20 + $0x80] sm:$0xff]  ;;  %v1113_v41 = vld [vmem:[%s1043_s20 + $0x88] sm:$0xff] }
  0x27   : > { %842 = vrcp.f32 %v330_v38  ;;  %v821_v46 = vpop.eup %820  ;;  %v332_v47 = vadd.f32 1.0, %v819_v44 }
  0x28   : > { %844 = vpow2.f32 %v476_v36  ;;  %v823_v48 = vpop.eup %822  ;;  %v535_v21 = vmul.f32 %v821_v46, %v1060_v49  ;;  %v488_v36 = vmul.f32 1.442695, %v211_v61  ;;  %v772_v46 = vmul.f32 -1.442695, %v1104_v31  ;;  %v1130_v61 = vld [vmem:[%s1043_s20 + $0x90] sm:$0xff] }
  0x29   : > { %846 = vrcp.f32 %v331_v42  ;;  %v825_v52 = vpop.eup %824  ;;  %v333_v53 = vadd.f32 1.0, %v823_v48 }
  0x2a   : > { %848 = vpow2.f32 %v766_v40  ;;  %v827_v54 = vpop.eup %826  ;;  %v536_v24 = vmul.f32 %v825_v52, %v1060_v49 }
  0x2b   : > { %850 = vrcp.f32 %v332_v47  ;;  %v829_v57 = vpop.eup %828  ;;  %v334_v59 = vadd.f32 1.0, %v827_v54 }
  0x2c   : > { %852 = vpow2.f32 %v478_v45  ;;  %v537_v34 = vmul.f32 %v829_v57, %v1060_v49 }
  0x2d   : > { %854 = vrcp.f32 %v333_v53  ;;  %v601_v53 = vld [vmem:[%s1364_s3 + $0x28] sm:$0xff] }
  0x2e   : > { %v831_v62 = vpop.eup %830  ;;  %856 = vpow2.f32 %v767_v50 }
  0x2f   : > { %v833_v63 = vpop.eup %832  ;;  %v429_v0 = vmul.f32 %v831_v62, %v1066_v55  ;;  %858 = vrcp.f32 %v334_v59 }
  0x30   : > { %v835_v3 = vpop.eup %834  ;;  %v335_v5 = vadd.f32 1.0, %v833_v63  ;;  %860 = vpow2.f32 %v480_v56  ;;  %v773_v56 = vmul.f32 -1.442695, %v1113_v41  ;;  %v602_v63 = vld [vmem:[%s1364_s3 + $0x30] sm:$0xff] }
  0x31   : > { %v837_v8 = vpop.eup %836  ;;  %v564_v9 = vadd.f32 %v532_v58, %v429_v0  ;;  %v430_v10 = vmul.f32 %v835_v3, %v1066_v55  ;;  %862 = vpow2.f32 %v768_v60 }
  0x32   : > { %v839_v13 = vpop.eup %838  ;;  %864 = vrcp.f32 %v335_v5  ;;  %v538_v44 = vmul.f32 %v837_v8, %v1060_v49  ;;  %v603_v8 = vld [vmem:[%s1364_s3 + $0x38] sm:$0xff] }
  0x33   : > { %v841_v17 = vpop.eup %840  ;;  %v628_v18 = vadd.f32 %v596_v4, %v564_v9  ;;  %v565_v19 = vadd.f32 %v533_v1, %v430_v10  ;;  %v431_v20 = vmul.f32 %v839_v13, %v1066_v55  ;;  %866 = vpow2.f32 %v769_v7 }
  0x34   : > { %v843_v22 = vpop.eup %842  ;;  %v336_v25 = vadd.f32 1.0, %v841_v17  ;;  %868 = vpow2.f32 %v482_v6  ;;  %v490_v1 = vmul.f32 1.442695, %v1073_v2  ;;  %v492_v2 = vmul.f32 1.442695, %v1081_v12  ;;  %v604_v12 = vld [vmem:[%s1364_s3 + $0x40] sm:$0xff] }
  0x35   : > { %v845_v27 = vpop.eup %844  ;;  %660 = vst [vmem:[%s1088_s29] sm:$0xff] %v628_v18  ;;  %v629_v28 = vadd.f32 %v597_v14, %v565_v19  ;;  %v566_v29 = vadd.f32 %v534_v11, %v431_v20  ;;  %v432_v30 = vmul.f32 %v843_v22, %v1066_v55  ;;  %v774_v10 = vmul.f32 -1.442695, %v1130_v61  ;;  %v1145_v11 = vld [vmem:[%s1043_s20 + $0x98] sm:$0xff]  ;;  %v1156_v22 = vld [vmem:[%s1043_s20 + $0xa0] sm:$0xff] }
  0x36   : > { %v847_v32 = vpop.eup %846  ;;  %870 = vrcp.f32 %v336_v25  ;;  %v539_v54 = vmul.f32 %v845_v27, %v1060_v49  ;;  %v494_v20 = vmul.f32 1.442695, %v1104_v31  ;;  %v776_v31 = vmul.f32 -1.442695, %v1156_v22 }
  0x37   : > { %v849_v37 = vpop.eup %848  ;;  %661 = vst [vmem:[%s1088_s29 + $0x8] sm:$0xff] %v629_v28  ;;  %v630_v38 = vadd.f32 %v598_v23, %v566_v29  ;;  %v567_v39 = vadd.f32 %v535_v21, %v432_v30  ;;  %v433_v40 = vmul.f32 %v847_v32, %v1066_v55  ;;  %872 = vpow2.f32 %v770_v16  ;;  %v1163_v32 = vld [vmem:[%s1043_s20 + $0xa8] sm:$0xff] }
  0x38   : > { %v851_v42 = vpop.eup %850  ;;  %v337_v45 = vadd.f32 1.0, %v849_v37  ;;  %874 = vpow2.f32 %v484_v15  ;;  %v775_v21 = vmul.f32 -1.442695, %v1145_v11 }
  0x39   : > { %v853_v47 = vpop.eup %852  ;;  %662 = vst [vmem:[%s1088_s29 + $0x10] sm:$0xff] %v630_v38  ;;  %v631_v48 = vadd.f32 %v599_v33, %v567_v39  ;;  %v568_v50 = vadd.f32 %v536_v24, %v433_v40  ;;  %v434_v51 = vmul.f32 %v851_v42, %v1066_v55  ;;  %876 = vpow2.f32 %v771_v26  ;;  %v1172_v40 = vld [vmem:[%s1043_s20 + $0xb0] sm:$0xff] }
  0x3a   : > { %v855_v52 = vpop.eup %854  ;;  %878 = vrcp.f32 %v337_v45  ;;  %v540_v9 = vmul.f32 %v853_v47, %v1060_v49  ;;  %v496_v39 = vmul.f32 1.442695, %v1113_v41  ;;  %v498_v41 = vmul.f32 1.442695, %v1130_v61 }
  0x3b   : > { %v857_v57 = vpop.eup %856  ;;  %663 = vst [vmem:[%s1088_s29 + $0x18] sm:$0xff] %v631_v48  ;;  %v632_v58 = vadd.f32 %v600_v43, %v568_v50  ;;  %v569_v59 = vadd.f32 %v537_v34, %v434_v51  ;;  %v435_v60 = vmul.f32 %v855_v52, %v1066_v55  ;;  %880 = vpow2.f32 %v486_v35  ;;  %v605_v34 = vld [vmem:[%s1364_s3 + $0x48] sm:$0xff]  ;;  %v606_v50 = vld [vmem:[%s1364_s3 + $0x50] sm:$0xff] }
  0x3c   : > { %v859_v62 = vpop.eup %858  ;;  %v338_v0 = vadd.f32 1.0, %v857_v57  ;;  %882 = vpow2.f32 %v772_v46  ;;  %v778_v51 = vmul.f32 -1.442695, %v1172_v40  ;;  %v1184_v57 = vld [vmem:[%s1043_s20 + $0xb8] sm:$0xff]  ;;  %v500_v61 = vmul.f32 1.442695, %v1145_v11 }
  0x3d   : > { %v861_v3 = vpop.eup %860  ;;  %664 = vst [vmem:[%s1088_s29 + $0x20] sm:$0xff] %v632_v58  ;;  %v633_v4 = vadd.f32 %v601_v53, %v569_v59  ;;  %v570_v5 = vadd.f32 %v538_v44, %v435_v60  ;;  %v436_v6 = vmul.f32 %v859_v62, %v1066_v55  ;;  %884 = vpow2.f32 %v488_v36  ;;  %v1201_v11 = vld [vmem:[%s1043_s20 + $0xc8] sm:$0xff] }
  0x3e   : > { %v863_v7 = vpop.eup %862  ;;  %886 = vrcp.f32 %v338_v0  ;;  %v541_v25 = vmul.f32 %v861_v3, %v1060_v49  ;;  %v777_v44 = vmul.f32 -1.442695, %v1163_v32 }
  0x3f   : > { %v865_v13 = vpop.eup %864  ;;  %665 = vst [vmem:[%s1088_s29 + $0x28] sm:$0xff] %v633_v4  ;;  %v634_v14 = vadd.f32 %v602_v63, %v570_v5  ;;  %v571_v15 = vadd.f32 %v539_v54, %v436_v6  ;;  %v339_v16 = vadd.f32 1.0, %v863_v7  ;;  %888 = vpow2.f32 %v773_v56  ;;  %v1189_v63 = vld [vmem:[%s1043_s20 + $0xc0] sm:$0xff] }
  0x40   : > { %v437_v17 = vmul.f32 %v865_v13, %v1066_v55  ;;  %890 = vpow2.f32 %v490_v1  ;;  %v867_v18 = vpop.eup %866  ;;  %v607_v1 = vld [vmem:[%s1364_s3 + $0x58] sm:$0xff]  ;;  %v779_v5 = vmul.f32 -1.442695, %v1184_v57 }
  0x41   : > { %666 = vst [vmem:[%s1088_s29 + $0x30] sm:$0xff] %v634_v14  ;;  %v635_v19 = vadd.f32 %v603_v8, %v571_v15  ;;  %892 = vrcp.f32 %v339_v16  ;;  %v869_v23 = vpop.eup %868  ;;  %v340_v26 = vadd.f32 1.0, %v867_v18  ;;  %v608_v15 = vld [vmem:[%s1364_s3 + $0x60] sm:$0xff] }
  0x42   : > { %v572_v24 = vadd.f32 %v540_v9, %v437_v17  ;;  %894 = vpow2.f32 %v774_v10  ;;  %v542_v38 = vmul.f32 %v869_v23, %v1060_v49  ;;  %v780_v10 = vmul.f32 -1.442695, %v1189_v63 }
  0x43   : > { %v871_v27 = vpop.eup %870  ;;  %667 = vst [vmem:[%s1088_s29 + $0x38] sm:$0xff] %v635_v19  ;;  %896 = vpow2.f32 %v492_v2  ;;  %v502_v2 = vmul.f32 1.442695, %v1156_v22  ;;  %v781_v22 = vmul.f32 -1.442695, %v1201_v11 }
  0x44   : > { %v873_v28 = vpop.eup %872  ;;  %v636_v29 = vadd.f32 %v604_v12, %v572_v24  ;;  %v438_v30 = vmul.f32 %v871_v27, %v1066_v55  ;;  %898 = vrcp.f32 %v340_v26 }
  0x45   : > { %v875_v33 = vpop.eup %874  ;;  %v341_v35 = vadd.f32 1.0, %v873_v28  ;;  %900 = vpow2.f32 %v775_v21  ;;  %v504_v21 = vmul.f32 1.442695, %v1163_v32  ;;  %v1216_v28 = vld [vmem:[%s1043_s20 + $0xd0] sm:$0xff] }
  0x46   : > { %v877_v36 = vpop.eup %876  ;;  %668 = vst [vmem:[%s1088_s29 + $0x40] sm:$0xff] %v636_v29  ;;  %v573_v37 = vadd.f32 %v541_v25, %v438_v30  ;;  %902 = vpow2.f32 %v494_v20  ;;  %v543_v54 = vmul.f32 %v875_v33, %v1060_v49  ;;  %v609_v25 = vld [vmem:[%s1364_s3 + $0x68] sm:$0xff] }
  0x47   : > { %v879_v42 = vpop.eup %878  ;;  %904 = vrcp.f32 %v341_v35  ;;  %v342_v43 = vadd.f32 1.0, %v877_v36  ;;  %v1223_v35 = vld [vmem:[%s1043_s20 + $0xd8] sm:$0xff] }
  0x48   : > { %v881_v45 = vpop.eup %880  ;;  %v637_v46 = vadd.f32 %v605_v34, %v573_v37  ;;  %v439_v47 = vmul.f32 %v879_v42, %v1066_v55  ;;  %906 = vpow2.f32 %v776_v31  ;;  %v506_v34 = vmul.f32 1.442695, %v1172_v40  ;;  %v611_v40 = vld [vmem:[%s1364_s3 + $0x78] sm:$0xff] }
  0x49   : > { %v883_v48 = vpop.eup %882  ;;  %908 = vrcp.f32 %v342_v43  ;;  %v544_v3 = vmul.f32 %v881_v45, %v1060_v49  ;;  %v782_v42 = vmul.f32 -1.442695, %v1216_v28 }
  0x4a   : > { %v885_v52 = vpop.eup %884  ;;  %669 = vst [vmem:[%s1088_s29 + $0x48] sm:$0xff] %v637_v46  ;;  %v574_v53 = vadd.f32 %v542_v38, %v439_v47  ;;  %v343_v56 = vadd.f32 1.0, %v883_v48  ;;  %910 = vpow2.f32 %v496_v39  ;;  %v610_v38 = vld [vmem:[%s1364_s3 + $0x70] sm:$0xff]  ;;  %v508_v48 = vmul.f32 1.442695, %v1184_v57  ;;  %v612_v57 = vld [vmem:[%s1364_s3 + $0x80] sm:$0xff] }
  0x4b   : > { %v887_v58 = vpop.eup %886  ;;  %912 = vpow2.f32 %v777_v44  ;;  %v545_v16 = vmul.f32 %v885_v52, %v1060_v49 }
  0x4c   : > { %v889_v59 = vpop.eup %888  ;;  %v638_v60 = vadd.f32 %v606_v50, %v574_v53  ;;  %v440_v62 = vmul.f32 %v887_v58, %v1066_v55  ;;  %914 = vrcp.f32 %v343_v56  ;;  %v783_v50 = vmul.f32 -1.442695, %v1223_v35 }
  0x4d   : > { %v891_v0 = vpop.eup %890  ;;  %v344_v4 = vadd.f32 1.0, %v889_v59  ;;  %916 = vpow2.f32 %v498_v41 }
  0x4e   : > { %v893_v6 = vpop.eup %892  ;;  %670 = vst [vmem:[%s1088_s29 + $0x50] sm:$0xff] %v638_v60  ;;  %v575_v7 = vadd.f32 %v543_v54, %v440_v62  ;;  %918 = vpow2.f32 %v778_v51  ;;  %v546_v26 = vmul.f32 %v891_v0, %v1060_v49  ;;  %v1238_v54 = vld [vmem:[%s1043_s20 + $0xe0] sm:$0xff] }
  0x4f   : > { %v895_v8 = vpop.eup %894  ;;  %v441_v9 = vmul.f32 %v893_v6, %v1066_v55  ;;  %920 = vrcp.f32 %v344_v4  ;;  %v784_v4 = vmul.f32 -1.442695, %v1238_v54 }
  0x50   : > { %v897_v13 = vpop.eup %896  ;;  %v639_v14 = vadd.f32 %v607_v1, %v575_v7  ;;  %v345_v17 = vadd.f32 1.0, %v895_v8  ;;  %922 = vpow2.f32 %v500_v61  ;;  %v510_v61 = vmul.f32 1.442695, %v1189_v63  ;;  %v613_v63 = vld [vmem:[%s1364_s3 + $0x88] sm:$0xff] }
  0x51   : > { %v899_v18 = vpop.eup %898  ;;  %v576_v19 = vadd.f32 %v544_v3, %v441_v9  ;;  %924 = vpow2.f32 %v779_v5  ;;  %v547_v33 = vmul.f32 %v897_v13, %v1060_v49  ;;  %v1249_v5 = vld [vmem:[%s1043_s20 + $0xe8] sm:$0xff] }
  0x52   : > { %v901_v12 = vpop.eup %900  ;;  %671 = vst [vmem:[%s1088_s29 + $0x58] sm:$0xff] %v639_v14  ;;  %v442_v20 = vmul.f32 %v899_v18, %v1066_v55  ;;  %926 = vrcp.f32 %v345_v17  ;;  %v1260_v17 = vld [vmem:[%s1043_s20 + $0xf0] sm:$0xff] }
  0x53   : > { %v903_v23 = vpop.eup %902  ;;  %v640_v24 = vadd.f32 %v608_v15, %v576_v19  ;;  %v346_v27 = vadd.f32 1.0, %v901_v12  ;;  %928 = vpow2.f32 %v502_v2 }
  0x54   : > { %v905_v29 = vpop.eup %904  ;;  %v577_v30 = vadd.f32 %v545_v16, %v442_v20  ;;  %930 = vpow2.f32 %v780_v10  ;;  %v548_v47 = vmul.f32 %v903_v23, %v1060_v49  ;;  %v512_v10 = vmul.f32 1.442695, %v1201_v11  ;;  %v614_v11 = vld [vmem:[%s1364_s3 + $0x90] sm:$0xff] }
  0x55   : > { %v907_v31 = vpop.eup %906  ;;  %672 = vst [vmem:[%s1088_s29 + $0x60] sm:$0xff] %v640_v24  ;;  %v443_v32 = vmul.f32 %v905_v29, %v1066_v55  ;;  %932 = vrcp.f32 %v346_v27  ;;  %v785_v16 = vmul.f32 -1.442695, %v1249_v5  ;;  %v1271_v27 = vld [vmem:[%s1043_s20 + $0xf8] sm:$0xff] }
  0x56   : > { %v909_v36 = vpop.eup %908  ;;  %v641_v37 = vadd.f32 %v609_v25, %v577_v30  ;;  %v347_v39 = vadd.f32 1.0, %v907_v31  ;;  %934 = vpow2.f32 %v504_v21 }
  0x57   : > { %v911_v43 = vpop.eup %910  ;;  %v578_v44 = vadd.f32 %v546_v26, %v443_v32  ;;  %v444_v45 = vmul.f32 %v909_v36, %v1066_v55  ;;  %936 = vpow2.f32 %v781_v22  ;;  %v514_v22 = vmul.f32 1.442695, %v1216_v28  ;;  %v615_v28 = vld [vmem:[%s1364_s3 + $0x98] sm:$0xff] }
  0x58   : > { %v913_v46 = vpop.eup %912  ;;  %673 = vst [vmem:[%s1088_s29 + $0x68] sm:$0xff] %v641_v37  ;;  %938 = vrcp.f32 %v347_v39  ;;  %v549_v62 = vmul.f32 %v911_v43, %v1060_v49  ;;  %v786_v26 = vmul.f32 -1.442695, %v1260_v17  ;;  %v787_v39 = vmul.f32 -1.442695, %v1271_v27 }
  0x59   : > { %v915_v41 = vpop.eup %914  ;;  %v642_v51 = vadd.f32 %v610_v38, %v578_v44  ;;  %v579_v52 = vadd.f32 %v547_v33, %v444_v45  ;;  %v348_v53 = vadd.f32 1.0, %v913_v46  ;;  %940 = vpow2.f32 %v506_v34  ;;  %v616_v46 = vld [vmem:[%s1364_s3 + $0xa0] sm:$0xff] }
  0x5a   : > { %v917_v56 = vpop.eup %916  ;;  %v445_v58 = vmul.f32 %v915_v41, %v1066_v55  ;;  %942 = vpow2.f32 %v782_v42  ;;  %v516_v34 = vmul.f32 1.442695, %v1223_v35 }
  0x5b   : > { %v919_v59 = vpop.eup %918  ;;  %674 = vst [vmem:[%s1088_s29 + $0x70] sm:$0xff] %v642_v51  ;;  %v643_v60 = vadd.f32 %v611_v40, %v579_v52  ;;  %944 = vrcp.f32 %v348_v53  ;;  %v550_v2 = vmul.f32 %v917_v56, %v1060_v49  ;;  %v617_v56 = vld [vmem:[%s1364_s3 + $0xa8] sm:$0xff] }
  0x5c   : > { %v921_v0 = vpop.eup %920  ;;  %v580_v1 = vadd.f32 %v548_v47, %v445_v58  ;;  %v349_v3 = vadd.f32 1.0, %v919_v59  ;;  %946 = vpow2.f32 %v508_v48 }
  0x5d   : > { %v923_v6 = vpop.eup %922  ;;  %675 = vst [vmem:[%s1088_s29 + $0x78] sm:$0xff] %v643_v60  ;;  %v446_v7 = vmul.f32 %v921_v0, %v1066_v55  ;;  %948 = vpow2.f32 %v783_v50  ;;  %v518_v50 = vmul.f32 1.442695, %v1238_v54  ;;  %v520_v54 = vmul.f32 1.442695, %v1249_v5 }
  0x5e   : > { %v925_v8 = vpop.eup %924  ;;  %v644_v9 = vadd.f32 %v612_v57, %v580_v1  ;;  %950 = vrcp.f32 %v349_v3  ;;  %v551_v21 = vmul.f32 %v923_v6, %v1060_v49  ;;  %v618_v3 = vld [vmem:[%s1364_s3 + $0xb0] sm:$0xff]  ;;  %v522_v5 = vmul.f32 1.442695, %v1260_v17 }
  0x5f   : > { %v927_v13 = vpop.eup %926  ;;  %v581_v14 = vadd.f32 %v549_v62, %v446_v7  ;;  %v350_v15 = vadd.f32 1.0, %v925_v8  ;;  %952 = vpow2.f32 %v510_v61  ;;  %v524_v17 = vmul.f32 1.442695, %v1271_v27 }
  0x60   : > { %v929_v18 = vpop.eup %928  ;;  %676 = vst [vmem:[%s1088_s29 + $0x80] sm:$0xff] %v644_v9  ;;  %v447_v19 = vmul.f32 %v927_v13, %v1066_v55  ;;  %954 = vpow2.f32 %v784_v4  ;;  %v619_v13 = vld [vmem:[%s1364_s3 + $0xb8] sm:$0xff] }
  0x61   : > { %v931_v12 = vpop.eup %930  ;;  %v645_v20 = vadd.f32 %v613_v63, %v581_v14  ;;  %956 = vrcp.f32 %v350_v15  ;;  %v552_v33 = vmul.f32 %v929_v18, %v1060_v49 }
  0x62   : > { %v933_v23 = vpop.eup %932  ;;  %v582_v24 = vadd.f32 %v550_v2, %v447_v19  ;;  %v351_v25 = vadd.f32 1.0, %v931_v12  ;;  %958 = vpow2.f32 %v512_v10 }
  0x63   : > { %v935_v29 = vpop.eup %934  ;;  %677 = vst [vmem:[%s1088_s29 + $0x88] sm:$0xff] %v645_v20  ;;  %v448_v30 = vmul.f32 %v933_v23, %v1066_v55  ;;  %960 = vpow2.f32 %v785_v16 }
  0x64   : > { %v937_v31 = vpop.eup %936  ;;  %v646_v32 = vadd.f32 %v614_v11, %v582_v24  ;;  %962 = vrcp.f32 %v351_v25  ;;  %v553_v35 = vmul.f32 %v935_v29, %v1060_v49 }
  0x65   : > { %v939_v36 = vpop.eup %938  ;;  %v583_v37 = vadd.f32 %v551_v21, %v448_v30  ;;  %v352_v38 = vadd.f32 1.0, %v937_v31  ;;  %964 = vpow2.f32 %v514_v22  ;;  %v620_v21 = vld [vmem:[%s1364_s3 + $0xc0] sm:$0xff]  ;;  %v621_v31 = vld [vmem:[%s1364_s3 + $0xc8] sm:$0xff] }
  0x66   : > { %v941_v42 = vpop.eup %940  ;;  %678 = vst [vmem:[%s1088_s29 + $0x90] sm:$0xff] %v646_v32  ;;  %v449_v43 = vmul.f32 %v939_v36, %v1066_v55  ;;  %966 = vpow2.f32 %v786_v26 }
  0x67   : > { %v943_v44 = vpop.eup %942  ;;  %v647_v45 = vadd.f32 %v615_v28, %v583_v37  ;;  %968 = vrcp.f32 %v352_v38  ;;  %v554_v58 = vmul.f32 %v941_v42, %v1060_v49 }
  0x68   : > { %v945_v40 = vpop.eup %944  ;;  %v584_v47 = vadd.f32 %v552_v33, %v449_v43  ;;  %v353_v48 = vadd.f32 1.0, %v943_v44  ;;  %970 = vpow2.f32 %v516_v34 }
  0x69   : > { %v947_v41 = vpop.eup %946  ;;  %679 = vst [vmem:[%s1088_s29 + $0x98] sm:$0xff] %v647_v45  ;;  %v450_v51 = vmul.f32 %v945_v40, %v1066_v55  ;;  %972 = vpow2.f32 %v787_v39  ;;  %v622_v39 = vld [vmem:[%s1364_s3 + $0xd0] sm:$0xff]  ;;  %v623_v40 = vld [vmem:[%s1364_s3 + $0xd8] sm:$0xff] }
  0x6a   : > { %v949_v52 = vpop.eup %948  ;;  %v648_v53 = vadd.f32 %v616_v46, %v584_v47  ;;  %974 = vrcp.f32 %v353_v48  ;;  %v555_v4 = vmul.f32 %v947_v41, %v1060_v49 }
  0x6b   : > { %v951_v59 = vpop.eup %950  ;;  %v585_v60 = vadd.f32 %v553_v35, %v450_v51  ;;  %v354_v57 = vadd.f32 1.0, %v949_v52  ;;  %976 = vpow2.f32 %v518_v50 }
  0x6c   : > { %v953_v62 = vpop.eup %952  ;;  %680 = vst [vmem:[%s1088_s29 + $0xa0] sm:$0xff] %v648_v53  ;;  %v451_v61 = vmul.f32 %v951_v59, %v1066_v55  ;;  %v624_v53 = vld [vmem:[%s1364_s3 + $0xe0] sm:$0xff] }
  0x6d   : > { %v955_v0 = vpop.eup %954  ;;  %v649_v1 = vadd.f32 %v617_v56, %v585_v60  ;;  %978 = vrcp.f32 %v354_v57  ;;  %v556_v14 = vmul.f32 %v953_v62, %v1060_v49  ;;  %v625_v62 = vld [vmem:[%s1364_s3 + $0xe8] sm:$0xff] }
  0x6e   : > { %v957_v6 = vpop.eup %956  ;;  %v586_v7 = vadd.f32 %v554_v58, %v451_v61  ;;  %v355_v8 = vadd.f32 1.0, %v955_v0  ;;  %980 = vpow2.f32 %v520_v54 }
  0x6f   : > { %v959_v9 = vpop.eup %958  ;;  %681 = vst [vmem:[%s1088_s29 + $0xa8] sm:$0xff] %v649_v1  ;;  %v452_v63 = vmul.f32 %v957_v6, %v1066_v55  ;;  %v626_v6 = vld [vmem:[%s1364_s3 + $0xf0] sm:$0xff] }
  0x70   : > { %v961_v2 = vpop.eup %960  ;;  %v650_v10 = vadd.f32 %v618_v3, %v586_v7  ;;  %982 = vrcp.f32 %v355_v8  ;;  %v557_v22 = vmul.f32 %v959_v9, %v1060_v49 }
  0x71   : > { %v963_v15 = vpop.eup %962  ;;  %v587_v16 = vadd.f32 %v555_v4, %v452_v63  ;;  %v356_v18 = vadd.f32 1.0, %v961_v2  ;;  %984 = vpow2.f32 %v522_v5  ;;  %v627_v2 = vld [vmem:[%s1364_s3 + $0xf8] sm:$0xff] }
  0x72   : > { %v965_v19 = vpop.eup %964  ;;  %682 = vst [vmem:[%s1088_s29 + $0xb0] sm:$0xff] %v650_v10  ;;  %v453_v12 = vmul.f32 %v963_v15, %v1066_v55 }
  0x73   : > { %v967_v20 = vpop.eup %966  ;;  %v651_v11 = vadd.f32 %v619_v13, %v587_v16  ;;  %986 = vrcp.f32 %v356_v18  ;;  %v558_v32 = vmul.f32 %v965_v19, %v1060_v49 }
  0x74   : > { %v969_v23 = vpop.eup %968  ;;  %v588_v24 = vadd.f32 %v556_v14, %v453_v12  ;;  %v357_v25 = vadd.f32 1.0, %v967_v20  ;;  %988 = vpow2.f32 %v524_v17 }
  0x75   : > { %v971_v26 = vpop.eup %970  ;;  %683 = vst [vmem:[%s1088_s29 + $0xb8] sm:$0xff] %v651_v11  ;;  %v454_v27 = vmul.f32 %v969_v23, %v1066_v55 }
  0x76   : > { %v973_v29 = vpop.eup %972  ;;  %v652_v30 = vadd.f32 %v620_v21, %v588_v24  ;;  %990 = vrcp.f32 %v357_v25  ;;  %v559_v42 = vmul.f32 %v971_v26, %v1060_v49 }
  0x77   : > { %v975_v28 = vpop.eup %974  ;;  %v589_v33 = vadd.f32 %v557_v22, %v454_v27  ;;  %v358_v34 = vadd.f32 1.0, %v973_v29 }
  0x78   : > { %684 = vst [vmem:[%s1088_s29 + $0xc0] sm:$0xff] %v652_v30  ;;  %v455_v36 = vmul.f32 %v975_v28, %v1066_v55  ;;  %v977_v37 = vpop.eup %976 }
  0x79   : > { %v653_v38 = vadd.f32 %v621_v31, %v589_v33  ;;  %992 = vrcp.f32 %v358_v34  ;;  %v560_v47 = vmul.f32 %v977_v37, %v1060_v49 }
  0x7a   : > { %v979_v43 = vpop.eup %978  ;;  %v590_v44 = vadd.f32 %v558_v32, %v455_v36 }
  0x7b   : > { %685 = vst [vmem:[%s1088_s29 + $0xc8] sm:$0xff] %v653_v38  ;;  %v456_v45 = vmul.f32 %v979_v43, %v1066_v55  ;;  %v981_v46 = vpop.eup %980 }
  0x7c   : > { %v654_v35 = vadd.f32 %v622_v39, %v590_v44  ;;  %v561_v56 = vmul.f32 %v981_v46, %v1060_v49 }
  0x7d   : > { %v983_v48 = vpop.eup %982  ;;  %v591_v50 = vadd.f32 %v559_v42, %v456_v45 }
  0x7e   : > { %686 = vst [vmem:[%s1088_s29 + $0xd0] sm:$0xff] %v654_v35  ;;  %v457_v41 = vmul.f32 %v983_v48, %v1066_v55  ;;  %v985_v51 = vpop.eup %984 }
  0x7f   : > { %v655_v52 = vadd.f32 %v623_v40, %v591_v50  ;;  %v562_v61 = vmul.f32 %v985_v51, %v1060_v49 }
  0x80   : > { %v987_v58 = vpop.eup %986  ;;  %v592_v59 = vadd.f32 %v560_v47, %v457_v41 }
  0x81   : > { %687 = vst [vmem:[%s1088_s29 + $0xd8] sm:$0xff] %v655_v52  ;;  %v458_v60 = vmul.f32 %v987_v58, %v1066_v55  ;;  %v989_v57 = vpop.eup %988 }
  0x82   : > { %v656_v54 = vadd.f32 %v624_v53, %v592_v59  ;;  %v563_v7 = vmul.f32 %v989_v57, %v1060_v49 }
  0x83   : > { %v991_v0 = vpop.eup %990  ;;  %v593_v1 = vadd.f32 %v561_v56, %v458_v60 }
  0x84   : > { %688 = vst [vmem:[%s1088_s29 + $0xe0] sm:$0xff] %v656_v54  ;;  %v459_v3 = vmul.f32 %v991_v0, %v1066_v55 }
  0x85   : > { %v657_v4 = vadd.f32 %v625_v62, %v593_v1 }
  0x86   : > { %v993_v8 = vpop.eup %992  ;;  %v594_v5 = vadd.f32 %v562_v61, %v459_v3 }
  0x87   : > { %689 = vst [vmem:[%s1088_s29 + $0xe8] sm:$0xff] %v657_v4  ;;  %v460_v9 = vmul.f32 %v993_v8, %v1066_v55 }
  0x88   : > { %v658_v63 = vadd.f32 %v626_v6, %v594_v5 }
  0x89   : > { %v595_v10 = vadd.f32 %v563_v7, %v460_v9 }
  0x8a   : > { %690 = vst [vmem:[%s1088_s29 + $0xf0] sm:$0xff] %v658_v63 }
  0x8b   : > { %v659_v13 = vadd.f32 %v627_v2, %v595_v10 }
  0x8d   : > { %691 = vst [vmem:[%s1088_s29 + $0xf8] sm:$0xff] %v659_v13 }
  0x8e PF: > { %s14_s15 = sadd.s32 1, %s1000_s15  }
  0x8f   : > { %p11_p4 = scmp.ge.s32.totalorder %s14_s15, 4  }
  0x91   :  { %13 = sbr.rel (!%p11_p4) target bundleno = 1 (0x1), region = 66 }

</bundles_post_ra>
